<compile_context>
chip_gen: v7x
topology: tpu7x:2x2x1
jax: 0.10.0
libtpu: 0.0.40
codegen_flags: <defaults>
</compile_context>

<pallas_src>
import functools

import jax
import jax.numpy as jnp
from jax.experimental import pallas as pl
from jax.experimental.pallas import tpu as pltpu


_TAPS = tuple((dy, dx) for dy in (-1, 0, 1) for dx in (-1, 0, 1))


def _shift_rows(x, s):
    """y[i] = x[i + s] if 0 <= i + s < n else 0 (static shift along sublanes)."""
    if s == 0:
        return x
    n, c = x.shape
    z = jnp.zeros((abs(s), c), x.dtype)
    if s > 0:
        return jnp.concatenate([x[s:], z], axis=0)
    return jnp.concatenate([z, x[:n + s]], axis=0)


# ----------------------------------------------------------------------------
# Stage 1: fused encoder conv + ReLU + [coef|freq] conv (per batch element)
# ----------------------------------------------------------------------------
def _conv_kernel(xp_ref, msk_ref, wenc_ref, benc_ref, wcf_ref, bcf_ref,
                 coef_ref, freq_ref, *, W, hd):
    Wp = W + 2
    x = xp_ref[0]                                        # (HWp, Cp) f32, halo-padded

    def im2col(src):
        # 9 statically shifted slabs concatenated on lanes -> ONE matmul per conv
        slabs = [_shift_rows(src, dy * Wp + dx) for dy, dx in _TAPS]
        return jnp.concatenate(slabs, axis=1).astype(jnp.bfloat16)

    feat = jnp.dot(im2col(x), wenc_ref[...],
                   preferred_element_type=jnp.float32) + benc_ref[...]
    # zero the halo ring so the coef/freq conv sees true zero padding
    feat = jnp.maximum(feat, 0.0) * msk_ref[...]

    cf = jnp.dot(im2col(feat), wcf_ref[...],
                 preferred_element_type=jnp.float32) + bcf_ref[...]
    coef_ref[0] = cf[:, :hd].astype(jnp.bfloat16)
    freq_ref[0] = cf[:, hd:].astype(jnp.bfloat16)


# ----------------------------------------------------------------------------
# Stage 2: query path, feature-major (features on sublanes, queries on lanes)
# ----------------------------------------------------------------------------
def _query_kernel(qc_ref, qf_ref, side_ref, samp_ref, wcp_ref,
                  w1_ref, b1_ref, w2_ref, b2_ref, out_ref, *, TQ):
    qc = qc_ref[0]                                       # (hd,  4TQ) bf16
    qf = qf_ref[0].astype(jnp.float32)                   # (hd2, 4TQ)
    side = side_ref[0]                                   # (4,   4TQ) f32
    rel_y, rel_x = side[0:1, :], side[1:2, :]
    cel_y, cel_x = side[2:3, :], side[3:4, :]
    wcp = wcp_ref[...]                                   # (hd2, 4): [cfy, cfx, phy, phx]

    # modulation (coord_fc + phase), cos/sin, coefficient multiply -- all f32
    coordm = wcp[:, 0:1] * rel_y + wcp[:, 1:2] * rel_x   # (hd2, 4TQ)
    phase = wcp[:, 2:3] * cel_y + wcp[:, 3:4] * cel_x
    f = qf * coordm + phase
    mod = jnp.concatenate([jnp.cos(jnp.pi * f), jnp.sin(jnp.pi * f)], axis=0)
    act = (qc.astype(jnp.float32) * mod).astype(jnp.bfloat16)     # (hd, 4TQ)

    # imnet hidden layer: one fused dot over all 4 taps
    h = jnp.dot(w1_ref[...], act, preferred_element_type=jnp.float32) + b1_ref[...]
    h = jnp.maximum(h, 0.0)                              # (mh, 4TQ)

    # area-weighted blend (weights sum to 1 -> blend before the final proj)
    area = jnp.abs(rel_y * rel_x) + 1e-9                 # (1, 4TQ)
    a0 = area[:, 0 * TQ:1 * TQ]
    a1 = area[:, 1 * TQ:2 * TQ]
    a2 = area[:, 2 * TQ:3 * TQ]
    a3 = area[:, 3 * TQ:4 * TQ]
    inv = pl.reciprocal(a0 + a1 + a2 + a3, approx=False)
    # bilinear swap: tap0<-area3, tap1<-area2, tap2<-area1, tap3<-area0
    hb = (h[:, 0 * TQ:1 * TQ] * (a3 * inv) + h[:, 1 * TQ:2 * TQ] * (a2 * inv)
          + h[:, 2 * TQ:3 * TQ] * (a1 * inv) + h[:, 3 * TQ:4 * TQ] * (a0 * inv))
    hb = hb.astype(jnp.bfloat16)                         # (mh, TQ)

    out_ref[0] = (jnp.dot(w2_ref[...], hb, preferred_element_type=jnp.float32)
                  + b2_ref[...] + samp_ref[0])           # (out_dim, TQ), lane-dense


# ----------------------------------------------------------------------------
# JAX glue: coord math and bilinear-border residual sampling
# ----------------------------------------------------------------------------
def _coord_val(idx, size):
    return -1.0 + (2.0 * idx.astype(jnp.float32) + 1.0) / size


def _nearest_idx(c, size):
    # grid_sample nearest, align_corners=False (round half to even ~ nearbyint)
    u = ((c + 1.0) * size - 1.0) / 2.0
    return jnp.clip(jnp.round(u), 0, size - 1).astype(jnp.int32)


def grid_sample_bilinear_border(img_nhwc, coord):
    B, H, W, C = img_nhwc.shape
    y = jnp.clip(((coord[..., 0] + 1.0) * H - 1.0) / 2.0, 0.0, H - 1.0)
    x = jnp.clip(((coord[..., 1] + 1.0) * W - 1.0) / 2.0, 0.0, W - 1.0)
    y0 = jnp.floor(y); x0 = jnp.floor(x)
    wy1 = y - y0; wy0 = 1.0 - wy1
    wx1 = x - x0; wx0 = 1.0 - wx1
    y0i = jnp.clip(y0, 0, H - 1).astype(jnp.int32)
    y1i = jnp.clip(y0 + 1, 0, H - 1).astype(jnp.int32)
    x0i = jnp.clip(x0, 0, W - 1).astype(jnp.int32)
    x1i = jnp.clip(x0 + 1, 0, W - 1).astype(jnp.int32)
    bidx = jnp.arange(B)[:, None]
    v00 = img_nhwc[bidx, y0i, x0i]
    v01 = img_nhwc[bidx, y0i, x1i]
    v10 = img_nhwc[bidx, y1i, x0i]
    v11 = img_nhwc[bidx, y1i, x1i]
    return (v00 * (wy0 * wx0)[..., None] + v01 * (wy0 * wx1)[..., None]
            + v10 * (wy1 * wx0)[..., None] + v11 * (wy1 * wx1)[..., None])


def _pick_tq(Q, hd, hd2, mh, out_dim, budget_bytes=40 * 1024 * 1024):
    """VMEM-aware Q-tile size (conservative so it also fits v7x's 64 MiB)."""
    def est(tq):
        cols = 4 * tq
        blocks = 2 * (cols * (2 * hd + 2 * hd2 + 4 * 4) + tq * out_dim * 4 * 2)
        live = cols * (4 * (3 * hd2 + hd + mh) + 2 * (hd + mh))
        return blocks + live
    for cand in (2048, 1024, 512, 256, 128):
        if Q % cand == 0 and est(cand) <= budget_bytes:
            return cand
    return Q


# ----------------------------------------------------------------------------
# Full ELTE forward
# ----------------------------------------------------------------------------
def elte_forward(params, inp_nchw, coord, cell, hidden_dim):
    inp = jnp.transpose(inp_nchw, (0, 2, 3, 1))          # NCHW -> NHWC
    B, H, W, Cin = inp.shape
    Hp, Wp = H + 2, W + 2
    HWp = Hp * Wp
    Q = coord.shape[1]
    E = params["enc_w"].shape[0]
    hd = hidden_dim
    hd2 = hd // 2
    CCF = hd + hd2
    mh = params["imnet_w1"].shape[0]
    out_dim = params["imnet_w2"].shape[0]
    assert E % 8 == 0 and hd2 % 8 == 0
    assert out_dim == Cin  # residual add requires matching channels

    # ---- halo-padded, channel-padded, flattened input (zero pad = conv pad) -
    Cp = ((Cin + 7) // 8) * 8
    xp = jnp.pad(inp, ((0, 0), (1, 1), (1, 1), (0, Cp - Cin))).reshape(B, HWp, Cp)

    # interior mask: zero the halo ring of `feat` before the coef/freq conv
    yy = jnp.arange(Hp)[:, None]
    xx = jnp.arange(Wp)[None, :]
    interior = (((yy >= 1) & (yy <= H) & (xx >= 1) & (xx <= W))
                .astype(jnp.float32).reshape(HWp, 1))

    # conv weights packed tap-major, bf16 for the MXU (f32 accumulate)
    wenc = jnp.transpose(params["enc_w"], (2, 3, 1, 0))              # (3,3,Cin,E)
    wenc = jnp.pad(wenc, ((0, 0), (0, 0), (0, Cp - Cin), (0, 0))).reshape(9 * Cp, E)
    wcf = jnp.concatenate(
        [jnp.transpose(params["coef_w"], (2, 3, 1, 0)).reshape(9 * E, hd),
         jnp.transpose(params["freq_w"], (2, 3, 1, 0)).reshape(9 * E, hd2)],
        axis=1)                                                      # (9E, CCF)
    benc = params["enc_b"].reshape(1, E)
    bcf = jnp.concatenate([params["coef_b"], params["freq_b"]]).reshape(1, CCF)

    coef, freq = pl.pallas_call(
        functools.partial(_conv_kernel, W=W, hd=hd),
        out_shape=(jax.ShapeDtypeStruct((B, HWp, hd), jnp.bfloat16),
                   jax.ShapeDtypeStruct((B, HWp, hd2), jnp.bfloat16)),
        grid_spec=pltpu.PrefetchScalarGridSpec(
            num_scalar_prefetch=0,
            grid=(B,),
            in_specs=[
                pl.BlockSpec((1, HWp, Cp), lambda b: (b, 0, 0)),     # padded input
                pl.BlockSpec((HWp, 1), lambda b: (0, 0)),            # interior mask
                pl.BlockSpec((9 * Cp, E), lambda b: (0, 0)),         # enc conv w
                pl.BlockSpec((1, E), lambda b: (0, 0)),              # enc conv b
                pl.BlockSpec((9 * E, CCF), lambda b: (0, 0)),        # [coef|freq] w
                pl.BlockSpec((1, CCF), lambda b: (0, 0)),            # [coef|freq] b
            ],
            out_specs=(pl.BlockSpec((1, HWp, hd), lambda b: (b, 0, 0)),
                       pl.BlockSpec((1, HWp, hd2), lambda b: (b, 0, 0))),
        ),
        compiler_params=pltpu.CompilerParams(
            dimension_semantics=("parallel",),
            vmem_limit_bytes=48 * 1024 * 1024),
    )(xp, interior, wenc.astype(jnp.bfloat16), benc,
      wcf.astype(jnp.bfloat16), bcf)

    # ---- query-side index / relative-coordinate precompute (tiny, XLA) ------
    rx, ry, eps = 1.0 / H, 1.0 / W, 1e-6
    cy, cx = coord[..., 0], coord[..., 1]                            # (B, Q)
    idx_l, rel_l = [], []
    for vx in (-1, 1):
        for vy in (-1, 1):
            cys = jnp.clip(cy + vx * rx + eps, -1 + 1e-6, 1 - 1e-6)
            cxs = jnp.clip(cx + vy * ry + eps, -1 + 1e-6, 1 - 1e-6)
            iy = _nearest_idx(cys, H)
            ix = _nearest_idx(cxs, W)
            rel_y = (cy - _coord_val(iy, H)) * H
            rel_x = (cx - _coord_val(ix, W)) * W
            idx_l.append((iy + 1) * Wp + (ix + 1))                   # padded-grid idx
            rel_l.append(jnp.stack([rel_y, rel_x], axis=-1))
    flat_idx = jnp.stack(idx_l, axis=1)                              # (B, 4, Q) i32
    rel = jnp.stack(rel_l, axis=1)                                   # (B, 4, Q, 2)
    cellr = jnp.broadcast_to(
        (cell * jnp.array([H, W], jnp.float32))[:, None], (B, 4, Q, 2))
    side = jnp.concatenate([rel, cellr], axis=-1)                    # (B, 4, Q, 4)

    # ---- VMEM-aware Q tiling + XLA nearest-tap gather of coef/freq ----------
    TQ = _pick_tq(Q, hd, hd2, mh, out_dim)
    nQ = Q // TQ

    gidx = flat_idx.reshape(B, 4 * Q, 1)
    q_coef = jnp.take_along_axis(coef, gidx, axis=1).reshape(B, 4, Q, hd)
    q_freq = jnp.take_along_axis(freq, gidx, axis=1).reshape(B, 4, Q, hd2)

    def fm(x):
        # (B, 4, Q, C) -> (B, C, 4Q) feature-major, column order (tile, tap, query)
        C = x.shape[-1]
        x = x.reshape(B, 4, nQ, TQ, C)
        return jnp.transpose(x, (0, 4, 2, 1, 3)).reshape(B, C, 4 * Q)

    qcT = fm(q_coef)                                                 # (B, hd, 4Q) bf16
    qfT = fm(q_freq)                                                 # (B, hd2,4Q) bf16
    sideT = fm(side)                                                 # (B, 4,  4Q) f32
    sampT = jnp.transpose(grid_sample_bilinear_border(inp, coord), (0, 2, 1))

    # ---- modulation / MLP weights (feature-major, bf16 for the MXU) ---------
    wcp = jnp.stack([params["coord_fc_w"][:, 0], params["coord_fc_w"][:, 1],
                     params["phase_w"][:, 0], params["phase_w"][:, 1]],
                    axis=1)                                          # (hd2, 4)
    w1 = params["imnet_w1"].astype(jnp.bfloat16)                     # (mh, hd)
    b1 = params["imnet_b1"].reshape(mh, 1)
    w2 = params["imnet_w2"].astype(jnp.bfloat16)                     # (out_dim, mh)
    b2 = params["imnet_b2"].reshape(out_dim, 1)

    outT = pl.pallas_call(
        functools.partial(_query_kernel, TQ=TQ),
        out_shape=jax.ShapeDtypeStruct((B, out_dim, Q), jnp.float32),
        grid_spec=pltpu.PrefetchScalarGridSpec(
            num_scalar_prefetch=0,
            grid=(B, nQ),
            in_specs=[
                pl.BlockSpec((1, hd, 4 * TQ), lambda b, q: (b, 0, q)),   # q_coef
                pl.BlockSpec((1, hd2, 4 * TQ), lambda b, q: (b, 0, q)),  # q_freq
                pl.BlockSpec((1, 4, 4 * TQ), lambda b, q: (b, 0, q)),    # rel/cell
                pl.BlockSpec((1, out_dim, TQ), lambda b, q: (b, 0, q)),  # residual
                pl.BlockSpec((hd2, 4), lambda b, q: (0, 0)),             # coord/phase
                pl.BlockSpec((mh, hd), lambda b, q: (0, 0)),             # imnet w1
                pl.BlockSpec((mh, 1), lambda b, q: (0, 0)),              # imnet b1
                pl.BlockSpec((out_dim, mh), lambda b, q: (0, 0)),        # imnet w2
                pl.BlockSpec((out_dim, 1), lambda b, q: (0, 0)),         # imnet b2
            ],
            out_specs=pl.BlockSpec((1, out_dim, TQ), lambda b, q: (b, 0, q)),
        ),
        compiler_params=pltpu.CompilerParams(
            dimension_semantics=("parallel", "parallel"),
            vmem_limit_bytes=48 * 1024 * 1024),
    )(qcT, qfT, sideT, sampT, wcp, w1, b1, w2, b2)

    return jnp.transpose(outT, (0, 2, 1))                            # (B, Q, out_dim)


# ----------------------------------------------------------------------------
# Deterministic parameter init + driver
# ----------------------------------------------------------------------------
def init_params(key, in_ch, enc_dim, hidden_dim, mlp_hidden, out_dim):
    ks = jax.random.split(key, 12)
    hd2 = hidden_dim // 2

    def w(k, shape, fan_in):
        return jax.random.normal(k, shape, jnp.float32) / jnp.sqrt(fan_in)

    return {
        "enc_w": w(ks[0], (enc_dim, in_ch, 3, 3), in_ch * 9),
        "enc_b": w(ks[1], (enc_dim,), enc_dim),
        "coef_w": w(ks[2], (hidden_dim, enc_dim, 3, 3), enc_dim * 9),
        "coef_b": w(ks[3], (hidden_dim,), hidden_dim),
        "freq_w": w(ks[4], (hd2, enc_dim, 3, 3), enc_dim * 9),
        "freq_b": w(ks[5], (hd2,), hd2),
        "coord_fc_w": w(ks[6], (hd2, 2), 2),          # Linear(2, hd2, bias=False)
        "phase_w": w(ks[7], (hd2, 2), 2),             # Linear(2, hd2, bias=False)
        "imnet_w1": w(ks[8], (mlp_hidden, hidden_dim), hidden_dim),
        "imnet_b1": w(ks[9], (mlp_hidden,), mlp_hidden),
        "imnet_w2": w(ks[10], (out_dim, mlp_hidden), mlp_hidden),
        "imnet_b2": w(ks[11], (out_dim,), out_dim),
    }


if __name__ == "__main__":
    B, C_IN, H, W = 2, 3, 16, 16
    Q = 64
    ENC_DIM = 8
    HIDDEN_DIM = 32
    MLP_HIDDEN = 32
    OUT_DIM = 3

    key = jax.random.PRNGKey(0)
    k_inp, k_coord, k_par = jax.random.split(key, 3)

    inp = jax.random.normal(k_inp, (B, C_IN, H, W), jnp.float32)       # NCHW
    coord = jax.random.uniform(k_coord, (B, Q, 2), jnp.float32,
                               minval=-1.0, maxval=1.0)
    cell = jnp.broadcast_to(
        jnp.array([2.0 / (2 * H), 2.0 / (2 * W)], jnp.float32), (B, Q, 2))

    params = init_params(k_par, C_IN, ENC_DIM, HIDDEN_DIM, MLP_HIDDEN, OUT_DIM)

    fwd = jax.jit(functools.partial(elte_forward, hidden_dim=HIDDEN_DIM))
    out = fwd(params, inp, coord, cell)
    out = jax.block_until_ready(out)

    assert out.shape == (B, Q, OUT_DIM)
    assert bool(jnp.all(jnp.isfinite(out)))
    print("KERNEL_OK")
</pallas_src>

<mosaic_0001>
module attributes {stable_mosaic.version = 11 : i64} {
  func.func @_conv_kernel(%arg0: i32, %arg1: memref<1x324x8xf32, #tpu.memory_space<vmem>>, %arg2: memref<324x1xf32, #tpu.memory_space<vmem>>, %arg3: memref<72x8xbf16, #tpu.memory_space<vmem>>, %arg4: memref<1x8xf32, #tpu.memory_space<vmem>>, %arg5: memref<72x48xbf16, #tpu.memory_space<vmem>>, %arg6: memref<1x48xf32, #tpu.memory_space<vmem>>, %arg7: memref<1x324x32xbf16, #tpu.memory_space<vmem>>, %arg8: memref<1x324x16xbf16, #tpu.memory_space<vmem>>) attributes {dimension_semantics = [#tpu.dimension_semantics<parallel>], iteration_bounds = array<i64: 2>, scalar_prefetch = 0 : i64, scratch_operands = 0 : i64, tpu.core_type = #tpu.core_type<tc>, window_params = [{transform_indices = @transform_0, window_bounds = array<i64: 1, 324, 8>}, {pipeline_mode = #tpu.pipeline_mode<synchronous>, transform_indices = @transform_1, window_bounds = array<i64: 324, 1>}, {pipeline_mode = #tpu.pipeline_mode<synchronous>, transform_indices = @transform_2, window_bounds = array<i64: 72, 8>}, {pipeline_mode = #tpu.pipeline_mode<synchronous>, transform_indices = @transform_3, window_bounds = array<i64: 1, 8>}, {pipeline_mode = #tpu.pipeline_mode<synchronous>, transform_indices = @transform_4, window_bounds = array<i64: 72, 48>}, {pipeline_mode = #tpu.pipeline_mode<synchronous>, transform_indices = @transform_5, window_bounds = array<i64: 1, 48>}, {transform_indices = @transform_6, window_bounds = array<i64: 1, 324, 32>}, {transform_indices = @transform_7, window_bounds = array<i64: 1, 324, 16>}]} {
    %c0 = arith.constant 0 : index
    %c0_0 = arith.constant 0 : index
    %c0_1 = arith.constant 0 : index
    %0 = vector.load %arg1[%c0, %c0_0, %c0_1] : memref<1x324x8xf32, #tpu.memory_space<vmem>>, vector<1x324x8xf32>
    %1 = vector.shape_cast %0 : vector<1x324x8xf32> to vector<324x8xf32>
    %cst = arith.constant 0.000000e+00 : f32
    %2 = vector.broadcast %cst : f32 to vector<19x8xf32>
    %3 = vector.extract_strided_slice %1 {offsets = [0, 0], sizes = [305, 8], strides = [1, 1]} : vector<324x8xf32> to vector<305x8xf32>
    %4 = tpu.concatenate %2, %3 in 0 : vector<19x8xf32>, vector<305x8xf32> -> vector<324x8xf32>
    %cst_2 = arith.constant 0.000000e+00 : f32
    %5 = vector.broadcast %cst_2 : f32 to vector<18x8xf32>
    %6 = vector.extract_strided_slice %1 {offsets = [0, 0], sizes = [306, 8], strides = [1, 1]} : vector<324x8xf32> to vector<306x8xf32>
    %7 = tpu.concatenate %5, %6 in 0 : vector<18x8xf32>, vector<306x8xf32> -> vector<324x8xf32>
    %cst_3 = arith.constant 0.000000e+00 : f32
    %8 = vector.broadcast %cst_3 : f32 to vector<17x8xf32>
    %9 = vector.extract_strided_slice %1 {offsets = [0, 0], sizes = [307, 8], strides = [1, 1]} : vector<324x8xf32> to vector<307x8xf32>
    %10 = tpu.concatenate %8, %9 in 0 : vector<17x8xf32>, vector<307x8xf32> -> vector<324x8xf32>
    %cst_4 = arith.constant 0.000000e+00 : f32
    %11 = vector.broadcast %cst_4 : f32 to vector<1x8xf32>
    %12 = vector.extract_strided_slice %1 {offsets = [0, 0], sizes = [323, 8], strides = [1, 1]} : vector<324x8xf32> to vector<323x8xf32>
    %13 = tpu.concatenate %11, %12 in 0 : vector<1x8xf32>, vector<323x8xf32> -> vector<324x8xf32>
    %cst_5 = arith.constant 0.000000e+00 : f32
    %14 = vector.broadcast %cst_5 : f32 to vector<1x8xf32>
    %15 = vector.extract_strided_slice %1 {offsets = [1, 0], sizes = [323, 8], strides = [1, 1]} : vector<324x8xf32> to vector<323x8xf32>
    %16 = tpu.concatenate %15, %14 in 0 : vector<323x8xf32>, vector<1x8xf32> -> vector<324x8xf32>
    %cst_6 = arith.constant 0.000000e+00 : f32
    %17 = vector.broadcast %cst_6 : f32 to vector<17x8xf32>
    %18 = vector.extract_strided_slice %1 {offsets = [17, 0], sizes = [307, 8], strides = [1, 1]} : vector<324x8xf32> to vector<307x8xf32>
    %19 = tpu.concatenate %18, %17 in 0 : vector<307x8xf32>, vector<17x8xf32> -> vector<324x8xf32>
    %cst_7 = arith.constant 0.000000e+00 : f32
    %20 = vector.broadcast %cst_7 : f32 to vector<18x8xf32>
    %21 = vector.extract_strided_slice %1 {offsets = [18, 0], sizes = [306, 8], strides = [1, 1]} : vector<324x8xf32> to vector<306x8xf32>
    %22 = tpu.concatenate %21, %20 in 0 : vector<306x8xf32>, vector<18x8xf32> -> vector<324x8xf32>
    %cst_8 = arith.constant 0.000000e+00 : f32
    %23 = vector.broadcast %cst_8 : f32 to vector<19x8xf32>
    %24 = vector.extract_strided_slice %1 {offsets = [19, 0], sizes = [305, 8], strides = [1, 1]} : vector<324x8xf32> to vector<305x8xf32>
    %25 = tpu.concatenate %24, %23 in 0 : vector<305x8xf32>, vector<19x8xf32> -> vector<324x8xf32>
    %26 = tpu.concatenate %4, %7, %10, %13, %1, %16, %19, %22, %25 in 1 : vector<324x8xf32>, vector<324x8xf32>, vector<324x8xf32>, vector<324x8xf32>, vector<324x8xf32>, vector<324x8xf32>, vector<324x8xf32>, vector<324x8xf32>, vector<324x8xf32> -> vector<324x72xf32>
    %27 = arith.truncf %26 : vector<324x72xf32> to vector<324x72xbf16>
    %c0_9 = arith.constant 0 : index
    %c0_10 = arith.constant 0 : index
    %28 = vector.load %arg3[%c0_9, %c0_10] : memref<72x8xbf16, #tpu.memory_space<vmem>>, vector<72x8xbf16>
    %cst_11 = arith.constant dense<0.000000e+00> : vector<324x8xf32>
    %29 = tpu.matmul %27, %28, %cst_11 {dimension_numbers = #tpu.dot_dimension_numbers<[1], [0], [0], [1], [0, 0, 1, 1], [], []>} : vector<324x72xbf16>, vector<72x8xbf16>, vector<324x8xf32> -> vector<324x8xf32>
    %c0_12 = arith.constant 0 : index
    %c0_13 = arith.constant 0 : index
    %30 = vector.load %arg4[%c0_12, %c0_13] : memref<1x8xf32, #tpu.memory_space<vmem>>, vector<1x8xf32>
    %31 = vector.broadcast %30 : vector<1x8xf32> to vector<324x8xf32>
    %32 = arith.addf %29, %31 : vector<324x8xf32>
    %cst_14 = arith.constant 0.000000e+00 : f32
    %33 = vector.broadcast %cst_14 : f32 to vector<324x8xf32>
    %34 = arith.maximumf %32, %33 : vector<324x8xf32>
    %c0_15 = arith.constant 0 : index
    %c0_16 = arith.constant 0 : index
    %35 = vector.load %arg2[%c0_15, %c0_16] : memref<324x1xf32, #tpu.memory_space<vmem>>, vector<324x1xf32>
    %36 = vector.broadcast %35 : vector<324x1xf32> to vector<324x8xf32>
    %37 = arith.mulf %34, %36 : vector<324x8xf32>
    %cst_17 = arith.constant 0.000000e+00 : f32
    %38 = vector.broadcast %cst_17 : f32 to vector<19x8xf32>
    %39 = vector.extract_strided_slice %37 {offsets = [0, 0], sizes = [305, 8], strides = [1, 1]} : vector<324x8xf32> to vector<305x8xf32>
    %40 = tpu.concatenate %38, %39 in 0 : vector<19x8xf32>, vector<305x8xf32> -> vector<324x8xf32>
    %cst_18 = arith.constant 0.000000e+00 : f32
    %41 = vector.broadcast %cst_18 : f32 to vector<18x8xf32>
    %42 = vector.extract_strided_slice %37 {offsets = [0, 0], sizes = [306, 8], strides = [1, 1]} : vector<324x8xf32> to vector<306x8xf32>
    %43 = tpu.concatenate %41, %42 in 0 : vector<18x8xf32>, vector<306x8xf32> -> vector<324x8xf32>
    %cst_19 = arith.constant 0.000000e+00 : f32
    %44 = vector.broadcast %cst_19 : f32 to vector<17x8xf32>
    %45 = vector.extract_strided_slice %37 {offsets = [0, 0], sizes = [307, 8], strides = [1, 1]} : vector<324x8xf32> to vector<307x8xf32>
    %46 = tpu.concatenate %44, %45 in 0 : vector<17x8xf32>, vector<307x8xf32> -> vector<324x8xf32>
    %cst_20 = arith.constant 0.000000e+00 : f32
    %47 = vector.broadcast %cst_20 : f32 to vector<1x8xf32>
    %48 = vector.extract_strided_slice %37 {offsets = [0, 0], sizes = [323, 8], strides = [1, 1]} : vector<324x8xf32> to vector<323x8xf32>
    %49 = tpu.concatenate %47, %48 in 0 : vector<1x8xf32>, vector<323x8xf32> -> vector<324x8xf32>
    %cst_21 = arith.constant 0.000000e+00 : f32
    %50 = vector.broadcast %cst_21 : f32 to vector<1x8xf32>
    %51 = vector.extract_strided_slice %37 {offsets = [1, 0], sizes = [323, 8], strides = [1, 1]} : vector<324x8xf32> to vector<323x8xf32>
    %52 = tpu.concatenate %51, %50 in 0 : vector<323x8xf32>, vector<1x8xf32> -> vector<324x8xf32>
    %cst_22 = arith.constant 0.000000e+00 : f32
    %53 = vector.broadcast %cst_22 : f32 to vector<17x8xf32>
    %54 = vector.extract_strided_slice %37 {offsets = [17, 0], sizes = [307, 8], strides = [1, 1]} : vector<324x8xf32> to vector<307x8xf32>
    %55 = tpu.concatenate %54, %53 in 0 : vector<307x8xf32>, vector<17x8xf32> -> vector<324x8xf32>
    %cst_23 = arith.constant 0.000000e+00 : f32
    %56 = vector.broadcast %cst_23 : f32 to vector<18x8xf32>
    %57 = vector.extract_strided_slice %37 {offsets = [18, 0], sizes = [306, 8], strides = [1, 1]} : vector<324x8xf32> to vector<306x8xf32>
    %58 = tpu.concatenate %57, %56 in 0 : vector<306x8xf32>, vector<18x8xf32> -> vector<324x8xf32>
    %cst_24 = arith.constant 0.000000e+00 : f32
    %59 = vector.broadcast %cst_24 : f32 to vector<19x8xf32>
    %60 = vector.extract_strided_slice %37 {offsets = [19, 0], sizes = [305, 8], strides = [1, 1]} : vector<324x8xf32> to vector<305x8xf32>
    %61 = tpu.concatenate %60, %59 in 0 : vector<305x8xf32>, vector<19x8xf32> -> vector<324x8xf32>
    %62 = tpu.concatenate %40, %43, %46, %49, %37, %52, %55, %58, %61 in 1 : vector<324x8xf32>, vector<324x8xf32>, vector<324x8xf32>, vector<324x8xf32>, vector<324x8xf32>, vector<324x8xf32>, vector<324x8xf32>, vector<324x8xf32>, vector<324x8xf32> -> vector<324x72xf32>
    %63 = arith.truncf %62 : vector<324x72xf32> to vector<324x72xbf16>
    %c0_25 = arith.constant 0 : index
    %c0_26 = arith.constant 0 : index
    %64 = vector.load %arg5[%c0_25, %c0_26] : memref<72x48xbf16, #tpu.memory_space<vmem>>, vector<72x48xbf16>
    %cst_27 = arith.constant dense<0.000000e+00> : vector<324x48xf32>
    %65 = tpu.matmul %63, %64, %cst_27 {dimension_numbers = #tpu.dot_dimension_numbers<[1], [0], [0], [1], [0, 0, 1, 1], [], []>} : vector<324x72xbf16>, vector<72x48xbf16>, vector<324x48xf32> -> vector<324x48xf32>
    %c0_28 = arith.constant 0 : index
    %c0_29 = arith.constant 0 : index
    %66 = vector.load %arg6[%c0_28, %c0_29] : memref<1x48xf32, #tpu.memory_space<vmem>>, vector<1x48xf32>
    %67 = vector.broadcast %66 : vector<1x48xf32> to vector<324x48xf32>
    %68 = arith.addf %65, %67 : vector<324x48xf32>
    %69 = vector.extract_strided_slice %68 {offsets = [0, 0], sizes = [324, 32], strides = [1, 1]} : vector<324x48xf32> to vector<324x32xf32>
    %70 = arith.truncf %69 : vector<324x32xf32> to vector<324x32xbf16>
    %c0_30 = arith.constant 0 : index
    %c0_31 = arith.constant 0 : index
    %c0_32 = arith.constant 0 : index
    %71 = vector.load %arg7[%c0_30, %c0_31, %c0_32] : memref<1x324x32xbf16, #tpu.memory_space<vmem>>, vector<1x324x32xbf16>
    %72 = vector.shape_cast %71 : vector<1x324x32xbf16> to vector<324x32xbf16>
    %73 = vector.shape_cast %70 : vector<324x32xbf16> to vector<1x324x32xbf16>
    tpu.vector_store %arg7[%c0_30, %c0_31, %c0_32], %73 {strides = array<i32>} : memref<1x324x32xbf16, #tpu.memory_space<vmem>>, vector<1x324x32xbf16>,
    %74 = vector.extract_strided_slice %68 {offsets = [0, 32], sizes = [324, 16], strides = [1, 1]} : vector<324x48xf32> to vector<324x16xf32>
    %75 = arith.truncf %74 : vector<324x16xf32> to vector<324x16xbf16>
    %c0_33 = arith.constant 0 : index
    %c0_34 = arith.constant 0 : index
    %c0_35 = arith.constant 0 : index
    %76 = vector.load %arg8[%c0_33, %c0_34, %c0_35] : memref<1x324x16xbf16, #tpu.memory_space<vmem>>, vector<1x324x16xbf16>
    %77 = vector.shape_cast %76 : vector<1x324x16xbf16> to vector<324x16xbf16>
    %78 = vector.shape_cast %75 : vector<324x16xbf16> to vector<1x324x16xbf16>
    tpu.vector_store %arg8[%c0_33, %c0_34, %c0_35], %78 {strides = array<i32>} : memref<1x324x16xbf16, #tpu.memory_space<vmem>>, vector<1x324x16xbf16>,
    return
  }
  func.func @transform_0(%arg0: i32) -> (i32, i32, i32) {
    %c0_i32 = arith.constant 0 : i32
    %c0_i32_0 = arith.constant 0 : i32
    %c0_i32_1 = arith.constant 0 : i32
    return %arg0, %c0_i32, %c0_i32_0 : i32, i32, i32
  }
  func.func @transform_1(%arg0: i32) -> (i32, i32) {
    %c0_i32 = arith.constant 0 : i32
    %c0_i32_0 = arith.constant 0 : i32
    %c0_i32_1 = arith.constant 0 : i32
    return %c0_i32, %c0_i32_0 : i32, i32
  }
  func.func @transform_2(%arg0: i32) -> (i32, i32) {
    %c0_i32 = arith.constant 0 : i32
    %c0_i32_0 = arith.constant 0 : i32
    %c0_i32_1 = arith.constant 0 : i32
    return %c0_i32, %c0_i32_0 : i32, i32
  }
  func.func @transform_3(%arg0: i32) -> (i32, i32) {
    %c0_i32 = arith.constant 0 : i32
    %c0_i32_0 = arith.constant 0 : i32
    %c0_i32_1 = arith.constant 0 : i32
    return %c0_i32, %c0_i32_0 : i32, i32
  }
  func.func @transform_4(%arg0: i32) -> (i32, i32) {
    %c0_i32 = arith.constant 0 : i32
    %c0_i32_0 = arith.constant 0 : i32
    %c0_i32_1 = arith.constant 0 : i32
    return %c0_i32, %c0_i32_0 : i32, i32
  }
  func.func @transform_5(%arg0: i32) -> (i32, i32) {
    %c0_i32 = arith.constant 0 : i32
    %c0_i32_0 = arith.constant 0 : i32
    %c0_i32_1 = arith.constant 0 : i32
    return %c0_i32, %c0_i32_0 : i32, i32
  }
  func.func @transform_6(%arg0: i32) -> (i32, i32, i32) {
    %c0_i32 = arith.constant 0 : i32
    %c0_i32_0 = arith.constant 0 : i32
    %c0_i32_1 = arith.constant 0 : i32
    return %arg0, %c0_i32, %c0_i32_0 : i32, i32, i32
  }
  func.func @transform_7(%arg0: i32) -> (i32, i32, i32) {
    %c0_i32 = arith.constant 0 : i32
    %c0_i32_0 = arith.constant 0 : i32
    %c0_i32_1 = arith.constant 0 : i32
    return %arg0, %c0_i32, %c0_i32_0 : i32, i32, i32
  }
}

module attributes {stable_mosaic.version = 11 : i64} {
  func.func @_query_kernel(%arg0: i32, %arg1: i32, %arg2: memref<1x32x256xbf16, #tpu.memory_space<vmem>>, %arg3: memref<1x16x256xbf16, #tpu.memory_space<vmem>>, %arg4: memref<1x4x256xf32, #tpu.memory_space<vmem>>, %arg5: memref<1x3x64xf32, #tpu.memory_space<vmem>>, %arg6: memref<16x4xf32, #tpu.memory_space<vmem>>, %arg7: memref<32x32xbf16, #tpu.memory_space<vmem>>, %arg8: memref<32x1xf32, #tpu.memory_space<vmem>>, %arg9: memref<3x32xbf16, #tpu.memory_space<vmem>>, %arg10: memref<3x1xf32, #tpu.memory_space<vmem>>, %arg11: memref<1x3x64xf32, #tpu.memory_space<vmem>>) attributes {dimension_semantics = [#tpu.dimension_semantics<parallel>, #tpu.dimension_semantics<parallel>], iteration_bounds = array<i64: 2, 1>, scalar_prefetch = 0 : i64, scratch_operands = 0 : i64, tpu.core_type = #tpu.core_type<tc>, window_params = [{transform_indices = @transform_0, window_bounds = array<i64: 1, 32, 256>}, {transform_indices = @transform_1, window_bounds = array<i64: 1, 16, 256>}, {transform_indices = @transform_2, window_bounds = array<i64: 1, 4, 256>}, {transform_indices = @transform_3, window_bounds = array<i64: 1, 3, 64>}, {pipeline_mode = #tpu.pipeline_mode<synchronous>, transform_indices = @transform_4, window_bounds = array<i64: 16, 4>}, {pipeline_mode = #tpu.pipeline_mode<synchronous>, transform_indices = @transform_5, window_bounds = array<i64: 32, 32>}, {pipeline_mode = #tpu.pipeline_mode<synchronous>, transform_indices = @transform_6, window_bounds = array<i64: 32, 1>}, {pipeline_mode = #tpu.pipeline_mode<synchronous>, transform_indices = @transform_7, window_bounds = array<i64: 3, 32>}, {pipeline_mode = #tpu.pipeline_mode<synchronous>, transform_indices = @transform_8, window_bounds = array<i64: 3, 1>}, {transform_indices = @transform_9, window_bounds = array<i64: 1, 3, 64>}]} {
    %c0 = arith.constant 0 : index
    %c0_0 = arith.constant 0 : index
    %c0_1 = arith.constant 0 : index
    %0 = vector.load %arg2[%c0, %c0_0, %c0_1] : memref<1x32x256xbf16, #tpu.memory_space<vmem>>, vector<1x32x256xbf16>
    %1 = vector.shape_cast %0 : vector<1x32x256xbf16> to vector<32x256xbf16>
    %c0_2 = arith.constant 0 : index
    %c0_3 = arith.constant 0 : index
    %c0_4 = arith.constant 0 : index
    %2 = vector.load %arg3[%c0_2, %c0_3, %c0_4] : memref<1x16x256xbf16, #tpu.memory_space<vmem>>, vector<1x16x256xbf16>
    %3 = vector.shape_cast %2 : vector<1x16x256xbf16> to vector<16x256xbf16>
    %4 = arith.extf %3 : vector<16x256xbf16> to vector<16x256xf32>
    %c0_5 = arith.constant 0 : index
    %c0_6 = arith.constant 0 : index
    %c0_7 = arith.constant 0 : index
    %5 = vector.load %arg4[%c0_5, %c0_6, %c0_7] : memref<1x4x256xf32, #tpu.memory_space<vmem>>, vector<1x4x256xf32>
    %6 = vector.shape_cast %5 : vector<1x4x256xf32> to vector<4x256xf32>
    %7 = vector.extract_strided_slice %6 {offsets = [0, 0], sizes = [1, 256], strides = [1, 1]} : vector<4x256xf32> to vector<1x256xf32>
    %8 = vector.extract_strided_slice %6 {offsets = [1, 0], sizes = [1, 256], strides = [1, 1]} : vector<4x256xf32> to vector<1x256xf32>
    %9 = vector.extract_strided_slice %6 {offsets = [2, 0], sizes = [1, 256], strides = [1, 1]} : vector<4x256xf32> to vector<1x256xf32>
    %10 = vector.extract_strided_slice %6 {offsets = [3, 0], sizes = [1, 256], strides = [1, 1]} : vector<4x256xf32> to vector<1x256xf32>
    %c0_8 = arith.constant 0 : index
    %c0_9 = arith.constant 0 : index
    %11 = vector.load %arg6[%c0_8, %c0_9] : memref<16x4xf32, #tpu.memory_space<vmem>>, vector<16x4xf32>
    %12 = vector.extract_strided_slice %11 {offsets = [0, 0], sizes = [16, 1], strides = [1, 1]} : vector<16x4xf32> to vector<16x1xf32>
    %13 = vector.broadcast %12 : vector<16x1xf32> to vector<16x256xf32>
    %14 = vector.broadcast %7 : vector<1x256xf32> to vector<16x256xf32>
    %15 = arith.mulf %13, %14 : vector<16x256xf32>
    %16 = vector.extract_strided_slice %11 {offsets = [0, 1], sizes = [16, 1], strides = [1, 1]} : vector<16x4xf32> to vector<16x1xf32>
    %17 = vector.broadcast %16 : vector<16x1xf32> to vector<16x256xf32>
    %18 = vector.broadcast %8 : vector<1x256xf32> to vector<16x256xf32>
    %19 = arith.mulf %17, %18 : vector<16x256xf32>
    %20 = arith.addf %15, %19 : vector<16x256xf32>
    %21 = vector.extract_strided_slice %11 {offsets = [0, 2], sizes = [16, 1], strides = [1, 1]} : vector<16x4xf32> to vector<16x1xf32>
    %22 = vector.broadcast %21 : vector<16x1xf32> to vector<16x256xf32>
    %23 = vector.broadcast %9 : vector<1x256xf32> to vector<16x256xf32>
    %24 = arith.mulf %22, %23 : vector<16x256xf32>
    %25 = vector.extract_strided_slice %11 {offsets = [0, 3], sizes = [16, 1], strides = [1, 1]} : vector<16x4xf32> to vector<16x1xf32>
    %26 = vector.broadcast %25 : vector<16x1xf32> to vector<16x256xf32>
    %27 = vector.broadcast %10 : vector<1x256xf32> to vector<16x256xf32>
    %28 = arith.mulf %26, %27 : vector<16x256xf32>
    %29 = arith.addf %24, %28 : vector<16x256xf32>
    %30 = arith.mulf %4, %20 : vector<16x256xf32>
    %31 = arith.addf %30, %29 : vector<16x256xf32>
    %cst = arith.constant 3.14159274 : f32
    %32 = vector.broadcast %cst : f32 to vector<16x256xf32>
    %33 = arith.mulf %32, %31 : vector<16x256xf32>
    %34 = math.cos %33 : vector<16x256xf32>
    %cst_10 = arith.constant 3.14159274 : f32
    %35 = vector.broadcast %cst_10 : f32 to vector<16x256xf32>
    %36 = arith.mulf %35, %31 : vector<16x256xf32>
    %37 = math.sin %36 : vector<16x256xf32>
    %38 = tpu.concatenate %34, %37 in 0 : vector<16x256xf32>, vector<16x256xf32> -> vector<32x256xf32>
    %39 = arith.extf %1 : vector<32x256xbf16> to vector<32x256xf32>
    %40 = arith.mulf %39, %38 : vector<32x256xf32>
    %41 = arith.truncf %40 : vector<32x256xf32> to vector<32x256xbf16>
    %c0_11 = arith.constant 0 : index
    %c0_12 = arith.constant 0 : index
    %42 = vector.load %arg7[%c0_11, %c0_12] : memref<32x32xbf16, #tpu.memory_space<vmem>>, vector<32x32xbf16>
    %cst_13 = arith.constant dense<0.000000e+00> : vector<32x256xf32>
    %43 = tpu.matmul %42, %41, %cst_13 {dimension_numbers = #tpu.dot_dimension_numbers<[1], [0], [0], [1], [0, 0, 1, 1], [], []>} : vector<32x32xbf16>, vector<32x256xbf16>, vector<32x256xf32> -> vector<32x256xf32>
    %c0_14 = arith.constant 0 : index
    %c0_15 = arith.constant 0 : index
    %44 = vector.load %arg8[%c0_14, %c0_15] : memref<32x1xf32, #tpu.memory_space<vmem>>, vector<32x1xf32>
    %45 = vector.broadcast %44 : vector<32x1xf32> to vector<32x256xf32>
    %46 = arith.addf %43, %45 : vector<32x256xf32>
    %cst_16 = arith.constant 0.000000e+00 : f32
    %47 = vector.broadcast %cst_16 : f32 to vector<32x256xf32>
    %48 = arith.maximumf %46, %47 : vector<32x256xf32>
    %49 = arith.mulf %7, %8 : vector<1x256xf32>
    %50 = math.absf %49 : vector<1x256xf32>
    %cst_17 = arith.constant 9.99999971E-10 : f32
    %51 = vector.broadcast %cst_17 : f32 to vector<1x256xf32>
    %52 = arith.addf %50, %51 : vector<1x256xf32>
    %53 = vector.extract_strided_slice %52 {offsets = [0, 0], sizes = [1, 64], strides = [1, 1]} : vector<1x256xf32> to vector<1x64xf32>
    %54 = vector.extract_strided_slice %52 {offsets = [0, 64], sizes = [1, 64], strides = [1, 1]} : vector<1x256xf32> to vector<1x64xf32>
    %55 = vector.extract_strided_slice %52 {offsets = [0, 128], sizes = [1, 64], strides = [1, 1]} : vector<1x256xf32> to vector<1x64xf32>
    %56 = vector.extract_strided_slice %52 {offsets = [0, 192], sizes = [1, 64], strides = [1, 1]} : vector<1x256xf32> to vector<1x64xf32>
    %57 = arith.addf %53, %54 : vector<1x64xf32>
    %58 = arith.addf %57, %55 : vector<1x64xf32>
    %59 = arith.addf %58, %56 : vector<1x64xf32>
    %60 = tpu.reciprocal %59 : vector<1x64xf32> -> vector<1x64xf32>
    %61 = vector.extract_strided_slice %48 {offsets = [0, 0], sizes = [32, 64], strides = [1, 1]} : vector<32x256xf32> to vector<32x64xf32>
    %62 = arith.mulf %56, %60 : vector<1x64xf32>
    %63 = vector.broadcast %62 : vector<1x64xf32> to vector<32x64xf32>
    %64 = arith.mulf %61, %63 : vector<32x64xf32>
    %65 = vector.extract_strided_slice %48 {offsets = [0, 64], sizes = [32, 64], strides = [1, 1]} : vector<32x256xf32> to vector<32x64xf32>
    %66 = arith.mulf %55, %60 : vector<1x64xf32>
    %67 = vector.broadcast %66 : vector<1x64xf32> to vector<32x64xf32>
    %68 = arith.mulf %65, %67 : vector<32x64xf32>
    %69 = arith.addf %64, %68 : vector<32x64xf32>
    %70 = vector.extract_strided_slice %48 {offsets = [0, 128], sizes = [32, 64], strides = [1, 1]} : vector<32x256xf32> to vector<32x64xf32>
    %71 = arith.mulf %54, %60 : vector<1x64xf32>
    %72 = vector.broadcast %71 : vector<1x64xf32> to vector<32x64xf32>
    %73 = arith.mulf %70, %72 : vector<32x64xf32>
    %74 = arith.addf %69, %73 : vector<32x64xf32>
    %75 = vector.extract_strided_slice %48 {offsets = [0, 192], sizes = [32, 64], strides = [1, 1]} : vector<32x256xf32> to vector<32x64xf32>
    %76 = arith.mulf %53, %60 : vector<1x64xf32>
    %77 = vector.broadcast %76 : vector<1x64xf32> to vector<32x64xf32>
    %78 = arith.mulf %75, %77 : vector<32x64xf32>
    %79 = arith.addf %74, %78 : vector<32x64xf32>
    %80 = arith.truncf %79 : vector<32x64xf32> to vector<32x64xbf16>
    %c0_18 = arith.constant 0 : index
    %c0_19 = arith.constant 0 : index
    %81 = vector.load %arg9[%c0_18, %c0_19] : memref<3x32xbf16, #tpu.memory_space<vmem>>, vector<3x32xbf16>
    %cst_20 = arith.constant dense<0.000000e+00> : vector<3x64xf32>
    %82 = tpu.matmul %81, %80, %cst_20 {dimension_numbers = #tpu.dot_dimension_numbers<[1], [0], [0], [1], [0, 0, 1, 1], [], []>} : vector<3x32xbf16>, vector<32x64xbf16>, vector<3x64xf32> -> vector<3x64xf32>
    %c0_21 = arith.constant 0 : index
    %c0_22 = arith.constant 0 : index
    %83 = vector.load %arg10[%c0_21, %c0_22] : memref<3x1xf32, #tpu.memory_space<vmem>>, vector<3x1xf32>
    %84 = vector.broadcast %83 : vector<3x1xf32> to vector<3x64xf32>
    %85 = arith.addf %82, %84 : vector<3x64xf32>
    %c0_23 = arith.constant 0 : index
    %c0_24 = arith.constant 0 : index
    %c0_25 = arith.constant 0 : index
    %86 = vector.load %arg5[%c0_23, %c0_24, %c0_25] : memref<1x3x64xf32, #tpu.memory_space<vmem>>, vector<1x3x64xf32>
    %87 = vector.shape_cast %86 : vector<1x3x64xf32> to vector<3x64xf32>
    %88 = arith.addf %85, %87 : vector<3x64xf32>
    %c0_26 = arith.constant 0 : index
    %c0_27 = arith.constant 0 : index
    %c0_28 = arith.constant 0 : index
    %89 = vector.load %arg11[%c0_26, %c0_27, %c0_28] : memref<1x3x64xf32, #tpu.memory_space<vmem>>, vector<1x3x64xf32>
    %90 = vector.shape_cast %89 : vector<1x3x64xf32> to vector<3x64xf32>
    %91 = vector.shape_cast %88 : vector<3x64xf32> to vector<1x3x64xf32>
    tpu.vector_store %arg11[%c0_26, %c0_27, %c0_28], %91 {strides = array<i32>} : memref<1x3x64xf32, #tpu.memory_space<vmem>>, vector<1x3x64xf32>,
    return
  }
  func.func @transform_0(%arg0: i32, %arg1: i32) -> (i32, i32, i32) {
    %c0_i32 = arith.constant 0 : i32
    %c0_i32_0 = arith.constant 0 : i32
    return %arg0, %c0_i32, %arg1 : i32, i32, i32
  }
  func.func @transform_1(%arg0: i32, %arg1: i32) -> (i32, i32, i32) {
    %c0_i32 = arith.constant 0 : i32
    %c0_i32_0 = arith.constant 0 : i32
    return %arg0, %c0_i32, %arg1 : i32, i32, i32
  }
  func.func @transform_2(%arg0: i32, %arg1: i32) -> (i32, i32, i32) {
    %c0_i32 = arith.constant 0 : i32
    %c0_i32_0 = arith.constant 0 : i32
    return %arg0, %c0_i32, %arg1 : i32, i32, i32
  }
  func.func @transform_3(%arg0: i32, %arg1: i32) -> (i32, i32, i32) {
    %c0_i32 = arith.constant 0 : i32
    %c0_i32_0 = arith.constant 0 : i32
    return %arg0, %c0_i32, %arg1 : i32, i32, i32
  }
  func.func @transform_4(%arg0: i32, %arg1: i32) -> (i32, i32) {
    %c0_i32 = arith.constant 0 : i32
    %c0_i32_0 = arith.constant 0 : i32
    %c0_i32_1 = arith.constant 0 : i32
    return %c0_i32, %c0_i32_0 : i32, i32
  }
  func.func @transform_5(%arg0: i32, %arg1: i32) -> (i32, i32) {
    %c0_i32 = arith.constant 0 : i32
    %c0_i32_0 = arith.constant 0 : i32
    %c0_i32_1 = arith.constant 0 : i32
    return %c0_i32, %c0_i32_0 : i32, i32
  }
  func.func @transform_6(%arg0: i32, %arg1: i32) -> (i32, i32) {
    %c0_i32 = arith.constant 0 : i32
    %c0_i32_0 = arith.constant 0 : i32
    %c0_i32_1 = arith.constant 0 : i32
    return %c0_i32, %c0_i32_0 : i32, i32
  }
  func.func @transform_7(%arg0: i32, %arg1: i32) -> (i32, i32) {
    %c0_i32 = arith.constant 0 : i32
    %c0_i32_0 = arith.constant 0 : i32
    %c0_i32_1 = arith.constant 0 : i32
    return %c0_i32, %c0_i32_0 : i32, i32
  }
  func.func @transform_8(%arg0: i32, %arg1: i32) -> (i32, i32) {
    %c0_i32 = arith.constant 0 : i32
    %c0_i32_0 = arith.constant 0 : i32
    %c0_i32_1 = arith.constant 0 : i32
    return %c0_i32, %c0_i32_0 : i32, i32
  }
  func.func @transform_9(%arg0: i32, %arg1: i32) -> (i32, i32, i32) {
    %c0_i32 = arith.constant 0 : i32
    %c0_i32_0 = arith.constant 0 : i32
    return %arg0, %c0_i32, %arg1 : i32, i32, i32
  }
}

</mosaic_0001>

<bundles_post_ra>
// kernel: elte_forward.2
= control target key start
LH: loop header
LB: loop body
LE: loop exit
PB: predicated region body
PF: predicated region fallthrough
CT: control target
= control target key end

     0   :  { %s7603_s24 = smov 0   ;;  %s12524_s0 = inlined_call_operand.vmem [shape: f32[2,324,8], index: 0, kind: input, shape index: {}]   ;;  %s12525_s1 = inlined_call_operand.vmem [shape: f32[324,1], index: 1, kind: input, shape index: {}]   ;;  %s12526_s2 = inlined_call_operand.vmem [shape: bf16[72,8], index: 2, kind: input, shape index: {}]   ;;  %s12527_s3 = inlined_call_operand.vmem [shape: f32[1,8], index: 3, kind: input, shape index: {}]   ;;  %s12528_s4 = inlined_call_operand.vmem [shape: bf16[72,48], index: 4, kind: input, shape index: {}]   ;;  %s12529_s5 = inlined_call_operand.vmem [shape: f32[1,48], index: 5, kind: input, shape index: {}]   ;;  %s12530_s6 = inlined_call_operand.vmem [shape: bf16[2,324,32], index: 6, kind: output, shape index: {0}]   ;;  %s12531_s7 = inlined_call_operand.vmem [shape: bf16[2,324,16], index: 7, kind: output, shape index: {1}]  }
   0x1 LB: > { %s5506_s25 = sadd.s32 4294967295, %s7549_s24   ;;  %p5510_p0 = scmp.ge.s32.totalorder %s7549_s24, 1  ;;  %s7549_s24 = sphi %s7603_s24, %s18_s24  }
   0x2   : > { %p240_p1 = scmp.lt.s32.totalorder %s7549_s24, 3 }
   0x4   : > { %p241_p2 = pnand %p5510_p0, %p240_p1 }
   0x6   : > { %244 = sbr.rel (%p241_p2) target bundleno = 1488 (0x5d0), region = 44 }
   0xd   : > { %p277_p3 = scmp.lt.s32.totalorder %s5506_s25, 1  ;;  %v12532_v0 = vmov 0.0   ;;  %vm12806_vm0 = vcmask 1041408   ;;  %s7552_s30 = smov 8   ;;  %vm571_vm1 = vcmask 1040384   ;;  %vm657_vm2 = vcmask 1046528  }
   0xe   : > { %5704 = vmatprep.subr.bf16.mxu0 %v12532_v0  ;;  %5798 = vmatprep.subr.bf16.mxu1 %v12532_v0  ;;  %s7553_s8 = smov 16   ;;  %s7554_s9 = smov 24   ;;  %vm373_vm3 = vcmask 1042432   ;;  %vm741_vm4 = vcmask 1045504   ;;  %vm12710_vm5 = vcmask 1043456   ;;  %vm821_vm6 = vcmask 1044480  }
   0xf   : > { %s13643_s25 = smov (!%p277_p3, %s5506_s25), 1  ;;  %s7555_s10 = smov 32   ;;  %vm7559_vm7 = vmmov 0   ;;  %vm1876_vm8 = vcmask 64512   ;;  %vm1917_vm9 = vcmask 130048   ;;  %vm1958_vm10 = vcmask 195584  }
  0x10   : > { %s5892_s26 = smul.u32 328, %s13643_s25  ;;  %s7556_s11 = smov 40   ;;  %vm2000_vm11 = vcmask 261120   ;;  %vm2042_vm12 = vcmask 326656   ;;  %vm2084_vm13 = vcmask 392192   ;;  %vm2126_vm14 = vcmask 457728  }
  0x11   : > { %s7557_s12 = smov 48   ;;  %s7558_s13 = smov 56   ;;  %vm2168_vm15 = vcmask 523264  }
  0x12   : > { %s7619_s29 = scalar_lea.vmem %s12524_s0, %s5892_s26  ;;  %s7560_s26 = smov 64  }
  0x13   : > { %v7622_v1 = vld [vmem:[%s7619_s29 + $0x10] sm:$0xff]  ;;  %v7625_v2 = vld [vmem:[%s7619_s29 + $0x18] sm:$0xff]  ;;  %v7628_v3 = vld [vmem:[%s7619_s29 + $0x20] sm:$0xff]  ;;  %s7562_s18 = smov 96  }
  0x14   : > { %v495_v4 = vrot.slane %v7622_v1, 6  ;;  %v497_v5 = vrot.slane %v7625_v2, 6  ;;  %v499_v6 = vrot.slane %v7628_v3, 6  ;;  %v7634_v7 = vld [vmem:[%s7619_s29] sm:$0xff]  ;;  %v7637_v8 = vld [vmem:[%s7619_s29 + $0x28] sm:$0xff]  ;;  %v7640_v9 = vld [vmem:[%s7619_s29 + $0x30] sm:$0xff] }
  0x15   : > { %v492_v10 = vrot.slane %v7634_v7, 6  ;;  %v501_v11 = vrot.slane %v7637_v8, 6  ;;  %v503_v12 = vrot.slane %v7640_v9, 6  ;;  %v7646_v13 = vld [vmem:[%s7619_s29 + $0x8] sm:$0xff]  ;;  %v7649_v14 = vld [vmem:[%s7619_s29 + $0x40] sm:$0xff]  ;;  %v7658_v19 = vld [vmem:[%s7619_s29 + $0x50] sm:$0xff] }
  0x16   : > { %v7652_v15 = vld [vmem:[%s7619_s29 + $0x48] sm:$0xff]  ;;  %v498_v16 = vsel %vm12806_vm0, %v495_v4, %v497_v5  ;;  %v500_v17 = vsel %vm12806_vm0, %v497_v5, %v499_v6  ;;  %v493_v18 = vrot.slane %v7646_v13, 6  ;;  %12871 = vst [vmem:[#allocation2_spill] sm:$0xff] %v7658_v19  ;;  %v507_v20 = vrot.slane %v7649_v14, 6  ;;  %v7662_v21 = vld [vmem:[%s7619_s29 + $0x38] sm:$0xff]  ;;  %v7665_v22 = vld [vmem:[%s7619_s29 + $0x60] sm:$0xff] }
  0x17   : > { %v5924_v23 = vpack.i.bf16 %v500_v17, %v498_v16  ;;  %v570_v24 = vsel %vm12806_vm0, 0.0, %v492_v10  ;;  %v502_v25 = vsel %vm12806_vm0, %v499_v6, %v501_v11  ;;  %v504_v26 = vsel %vm12806_vm0, %v501_v11, %v503_v12  ;;  %v7671_v27 = vld [vmem:[%s7619_s29 + $0x68] sm:$0xff]  ;;  %v7674_v28 = vld [vmem:[%s7619_s29 + $0x70] sm:$0xff]  ;;  %v7677_v29 = vld [vmem:[%s7619_s29 + $0x58] sm:$0xff] }
  0x18   : > { %12872 = vst [vmem:[#allocation3_spill] sm:$0xff] %v7674_v28  ;;  %12873 = vst [vmem:[#allocation4_spill] sm:$0xff] %v7677_v29  ;;  %v5914_v30 = vpack.i.bf16 %v570_v24, %v12532_v0  ;;  %v5929_v31 = vpack.i.bf16 %v504_v26, %v502_v25  ;;  %v494_v32 = vsel %vm12806_vm0, %v492_v10, %v493_v18  ;;  %v509_v35 = vrot.slane %v7652_v15, 6  ;;  %v7692_v42 = vld [vmem:[%s7619_s29 + $0x80] sm:$0xff]  ;;  %v7699_v47 = vld [vmem:[%s7619_s29 + $0x88] sm:$0xff] }
  0x19   : > { %v496_v33 = vsel %vm12806_vm0, %v493_v18, %v495_v4  ;;  %5925 = vrot.lane.b32.xlu1 %v5924_v23, %s7552_s30  ;;  %v511_v36 = vrot.slane %v7658_v19, 6  ;;  %v505_v37 = vrot.slane %v7662_v21, 6  ;;  %v515_v38 = vrot.slane %v7665_v22, 6  ;;  %12874 = vst [vmem:[#allocation5_spill] sm:$0xff] %v7692_v42  ;;  %12875 = vst [vmem:[#allocation6_spill] sm:$0xff] %v7699_v47  ;;  %v7702_v48 = vld [vmem:[%s7619_s29 + $0x90] sm:$0xff] }
  0x1a   : > { %v5919_v34 = vpack.i.bf16 %v496_v33, %v494_v32  ;;  %5915 = vrot.lane.b32.xlu0 %v5914_v30, %s7552_s30  ;;  %v517_v39 = vrot.slane %v7671_v27, 6  ;;  %v519_v40 = vrot.slane %v7674_v28, 6  ;;  %v513_v41 = vrot.slane %v7677_v29, 6  ;;  %12876 = vst [vmem:[#allocation7_spill] sm:$0xff] %v7702_v48  ;;  %v7705_v49 = vld [vmem:[%s7619_s29 + $0x78] sm:$0xff]  ;;  %v7710_v52 = vld [vmem:[%s7619_s29 + $0xa0] sm:$0xff] }
  0x1b   : > { %v510_v43 = vsel %vm12806_vm0, %v507_v20, %v509_v35  ;;  %v512_v44 = vsel %vm12806_vm0, %v509_v35, %v511_v36  ;;  %v506_v45 = vsel %vm12806_vm0, %v503_v12, %v505_v37  ;;  %v508_v46 = vsel %vm12806_vm0, %v505_v37, %v507_v20  ;;  %12877 = vst [vmem:[#allocation8_spill] sm:$0xff] %v7705_v49  ;;  %v7715_v55 = vld [vmem:[%s7619_s29 + $0xa8] sm:$0xff]  ;;  %v7718_v56 = vld [vmem:[%s7619_s29 + $0xb0] sm:$0xff]  ;;  %v7721_v57 = vld [vmem:[%s7619_s29 + $0x98] sm:$0xff] }
  0x1c   : > { %v518_v50 = vsel %vm12806_vm0, %v515_v38, %v517_v39  ;;  %v520_v51 = vsel %vm12806_vm0, %v517_v39, %v519_v40  ;;  %12878 = vst [vmem:[#allocation9_spill] sm:$0xff] %v7710_v52  ;;  %v5939_v53 = vpack.i.bf16 %v512_v44, %v510_v43  ;;  %v523_v54 = vrot.slane %v7692_v42, 6  ;;  %12879 = vst [vmem:[#allocation10_spill] sm:$0xff] %v7715_v55  ;;  %v7739_v20 = vld [vmem:[%s7619_s29 + $0xc0] sm:$0xff]  ;;  %v7743_v24 = vld [vmem:[%s7619_s29 + $0xc8] sm:$0xff] }
  0x1d   : > { %5930 = vrot.lane.b32.xlu1 %v5929_v31, %s7552_s30  ;;  %12880 = vst [vmem:[#allocation11_spill] sm:$0xff] %v7718_v56  ;;  %12881 = vst [vmem:[#allocation12_spill] sm:$0xff] %v7721_v57  ;;  %v5934_v58 = vpack.i.bf16 %v508_v46, %v506_v45  ;;  %v525_v59 = vrot.slane %v7699_v47, 6  ;;  %v527_v60 = vrot.slane %v7702_v48, 6  ;;  %v521_v61 = vrot.slane %v7705_v49, 6  ;;  %v7746_v25 = vld [vmem:[%s7619_s29 + $0xd0] sm:$0xff] }
  0x1e   : > { %5920 = vrot.lane.b32.xlu0 %v5919_v34, %s7552_s30  ;;  %v5949_v62 = vpack.i.bf16 %v520_v51, %v518_v50  ;;  %v514_v63 = vsel %vm12806_vm0, %v511_v36, %v513_v41  ;;  %v516_v4 = vsel %vm12806_vm0, %v513_v41, %v515_v38  ;;  %v531_v5 = vrot.slane %v7710_v52, 6  ;;  %12882 = vst [vmem:[#allocation13_spill] sm:$0xff] %v7739_v20  ;;  %v7749_v26 = vld [vmem:[%s7619_s29 + $0xb8] sm:$0xff]  ;;  %v7757_v36 = vld [vmem:[%s7619_s29 + $0xe0] sm:$0xff]  ;;  %v7765_v41 = vld [vmem:[%s7619_s29 + $0xe8] sm:$0xff] }
  0x1f   : > { %v533_v6 = vrot.slane %v7715_v55, 6  ;;  %v535_v10 = vrot.slane %v7718_v56, 6  ;;  %v529_v11 = vrot.slane %v7721_v57, 6  ;;  %v526_v12 = vsel %vm12806_vm0, %v523_v54, %v525_v59  ;;  %12883 = vst [vmem:[#allocation14_spill] sm:$0xff] %v7743_v24  ;;  %12884 = vst [vmem:[#allocation15_spill] sm:$0xff] %v7746_v25  ;;  %v7768_v43 = vld [vmem:[%s7619_s29 + $0xf0] sm:$0xff] }
  0x20   : > { %v528_v16 = vsel %vm12806_vm0, %v525_v59, %v527_v60  ;;  %v522_v17 = vsel %vm12806_vm0, %v519_v40, %v521_v61  ;;  %v524_v18 = vsel %vm12806_vm0, %v521_v61, %v523_v54  ;;  %v5944_v23 = vpack.i.bf16 %v516_v4, %v514_v63  ;;  %12885 = vst [vmem:[#allocation16_spill] sm:$0xff] %v7749_v26  ;;  %v7771_v45 = vld [vmem:[%s7619_s29 + $0xd8] sm:$0xff]  ;;  %v7787_v63 = vld [vmem:[%s7619_s29 + $0x108] sm:$0xff]  ;;  %v7790_v4 = vld [vmem:[%s7619_s29 + $0x110] sm:$0xff] }
  0x21   : > { %5940 = vrot.lane.b32.xlu1 %v5939_v53, %s7552_s30  ;;  %v5959_v30 = vpack.i.bf16 %v528_v16, %v526_v12  ;;  %v5954_v31 = vpack.i.bf16 %v524_v18, %v522_v17  ;;  %v534_v32 = vsel %vm12806_vm0, %v531_v5, %v533_v6  ;;  %v536_v33 = vsel %vm12806_vm0, %v533_v6, %v535_v10 }
  0x22   : > { %5935 = vrot.lane.b32.xlu0 %v5934_v58, %s7552_s30  ;;  %v530_v34 = vsel %vm12806_vm0, %v527_v60, %v529_v11  ;;  %v532_v35 = vsel %vm12806_vm0, %v529_v11, %v531_v5  ;;  %12886 = vst [vmem:[#allocation17_spill] sm:$0xff] %v7757_v36  ;;  %v539_v37 = vrot.slane %v7739_v20, 6  ;;  %v541_v38 = vrot.slane %v7743_v24, 6  ;;  %12887 = vst [vmem:[#allocation18_spill] sm:$0xff] %v7765_v41  ;;  %v7793_v5 = vld [vmem:[%s7619_s29 + $0xf8] sm:$0xff] }
  0x23   : > { %v543_v39 = vrot.slane %v7746_v25, 6  ;;  %v537_v40 = vrot.slane %v7749_v26, 6  ;;  %12888 = vst [vmem:[#allocation19_spill] sm:$0xff] %v7768_v43  ;;  %v5969_v44 = vpack.i.bf16 %v536_v33, %v534_v32  ;;  %12889 = vst [vmem:[#allocation20_spill] sm:$0xff] %v7771_v45  ;;  %v5964_v46 = vpack.i.bf16 %v532_v35, %v530_v34  ;;  %v7815_v35 = vld [vmem:[%s7619_s29 + $0x118] sm:$0xff] }
  0x24   : > { %v547_v50 = vrot.slane %v7757_v36, 6  ;;  %v549_v51 = vrot.slane %v7765_v41, 6  ;;  %v551_v53 = vrot.slane %v7768_v43, 6  ;;  %v542_v54 = vsel %vm12806_vm0, %v539_v37, %v541_v38  ;;  %12891 = vst [vmem:[#allocation22_spill] sm:$0xff] %v7787_v63  ;;  %12892 = vst [vmem:[#allocation23_spill] sm:$0xff] %v7790_v4 }
  0x25   : > { %5950 = vrot.lane.b32.xlu1 %v5949_v62, %s7552_s30  ;;  %v544_v58 = vsel %vm12806_vm0, %v541_v38, %v543_v39  ;;  %v538_v59 = vsel %vm12806_vm0, %v535_v10, %v537_v40  ;;  %v540_v60 = vsel %vm12806_vm0, %v537_v40, %v539_v37  ;;  %v545_v61 = vrot.slane %v7771_v45, 6  ;;  %v7784_v62 = vld [vmem:[%s7619_s29 + $0x100] sm:$0xff]  ;;  %12893 = vst [vmem:[#allocation24_spill] sm:$0xff] %v7793_v5 }
  0x26   : > { %5945 = vrot.lane.b32.xlu0 %v5944_v23, %s7552_s30  ;;  %12890 = vst [vmem:[#allocation21_spill] sm:$0xff] %v7784_v62  ;;  %v5979_v6 = vpack.i.bf16 %v544_v58, %v542_v54  ;;  %v5974_v10 = vpack.i.bf16 %v540_v60, %v538_v59  ;;  %v550_v11 = vsel %vm12806_vm0, %v547_v50, %v549_v51  ;;  %v555_v16 = vrot.slane %v7784_v62, 6  ;;  %v7803_v23 = vld [vmem:[%s7619_s29 + $0x120] sm:$0xff] }
  0x27   : > { %v552_v12 = vsel %vm12806_vm0, %v549_v51, %v551_v53  ;;  %v557_v17 = vrot.slane %v7787_v63, 6  ;;  %v559_v18 = vrot.slane %v7790_v4, 6  ;;  %12894 = vst [vmem:[#allocation25_spill] sm:$0xff] %v7803_v23  ;;  %v546_v32 = vsel %vm12806_vm0, %v543_v39, %v545_v61 }
  0x28   : > { %v548_v33 = vsel %vm12806_vm0, %v545_v61, %v547_v50  ;;  %v553_v34 = vrot.slane %v7793_v5, 6  ;;  %v5989_v37 = vpack.i.bf16 %v552_v12, %v550_v11  ;;  %v563_v38 = vrot.slane %v7803_v23, 6 }
  0x29   : > { %5960 = vrot.lane.b32.xlu1 %v5959_v30, %s7552_s30  ;;  %v7806_v30 = vld [vmem:[%s7619_s29 + $0x128] sm:$0xff]  ;;  %v558_v39 = vsel %vm12806_vm0, %v555_v16, %v557_v17  ;;  %v560_v50 = vsel %vm12806_vm0, %v557_v17, %v559_v18  ;;  %v561_v58 = vrot.slane %v7815_v35, 6  ;;  %v573_v11 = vrot.slane %v7646_v13, 7 }
  0x2a   : > { %5955 = vrot.lane.b32.xlu0 %v5954_v31, %s7552_s30  ;;  %12895 = vst [vmem:[#allocation26_spill] sm:$0xff] %v7806_v30  ;;  %v7809_v31 = vld [vmem:[%s7619_s29 + $0x130] sm:$0xff]  ;;  %v565_v40 = vrot.slane %v7806_v30, 6  ;;  %v554_v51 = vsel %vm12806_vm0, %v551_v53, %v553_v34  ;;  %v556_v54 = vsel %vm12806_vm0, %v553_v34, %v555_v16  ;;  %v5999_v59 = vpack.i.bf16 %v560_v50, %v558_v39 }
  0x2b   : > { %12896 = vst [vmem:[#allocation27_spill] sm:$0xff] %v7809_v31  ;;  %v575_v53 = vrot.slane %v7622_v1, 7  ;;  %v562_v12 = vsel %vm12806_vm0, %v559_v18, %v561_v58  ;;  %v564_v16 = vsel %vm12806_vm0, %v561_v58, %v563_v38  ;;  %v581_v34 = vrot.slane %v7637_v8, 7 }
  0x2c   : > { %v566_v60 = vsel %vm12806_vm0, %v563_v38, %v565_v40  ;;  %v577_v38 = vrot.slane %v7625_v2, 7  ;;  %v587_v39 = vrot.slane %v7649_v14, 7  ;;  %v589_v58 = vrot.slane %v7652_v15, 7 }
  0x2d   : > { %5970 = vrot.lane.b32.xlu1 %v5969_v44, %s7552_s30  ;;  %v567_v44 = vrot.slane %v7809_v31, 6  ;;  %v7848_v18 = vsel %vm571_vm1, %v573_v11, %v575_v53 }
  0x2e   : > { %5965 = vrot.lane.b32.xlu0 %v5964_v46, %s7552_s30  ;;  %v5984_v46 = vpack.i.bf16 %v548_v33, %v546_v32  ;;  %v579_v33 = vrot.slane %v7628_v3, 7 }
  0x2f   : > { %v568_v61 = vsel %vm12806_vm0, %v565_v40, %v567_v44  ;;  %v6004_v40 = vpack.i.bf16 %v564_v16, %v562_v12  ;;  %v7879_v12 = vsel %vm571_vm1, %v587_v39, %v589_v58  ;;  %v597_v16 = vrot.slane %v7671_v27, 7 }
  0x30   : > { %v6009_v17 = vpack.i.bf16 %v568_v61, %v566_v60  ;;  %v7869_v60 = vsel %vm571_vm1, %v577_v38, %v579_v33  ;;  %v591_v61 = vrot.slane %v7658_v19, 7  ;;  %v611_v19 = vrot.slane %v7710_v52, 7 }
  0x31   : > { %5980 = vrot.lane.b32.xlu1 %v5979_v6, %s7552_s30  ;;  %v572_v6 = vrot.slane %v7634_v7, 7 }
  0x32   : > { %5975 = vrot.lane.b32.xlu0 %v5974_v10, %s7552_s30  ;;  %v5994_v10 = vpack.i.bf16 %v556_v54, %v554_v51  ;;  %v7858_v51 = vsel %vm571_vm1, %v579_v33, %v581_v34 }
  0x33   : > { %v7838_v32 = vsel %vm571_vm1, 0.0, %v572_v6  ;;  %v7845_v44 = vsel %vm571_vm1, %v572_v6, %v573_v11  ;;  %v585_v6 = vrot.slane %v7662_v21, 7 }
  0x34   : > { %v6019_v50 = vpack.i.bf16 %v7848_v18, %v7845_v44 }
  0x35   : > { %5990 = vrot.lane.b32.xlu1 %v5989_v37, %s7552_s30  ;;  %v583_v37 = vrot.slane %v7640_v9, 7 }
  0x36   : > { %5985 = vrot.lane.b32.xlu0 %v5984_v46, %s7552_s30  ;;  %v6014_v46 = vpack.i.bf16 %v7838_v32, %v12532_v0 }
  0x37   : > { %v7861_v54 = vsel %vm571_vm1, %v581_v34, %v583_v37  ;;  %v7888_v33 = vsel %vm571_vm1, %v583_v37, %v585_v6  ;;  %v7891_v34 = vsel %vm571_vm1, %v585_v6, %v587_v39  ;;  %v603_v39 = vrot.slane %v7692_v42, 7 }
  0x38   : > { %v605_v6 = vrot.slane %v7699_v47, 7  ;;  %v615_v47 = vrot.slane %v7718_v56, 7 }
  0x39   : > { %6000 = vrot.lane.b32.xlu1 %v5999_v59, %s7552_s30  ;;  %v7866_v59 = vsel %vm571_vm1, %v575_v53, %v577_v38  ;;  %v595_v53 = vrot.slane %v7665_v22, 7  ;;  %v593_v38 = vrot.slane %v7677_v29, 7  ;;  %v601_v29 = vrot.slane %v7705_v49, 7 }
  0x3a   : > { %5995 = vrot.lane.b32.xlu0 %v5994_v10, %s7552_s30  ;;  %v6029_v10 = vpack.i.bf16 %v7861_v54, %v7858_v51  ;;  %v6024_v11 = vpack.i.bf16 %v7869_v60, %v7866_v59  ;;  %v633_v49 = vrot.slane %v7793_v5, 7 }
  0x3b   : > { %v7911_v0 = vsel %vm571_vm1, %v591_v61, %v593_v38 }
  0x3d   : > { %6010 = vrot.lane.b32.xlu1 %v6009_v17, %s7552_s30  ;;  %v7885_v17 = vsel %vm571_vm1, %v589_v58, %v591_v61  ;;  %v7901_v58 = vsel %vm571_vm1, %v595_v53, %v597_v16 }
  0x3e   : > { %6005 = vrot.lane.b32.xlu0 %v6004_v40, %s7552_s30  ;;  %v599_v40 = vrot.slane %v7674_v28, 7  ;;  %v7914_v28 = vsel %vm571_vm1, %v593_v38, %v595_v53  ;;  %v7927_v53 = vsel %vm571_vm1, %v603_v39, %v605_v6 }
  0x3f   : > { %v6044_v61 = vpack.i.bf16 %v7914_v28, %v7911_v0 }
  0x40   : > { %v7905_v37 = vsel %vm571_vm1, %v597_v16, %v599_v40 }
  0x41   : > { %6020 = vrot.lane.b32.xlu1 %v6019_v50, %s7553_s8  ;;  %v6039_v50 = vpack.i.bf16 %v7885_v17, %v7879_v12  ;;  %v6049_v16 = vpack.i.bf16 %v7905_v37, %v7901_v58 }
  0x42   : > { %6015 = vrot.lane.b32.xlu0 %v6014_v46, %s7553_s8  ;;  %v6034_v46 = vpack.i.bf16 %v7891_v34, %v7888_v33 }
  0x45   : > { %6030 = vrot.lane.b32.xlu1 %v6029_v10, %s7553_s8  ;;  %v607_v10 = vrot.slane %v7702_v48, 7  ;;  %v7933_v48 = vsel %vm571_vm1, %v599_v40, %v601_v29  ;;  %v621_v40 = vrot.slane %v7743_v24, 7  ;;  %v627_v24 = vrot.slane %v7757_v36, 7 }
  0x46   : > { %6025 = vrot.lane.b32.xlu0 %v6024_v11, %s7553_s8  ;;  %v613_v11 = vrot.slane %v7715_v55, 7  ;;  %v609_v55 = vrot.slane %v7721_v57, 7  ;;  %v617_v57 = vrot.slane %v7749_v26, 7 }
  0x47   : > { %v7930_v38 = vsel %vm571_vm1, %v605_v6, %v607_v10 }
  0x48   : > { %v7940_v56 = vsel %vm571_vm1, %v611_v19, %v613_v11  ;;  %v6059_v52 = vpack.i.bf16 %v7930_v38, %v7927_v53  ;;  %v7947_v6 = vsel %vm571_vm1, %v613_v11, %v615_v47  ;;  %v7978_v36 = vsel %vm571_vm1, %v615_v47, %v617_v57 }
  0x49   : > { %6040 = vrot.lane.b32.xlu1 %v6039_v50, %s7553_s8  ;;  %v7936_v50 = vsel %vm571_vm1, %v601_v29, %v603_v39  ;;  %v623_v29 = vrot.slane %v7746_v25, 7  ;;  %v6069_v11 = vpack.i.bf16 %v7947_v6, %v7940_v56  ;;  %v629_v25 = vrot.slane %v7765_v41, 7 }
  0x4a   : > { %6035 = vrot.lane.b32.xlu0 %v6034_v46, %s7553_s8  ;;  %v619_v46 = vrot.slane %v7739_v20, 7  ;;  %v6054_v39 = vpack.i.bf16 %v7936_v50, %v7933_v48  ;;  %v7956_v20 = vsel %vm571_vm1, %v607_v10, %v609_v55  ;;  %v631_v10 = vrot.slane %v7768_v43, 7 }
  0x4b   : > { %v7970_v26 = vsel %vm571_vm1, %v621_v40, %v623_v29  ;;  %v7989_v43 = vsel %vm571_vm1, %v627_v24, %v629_v25 }
  0x4c   : > { %v634_v5 = vsel %vm571_vm1, %v631_v10, %v633_v49 }
  0x4d   : > { %6050 = vrot.lane.b32.xlu1 %v6049_v16, %s7553_s8  ;;  %v7959_v16 = vsel %vm571_vm1, %v609_v55, %v611_v19  ;;  %v625_v19 = vrot.slane %v7771_v45, 7  ;;  %v639_v45 = vrot.slane %v7790_v4, 7  ;;  %v647_v4 = vrot.slane %v7809_v31, 7 }
  0x4e   : > { %6045 = vrot.lane.b32.xlu0 %v6044_v61, %s7553_s8  ;;  %v7967_v61 = vsel %vm571_vm1, %v619_v46, %v621_v40  ;;  %v6064_v55 = vpack.i.bf16 %v7959_v16, %v7956_v20 }
  0x4f   : > { %v6079_v41 = vpack.i.bf16 %v7970_v26, %v7967_v61  ;;  %v626_v47 = vsel %vm571_vm1, %v623_v29, %v625_v19 }
  0x51   : > { %6060 = vrot.lane.b32.xlu1 %v6059_v52, %s7553_s8  ;;  %v7981_v52 = vsel %vm571_vm1, %v617_v57, %v619_v46  ;;  %v7997_v57 = vsel %vm571_vm1, %v625_v19, %v627_v24  ;;  %v635_v46 = vrot.slane %v7784_v62, 7  ;;  %v641_v62 = vrot.slane %v7815_v35, 7 }
  0x52   : > { %6055 = vrot.lane.b32.xlu0 %v6054_v39, %s7553_s8  ;;  %v6074_v40 = vpack.i.bf16 %v7981_v52, %v7978_v36  ;;  %v7992_v39 = vsel %vm571_vm1, %v629_v25, %v631_v10  ;;  %v6084_v29 = vpack.i.bf16 %v7997_v57, %v626_v47 }
  0x53   : > { %v6089_v25 = vpack.i.bf16 %v7992_v39, %v7989_v43 }
  0x55   : > { %6070 = vrot.lane.b32.xlu1 %v6069_v11, %s7553_s8  ;;  %v637_v11 = vrot.slane %v7787_v63, 7  ;;  %v645_v63 = vrot.slane %v7806_v30, 7  ;;  %v642_v30 = vsel %vm571_vm1, %v639_v45, %v641_v62 }
  0x56   : > { %6065 = vrot.lane.b32.xlu0 %v6064_v55, %s7553_s8  ;;  %v643_v55 = vrot.slane %v7803_v23, 7 }
  0x57   : > { %v638_v24 = vsel %vm571_vm1, %v635_v46, %v637_v11  ;;  %v640_v19 = vsel %vm571_vm1, %v637_v11, %v639_v45  ;;  %v648_v11 = vsel %vm571_vm1, %v645_v63, %v647_v4  ;;  %v6124_v45 = vpack.i.bf16 %v7858_v51, %v7869_v60 }
  0x58   : > { %v6099_v42 = vpack.i.bf16 %v640_v19, %v638_v24  ;;  %v646_v23 = vsel %vm571_vm1, %v643_v55, %v645_v63  ;;  %v644_v31 = vsel %vm571_vm1, %v641_v62, %v643_v55  ;;  %v6114_v63 = vpack.i.bf16 %v7845_v44, %v7838_v32 }
  0x59   : > { %6080 = vrot.lane.b32.xlu1 %v6079_v41, %s7553_s8  ;;  %v636_v41 = vsel %vm571_vm1, %v633_v49, %v635_v46  ;;  %v6109_v10 = vpack.i.bf16 %v648_v11, %v646_v23  ;;  %v6104_v49 = vpack.i.bf16 %v644_v31, %v642_v30  ;;  %v6119_v46 = vpack.i.bf16 %v7866_v59, %v7848_v18  ;;  %v8066_v59 = vld [vmem:[%s7619_s29 + $0x138] sm:$0xff] }
  0x5a   : > { %6075 = vrot.lane.b32.xlu0 %v6074_v40, %s7553_s8  ;;  %v6094_v40 = vpack.i.bf16 %v636_v41, %v634_v5  ;;  %v6139_v62 = vpack.i.bf16 %v7911_v0, %v7885_v17  ;;  %v6134_v32 = vpack.i.bf16 %v7879_v12, %v7891_v34  ;;  %v6149_v44 = vpack.i.bf16 %v7933_v48, %v7905_v37 }
  0x5b   : > { %v6144_v18 = vpack.i.bf16 %v7901_v58, %v7914_v28  ;;  %v6159_v0 = vpack.i.bf16 %v7956_v20, %v7930_v38  ;;  %v6154_v51 = vpack.i.bf16 %v7927_v53, %v7936_v50  ;;  %v6169_v48 = vpack.i.bf16 %v7978_v36, %v7947_v6 }
  0x5c   : > { %v6164_v28 = vpack.i.bf16 %v7940_v56, %v7959_v16  ;;  %v6179_v20 = vpack.i.bf16 %v626_v47, %v7970_v26  ;;  %v6189_v36 = vpack.i.bf16 %v634_v5, %v7992_v39  ;;  %v6184_v56 = vpack.i.bf16 %v7989_v43, %v7997_v57  ;;  %v12903_v57 = vld [vmem:[#allocation2_spill] sm:$0xff] }
  0x5d   : > { %6090 = vrot.lane.b32.xlu1 %v6089_v25, %s7553_s8  ;;  %v653_v60 = vrot.slane %v8066_v59, 7  ;;  %v6199_v26 = vpack.i.bf16 %v642_v30, %v640_v19  ;;  %v6194_v12 = vpack.i.bf16 %v638_v24, %v636_v41  ;;  %v6204_v34 = vpack.i.bf16 %v646_v23, %v644_v31  ;;  %v12904_v25 = vld [vmem:[#allocation4_spill] sm:$0xff]  ;;  %v12907_v19 = vld [vmem:[#allocation5_spill] sm:$0xff]  ;;  %v12908_v41 = vld [vmem:[#allocation6_spill] sm:$0xff] }
  0x5e   : > { %6085 = vrot.lane.b32.xlu0 %v6084_v29, %s7553_s8  ;;  %v6214_v30 = vpack.i.bf16 %v7646_v13, %v7634_v7  ;;  %v6224_v23 = vpack.i.bf16 %v7637_v8, %v7628_v3  ;;  %v6219_v31 = vpack.i.bf16 %v7625_v2, %v7622_v1  ;;  %v6234_v16 = vpack.i.bf16 %v7652_v15, %v7649_v14 }
  0x5f   : > { %v654_v17 = vsel %vm571_vm1, %v647_v4, %v653_v60  ;;  %v6244_v47 = vpack.i.bf16 %v7671_v27, %v7665_v22  ;;  %v6239_v29 = vpack.i.bf16 %v12904_v25, %v12903_v57 }
  0x60   : > { %v6209_v5 = vpack.i.bf16 %v654_v17, %v648_v11  ;;  %v12909_v11 = vld [vmem:[#allocation3_spill] sm:$0xff]  ;;  %v12926_v17 = vld [vmem:[#allocation18_spill] sm:$0xff] }
  0x61   : > { %6100 = vrot.lane.b32.xlu1 %v6099_v42, %s7553_s8  ;;  %v6129_v42 = vpack.i.bf16 %v7888_v33, %v7861_v54  ;;  %v6174_v54 = vpack.i.bf16 %v7967_v61, %v7981_v52  ;;  %v8078_v33 = vld [vmem:[%s7619_s29 + $0x140] sm:$0xf]  ;;  %v6229_v61 = vpack.i.bf16 %v7662_v21, %v7640_v9 }
  0x62   : > { %6095 = vrot.lane.b32.xlu0 %v6094_v40, %s7553_s8  ;;  %v655_v43 = vrot.slane %v8078_v33, 7  ;;  %v6254_v40 = vpack.i.bf16 %v12908_v41, %v12907_v19 }
  0x64   : > { %v656_v53 = vsel %vm571_vm1, %v653_v60, %v655_v43  ;;  %v12928_v43 = vld [vmem:[#allocation20_spill] sm:$0xff] }
  0x65   : > { %6110 = vrot.lane.b32.xlu1 %v6109_v10, %s7553_s8  ;;  %v12910_v10 = vld [vmem:[#allocation8_spill] sm:$0xff] }
  0x66   : > { %6105 = vrot.lane.b32.xlu0 %v6104_v49, %s7553_s8  ;;  %v6249_v49 = vpack.i.bf16 %v12910_v10, %v12909_v11 }
  0x69   : > { %6120 = vrot.lane.b32.xlu1 %v6119_v46, %s7554_s9 }
  0x6a   : > { %6115 = vrot.lane.b32.xlu0 %v6114_v63, %s7554_s9 }
  0x6d   : > { %6130 = vrot.lane.b32.xlu1 %v6129_v42, %s7554_s9  ;;  %v12913_v42 = vld [vmem:[#allocation9_spill] sm:$0xff] }
  0x6e   : > { %6125 = vrot.lane.b32.xlu0 %v6124_v45, %s7554_s9  ;;  %v12914_v45 = vld [vmem:[#allocation10_spill] sm:$0xff] }
  0x71   : > { %6140 = vrot.lane.b32.xlu1 %v6139_v62, %s7554_s9  ;;  %v6264_v62 = vpack.i.bf16 %v12914_v45, %v12913_v42 }
  0x72   : > { %6135 = vrot.lane.b32.xlu0 %v6134_v32, %s7554_s9  ;;  %v12915_v32 = vld [vmem:[#allocation7_spill] sm:$0xff] }
  0x75   : > { %6150 = vrot.lane.b32.xlu1 %v6149_v44, %s7554_s9  ;;  %v12916_v44 = vld [vmem:[#allocation12_spill] sm:$0xff] }
  0x76   : > { %6145 = vrot.lane.b32.xlu0 %v6144_v18, %s7554_s9  ;;  %v6259_v18 = vpack.i.bf16 %v12916_v44, %v12915_v32 }
  0x79   : > { %6160 = vrot.lane.b32.xlu1 %v6159_v0, %s7554_s9 }
  0x7a   : > { %6155 = vrot.lane.b32.xlu0 %v6154_v51, %s7554_s9 }
  0x7d   : > { %6170 = vrot.lane.b32.xlu1 %v6169_v48, %s7554_s9  ;;  %v12919_v48 = vld [vmem:[#allocation13_spill] sm:$0xff] }
  0x7e   : > { %6165 = vrot.lane.b32.xlu0 %v6164_v28, %s7554_s9  ;;  %v12920_v28 = vld [vmem:[#allocation14_spill] sm:$0xff] }
  0x81   : > { %6180 = vrot.lane.b32.xlu1 %v6179_v20, %s7554_s9  ;;  %v6274_v20 = vpack.i.bf16 %v12920_v28, %v12919_v48 }
  0x82   : > { %6175 = vrot.lane.b32.xlu0 %v6174_v54, %s7554_s9  ;;  %v12921_v54 = vld [vmem:[#allocation11_spill] sm:$0xff] }
  0x85   : > { %6190 = vrot.lane.b32.xlu1 %v6189_v36, %s7554_s9  ;;  %v12922_v36 = vld [vmem:[#allocation16_spill] sm:$0xff] }
  0x86   : > { %6185 = vrot.lane.b32.xlu0 %v6184_v56, %s7554_s9  ;;  %v6269_v56 = vpack.i.bf16 %v12922_v36, %v12921_v54 }
  0x89   : > { %6200 = vrot.lane.b32.xlu1 %v6199_v26, %s7554_s9 }
  0x8a   : > { %6195 = vrot.lane.b32.xlu0 %v6194_v12, %s7554_s9  ;;  %v12925_v12 = vld [vmem:[#allocation17_spill] sm:$0xff] }
  0x8b   : > { %v8082_v58 = vpop.permute.xlu1 %5925 }
  0x8c   : > { %v8085_v37 = vpop.permute.xlu0 %5915 }
  0x8d   : > { %6210 = vrot.lane.b32.xlu1 %v6209_v5, %s7554_s9  ;;  %v6284_v5 = vpack.i.bf16 %v12926_v17, %v12925_v12 }
  0x8e   : > { %6205 = vrot.lane.b32.xlu0 %v6204_v34, %s7554_s9  ;;  %v12927_v34 = vld [vmem:[#allocation15_spill] sm:$0xff] }
  0x8f   : > { %v8091_v4 = vpop.permute.xlu1 %5930 }
  0x90   : > { %12897 = vst [vmem:[#allocation28_spill] sm:$0xff] %v8091_v4  ;;  %v8094_v38 = vpop.permute.xlu0 %5920  ;;  %v8696_v4 = vld [vmem:[%s7619_s29 + $0x130] sm:$0xff] }
  0x91   : > { %12898 = vst [vmem:[#allocation29_spill] sm:$0xff] %v8094_v38  ;;  %6215 = vrot.lane.b32.xlu1 %v6214_v30, %s7555_s10  ;;  %v6279_v30 = vpack.i.bf16 %v12928_v43, %v12927_v34  ;;  %13000 = vst [vmem:[#allocation78_spill] sm:$0xff] %v8696_v4 }
  0x92   : > { %1224 = vrot.lane.b32.xlu0 %v656_v53, %s7554_s9 }
  0x93   : > { %v8102_v50 = vpop.permute.xlu1 %5940 }
  0x94   : > { %12899 = vst [vmem:[#allocation30_spill] sm:$0xff] %v8102_v50  ;;  %v8104_v6 = vpop.permute.xlu0 %5935 }
  0x95   : > { %12900 = vst [vmem:[#allocation31_spill] sm:$0xff] %v8104_v6  ;;  %6225 = vrot.lane.b32.xlu1 %v6224_v23, %s7555_s10 }
  0x96   : > { %6220 = vrot.lane.b32.xlu0 %v6219_v31, %s7555_s10  ;;  %v12931_v31 = vld [vmem:[#allocation21_spill] sm:$0xff] }
  0x97   : > { %v8112_v52 = vpop.permute.xlu1 %5950 }
  0x98   : > { %12901 = vst [vmem:[#allocation32_spill] sm:$0xff] %v8112_v52  ;;  %v8114_v39 = vpop.permute.xlu0 %5945 }
  0x99   : > { %12902 = vst [vmem:[#allocation33_spill] sm:$0xff] %v8114_v39  ;;  %6235 = vrot.lane.b32.xlu1 %v6234_v16, %s7555_s10  ;;  %v12932_v16 = vld [vmem:[#allocation22_spill] sm:$0xff]  ;;  %v8636_v39 = vld [vmem:[%s7619_s29 + $0xf8] sm:$0xff] }
  0x9a   : > { %6230 = vrot.lane.b32.xlu0 %v6229_v61, %s7555_s10  ;;  %v6294_v61 = vpack.i.bf16 %v12932_v16, %v12931_v31 }
  0x9b   : > { %v8122_v55 = vpop.permute.xlu1 %5960 }
  0x9c   : > { %12905 = vst [vmem:[#allocation2_spill] sm:$0xff] %v8122_v55  ;;  %v8124_v24 = vpop.permute.xlu0 %5955  ;;  %v8555_v55 = vld [vmem:[%s7619_s29 + $0x90] sm:$0xff] }
  0x9d   : > { %12906 = vst [vmem:[#allocation4_spill] sm:$0xff] %v8124_v24  ;;  %6245 = vrot.lane.b32.xlu1 %v6244_v47, %s7555_s10  ;;  %v12933_v47 = vld [vmem:[#allocation19_spill] sm:$0xff] }
  0x9e   : > { %6240 = vrot.lane.b32.xlu0 %v6239_v29, %s7555_s10  ;;  %v12934_v29 = vld [vmem:[#allocation24_spill] sm:$0xff] }
  0x9f   : > { %v8132_v46 = vpop.permute.xlu1 %5970 }
  0xa0   : > { %12911 = vst [vmem:[#allocation5_spill] sm:$0xff] %v8132_v46  ;;  %v8134_v63 = vpop.permute.xlu0 %5965  ;;  %v667_v46 = vrot.slane %v7637_v8, 1  ;;  %v681_v8 = vrot.slane %v7665_v22, 1  ;;  %v687_v22 = vrot.slane %v12910_v10, 1  ;;  %v695_v10 = vrot.slane %v12916_v44, 1 }
  0xa1   : > { %12912 = vst [vmem:[#allocation6_spill] sm:$0xff] %v8134_v63  ;;  %6255 = vrot.lane.b32.xlu1 %v6254_v40, %s7555_s10  ;;  %v6289_v40 = vpack.i.bf16 %v12934_v29, %v12933_v47  ;;  %v673_v63 = vrot.slane %v7649_v14, 1 }
  0xa2   : > { %6250 = vrot.lane.b32.xlu0 %v6249_v49, %s7555_s10 }
  0xa3   : > { %v8142_v0 = vpop.permute.xlu1 %5980 }
  0xa4   : > { %12917 = vst [vmem:[#allocation3_spill] sm:$0xff] %v8142_v0  ;;  %v8144_v51 = vpop.permute.xlu0 %5975  ;;  %v671_v0 = vrot.slane %v7662_v21, 1 }
  0xa5   : > { %12918 = vst [vmem:[#allocation8_spill] sm:$0xff] %v8144_v51  ;;  %6265 = vrot.lane.b32.xlu1 %v6264_v62, %s7555_s10  ;;  %v12942_v51 = vld [vmem:[#allocation27_spill] sm:$0xff] }
  0xa6   : > { %6260 = vrot.lane.b32.xlu0 %v6259_v18, %s7555_s10  ;;  %v12937_v18 = vld [vmem:[#allocation25_spill] sm:$0xff]  ;;  %v674_v14 = vsel %vm657_vm2, %v671_v0, %v673_v63 }
  0xa7   : > { %v8152_v60 = vpop.permute.xlu1 %5990 }
  0xa8   : > { %12923 = vst [vmem:[#allocation9_spill] sm:$0xff] %v8152_v60  ;;  %v8154_v26 = vpop.permute.xlu0 %5985 }
  0xa9   : > { %12924 = vst [vmem:[#allocation10_spill] sm:$0xff] %v8154_v26  ;;  %6275 = vrot.lane.b32.xlu1 %v6274_v20, %s7555_s10  ;;  %v12938_v20 = vld [vmem:[#allocation26_spill] sm:$0xff]  ;;  %v663_v26 = vrot.slane %v7625_v2, 1 }
  0xaa   : > { %6270 = vrot.lane.b32.xlu0 %v6269_v56, %s7555_s10  ;;  %v6304_v56 = vpack.i.bf16 %v12938_v20, %v12937_v18 }
  0xab   : > { %v8162_v53 = vpop.permute.xlu1 %6000 }
  0xac   : > { %12929 = vst [vmem:[#allocation7_spill] sm:$0xff] %v8162_v53  ;;  %v8164_v23 = vpop.permute.xlu0 %5995  ;;  %v661_v53 = vrot.slane %v7622_v1, 1  ;;  %v6309_v1 = vpack.i.bf16 %v8066_v59, %v12942_v51 }
  0xad   : > { %12930 = vst [vmem:[#allocation12_spill] sm:$0xff] %v8164_v23  ;;  %6285 = vrot.lane.b32.xlu1 %v6284_v5, %s7555_s10  ;;  %v12939_v23 = vld [vmem:[#allocation23_spill] sm:$0xff] }
  0xae   : > { %6280 = vrot.lane.b32.xlu0 %v6279_v30, %s7555_s10  ;;  %v6299_v5 = vpack.i.bf16 %v7815_v35, %v12939_v23  ;;  %v665_v30 = vrot.slane %v7628_v3, 1  ;;  %v664_v2 = vsel %vm657_vm2, %v661_v53, %v663_v26 }
  0xaf   : > { %v8172_v49 = vpop.permute.xlu1 %6010 }
  0xb0   : > { %12935 = vst [vmem:[#allocation13_spill] sm:$0xff] %v8172_v49  ;;  %v8174_v62 = vpop.permute.xlu0 %6005  ;;  %v658_v49 = vrot.slane %v7634_v7, 1  ;;  %v666_v3 = vsel %vm657_vm2, %v663_v26, %v665_v30  ;;  %v677_v26 = vrot.slane %v12903_v57, 1 }
  0xb1   : > { %12936 = vst [vmem:[#allocation14_spill] sm:$0xff] %v8174_v62  ;;  %6295 = vrot.lane.b32.xlu1 %v6294_v61, %s7555_s10  ;;  %v659_v62 = vrot.slane %v7646_v13, 1 }
  0xb2   : > { %6290 = vrot.lane.b32.xlu0 %v6289_v40, %s7555_s10  ;;  %v669_v40 = vrot.slane %v7640_v9, 1  ;;  %v8209_v9 = vpack.i.bf16 %v666_v3, %v664_v2  ;;  %v675_v3 = vrot.slane %v7652_v15, 1 }
  0xb3   : > { %v8187_v61 = vpop.permute.xlu1 %6020  ;;  %v660_v7 = vsel %vm657_vm2, %v658_v49, %v659_v62  ;;  %v662_v13 = vsel %vm657_vm2, %v659_v62, %v661_v53  ;;  %v679_v49 = vrot.slane %v12904_v25, 1  ;;  %v685_v25 = vrot.slane %v12909_v11, 1 }
  0xb4   : > { %12940 = vst [vmem:[#allocation11_spill] sm:$0xff] %v8187_v61  ;;  %v8189_v60 = vpop.permute.xlu0 %6015  ;;  %v6314_v21 = vpack.i.bf16 %v662_v13, %v660_v7  ;;  %v672_v53 = vsel %vm657_vm2, %v669_v40, %v671_v0  ;;  %v670_v2 = vsel %vm657_vm2, %v667_v46, %v669_v40  ;;  %v689_v0 = vrot.slane %v12907_v19, 1 }
  0xb5   : > { %12941 = vst [vmem:[#allocation16_spill] sm:$0xff] %v8189_v60  ;;  %6305 = vrot.lane.b32.xlu1 %v6304_v56, %s7555_s10  ;;  %v8226_v57 = vpack.i.bf16 %v674_v14, %v672_v53  ;;  %v680_v15 = vsel %vm657_vm2, %v677_v26, %v679_v49  ;;  %v676_v40 = vsel %vm657_vm2, %v673_v63, %v675_v3  ;;  %v683_v11 = vrot.slane %v7671_v27, 1 }
  0xb6   : > { %6300 = vrot.lane.b32.xlu0 %v6299_v5, %s7555_s10  ;;  %v668_v5 = vsel %vm657_vm2, %v665_v30, %v667_v46  ;;  %v682_v46 = vsel %vm657_vm2, %v679_v49, %v681_v8  ;;  %v678_v13 = vsel %vm657_vm2, %v675_v3, %v677_v26  ;;  %v693_v19 = vrot.slane %v12915_v32, 1 }
  0xb7   : > { %v8202_v56 = vpop.permute.xlu1 %6030  ;;  %v8232_v30 = vpack.i.bf16 %v670_v2, %v668_v5  ;;  %v688_v14 = vsel %vm657_vm2, %v685_v25, %v687_v22  ;;  %v690_v49 = vsel %vm657_vm2, %v687_v22, %v689_v0  ;;  %v697_v63 = vrot.slane %v12913_v42, 1 }
  0xb8   : > { %12943 = vst [vmem:[#allocation17_spill] sm:$0xff] %v8202_v56  ;;  %v8205_v24 = vpop.permute.xlu0 %6025  ;;  %v8254_v27 = vpack.i.bf16 %v678_v13, %v676_v40  ;;  %v684_v32 = vsel %vm657_vm2, %v681_v8, %v683_v11  ;;  %v686_v44 = vsel %vm657_vm2, %v683_v11, %v685_v25  ;;  %v691_v5 = vrot.slane %v12908_v41, 1  ;;  %v8628_v56 = vld [vmem:[%s7619_s29 + $0xc8] sm:$0xff] }
  0xb9   : > { %12944 = vst [vmem:[#allocation18_spill] sm:$0xff] %v8205_v24  ;;  %1347 = vrot.lane.b32.xlu1 %v8078_v33, %s7555_s10  ;;  %v8263_v3 = vpack.i.bf16 %v690_v49, %v688_v14  ;;  %v696_v22 = vsel %vm657_vm2, %v693_v19, %v695_v10  ;;  %v701_v42 = vrot.slane %v12921_v54, 1  ;;  %v705_v8 = vrot.slane %v12919_v48, 1  ;;  %v8642_v24 = vld [vmem:[%s7619_s29 + $0x100] sm:$0xff] }
  0xba   : > { %6310 = vrot.lane.b32.xlu0 %v6309_v1, %s7555_s10  ;;  %v699_v25 = vrot.slane %v12914_v45, 1  ;;  %v8275_v41 = vpack.i.bf16 %v686_v44, %v684_v32  ;;  %v692_v54 = vsel %vm657_vm2, %v689_v0, %v691_v5  ;;  %v694_v13 = vsel %vm657_vm2, %v691_v5, %v693_v19 }
  0xbb   : > { %v8217_v62 = vpop.permute.xlu1 %6040  ;;  %v711_v48 = vrot.slane %v12928_v43, 1  ;;  %v8295_v19 = vpack.i.bf16 %v694_v13, %v692_v54  ;;  %v707_v43 = vrot.slane %v12920_v28, 1  ;;  %v715_v54 = vrot.slane %v12926_v17, 1 }
  0xbc   : > { %12945 = vst [vmem:[#allocation15_spill] sm:$0xff] %v8217_v62  ;;  %v8222_v7 = vpop.permute.xlu0 %6035  ;;  %v700_v49 = vsel %vm657_vm2, %v697_v63, %v699_v25  ;;  %v702_v0 = vsel %vm657_vm2, %v699_v25, %v701_v42 }
  0xbd   : > { %12946 = vst [vmem:[#allocation20_spill] sm:$0xff] %v8222_v7  ;;  %6320 = vrot.lane.b32.xlu1 %v8209_v9, %s7556_s11 }
  0xbe   : > { %6315 = vrot.lane.b32.xlu0 %v6314_v21, %s7556_s11  ;;  %v8247_v21 = vpack.i.bf16 %v682_v46, %v680_v15  ;;  %v698_v15 = vsel %vm657_vm2, %v695_v10, %v697_v63  ;;  %v703_v46 = vrot.slane %v12922_v36, 1  ;;  %v709_v36 = vrot.slane %v12927_v34, 1 }
  0xbf   : > { %v8236_v1 = vpop.permute.xlu1 %6050  ;;  %v8283_v10 = vpack.i.bf16 %v698_v15, %v696_v22  ;;  %v713_v34 = vrot.slane %v12925_v12, 1  ;;  %v8305_v22 = vpack.i.bf16 %v702_v0, %v700_v49  ;;  %v719_v15 = vrot.slane %v12934_v29, 1 }
  0xc0   : > { %12947 = vst [vmem:[#allocation21_spill] sm:$0xff] %v8236_v1  ;;  %v8241_v53 = vpop.permute.xlu0 %6045  ;;  %v704_v45 = vsel %vm657_vm2, %v701_v42, %v703_v46  ;;  %v706_v14 = vsel %vm657_vm2, %v703_v46, %v705_v8  ;;  %v712_v63 = vsel %vm657_vm2, %v709_v36, %v711_v48  ;;  %v717_v42 = vrot.slane %v12933_v47, 1 }
  0xc1   : > { %12948 = vst [vmem:[#allocation22_spill] sm:$0xff] %v8241_v53  ;;  %6330 = vrot.lane.b32.xlu1 %v8226_v57, %s7556_s11  ;;  %v8303_v5 = vpack.i.bf16 %v706_v14, %v704_v45  ;;  %v721_v12 = vrot.slane %v12931_v31, 1  ;;  %v714_v28 = vsel %vm657_vm2, %v711_v48, %v713_v34  ;;  %v708_v46 = vsel %vm657_vm2, %v705_v8, %v707_v43 }
  0xc2   : > { %6325 = vrot.lane.b32.xlu0 %v8232_v30, %s7556_s11  ;;  %v710_v25 = vsel %vm657_vm2, %v707_v43, %v709_v36  ;;  %v725_v47 = vrot.slane %v12939_v23, 1  ;;  %v8326_v31 = vpack.i.bf16 %v714_v28, %v712_v63  ;;  %v720_v48 = vsel %vm657_vm2, %v717_v42, %v719_v15 }
  0xc3   : > { %v8256_v26 = vpop.permute.xlu1 %6060  ;;  %v8328_v29 = vpack.i.bf16 %v710_v25, %v708_v46  ;;  %v722_v8 = vsel %vm657_vm2, %v719_v15, %v721_v12  ;;  %v716_v17 = vsel %vm657_vm2, %v713_v34, %v715_v54  ;;  %v718_v36 = vsel %vm657_vm2, %v715_v54, %v717_v42 }
  0xc4   : > { %12949 = vst [vmem:[#allocation19_spill] sm:$0xff] %v8256_v26  ;;  %v8261_v2 = vpop.permute.xlu0 %6055  ;;  %v727_v23 = vrot.slane %v7815_v35, 1  ;;  %v729_v14 = vrot.slane %v12937_v18, 1  ;;  %v723_v0 = vrot.slane %v12932_v16, 1  ;;  %v8345_v63 = vpack.i.bf16 %v722_v8, %v720_v48  ;;  %v8531_v26 = vld [vmem:[%s7619_s29 + $0x78] sm:$0xff] }
  0xc5   : > { %12950 = vst [vmem:[#allocation24_spill] sm:$0xff] %v8261_v2  ;;  %6340 = vrot.lane.b32.xlu1 %v8247_v21, %s7556_s11  ;;  %v8347_v15 = vpack.i.bf16 %v718_v36, %v716_v17  ;;  %v733_v34 = vrot.slane %v12942_v51, 1  ;;  %v735_v16 = vrot.slane %v8066_v59, 1  ;;  %v737_v42 = vrot.slane %v8078_v33, 1 }
  0xc6   : > { %6335 = vrot.lane.b32.xlu0 %v8254_v27, %s7556_s11  ;;  %v728_v35 = vsel %vm657_vm2, %v725_v47, %v727_v23  ;;  %v730_v18 = vsel %vm657_vm2, %v727_v23, %v729_v14  ;;  %v724_v46 = vsel %vm657_vm2, %v721_v12, %v723_v0  ;;  %v726_v25 = vsel %vm657_vm2, %v723_v0, %v725_v47 }
  0xc7   : > { %v8277_v40 = vpop.permute.xlu1 %6070  ;;  %v731_v54 = vrot.slane %v12938_v20, 1  ;;  %v6399_v48 = vpack.i.bf16 %v730_v18, %v728_v35  ;;  %v6394_v8 = vpack.i.bf16 %v726_v25, %v724_v46  ;;  %v736_v17 = vsel %vm657_vm2, %v733_v34, %v735_v16 }
  0xc8   : > { %12951 = vst [vmem:[#allocation25_spill] sm:$0xff] %v8277_v40  ;;  %v8281_v11 = vpop.permute.xlu0 %6065  ;;  %v738_v36 = vsel %vm657_vm2, %v735_v16, %v737_v42 }
  0xc9   : > { %12952 = vst [vmem:[#allocation26_spill] sm:$0xff] %v8281_v11  ;;  %6350 = vrot.lane.b32.xlu1 %v8263_v3, %s7556_s11  ;;  %v732_v12 = vsel %vm657_vm2, %v729_v14, %v731_v54  ;;  %v734_v20 = vsel %vm657_vm2, %v731_v54, %v733_v34  ;;  %v8376_v0 = vpack.i.bf16 %v738_v36, %v736_v17  ;;  %v8392_v34 = vsel %vm373_vm3, %v737_v42, 0.0 }
  0xca   : > { %6345 = vrot.lane.b32.xlu0 %v8275_v41, %s7556_s11  ;;  %v8379_v35 = vpack.i.bf16 %v734_v20, %v732_v12  ;;  %v8459_v12 = vld [vmem:[%s7619_s29 + $0x18] sm:$0xff] }
  0xcb   : > { %v8299_v32 = vpop.permute.xlu1 %6080 }
  0xcc   : > { %12953 = vst [vmem:[#allocation23_spill] sm:$0xff] %v8299_v32  ;;  %v8301_v44 = vpop.permute.xlu0 %6075 }
  0xcd   : > { %12954 = vst [vmem:[#allocation27_spill] sm:$0xff] %v8301_v44  ;;  %6360 = vrot.lane.b32.xlu1 %v8283_v10, %s7556_s11 }
  0xce   : > { %6355 = vrot.lane.b32.xlu0 %v8295_v19, %s7556_s11 }
  0xcf   : > { %v8319_v13 = vpop.permute.xlu1 %6090 }
  0xd0   : > { %12955 = vst [vmem:[#allocation34_spill] sm:$0xff] %v8319_v13  ;;  %v8321_v45 = vpop.permute.xlu0 %6085 }
  0xd1   : > { %12956 = vst [vmem:[#allocation35_spill] sm:$0xff] %v8321_v45  ;;  %6370 = vrot.lane.b32.xlu1 %v8303_v5, %s7556_s11 }
  0xd2   : > { %6365 = vrot.lane.b32.xlu0 %v8305_v22, %s7556_s11 }
  0xd3   : > { %v8338_v49 = vpop.permute.xlu1 %6100 }
  0xd4   : > { %12957 = vst [vmem:[#allocation36_spill] sm:$0xff] %v8338_v49  ;;  %v8341_v43 = vpop.permute.xlu0 %6095 }
  0xd5   : > { %12958 = vst [vmem:[#allocation37_spill] sm:$0xff] %v8341_v43  ;;  %6380 = vrot.lane.b32.xlu1 %v8326_v31, %s7556_s11 }
  0xd6   : > { %6375 = vrot.lane.b32.xlu0 %v8328_v29, %s7556_s11 }
  0xd7   : > { %v8356_v28 = vpop.permute.xlu1 %6110 }
  0xd8   : > { %12959 = vst [vmem:[#allocation38_spill] sm:$0xff] %v8356_v28  ;;  %v8361_v51 = vpop.permute.xlu0 %6105 }
  0xd9   : > { %12960 = vst [vmem:[#allocation39_spill] sm:$0xff] %v8361_v51  ;;  %6390 = vrot.lane.b32.xlu1 %v8345_v63, %s7556_s11 }
  0xda   : > { %6385 = vrot.lane.b32.xlu0 %v8347_v15, %s7556_s11 }
  0xdb   : > { %v8369_v23 = vpop.permute.xlu1 %6120 }
  0xdc   : > { %12961 = vst [vmem:[#allocation40_spill] sm:$0xff] %v8369_v23  ;;  %v8373_v47 = vpop.permute.xlu0 %6115  ;;  %v7493_v23 = vld [vmem:[%s12526_s2 + $0x10] sm:$0xff]  }
  0xdd   : > { %12962 = vst [vmem:[#allocation41_spill] sm:$0xff] %v8373_v47  ;;  %6400 = vrot.lane.b32.xlu1 %v6399_v48, %s7556_s11 }
  0xde   : > { %6395 = vrot.lane.b32.xlu0 %v6394_v8, %s7556_s11 }
  0xdf   : > { %v8381_v18 = vpop.permute.xlu1 %6130 }
  0xe0   : > { %12963 = vst [vmem:[#allocation42_spill] sm:$0xff] %v8381_v18  ;;  %v8383_v46 = vpop.permute.xlu0 %6125 }
  0xe1   : > { %12964 = vst [vmem:[#allocation43_spill] sm:$0xff] %v8383_v46  ;;  %6410 = vrot.lane.b32.xlu1 %v8376_v0, %s7556_s11 }
  0xe2   : > { %6405 = vrot.lane.b32.xlu0 %v8379_v35, %s7556_s11 }
  0xe3   : > { %v8389_v14 = vpop.permute.xlu1 %6140 }
  0xe4   : > { %12965 = vst [vmem:[#allocation44_spill] sm:$0xff] %v8389_v14  ;;  %v8394_v16 = vpop.permute.xlu0 %6135 }
  0xe5   : > { %12966 = vst [vmem:[#allocation45_spill] sm:$0xff] %v8394_v16  ;;  %6415 = vrot.lane.b32.xlu1 %v8209_v9, %s7557_s12 }
  0xe6   : > { %1471 = vrot.lane.b32.xlu0 %v8392_v34, %s7556_s11 }
  0xe7   : > { %v8400_v25 = vpop.permute.xlu1 %6150 }
  0xe8   : > { %12967 = vst [vmem:[#allocation46_spill] sm:$0xff] %v8400_v25  ;;  %v8402_v54 = vpop.permute.xlu0 %6145  ;;  %v8542_v25 = vld [vmem:[%s7619_s29 + $0x68] sm:$0xff] }
  0xe9   : > { %12968 = vst [vmem:[#allocation47_spill] sm:$0xff] %v8402_v54  ;;  %6425 = vrot.lane.b32.xlu1 %v8226_v57, %s7557_s12  ;;  %v763_v1 = vrot.slane %v8542_v25, 2 }
  0xea   : > { %6420 = vrot.lane.b32.xlu0 %v8232_v30, %s7557_s12 }
  0xeb   : > { %v8408_v42 = vpop.permute.xlu1 %6160 }
  0xec   : > { %12969 = vst [vmem:[#allocation48_spill] sm:$0xff] %v8408_v42  ;;  %v8410_v17 = vpop.permute.xlu0 %6155 }
  0xed   : > { %12970 = vst [vmem:[#allocation49_spill] sm:$0xff] %v8410_v17  ;;  %6435 = vrot.lane.b32.xlu1 %v8247_v21, %s7557_s12  ;;  %v8535_v17 = vld [vmem:[%s7619_s29 + $0x80] sm:$0xff] }
  0xee   : > { %6430 = vrot.lane.b32.xlu0 %v8254_v27, %s7557_s12 }
  0xef   : > { %v8416_v9 = vpop.permute.xlu1 %6170 }
  0xf0   : > { %12971 = vst [vmem:[#allocation50_spill] sm:$0xff] %v8416_v9  ;;  %v8418_v36 = vpop.permute.xlu0 %6165 }
  0xf1   : > { %12972 = vst [vmem:[#allocation51_spill] sm:$0xff] %v8418_v36  ;;  %6445 = vrot.lane.b32.xlu1 %v8263_v3, %s7557_s12  ;;  %v8521_v36 = vld [vmem:[%s7619_s29 + $0x48] sm:$0xff] }
  0xf2   : > { %6440 = vrot.lane.b32.xlu0 %v8275_v41, %s7557_s12  ;;  %v755_v11 = vrot.slane %v8521_v36, 2 }
  0xf3   : > { %v8424_v57 = vpop.permute.xlu1 %6180 }
  0xf4   : > { %12973 = vst [vmem:[#allocation52_spill] sm:$0xff] %v8424_v57  ;;  %v8426_v30 = vpop.permute.xlu0 %6175  ;;  %v8507_v57 = vld [vmem:[%s7619_s29 + $0x60] sm:$0xff] }
  0xf5   : > { %12974 = vst [vmem:[#allocation53_spill] sm:$0xff] %v8426_v30  ;;  %6455 = vrot.lane.b32.xlu1 %v8283_v10, %s7557_s12  ;;  %v761_v32 = vrot.slane %v8507_v57, 2  ;;  %v12985_v30 = vmov 0.0  }
  0xf6   : > { %6450 = vrot.lane.b32.xlu0 %v8295_v19, %s7557_s12  ;;  %v6509_v44 = vpack.i.bf16 %v12985_v30, %v8392_v34  ;;  %v8527_v34 = vld [vmem:[%s7619_s29 + $0x70] sm:$0xff]  ;;  %5714 = vmatprep.mubr.msk.bf16.mxu0 %vm7559_vm7, %v12985_v30 }
  0xf7   : > { %v8432_v21 = vpop.permute.xlu1 %6190  ;;  %5808 = vmatprep.mubr.msk.bf16.mxu1 %vm7559_vm7, %v12985_v30 }
  0xf8   : > { %12975 = vst [vmem:[#allocation54_spill] sm:$0xff] %v8432_v21  ;;  %v8434_v27 = vpop.permute.xlu0 %6185  ;;  %v8499_v21 = vld [vmem:[%s7619_s29 + $0x50] sm:$0xff] }
  0xf9   : > { %12976 = vst [vmem:[#allocation55_spill] sm:$0xff] %v8434_v27  ;;  %6465 = vrot.lane.b32.xlu1 %v8303_v5, %s7557_s12  ;;  %v8455_v5 = vld [vmem:[%s7619_s29 + $0x10] sm:$0xff]  ;;  %v757_v13 = vrot.slane %v8499_v21, 2  ;;  %v8503_v27 = vld [vmem:[%s7619_s29 + $0x58] sm:$0xff] }
  0xfa   : > { %6460 = vrot.lane.b32.xlu0 %v8305_v22, %s7557_s12  ;;  %v742_v22 = vrot.slane %v8455_v5, 2  ;;  %v759_v45 = vrot.slane %v8503_v27, 2 }
  0xfb   : > { %v8440_v3 = vpop.permute.xlu1 %6200 }
  0xfc   : > { %12977 = vst [vmem:[#allocation56_spill] sm:$0xff] %v8440_v3  ;;  %v8442_v41 = vpop.permute.xlu0 %6195  ;;  %v8481_v3 = vld [vmem:[%s7619_s29 + $0x38] sm:$0xff]  ;;  %v762_v2 = vsel %vm741_vm4, %v759_v45, %v761_v32 }
  0xfd   : > { %12978 = vst [vmem:[#allocation57_spill] sm:$0xff] %v8442_v41  ;;  %6475 = vrot.lane.b32.xlu1 %v8326_v31, %s7557_s12  ;;  %v743_v31 = vrot.slane %v8459_v12, 2  ;;  %v751_v49 = vrot.slane %v8481_v3, 2 }
  0xfe   : > { %6470 = vrot.lane.b32.xlu0 %v8328_v29, %s7557_s12  ;;  %v8465_v29 = vld [vmem:[%s7619_s29 + $0x20] sm:$0xff] }
  0xff   : > { %v8448_v10 = vpop.permute.xlu1 %6210  ;;  %v745_v20 = vrot.slane %v8465_v29, 2  ;;  %v744_v28 = vsel %vm741_vm4, %v742_v22, %v743_v31  ;;  %v8491_v22 = vld [vmem:[%s7619_s29 + $0x28] sm:$0xff] }
 0x100   : > { %12979 = vst [vmem:[#allocation58_spill] sm:$0xff] %v8448_v10  ;;  %v8450_v19 = vpop.permute.xlu0 %6205 }
 0x101   : > { %12980 = vst [vmem:[#allocation59_spill] sm:$0xff] %v8450_v19  ;;  %6485 = vrot.lane.b32.xlu1 %v8345_v63, %s7557_s12  ;;  %v8477_v19 = vld [vmem:[%s7619_s29 + $0x30] sm:$0xff] }
 0x102   : > { %6480 = vrot.lane.b32.xlu0 %v8347_v15, %s7557_s12  ;;  %v746_v15 = vsel %vm741_vm4, %v743_v31, %v745_v20  ;;  %v749_v51 = vrot.slane %v8477_v19, 2 }
 0x103   : > { %v8468_v63 = vpop.permute.xlu1 %6215  ;;  %v6514_v43 = vpack.i.bf16 %v746_v15, %v744_v28 }
 0x104   : > { %12981 = vst [vmem:[#allocation60_spill] sm:$0xff] %v8468_v63  ;;  %v8470_v10 = vpop.permute.xlu0 %1224  ;;  %v752_v28 = vsel %vm741_vm4, %v749_v51, %v751_v49 }
 0x105   : > { %12982 = vst [vmem:[#allocation61_spill] sm:$0xff] %v8470_v10  ;;  %6495 = vrot.lane.b32.xlu1 %v6399_v48, %s7557_s12  ;;  %v8485_v10 = vld [vmem:[%s7619_s29 + $0x40] sm:$0xff] }
 0x106   : > { %6490 = vrot.lane.b32.xlu0 %v6394_v8, %s7557_s12  ;;  %v753_v48 = vrot.slane %v8485_v10, 2  ;;  %v747_v8 = vrot.slane %v8491_v22, 2 }
 0x107   : > { %v8488_v41 = vpop.permute.xlu1 %6225 }
 0x108   : > { %12983 = vst [vmem:[#allocation62_spill] sm:$0xff] %v8488_v41  ;;  %v8494_v31 = vpop.permute.xlu0 %6220  ;;  %v748_v9 = vsel %vm741_vm4, %v745_v20, %v747_v8  ;;  %v750_v40 = vsel %vm741_vm4, %v747_v8, %v749_v51  ;;  %v769_v20 = vrot.slane %v8535_v17, 2  ;;  %v760_v8 = vsel %vm741_vm4, %v757_v13, %v759_v45 }
 0x109   : > { %12984 = vst [vmem:[#allocation63_spill] sm:$0xff] %v8494_v31  ;;  %6505 = vrot.lane.b32.xlu1 %v8376_v0, %s7557_s12  ;;  %v754_v0 = vsel %vm741_vm4, %v751_v49, %v753_v48  ;;  %v767_v49 = vrot.slane %v8531_v26, 2  ;;  %v6519_v54 = vpack.i.bf16 %v750_v40, %v748_v9  ;;  %v756_v14 = vsel %vm741_vm4, %v753_v48, %v755_v11 }
 0x10a   : > { %6500 = vrot.lane.b32.xlu0 %v8379_v35, %s7557_s12  ;;  %v765_v35 = vrot.slane %v8527_v34, 2  ;;  %v6524_v51 = vpack.i.bf16 %v754_v0, %v752_v28  ;;  %v6534_v0 = vpack.i.bf16 %v762_v2, %v760_v8  ;;  %v764_v40 = vsel %vm741_vm4, %v761_v32, %v763_v1  ;;  %v8566_v2 = vld [vmem:[%s7619_s29 + $0xa0] sm:$0xff]  ;;  %v8571_v8 = vld [vmem:[%s7619_s29 + $0x88] sm:$0xff] }
 0x10b   : > { %v8516_v15 = vpop.permute.xlu1 %6235  ;;  %v770_v62 = vsel %vm741_vm4, %v767_v49, %v769_v20  ;;  %v777_v48 = vrot.slane %v8566_v2, 2  ;;  %v771_v32 = vrot.slane %v8571_v8, 2  ;;  %v799_v41 = vrot.slane %v8636_v39, 2 }
 0x10c   : > { %12986 = vst [vmem:[#allocation64_spill] sm:$0xff] %v8516_v15  ;;  %v8524_v42 = vpop.permute.xlu0 %6230  ;;  %v768_v45 = vsel %vm741_vm4, %v765_v35, %v767_v49  ;;  %v766_v9 = vsel %vm741_vm4, %v763_v1, %v765_v35 }
 0x10d   : > { %12987 = vst [vmem:[#allocation65_spill] sm:$0xff] %v8524_v42  ;;  %6515 = vrot.lane.b32.xlu1 %v6514_v43, %s7558_s13  ;;  %v758_v43 = vsel %vm741_vm4, %v755_v11, %v757_v13  ;;  %v8562_v11 = vld [vmem:[%s7619_s29 + $0x98] sm:$0xff]  ;;  %v6544_v35 = vpack.i.bf16 %v770_v62, %v768_v45  ;;  %v772_v62 = vsel %vm741_vm4, %v769_v20, %v771_v32  ;;  %v7491_v42 = vld [vmem:[%s12526_s2] sm:$0xff]  }
 0x10e   : > { %6510 = vrot.lane.b32.xlu0 %v6509_v44, %s7557_s12  ;;  %v773_v44 = vrot.slane %v8555_v55, 2  ;;  %v775_v13 = vrot.slane %v8562_v11, 2  ;;  %v6529_v49 = vpack.i.bf16 %v758_v43, %v756_v14  ;;  %v8586_v43 = vld [vmem:[%s7619_s29 + $0xb8] sm:$0xff]  ;;  %5705 = vmatpush3.bf16.msra.mxu0 %v7491_v42 }
 0x10f   : > { %v8546_v53 = vpop.permute.xlu1 %6245  ;;  %5706 = vmatprep.subr.bf16.mxu0 %v12985_v30 }
 0x110   : > { %12988 = vst [vmem:[#allocation66_spill] sm:$0xff] %v8546_v53  ;;  %v8550_v28 = vpop.permute.xlu0 %6240  ;;  %v6539_v53 = vpack.i.bf16 %v766_v9, %v764_v40  ;;  %v778_v15 = vsel %vm741_vm4, %v775_v13, %v777_v48  ;;  %v774_v45 = vsel %vm741_vm4, %v771_v32, %v773_v44  ;;  %v8597_v9 = vld [vmem:[%s7619_s29 + $0xa8] sm:$0xff]  ;;  %v8607_v32 = vld [vmem:[%s7619_s29 + $0xd0] sm:$0xff] }
 0x111   : > { %12989 = vst [vmem:[#allocation67_spill] sm:$0xff] %v8550_v28  ;;  %6525 = vrot.lane.b32.xlu1 %v6524_v51, %s7558_s13  ;;  %v776_v28 = vsel %vm741_vm4, %v773_v44, %v775_v13  ;;  %v779_v13 = vrot.slane %v8597_v9, 2  ;;  %v789_v7 = vrot.slane %v8607_v32, 2 }
 0x112   : > { %6520 = vrot.lane.b32.xlu0 %v6519_v54, %s7558_s13  ;;  %v8582_v54 = vld [vmem:[%s7619_s29 + $0xb0] sm:$0xff]  ;;  %v6554_v20 = vpack.i.bf16 %v778_v15, %v776_v28  ;;  %v8617_v28 = vld [vmem:[%s7619_s29 + $0xd8] sm:$0xff] }
 0x113   : > { %v8574_v51 = vpop.permute.xlu1 %6255  ;;  %v781_v14 = vrot.slane %v8582_v54, 2  ;;  %v780_v15 = vsel %vm741_vm4, %v777_v48, %v779_v13 }
 0x114   : > { %12990 = vst [vmem:[#allocation68_spill] sm:$0xff] %v8574_v51  ;;  %v8576_v1 = vpop.permute.xlu0 %6250  ;;  %v783_v51 = vrot.slane %v8586_v43, 2 }
 0x115   : > { %12991 = vst [vmem:[#allocation69_spill] sm:$0xff] %v8576_v1  ;;  %6535 = vrot.lane.b32.xlu1 %v6534_v0, %s7558_s13  ;;  %v8593_v0 = vld [vmem:[%s7619_s29 + $0xc0] sm:$0xff]  ;;  %v782_v18 = vsel %vm741_vm4, %v779_v13, %v781_v14 }
 0x116   : > { %6530 = vrot.lane.b32.xlu0 %v6529_v49, %s7558_s13  ;;  %v785_v40 = vrot.slane %v8593_v0, 2  ;;  %v6549_v49 = vpack.i.bf16 %v774_v45, %v772_v62  ;;  %v784_v44 = vsel %vm741_vm4, %v781_v14, %v783_v51  ;;  %v8621_v62 = vld [vmem:[%s7619_s29 + $0xe0] sm:$0xff]  ;;  %v801_v14 = vrot.slane %v8642_v24, 2 }
 0x117   : > { %v8600_v1 = vpop.permute.xlu1 %6265  ;;  %v793_v45 = vrot.slane %v8621_v62, 2  ;;  %v6559_v42 = vpack.i.bf16 %v782_v18, %v780_v15  ;;  %v8666_v15 = vld [vmem:[%s7619_s29 + $0x110] sm:$0xff] }
 0x118   : > { %12992 = vst [vmem:[#allocation70_spill] sm:$0xff] %v8600_v1  ;;  %v8602_v16 = vpop.permute.xlu0 %6260  ;;  %v786_v1 = vsel %vm741_vm4, %v783_v51, %v785_v40  ;;  %v8632_v51 = vld [vmem:[%s7619_s29 + $0xf0] sm:$0xff] }
 0x119   : > { %12993 = vst [vmem:[#allocation71_spill] sm:$0xff] %v8602_v16  ;;  %6545 = vrot.lane.b32.xlu1 %v6544_v35, %s7558_s13  ;;  %v791_v35 = vrot.slane %v8617_v28, 2  ;;  %v797_v48 = vrot.slane %v8632_v51, 2  ;;  %v6564_v13 = vpack.i.bf16 %v786_v1, %v784_v44  ;;  %v8659_v44 = vld [vmem:[%s7619_s29 + $0xe8] sm:$0xff] }
 0x11a   : > { %6540 = vrot.lane.b32.xlu0 %v6539_v53, %s7558_s13  ;;  %v787_v53 = vrot.slane %v8628_v56, 2  ;;  %v795_v47 = vrot.slane %v8659_v44, 2 }
 0x11b   : > { %v8624_v16 = vpop.permute.xlu1 %6275  ;;  %v794_v52 = vsel %vm741_vm4, %v791_v35, %v793_v45  ;;  %v800_v1 = vsel %vm741_vm4, %v797_v48, %v799_v41 }
 0x11c   : > { %12994 = vst [vmem:[#allocation72_spill] sm:$0xff] %v8624_v16  ;;  %v8639_v46 = vpop.permute.xlu0 %6270  ;;  %v7492_v16 = vld [vmem:[%s12526_s2 + $0x8] sm:$0xff]   ;;  %v788_v63 = vsel %vm741_vm4, %v785_v40, %v787_v53  ;;  %v8674_v40 = vld [vmem:[%s7619_s29 + $0x120] sm:$0xff]  ;;  %v796_v50 = vsel %vm741_vm4, %v793_v45, %v795_v47 }
 0x11d   : > { %12995 = vst [vmem:[#allocation73_spill] sm:$0xff] %v8639_v46  ;;  %6555 = vrot.lane.b32.xlu1 %v6554_v20, %s7558_s13  ;;  %v792_v46 = vsel %vm741_vm4, %v789_v7, %v791_v35  ;;  %v790_v20 = vsel %vm741_vm4, %v787_v53, %v789_v7  ;;  %5707 = vmatpush3.bf16.msra.mxu0 %v7492_v16  ;;  %v805_v35 = vrot.slane %v8666_v15, 2  ;;  %v809_v53 = vrot.slane %v8674_v40, 2 }
 0x11e   : > { %6550 = vrot.lane.b32.xlu0 %v6549_v49, %s7558_s13  ;;  %v802_v49 = vsel %vm741_vm4, %v799_v41, %v801_v14  ;;  %5708 = vmatprep.subr.bf16.mxu0 %v12985_v30  ;;  %v6574_v16 = vpack.i.bf16 %v794_v52, %v792_v46  ;;  %v6569_v60 = vpack.i.bf16 %v790_v20, %v788_v63  ;;  %v815_v63 = vrot.slane %v8066_v59, 2 }
 0x11f   : > { %v8653_v31 = vpop.permute.xlu1 %6285  ;;  %v6584_v6 = vpack.i.bf16 %v802_v49, %v800_v1  ;;  %v7494_v1 = vld [vmem:[%s12526_s2 + $0x18] sm:$0xff]  }
 0x120   : > { %12996 = vst [vmem:[#allocation74_spill] sm:$0xff] %v8653_v31  ;;  %v8662_v18 = vpop.permute.xlu0 %6280  ;;  %v8670_v31 = vld [vmem:[%s7619_s29 + $0x118] sm:$0xff] }
 0x121   : > { %12997 = vst [vmem:[#allocation75_spill] sm:$0xff] %v8662_v18  ;;  %v807_v7 = vrot.slane %v8670_v31, 2  ;;  %6565 = vrot.lane.b32.xlu1 %v6564_v13, %s7558_s13  ;;  %v8680_v18 = vld [vmem:[%s7619_s29 + $0x108] sm:$0xff]  ;;  %v798_v13 = vsel %vm741_vm4, %v795_v47, %v797_v48  ;;  %5709 = vmatpush3.bf16.msra.mxu0 %v7493_v23  ;;  %v817_v47 = vrot.slane %v8078_v33, 2 }
 0x122   : > { %v803_v41 = vrot.slane %v8680_v18, 2  ;;  %6560 = vrot.lane.b32.xlu0 %v6559_v42, %s7558_s13  ;;  %v813_v42 = vrot.slane %v8696_v4, 2  ;;  %5710 = vmatprep.subr.bf16.mxu0 %v12985_v30  ;;  %v8706_v48 = vld [vmem:[%s7619_s29 + $0x128] sm:$0xff]  ;;  %v6579_v59 = vpack.i.bf16 %v798_v13, %v796_v50  ;;  %v823_v13 = vrot.slane %v8459_v12, 3 }
 0x123   : > { %v8687_v61 = vpop.permute.xlu1 %6295  ;;  %v808_v46 = vsel %vm741_vm4, %v805_v35, %v807_v7  ;;  %v810_v38 = vsel %vm741_vm4, %v807_v7, %v809_v53  ;;  %13001 = vst [vmem:[#allocation79_spill] sm:$0xff] %v8706_v48  ;;  %v811_v20 = vrot.slane %v8706_v48, 2 }
 0x124   : > { %12998 = vst [vmem:[#allocation76_spill] sm:$0xff] %v8687_v61  ;;  %v8691_v52 = vpop.permute.xlu0 %6290  ;;  %v804_v45 = vsel %vm741_vm4, %v801_v14, %v803_v41  ;;  %v806_v23 = vsel %vm741_vm4, %v803_v41, %v805_v35  ;;  %v6594_v14 = vpack.i.bf16 %v810_v38, %v808_v46  ;;  %v816_v33 = vsel %vm741_vm4, %v813_v42, %v815_v63 }
 0x125   : > { %12999 = vst [vmem:[#allocation77_spill] sm:$0xff] %v8691_v52  ;;  %6575 = vrot.lane.b32.xlu1 %v6574_v16, %s7558_s13  ;;  %5711 = vmatpush3.bf16.msra.mxu0 %v7494_v1  ;;  %v6589_v35 = vpack.i.bf16 %v806_v23, %v804_v45  ;;  %v7495_v16 = vld [vmem:[%s12526_s2 + $0x20] ss:$0 sps:$4 sm:$0xff]   ;;  %v812_v50 = vsel %vm741_vm4, %v809_v53, %v811_v20  ;;  %v822_v38 = vrot.slane %v8455_v5, 3  ;;  %v825_v46 = vrot.slane %v8465_v29, 3 }
 0x126   : > { %6570 = vrot.lane.b32.xlu0 %v6569_v60, %s7558_s13  ;;  %5712 = vmatprep.subr.bf16.mxu0 %v12985_v30  ;;  %v818_v60 = vsel %vm741_vm4, %v815_v63, %v817_v47  ;;  %v814_v41 = vsel %vm741_vm4, %v811_v20, %v813_v42  ;;  %v2340_v45 = vsel %vm12710_vm5, %v7495_v16, 0  ;;  %v820_v63 = vsel %vm12806_vm0, %v817_v47, 0.0 }
 0x127   : > { %v8713_v49 = vpop.permute.xlu1 %6305  ;;  %v6604_v53 = vpack.i.bf16 %v818_v60, %v816_v33  ;;  %v6599_v42 = vpack.i.bf16 %v814_v41, %v812_v50  ;;  %v829_v20 = vrot.slane %v8477_v19, 3  ;;  %v831_v1 = vrot.slane %v8481_v3, 3 }
 0x128   : > { %13002 = vst [vmem:[#allocation80_spill] sm:$0xff] %v8713_v49  ;;  %v8715_v7 = vpop.permute.xlu0 %6300  ;;  %v826_v16 = vsel %vm821_vm6, %v823_v13, %v825_v46  ;;  %v833_v33 = vrot.slane %v8485_v10, 3  ;;  %v6609_v50 = vpack.i.bf16 %v12985_v30, %v820_v63  ;;  %v841_v49 = vrot.slane %v8507_v57, 3 }
 0x129   : > { %13003 = vst [vmem:[#allocation81_spill] sm:$0xff] %v8715_v7  ;;  %6585 = vrot.lane.b32.xlu1 %v6584_v6, %s7558_s13  ;;  %5713 = vmatpush3.bf16.msra.mxu0 %v2340_v45  ;;  %v832_v41 = vsel %vm821_vm6, %v829_v20, %v831_v1  ;;  %vm2274_vm5 = vcmask 588800  }
 0x12a   : > { %6580 = vrot.lane.b32.xlu0 %v6579_v59, %s7558_s13  ;;  %v824_v59 = vsel %vm821_vm6, %v822_v38, %v823_v13  ;;  %v837_v38 = vrot.slane %v8499_v21, 3  ;;  %v839_v13 = vrot.slane %v8503_v27, 3  ;;  %v834_v45 = vsel %vm821_vm6, %v831_v1, %v833_v33 }
 0x12b   : > { %v8731_v23 = vpop.permute.xlu1 %1347  ;;  %v847_v1 = vrot.slane %v8531_v26, 3 }
 0x12c   : > { %13004 = vst [vmem:[#allocation82_spill] sm:$0xff] %v8731_v23  ;;  %v8733_v6 = vpop.permute.xlu0 %6310 }
 0x12d   : > { %13005 = vst [vmem:[#allocation83_spill] sm:$0xff] %v8733_v6  ;;  %6595 = vrot.lane.b32.xlu1 %v6594_v14, %s7558_s13  ;;  %v827_v14 = vrot.slane %v8491_v22, 3 }
 0x12e   : > { %6590 = vrot.lane.b32.xlu0 %v6589_v35, %s7558_s13  ;;  %v6614_v35 = vpack.i.bf16 %v826_v16, %v824_v59  ;;  %v6624_v16 = vpack.i.bf16 %v834_v45, %v832_v41  ;;  %v853_v41 = vrot.slane %v8555_v55, 3  ;;  %v857_v45 = vrot.slane %v8566_v2, 3 }
 0x12f   : > { %v8748_v47 = vpop.permute.xlu1 %6320  ;;  %v828_v23 = vsel %vm821_vm6, %v825_v46, %v827_v14  ;;  %v830_v6 = vsel %vm821_vm6, %v827_v14, %v829_v20  ;;  %v842_v46 = vsel %vm821_vm6, %v839_v13, %v841_v49  ;;  %v845_v20 = vrot.slane %v8527_v34, 3 }
 0x130   : > { %13006 = vst [vmem:[#allocation84_spill] sm:$0xff] %v8748_v47  ;;  %v8750_v60 = vpop.permute.xlu0 %6315  ;;  %v6619_v7 = vpack.i.bf16 %v830_v6, %v828_v23  ;;  %v849_v14 = vrot.slane %v8535_v17, 3  ;;  %v843_v23 = vrot.slane %v8542_v25, 3 }
 0x131   : > { %13007 = vst [vmem:[#allocation85_spill] sm:$0xff] %v8750_v60  ;;  %6605 = vrot.lane.b32.xlu1 %v6604_v53, %s7558_s13  ;;  %v835_v53 = vrot.slane %v8521_v36, 3 }
 0x132   : > { %6600 = vrot.lane.b32.xlu0 %v6599_v42, %s7558_s13  ;;  %v840_v42 = vsel %vm821_vm6, %v837_v38, %v839_v13  ;;  %v855_v13 = vrot.slane %v8562_v11, 3 }
 0x133   : > { %v8762_v63 = vpop.permute.xlu1 %6330  ;;  %v836_v52 = vsel %vm821_vm6, %v833_v33, %v835_v53  ;;  %v848_v33 = vsel %vm821_vm6, %v845_v20, %v847_v1 }
 0x134   : > { %13008 = vst [vmem:[#allocation86_spill] sm:$0xff] %v8762_v63  ;;  %v8765_v59 = vpop.permute.xlu0 %6325  ;;  %v861_v63 = vrot.slane %v8582_v54, 3 }
 0x135   : > { %13009 = vst [vmem:[#allocation87_spill] sm:$0xff] %v8765_v59  ;;  %6615 = vrot.lane.b32.xlu1 %v6614_v35, %s7560_s26  ;;  %v838_v35 = vsel %vm821_vm6, %v835_v53, %v837_v38  ;;  %v850_v38 = vsel %vm821_vm6, %v847_v1, %v849_v14  ;;  %v863_v59 = vrot.slane %v8586_v43, 3  ;;  %v856_v1 = vsel %vm821_vm6, %v853_v41, %v855_v13 }
 0x136   : > { %6610 = vrot.lane.b32.xlu0 %v6609_v50, %s7558_s13  ;;  %v6634_v50 = vpack.i.bf16 %v842_v46, %v840_v42  ;;  %v851_v42 = vrot.slane %v8571_v8, 3 }
 0x137   : > { %v8774_v61 = vpop.permute.xlu1 %6340 }
 0x138   : > { %13010 = vst [vmem:[#allocation88_spill] sm:$0xff] %v8774_v61  ;;  %v8779_v6 = vpop.permute.xlu0 %6335  ;;  %v6629_v61 = vpack.i.bf16 %v838_v35, %v836_v52  ;;  %v865_v52 = vrot.slane %v8593_v0, 3  ;;  %v858_v35 = vsel %vm821_vm6, %v855_v13, %v857_v45  ;;  %v869_v13 = vrot.slane %v8607_v32, 3 }
 0x139   : > { %13011 = vst [vmem:[#allocation89_spill] sm:$0xff] %v8779_v6  ;;  %6625 = vrot.lane.b32.xlu1 %v6624_v16, %s7560_s26  ;;  %v844_v6 = vsel %vm821_vm6, %v841_v49, %v843_v23  ;;  %v846_v16 = vsel %vm821_vm6, %v843_v23, %v845_v20  ;;  %v859_v49 = vrot.slane %v8597_v9, 3  ;;  %v6654_v60 = vpack.i.bf16 %v858_v35, %v856_v1 }
 0x13a   : > { %6620 = vrot.lane.b32.xlu0 %v6619_v7, %s7560_s26  ;;  %v6644_v7 = vpack.i.bf16 %v850_v38, %v848_v33  ;;  %v6639_v20 = vpack.i.bf16 %v846_v16, %v844_v6  ;;  %v866_v33 = vsel %vm821_vm6, %v863_v59, %v865_v52  ;;  %v871_v38 = vrot.slane %v8617_v28, 3 }
 0x13b   : > { %v8788_v53 = vpop.permute.xlu1 %6350  ;;  %v862_v6 = vsel %vm821_vm6, %v859_v49, %v861_v63  ;;  %v867_v16 = vrot.slane %v8628_v56, 3 }
 0x13c   : > { %13012 = vst [vmem:[#allocation90_spill] sm:$0xff] %v8788_v53  ;;  %v8793_v46 = vpop.permute.xlu0 %6345  ;;  %v852_v53 = vsel %vm821_vm6, %v849_v14, %v851_v42  ;;  %v873_v14 = vrot.slane %v8621_v62, 3 }
 0x13d   : > { %13013 = vst [vmem:[#allocation91_spill] sm:$0xff] %v8793_v46  ;;  %6635 = vrot.lane.b32.xlu1 %v6634_v50, %s7560_s26  ;;  %v854_v46 = vsel %vm821_vm6, %v851_v42, %v853_v41  ;;  %v864_v50 = vsel %vm821_vm6, %v861_v63, %v863_v59 }
 0x13e   : > { %6630 = vrot.lane.b32.xlu0 %v6629_v61, %s7560_s26  ;;  %v860_v61 = vsel %vm821_vm6, %v857_v45, %v859_v49  ;;  %v6649_v41 = vpack.i.bf16 %v854_v46, %v852_v53  ;;  %v6664_v1 = vpack.i.bf16 %v866_v33, %v864_v50  ;;  %v872_v45 = vsel %vm821_vm6, %v869_v13, %v871_v38 }
 0x13f   : > { %v8803_v23 = vpop.permute.xlu1 %6360  ;;  %v6659_v35 = vpack.i.bf16 %v862_v6, %v860_v61  ;;  %v874_v63 = vsel %vm821_vm6, %v871_v38, %v873_v14  ;;  %v879_v49 = vrot.slane %v8636_v39, 3  ;;  %v868_v53 = vsel %vm821_vm6, %v865_v52, %v867_v16 }
 0x140   : > { %13014 = vst [vmem:[#allocation92_spill] sm:$0xff] %v8803_v23  ;;  %v8807_v47 = vpop.permute.xlu0 %6355  ;;  %v870_v46 = vsel %vm821_vm6, %v867_v16, %v869_v13  ;;  %v875_v50 = vrot.slane %v8659_v44, 3  ;;  %v6674_v61 = vpack.i.bf16 %v874_v63, %v872_v45  ;;  %v887_v52 = vrot.slane %v8670_v31, 3 }
 0x141   : > { %13015 = vst [vmem:[#allocation93_spill] sm:$0xff] %v8807_v47  ;;  %6645 = vrot.lane.b32.xlu1 %v6644_v7, %s7560_s26  ;;  %v877_v7 = vrot.slane %v8632_v51, 3  ;;  %v6669_v6 = vpack.i.bf16 %v870_v46, %v868_v53  ;;  %v889_v45 = vrot.slane %v8674_v40, 3  ;;  %v883_v63 = vrot.slane %v8680_v18, 3 }
 0x142   : > { %6640 = vrot.lane.b32.xlu0 %v6639_v20, %s7560_s26  ;;  %v881_v20 = vrot.slane %v8642_v24, 3  ;;  %v876_v16 = vsel %vm821_vm6, %v873_v14, %v875_v50  ;;  %v391_v23 = vrot.slane %v8521_v36, 5  ;;  %v399_v36 = vrot.slane %v8542_v25, 5 }
 0x143   : > { %v8819_v42 = vpop.permute.xlu1 %6370  ;;  %v880_v38 = vsel %vm821_vm6, %v877_v7, %v879_v49  ;;  %v890_v14 = vsel %vm821_vm6, %v887_v52, %v889_v45 }
 0x144   : > { %13016 = vst [vmem:[#allocation94_spill] sm:$0xff] %v8819_v42  ;;  %v8821_v59 = vpop.permute.xlu0 %6365  ;;  %v882_v13 = vsel %vm821_vm6, %v879_v49, %v881_v20  ;;  %v7538_v49 = vld [vmem:[%s7619_s29 + $0x138] sm:$0xff]  ;;  %v7539_v42 = vld [vmem:[%s7619_s29 + $0x140] sm:$0xf] }
 0x145   : > { %13017 = vst [vmem:[#allocation95_spill] sm:$0xff] %v8821_v59  ;;  %6655 = vrot.lane.b32.xlu1 %v6654_v60, %s7560_s26  ;;  %v6684_v46 = vpack.i.bf16 %v882_v13, %v880_v38 }
 0x146   : > { %6650 = vrot.lane.b32.xlu0 %v6649_v41, %s7560_s26  ;;  %v885_v41 = vrot.slane %v8666_v15, 3 }
 0x147   : > { %v8833_v33 = vpop.permute.xlu1 %6380 }
 0x148   : > { %13018 = vst [vmem:[#allocation96_spill] sm:$0xff] %v8833_v33  ;;  %v8835_v60 = vpop.permute.xlu0 %6375  ;;  %v878_v33 = vsel %vm821_vm6, %v875_v50, %v877_v7  ;;  %v893_v7 = vrot.slane %v8696_v4, 3  ;;  %v895_v50 = vrot.slane %v7538_v49, 3 }
 0x149   : > { %13019 = vst [vmem:[#allocation97_spill] sm:$0xff] %v8835_v60  ;;  %6665 = vrot.lane.b32.xlu1 %v6664_v1, %s7560_s26  ;;  %v6679_v60 = vpack.i.bf16 %v878_v33, %v876_v16  ;;  %v891_v33 = vrot.slane %v8706_v48, 3 }
 0x14a   : > { %6660 = vrot.lane.b32.xlu0 %v6659_v35, %s7560_s26  ;;  %v888_v35 = vsel %vm821_vm6, %v885_v41, %v887_v52  ;;  %v896_v13 = vsel %vm821_vm6, %v893_v7, %v895_v50 }
 0x14b   : > { %v8846_v1 = vpop.permute.xlu1 %6390 }
 0x14c   : > { %13020 = vst [vmem:[#allocation98_spill] sm:$0xff] %v8846_v1  ;;  %v8849_v53 = vpop.permute.xlu0 %6385  ;;  %v897_v1 = vrot.slane %v7539_v42, 3 }
 0x14d   : > { %13021 = vst [vmem:[#allocation99_spill] sm:$0xff] %v8849_v53  ;;  %6675 = vrot.lane.b32.xlu1 %v6674_v61, %s7560_s26  ;;  %v884_v53 = vsel %vm821_vm6, %v881_v20, %v883_v63  ;;  %v886_v61 = vsel %vm821_vm6, %v883_v63, %v885_v41  ;;  %v892_v20 = vsel %vm821_vm6, %v889_v45, %v891_v33 }
 0x14e   : > { %6670 = vrot.lane.b32.xlu0 %v6669_v6, %s7560_s26  ;;  %v6694_v6 = vpack.i.bf16 %v890_v14, %v888_v35  ;;  %v6689_v52 = vpack.i.bf16 %v886_v61, %v884_v53  ;;  %v898_v42 = vsel %vm821_vm6, %v895_v50, %v897_v1  ;;  %v894_v41 = vsel %vm821_vm6, %v891_v33, %v893_v7  ;;  %v2583_v7 = vld [vmem:[%s12525_s1] sm:$0xff] }
 0x14f   : > { %v8858_v59 = vpop.permute.xlu1 %6400  ;;  %v6704_v49 = vpack.i.bf16 %v898_v42, %v896_v13  ;;  %v900_v35 = vsel %vm571_vm1, %v897_v1, 0.0  ;;  %v2585_v1 = vld [vmem:[%s12525_s1 + $0x10] sm:$0xff] }
 0x150   : > { %13022 = vst [vmem:[#allocation100_spill] sm:$0xff] %v8858_v59  ;;  %v8863_v38 = vpop.permute.xlu0 %6395  ;;  %v6709_v45 = vpack.i.bf16 %v12985_v30, %v900_v35  ;;  %v2590_v35 = vld [vmem:[%s12525_s1 + $0x38] sm:$0xff] }
 0x151   : > { %13023 = vst [vmem:[#allocation101_spill] sm:$0xff] %v8863_v38  ;;  %6685 = vrot.lane.b32.xlu1 %v6684_v46, %s7560_s26  ;;  %v6699_v46 = vpack.i.bf16 %v894_v41, %v892_v20  ;;  %v2584_v20 = vld [vmem:[%s12525_s1 + $0x8] sm:$0xff] }
 0x152   : > { %6680 = vrot.lane.b32.xlu0 %v6679_v60, %s7560_s26  ;;  %v7561_v60 = vmov 0   ;;  %v2588_v41 = vld [vmem:[%s12525_s1 + $0x28] sm:$0xff] }
 0x153   : > { %v8869_v16 = vpop.permute.xlu1 %6410  ;;  %6714 = vset.pattern.permute.xlu1 %v7561_v60  ;;  %6715 = vset.pattern.permute.xlu0 %v7561_v60 }
 0x154   : > { %13024 = vst [vmem:[#allocation102_spill] sm:$0xff] %v8869_v16  ;;  %v8873_v63 = vpop.permute.xlu0 %6405 }
 0x155   : > { %13025 = vst [vmem:[#allocation103_spill] sm:$0xff] %v8873_v63  ;;  %6695 = vrot.lane.b32.xlu1 %v6694_v6, %s7560_s26  ;;  %v2596_v63 = vld [vmem:[%s12525_s1 + $0x68] sm:$0xff] }
 0x156   : > { %6690 = vrot.lane.b32.xlu0 %v6689_v52, %s7560_s26  ;;  %v2586_v52 = vld [vmem:[%s12525_s1 + $0x18] sm:$0xff] }
 0x157   : > { %v8877_v53 = vpop.permute.xlu1 %6415 }
 0x158   : > { %v8880_v14 = vpop.permute.xlu0 %1471 }
 0x159   : > { %13026 = vst [vmem:[#allocation104_spill] sm:$0xff] %v8880_v14  ;;  %6705 = vrot.lane.b32.xlu1 %v6704_v49, %s7560_s26 }
 0x15a   : > { %6700 = vrot.lane.b32.xlu0 %v6699_v46, %s7560_s26  ;;  %v2587_v46 = vld [vmem:[%s12525_s1 + $0x20] sm:$0xff] }
 0x15b   : > { %v8888_v50 = vpop.permute.xlu1 %6425 }
 0x15c   : > { %v8890_v61 = vpop.permute.xlu0 %6420 }
 0x15d   : > { %2626 = vperm.xlu1 %6714, %v2583_v7  }
 0x15e   : > { %6710 = vrot.lane.b32.xlu0 %v6709_v45, %s7560_s26 }
 0x15f   : > { %v8896_v33 = vpop.permute.xlu1 %6435 }
 0x160   : > { %v8898_v6 = vpop.permute.xlu0 %6430 }
 0x161   : > { %2636 = vperm.xlu1 %6714, %v2585_v1   ;;  %v2589_v1 = vld [vmem:[%s12525_s1 + $0x30] sm:$0xff] }
 0x162   : > { %2631 = vperm.xlu0 %6715, %v2584_v20  }
 0x163   : > { %v8903_v13 = vpop.permute.xlu1 %6445 }
 0x164   : > { %13027 = vst [vmem:[#allocation105_spill] sm:$0xff] %v8903_v13  ;;  %v8905_v42 = vpop.permute.xlu0 %6440  ;;  %v387_v13 = vrot.slane %v8481_v3, 5  ;;  %v409_v3 = vrot.slane %v8555_v55, 5 }
 0x165   : > { %13028 = vst [vmem:[#allocation106_spill] sm:$0xff] %v8905_v42  ;;  %2641 = vperm.xlu1 %6714, %v2586_v52   ;;  %v2592_v52 = vld [vmem:[%s12525_s1 + $0x48] sm:$0xff]  ;;  %v2606_v42 = vld [vmem:[%s12525_s1 + $0xb8] sm:$0xff] }
 0x166   : > { %2646 = vperm.xlu0 %6715, %v2587_v46  }
 0x167   : > { %v8913_v49 = vpop.permute.xlu1 %6455 }
 0x168   : > { %13029 = vst [vmem:[#allocation107_spill] sm:$0xff] %v8913_v49  ;;  %v8918_v60 = vpop.permute.xlu0 %6450 }
 0x169   : > { %13030 = vst [vmem:[#allocation108_spill] sm:$0xff] %v8918_v60  ;;  %2651 = vperm.xlu1 %6714, %v2588_v41   ;;  %v2591_v41 = vld [vmem:[%s12525_s1 + $0x40] sm:$0xff] }
 0x16a   : > { %2656 = vperm.xlu0 %6715, %v2589_v1   ;;  %v2593_v1 = vld [vmem:[%s12525_s1 + $0x50] sm:$0xff] }
 0x16b   : > { %v8923_v45 = vpop.permute.xlu1 %6465 }
 0x16c   : > { %13031 = vst [vmem:[#allocation109_spill] sm:$0xff] %v8923_v45  ;;  %v8925_v7 = vpop.permute.xlu0 %6460 }
 0x16d   : > { %13032 = vst [vmem:[#allocation110_spill] sm:$0xff] %v8925_v7  ;;  %2661 = vperm.xlu1 %6714, %v2590_v35   ;;  %v2594_v35 = vld [vmem:[%s12525_s1 + $0x58] sm:$0xff]  ;;  %v389_v7 = vrot.slane %v8485_v10, 5  ;;  %v397_v10 = vrot.slane %v8507_v57, 5 }
 0x16e   : > { %2666 = vperm.xlu0 %6715, %v2591_v41   ;;  %v2595_v41 = vld [vmem:[%s12525_s1 + $0x60] sm:$0xff] }
 0x16f   : > { %v8933_v20 = vpop.permute.xlu1 %6475 }
 0x170   : > { %13033 = vst [vmem:[#allocation111_spill] sm:$0xff] %v8933_v20  ;;  %v8938_v46 = vpop.permute.xlu0 %6470 }
 0x171   : > { %13034 = vst [vmem:[#allocation112_spill] sm:$0xff] %v8938_v46  ;;  %2671 = vperm.xlu1 %6714, %v2592_v52   ;;  %v7540_v46 = vld [vmem:[%s7619_s29] sm:$0xff] }
 0x172   : > { %2676 = vperm.xlu0 %6715, %v2593_v1   ;;  %v2597_v1 = vld [vmem:[%s12525_s1 + $0x70] sm:$0xff]  ;;  %v374_v45 = vrot.slane %v7540_v46, 5 }
 0x173   : > { %v8943_v14 = vpop.permute.xlu1 %6485 }
 0x174   : > { %13035 = vst [vmem:[#allocation113_spill] sm:$0xff] %v8943_v14  ;;  %v8945_v16 = vpop.permute.xlu0 %6480  ;;  %v9017_v47 = vsel %vm373_vm3, 0.0, %v374_v45 }
 0x175   : > { %13036 = vst [vmem:[#allocation114_spill] sm:$0xff] %v8945_v16  ;;  %2681 = vperm.xlu1 %6714, %v2594_v35   ;;  %v2598_v35 = vld [vmem:[%s12525_s1 + $0x78] sm:$0xff] }
 0x176   : > { %2686 = vperm.xlu0 %6715, %v2595_v41   ;;  %v2599_v41 = vld [vmem:[%s12525_s1 + $0x80] sm:$0xff] }
 0x177   : > { %v8953_v52 = vpop.permute.xlu1 %6495 }
 0x178   : > { %13037 = vst [vmem:[#allocation115_spill] sm:$0xff] %v8953_v52  ;;  %v8958_v59 = vpop.permute.xlu0 %6490  ;;  %v2600_v52 = vld [vmem:[%s12525_s1 + $0x88] sm:$0xff] }
 0x179   : > { %13038 = vst [vmem:[#allocation116_spill] sm:$0xff] %v8958_v59  ;;  %2691 = vperm.xlu1 %6714, %v2596_v63   ;;  %v381_v59 = vrot.slane %v8465_v29, 5  ;;  %v2604_v29 = vld [vmem:[%s12525_s1 + $0xa8] sm:$0xff] }
 0x17a   : > { %2696 = vperm.xlu0 %6715, %v2597_v1   ;;  %v377_v1 = vrot.slane %v8455_v5, 5 }
 0x17b   : > { %v8963_v38 = vpop.permute.xlu1 %6505 }
 0x17c   : > { %13039 = vst [vmem:[#allocation117_spill] sm:$0xff] %v8963_v38  ;;  %v8965_v14 = vpop.permute.xlu0 %6500 }
 0x17d   : > { %13040 = vst [vmem:[#allocation118_spill] sm:$0xff] %v8965_v14  ;;  %2701 = vperm.xlu1 %6714, %v2598_v35   ;;  %v2602_v35 = vld [vmem:[%s12525_s1 + $0x98] sm:$0xff]  ;;  %v379_v14 = vrot.slane %v8459_v12, 5  ;;  %v2601_v12 = vld [vmem:[%s12525_s1 + $0x90] sm:$0xff] }
 0x17e   : > { %2706 = vperm.xlu0 %6715, %v2599_v41  }
 0x17f   : > { %v8973_v63 = vpop.permute.xlu1 %6515  ;;  %v9000_v5 = vsel %vm373_vm3, %v379_v14, %v381_v59  ;;  %v9003_v41 = vsel %vm373_vm3, %v377_v1, %v379_v14 }
 0x180   : > { %v8978_v38 = vpop.permute.xlu0 %6510 }
 0x181   : > { %13041 = vst [vmem:[#allocation119_spill] sm:$0xff] %v8978_v38  ;;  %2711 = vperm.xlu1 %6714, %v2600_v52   ;;  %v383_v52 = vrot.slane %v8491_v22, 5  ;;  %v385_v38 = vrot.slane %v8477_v19, 5  ;;  %v2603_v19 = vld [vmem:[%s12525_s1 + $0xa0] sm:$0xff]  ;;  %v7541_v22 = vld [vmem:[%s7619_s29 + $0x8] sm:$0xff] }
 0x182   : > { %2716 = vperm.xlu0 %6715, %v2601_v12   ;;  %v393_v12 = vrot.slane %v8499_v21, 5  ;;  %v401_v21 = vrot.slane %v8527_v34, 5  ;;  %v9046_v34 = vsel %vm373_vm3, %v389_v7, %v391_v23 }
 0x183   : > { %v8986_v16 = vpop.permute.xlu1 %6525  ;;  %v9020_v14 = vsel %vm373_vm3, %v381_v59, %v383_v52  ;;  %v9023_v60 = vsel %vm373_vm3, %v383_v52, %v385_v38  ;;  %v405_v59 = vrot.slane %v8535_v17, 5  ;;  %v407_v52 = vrot.slane %v8571_v8, 5 }
 0x184   : > { %v8988_v20 = vpop.permute.xlu0 %6520  ;;  %v9054_v55 = vsel %vm373_vm3, %v385_v38, %v387_v13  ;;  %v415_v8 = vrot.slane %v8597_v9, 5  ;;  %v9069_v38 = vsel %vm373_vm3, %v399_v36, %v401_v21 }
 0x185   : > { %2721 = vperm.xlu1 %6714, %v2602_v35   ;;  %v375_v35 = vrot.slane %v7541_v22, 5  ;;  %v395_v22 = vrot.slane %v8503_v27, 5 }
 0x186   : > { %2726 = vperm.xlu0 %6715, %v2603_v19   ;;  %v9049_v19 = vsel %vm373_vm3, %v391_v23, %v393_v12  ;;  %v9066_v23 = vsel %vm373_vm3, %v397_v10, %v399_v36 }
 0x187   : > { %v9005_v46 = vpop.permute.xlu1 %6535  ;;  %v9040_v25 = vsel %vm373_vm3, %v375_v35, %v377_v1  ;;  %v9043_v27 = vsel %vm373_vm3, %v374_v45, %v375_v35  ;;  %v417_v1 = vrot.slane %v8582_v54, 5  ;;  %v2605_v45 = vld [vmem:[%s12525_s1 + $0xb0] sm:$0xff]  ;;  %v9063_v35 = vsel %vm373_vm3, %v387_v13, %v389_v7  ;;  %v2608_v54 = vld [vmem:[%s12525_s1 + $0xc8] sm:$0xff] }
 0x188   : > { %v9014_v49 = vpop.permute.xlu0 %6530  ;;  %v9078_v9 = vsel %vm373_vm3, %v395_v22, %v397_v10  ;;  %v9081_v13 = vsel %vm373_vm3, %v405_v59, %v407_v52  ;;  %v421_v10 = vrot.slane %v8593_v0, 5  ;;  %v429_v0 = vrot.slane %v8621_v62, 5 }
 0x189   : > { %2731 = vperm.xlu1 %6714, %v2604_v29   ;;  %v403_v29 = vrot.slane %v8531_v26, 5  ;;  %v413_v26 = vrot.slane %v8566_v2, 5  ;;  %v9072_v2 = vsel %vm373_vm3, %v393_v12, %v395_v22  ;;  %13043 = vst [vmem:[#allocation121_spill] sm:$0xff] %v9081_v13  ;;  %v2607_v12 = vld [vmem:[%s12525_s1 + $0xc0] sm:$0xff]  ;;  %v423_v22 = vrot.slane %v8628_v56, 5 }
 0x18a   : > { %2736 = vperm.xlu0 %6715, %v2605_v45   ;;  %v411_v45 = vrot.slane %v8562_v11, 5  ;;  %v419_v11 = vrot.slane %v8586_v43, 5  ;;  %v431_v56 = vrot.slane %v8659_v44, 5  ;;  %v441_v43 = vrot.slane %v8666_v15, 5 }
 0x18b   : > { %v9037_v57 = vpop.permute.xlu1 %6545  ;;  %v9087_v7 = vsel %vm373_vm3, %v401_v21, %v403_v29  ;;  %v9101_v21 = vsel %vm373_vm3, %v403_v29, %v405_v59  ;;  %v2610_v59 = vld [vmem:[%s12525_s1 + $0xd8] sm:$0xff]  ;;  %v437_v29 = vrot.slane %v8642_v24, 5 }
 0x18c   : > { %13042 = vst [vmem:[#allocation120_spill] sm:$0xff] %v9037_v57  ;;  %v9051_v17 = vpop.permute.xlu0 %6540  ;;  %v425_v57 = vrot.slane %v8607_v32, 5  ;;  %v433_v32 = vrot.slane %v8632_v51, 5  ;;  %v9124_v44 = vsel %vm373_vm3, %v409_v3, %v411_v45  ;;  %v9130_v51 = vsel %vm373_vm3, %v421_v10, %v423_v22 }
 0x18d   : > { %2741 = vperm.xlu1 %6714, %v2606_v42   ;;  %v9084_v42 = vsel %vm373_vm3, %v407_v52, %v409_v3  ;;  %v9104_v52 = vsel %vm373_vm3, %v413_v26, %v415_v8  ;;  %v443_v3 = vrot.slane %v8670_v31, 5  ;;  %v2612_v31 = vld [vmem:[%s12525_s1 + $0xe8] sm:$0xff] }
 0x18e   : > { %2746 = vperm.xlu0 %6715, %v2607_v12   ;;  %v9133_v12 = vsel %vm373_vm3, %v423_v22, %v425_v57  ;;  %v9150_v22 = vsel %vm373_vm3, %v429_v0, %v431_v56 }
 0x18f   : > { %v9089_v36 = vpop.permute.xlu1 %6555  ;;  %13046 = vst [vmem:[#allocation124_spill] sm:$0xff] %v9150_v22 }
 0x190   : > { %13044 = vst [vmem:[#allocation122_spill] sm:$0xff] %v9089_v36  ;;  %v9098_v13 = vpop.permute.xlu0 %6550  ;;  %v9107_v36 = vsel %vm373_vm3, %v415_v8, %v417_v1  ;;  %v439_v8 = vrot.slane %v8680_v18, 5  ;;  %v9138_v18 = vsel %vm373_vm3, %v417_v1, %v419_v11  ;;  %v9153_v1 = vsel %vm373_vm3, %v431_v56, %v433_v32 }
 0x191   : > { %13045 = vst [vmem:[#allocation123_spill] sm:$0xff] %v9098_v13  ;;  %2751 = vperm.xlu1 %6714, %v2608_v54   ;;  %v427_v13 = vrot.slane %v8617_v28, 5  ;;  %v435_v54 = vrot.slane %v8636_v39, 5  ;;  %v9127_v28 = vsel %vm373_vm3, %v411_v45, %v413_v26  ;;  %v445_v39 = vrot.slane %v8674_v40, 5  ;;  %v2609_v26 = vld [vmem:[%s12525_s1 + $0xd0] sm:$0xff]  ;;  %13047 = vst [vmem:[#allocation125_spill] sm:$0xff] %v9153_v1 }
 0x192   : > { %v9147_v45 = vsel %vm373_vm3, %v419_v11, %v421_v10  ;;  %2756 = vperm.xlu0 %6715, %v2609_v26   ;;  %v9165_v10 = vsel %vm373_vm3, %v437_v29, %v439_v8  ;;  %v9168_v11 = vsel %vm373_vm3, %v439_v8, %v441_v43  ;;  %v5928_v26 = vunpack.i.h.bf16 %v8082_v58 }
 0x193   : > { %v9121_v62 = vpop.permute.xlu1 %6565  ;;  %v9156_v40 = vsel %vm373_vm3, %v425_v57, %v427_v13  ;;  %13050 = vst [vmem:[#allocation128_spill] sm:$0xff] %v9165_v10  ;;  %13051 = vst [vmem:[#allocation129_spill] sm:$0xff] %v9168_v11  ;;  %v9171_v56 = vsel %vm373_vm3, %v433_v32, %v435_v54  ;;  %v2611_v57 = vld [vmem:[%s12525_s1 + $0xe0] sm:$0xff]  ;;  %v5917_v8 = vunpack.i.l.bf16 %v8085_v37  ;;  %v13055_v32 = vrot.slane %v8706_v48, 5  ;;  %v2614_v48 = vld [vmem:[%s12525_s1 + $0xf8] sm:$0xff] }
 0x194   : > { %v9135_v24 = vpop.permute.xlu0 %6560  ;;  %13048 = vst [vmem:[#allocation126_spill] sm:$0xff] %v9156_v40  ;;  %13052 = vst [vmem:[#allocation130_spill] sm:$0xff] %v9171_v56  ;;  %v9192_v56 = vsel %vm373_vm3, %v441_v43, %v443_v3  ;;  %v13060_v43 = vld [vmem:[#allocation29_spill] sm:$0xff]  ;;  %v13065_v40 = vld [vmem:[#allocation11_spill] sm:$0xff] }
 0x195   : > { %2761 = vperm.xlu1 %6714, %v2610_v59   ;;  %v9162_v59 = vsel %vm373_vm3, %v427_v13, %v429_v0  ;;  %v5927_v13 = vunpack.i.l.bf16 %v8082_v58  ;;  %v9181_v0 = vsel %vm373_vm3, %v435_v54, %v437_v29  ;;  %v9189_v11 = vsel %vm373_vm3, %v445_v39, %v13055_v32  ;;  %13057 = vst [vmem:[#allocation134_spill] sm:$0xff] %v9192_v56  ;;  %v13059_v29 = vld [vmem:[#allocation28_spill] sm:$0xff] }
 0x196   : > { %13049 = vst [vmem:[#allocation127_spill] sm:$0xff] %v9162_v59  ;;  %13054 = vst [vmem:[#allocation132_spill] sm:$0xff] %v9181_v0  ;;  %v9195_v59 = vsel %vm373_vm3, %v443_v3, %v445_v39  ;;  %v5918_v58 = vunpack.i.h.bf16 %v8085_v37  ;;  %v5933_v54 = vunpack.i.h.bf16 %v13059_v29  ;;  %2766 = vperm.xlu0 %6715, %v2611_v57   ;;  %v5932_v32 = vunpack.i.l.bf16 %v13059_v29  ;;  %v13062_v0 = vld [vmem:[#allocation30_spill] sm:$0xff] }
 0x197   : > { %v9173_v15 = vpop.permute.xlu1 %6575  ;;  %13056 = vst [vmem:[#allocation133_spill] sm:$0xff] %v9189_v11  ;;  %13058 = vst [vmem:[#allocation135_spill] sm:$0xff] %v9195_v59  ;;  %v5923_v11 = vunpack.i.h.bf16 %v13060_v43  ;;  %v5922_v39 = vunpack.i.l.bf16 %v13060_v43  ;;  %v9210_v37 = vsel %vm1876_vm8, %v9000_v5, %v5928_v26  ;;  %v5943_v4 = vunpack.i.h.bf16 %v13062_v0  ;;  %v13064_v43 = vld [vmem:[#allocation31_spill] sm:$0xff]  ;;  %v2613_v5 = vld [vmem:[%s12525_s1 + $0xf0] sm:$0xff] }
 0x198   : > { %13053 = vst [vmem:[#allocation131_spill] sm:$0xff] %v9173_v15  ;;  %v9183_v10 = vpop.permute.xlu0 %6570  ;;  %v5942_v57 = vunpack.i.l.bf16 %v13062_v0  ;;  %v1877_v59 = vsel %vm1876_vm8, 0.0, %v5917_v8  ;;  %v5938_v56 = vunpack.i.h.bf16 %v13064_v43  ;;  %v6022_v22 = vunpack.i.l.bf16 %v13065_v40 }
 0x199   : > { %2771 = vperm.xlu1 %6714, %v2612_v31   ;;  %v9214_v31 = vsel %vm1876_vm8, %v9003_v41, %v5927_v13  ;;  %v1878_v41 = vsel %vm1876_vm8, %v9017_v47, %v5918_v58  ;;  %v9231_v26 = vsel %vm1876_vm8, %v9023_v60, %v5933_v54  ;;  %v13066_v13 = vld [vmem:[#allocation16_spill] sm:$0xff]  ;;  %v9244_v47 = vsel %vm1876_vm8, %v9040_v25, %v5923_v11  ;;  %v13069_v25 = vld [vmem:[#allocation41_spill] sm:$0xff] }
 0x19a   : > { %v6018_v0 = vunpack.i.h.bf16 %v13066_v13  ;;  %v6017_v8 = vunpack.i.l.bf16 %v13066_v13  ;;  %2776 = vperm.xlu0 %6715, %v2613_v5   ;;  %v1879_v60 = vsel %vm1876_vm8, %v9043_v27, %v5922_v39  ;;  %v13067_v58 = vld [vmem:[#allocation40_spill] sm:$0xff]  ;;  %v2615_v13 = vld [vmem:[%s12525_s1 + $0x100] sm:$0xff]  ;;  %v9256_v5 = vsel %vm1876_vm8, %v9049_v19, %v5943_v4 }
 0x19b   : > { %v9206_v3 = vpop.permute.xlu1 %6585  ;;  %v6122_v54 = vunpack.i.l.bf16 %v13067_v58  ;;  %v6118_v11 = vunpack.i.h.bf16 %v13069_v25  ;;  %v6117_v27 = vunpack.i.l.bf16 %v13069_v25  ;;  %v9268_v39 = vsel %vm1876_vm8, %v9063_v35, %v5938_v56  ;;  %v2618_v35 = vld [vmem:[%s12525_s1 + $0x118] sm:$0xff] }
 0x19c   : > { %13061 = vst [vmem:[#allocation28_spill] sm:$0xff] %v9206_v3  ;;  %v9218_v29 = vpop.permute.xlu0 %6580  ;;  %v5937_v3 = vunpack.i.l.bf16 %v13064_v43  ;;  %v2616_v43 = vld [vmem:[%s12525_s1 + $0x108] sm:$0xff]  ;;  %v1920_v4 = vsel %vm1917_vm9, %v1879_v60, %v6022_v22  ;;  %v1919_v19 = vsel %vm1917_vm9, %v1878_v41, %v6018_v0  ;;  %v13073_v56 = vld [vmem:[#allocation85_spill] sm:$0xff]  ;;  %v6417_v60 = vunpack.i.l.bf16 %v8877_v53 }
 0x19d   : > { %13063 = vst [vmem:[#allocation29_spill] sm:$0xff] %v9218_v29  ;;  %2781 = vperm.xlu1 %6714, %v2614_v48   ;;  %v9240_v48 = vsel %vm1876_vm8, %v9020_v14, %v5932_v32  ;;  %v9260_v14 = vsel %vm1876_vm8, %v9046_v34, %v5942_v57  ;;  %v9276_v34 = vsel %vm1917_vm9, %v1877_v59, %v6017_v8  ;;  %v13072_v57 = vld [vmem:[#allocation60_spill] sm:$0xff]  ;;  %v6317_v59 = vunpack.i.l.bf16 %v13073_v56 }
 0x19e   : > { %13071 = vst [vmem:[#allocation11_spill] sm:$0xff] %v9276_v34  ;;  %v6218_v25 = vunpack.i.h.bf16 %v13072_v57  ;;  %2786 = vperm.xlu0 %6715, %v2615_v13   ;;  %v1961_v22 = vsel %vm1958_vm10, %v1919_v19, %v6122_v54  ;;  %v1959_v41 = vsel %vm1958_vm10, %v9276_v34, %v6117_v27  ;;  %v1960_v0 = vsel %vm1958_vm10, %v9276_v34, %v6118_v11  ;;  %v2617_v27 = vld [vmem:[%s12525_s1 + $0x110] sm:$0xff]  ;;  %v2620_v34 = vld [vmem:[%s12525_s1 + $0x128] sm:$0xff] }
 0x19f   : > { %v9249_v1 = vpop.permute.xlu1 %6595  ;;  %v6517_v54 = vunpack.i.l.bf16 %v8973_v63  ;;  %v6422_v15 = vunpack.i.l.bf16 %v8890_v61 }
 0x1a0   : > { %13068 = vst [vmem:[#allocation30_spill] sm:$0xff] %v9249_v1  ;;  %v9264_v32 = vpop.permute.xlu0 %6590  ;;  %v9272_v1 = vsel %vm1876_vm8, %v9054_v55, %v5937_v3  ;;  %v6123_v55 = vunpack.i.h.bf16 %v13067_v58  ;;  %v6318_v3 = vunpack.i.h.bf16 %v13073_v56  ;;  %v6518_v58 = vunpack.i.h.bf16 %v8973_v63 }
 0x1a1   : > { %13070 = vst [vmem:[#allocation31_spill] sm:$0xff] %v9264_v32  ;;  %2791 = vperm.xlu1 %6714, %v2616_v43   ;;  %v6217_v32 = vunpack.i.l.bf16 %v13072_v57  ;;  %v6418_v43 = vunpack.i.h.bf16 %v8877_v53  ;;  %v2002_v11 = vsel %vm2000_vm11, %v1960_v0, %v6218_v25  ;;  %v13076_v57 = vld [vmem:[#allocation63_spill] sm:$0xff] }
 0x1a2   : > { %v6223_v56 = vunpack.i.h.bf16 %v13076_v57  ;;  %v6222_v53 = vunpack.i.l.bf16 %v13076_v57  ;;  %2796 = vperm.xlu0 %6715, %v2617_v27   ;;  %v13077_v27 = vld [vmem:[#allocation84_spill] sm:$0xff] }
 0x1a3   : > { %v9288_v8 = vpop.permute.xlu1 %6605  ;;  %v2001_v19 = vsel %vm2000_vm11, %v1959_v41, %v6217_v32  ;;  %v2619_v32 = vld [vmem:[%s12525_s1 + $0x120] sm:$0xff]  ;;  %v6323_v29 = vunpack.i.h.bf16 %v13077_v27 }
 0x1a4   : > { %13074 = vst [vmem:[#allocation16_spill] sm:$0xff] %v9288_v8  ;;  %v9296_v13 = vpop.permute.xlu0 %6600  ;;  %v2043_v63 = vsel %vm2042_vm12, %v2001_v19, %v6317_v59  ;;  %v6322_v59 = vunpack.i.l.bf16 %v13077_v27 }
 0x1a5   : > { %13075 = vst [vmem:[#allocation40_spill] sm:$0xff] %v9296_v13  ;;  %2801 = vperm.xlu1 %6714, %v2618_v35   ;;  %v2044_v35 = vsel %vm2042_vm12, %v2002_v11, %v6318_v3  ;;  %v2085_v25 = vsel %vm2084_vm13, %v2043_v63, %v6417_v60  ;;  %v6423_v11 = vunpack.i.h.bf16 %v8890_v61  ;;  %v1962_v63 = vsel %vm1958_vm10, %v1920_v4, %v6123_v55  ;;  %v13079_v55 = vld [vmem:[#allocation18_spill] sm:$0xff] }
 0x1a6   : > { %v2086_v41 = vsel %vm2084_vm13, %v2044_v35, %v6418_v43  ;;  %v2127_v3 = vsel %vm2126_vm14, %v2085_v25, %v6517_v54  ;;  %2806 = vperm.xlu0 %6715, %v2619_v32   ;;  %v6523_v54 = vunpack.i.h.bf16 %v8988_v20  ;;  %v13078_v35 = vld [vmem:[#allocation32_spill] sm:$0xff]  ;;  %v6023_v61 = vunpack.i.h.bf16 %v13065_v40 }
 0x1a7   : > { %v6616_v8 = vpop.permute.xlu1 %6615  ;;  %v2128_v19 = vsel %vm2126_vm14, %v2086_v41, %v6518_v58  ;;  %v6522_v58 = vunpack.i.l.bf16 %v8988_v20  ;;  %v5953_v25 = vunpack.i.h.bf16 %v13078_v35  ;;  %v2003_v41 = vsel %vm2000_vm11, %v1961_v22, %v6222_v53  ;;  %v2621_v20 = vld [vmem:[%s12525_s1 + $0x130] sm:$0xff] }
 0x1a8   : > { %v6618_v0 = vunpack.i.h.bf16 %v6616_v8  ;;  %v6617_v57 = vunpack.i.l.bf16 %v6616_v8  ;;  %v9317_v13 = vpop.permute.xlu0 %6610  ;;  %v2622_v8 = vld [vmem:[%s12525_s1 + $0x138] sm:$0xff]  ;;  %v2045_v27 = vsel %vm2042_vm12, %v2003_v41, %v6322_v59  ;;  %v6027_v40 = vunpack.i.l.bf16 %v13079_v55 }
 0x1a9   : > { %2811 = vperm.xlu1 %6714, %v2620_v34  }
 0x1aa   : > { %v2169_v60 = vsel %vm2168_vm15, %v2127_v3, %v6617_v57  ;;  %v2170_v43 = vsel %vm2168_vm15, %v2128_v19, %v6618_v0  ;;  %v2004_v0 = vsel %vm2000_vm11, %v1962_v63, %v6223_v56  ;;  %v13080_v19 = vld [vmem:[#allocation43_spill] sm:$0xff]  ;;  %v2087_v56 = vsel %vm2084_vm13, %v2045_v27, %v6422_v15  ;;  %2816 = vperm.xlu0 %6715, %v2621_v20   ;;  %v13081_v63 = vld [vmem:[#allocation62_spill] sm:$0xff] }
 0x1ab   : > { %v2210_v34 = vpack.c.bf16 %v2170_v43, %v2169_v60  ;;  %v2046_v32 = vsel %vm2042_vm12, %v2004_v0, %v6323_v29  ;;  %v6127_v22 = vunpack.i.l.bf16 %v13080_v19  ;;  %v5952_v29 = vunpack.i.l.bf16 %v13078_v35  ;;  %v13082_v0 = vld [vmem:[#allocation33_spill] sm:$0xff] }
 0x1ac   : > { %v6621_v57 = vpop.permute.xlu0 %6620  ;;  %v2088_v53 = vsel %vm2084_vm13, %v2046_v32, %v6423_v11  ;;  %v6128_v59 = vunpack.i.h.bf16 %v13080_v19  ;;  %v2129_v60 = vsel %vm2126_vm14, %v2087_v56, %v6522_v58  ;;  %v6228_v15 = vunpack.i.h.bf16 %v13081_v63  ;;  %v13083_v58 = vld [vmem:[#allocation87_spill] sm:$0xff]  ;;  %v6626_v32 = vpop.permute.xlu1 %6625 }
 0x1ad   : > { %v6623_v3 = vunpack.i.h.bf16 %v6621_v57  ;;  %v6622_v4 = vunpack.i.l.bf16 %v6621_v57  ;;  %5715 = vmatmul.mubr.msk.bf16.vlgmr.msra.gmra.mrb[0].mxu0 %vm2274_vm5, %v2210_v34  ;;  %2821 = vperm.xlu1 %6714, %v2622_v8   ;;  %v2130_v43 = vsel %vm2126_vm14, %v2088_v53, %v6523_v54  ;;  %v2623_v8 = vld [vmem:[%s12525_s1 + $0x140] sm:$0xf]  ;;  %v6227_v11 = vunpack.i.l.bf16 %v13081_v63 }
 0x1ae   : > { %5718 = vmatprep.mubr.msk.bf16.mxu0 %vm7559_vm7, %v12985_v30  ;;  %v5948_v35 = vunpack.i.h.bf16 %v13082_v0  ;;  %v1921_v57 = vsel %vm1917_vm9, %v9244_v47, %v6023_v61  ;;  %v6328_v27 = vunpack.i.h.bf16 %v13083_v58  ;;  %v6327_v54 = vunpack.i.l.bf16 %v13083_v58  ;;  %2826 = vperm.xlu0 %6715, %v2623_v8  }
 0x1af   : > { %v2171_v34 = vsel %vm2168_vm15, %v2129_v60, %v6622_v4  ;;  %v2172_v41 = vsel %vm2168_vm15, %v2130_v43, %v6623_v3  ;;  %v1922_v20 = vsel %vm1917_vm9, %v9214_v31, %v6027_v40  ;;  %v1963_v19 = vsel %vm1958_vm10, %v1921_v57, %v6127_v22 }
 0x1b0   : > { %v6428_v56 = vunpack.i.h.bf16 %v8888_v50  ;;  %v6427_v4 = vunpack.i.l.bf16 %v8888_v50  ;;  %v1964_v3 = vsel %vm1958_vm10, %v1922_v20, %v6128_v59  ;;  %v6528_v53 = vunpack.i.h.bf16 %v8986_v16  ;;  %v13084_v59 = vld [vmem:[#allocation17_spill] sm:$0xff] }
 0x1b1   : > { %v6527_v47 = vunpack.i.l.bf16 %v8986_v16  ;;  %v2211_v61 = vpack.c.bf16 %v2172_v41, %v2171_v34  ;;  %v2005_v60 = vsel %vm2000_vm11, %v1963_v19, %v6227_v11  ;;  %v2006_v43 = vsel %vm2000_vm11, %v1964_v3, %v6228_v15  ;;  %v13085_v16 = vld [vmem:[#allocation42_spill] sm:$0xff] }
 0x1b2   : > { %v6628_v63 = vunpack.i.h.bf16 %v6626_v32  ;;  %v6627_v31 = vunpack.i.l.bf16 %v6626_v32  ;;  %v5947_v40 = vunpack.i.l.bf16 %v13082_v0  ;;  %v6028_v22 = vunpack.i.h.bf16 %v13079_v55 }
 0x1b3   : > { %v2047_v50 = vsel %vm2042_vm12, %v2005_v60, %v6327_v54  ;;  %v2048_v8 = vsel %vm2042_vm12, %v2006_v43, %v6328_v27  ;;  %v6032_v57 = vunpack.i.l.bf16 %v13084_v59  ;;  %v6132_v34 = vunpack.i.l.bf16 %v13085_v16  ;;  %v13086_v27 = vld [vmem:[#allocation65_spill] sm:$0xff] }
 0x1b4   : > { %v2089_v11 = vsel %vm2084_vm13, %v2047_v50, %v6427_v4  ;;  %v2090_v15 = vsel %vm2084_vm13, %v2048_v8, %v6428_v56  ;;  %v9388_v55 = vsel %vm1876_vm8, %v9069_v38, %v5953_v25  ;;  %v6133_v41 = vunpack.i.h.bf16 %v13085_v16  ;;  %v13087_v25 = vld [vmem:[#allocation86_spill] sm:$0xff] }
 0x1b5   : > { %5719 = vmatmul.mubr.msk.bf16.gmra.mrb[4].mxu0 %vm2274_vm5, %v2211_v61  ;;  %v2131_v0 = vsel %vm2126_vm14, %v2089_v11, %v6527_v47  ;;  %v2132_v58 = vsel %vm2126_vm14, %v2090_v15, %v6528_v53  ;;  %v6233_v54 = vunpack.i.h.bf16 %v13086_v27  ;;  %v6232_v32 = vunpack.i.l.bf16 %v13086_v27  ;;  %v6631_v53 = vpop.permute.xlu0 %6630  ;;  %v13089_v11 = vld [vmem:[#allocation45_spill] sm:$0xff]  ;;  %v13090_v27 = vld [vmem:[#allocation64_spill] sm:$0xff] }
 0x1b6   : > { %5722 = vmatprep.mubr.msk.bf16.mxu0 %vm7559_vm7, %v12985_v30  ;;  %v2173_v20 = vsel %vm2168_vm15, %v2131_v0, %v6627_v31  ;;  %v2174_v19 = vsel %vm2168_vm15, %v2132_v58, %v6628_v63  ;;  %v9399_v56 = vsel %vm1876_vm8, %v9066_v23, %v5952_v29  ;;  %v1923_v38 = vsel %vm1917_vm9, %v9210_v37, %v6028_v22 }
 0x1b7   : > { %v6333_v4 = vunpack.i.h.bf16 %v13087_v25  ;;  %v6332_v3 = vunpack.i.l.bf16 %v13087_v25  ;;  %v1924_v47 = vsel %vm1917_vm9, %v9240_v48, %v6032_v57  ;;  %v1965_v61 = vsel %vm1958_vm10, %v1923_v38, %v6132_v34  ;;  %v13091_v38 = vld [vmem:[#allocation2_spill] sm:$0xff] }
 0x1b8   : > { %v6433_v60 = vunpack.i.h.bf16 %v8898_v6  ;;  %v6432_v43 = vunpack.i.l.bf16 %v8898_v6  ;;  %v1966_v23 = vsel %vm1958_vm10, %v1924_v47, %v6133_v41  ;;  %v6533_v29 = vunpack.i.h.bf16 %v9014_v49 }
 0x1b9   : > { %v6532_v37 = vunpack.i.l.bf16 %v9014_v49  ;;  %v2212_v63 = vpack.c.bf16 %v2174_v19, %v2173_v20  ;;  %v2008_v31 = vsel %vm2000_vm11, %v1966_v23, %v6233_v54  ;;  %v2007_v22 = vsel %vm2000_vm11, %v1965_v61, %v6232_v32  ;;  %v13088_v49 = vld [vmem:[#allocation20_spill] sm:$0xff] }
 0x1ba   : > { %v6633_v50 = vunpack.i.h.bf16 %v6631_v53  ;;  %v6632_v8 = vunpack.i.l.bf16 %v6631_v53  ;;  %v9417_v48 = vsel %vm1876_vm8, %v9078_v9, %v5948_v35  ;;  %v6033_v57 = vunpack.i.h.bf16 %v13084_v59  ;;  %v6636_v53 = vpop.permute.xlu1 %6635 }
 0x1bb   : > { %v2049_v6 = vsel %vm2042_vm12, %v2007_v22, %v6332_v3  ;;  %v2050_v16 = vsel %vm2042_vm12, %v2008_v31, %v6333_v4  ;;  %v6037_v34 = vunpack.i.l.bf16 %v13088_v49  ;;  %v6137_v15 = vunpack.i.l.bf16 %v13089_v11 }
 0x1bc   : > { %v2091_v41 = vsel %vm2084_vm13, %v2049_v6, %v6432_v43  ;;  %v2092_v0 = vsel %vm2084_vm13, %v2050_v16, %v6433_v60  ;;  %v9431_v9 = vsel %vm1876_vm8, %v9072_v2, %v5947_v40  ;;  %v6138_v35 = vunpack.i.h.bf16 %v13089_v11  ;;  %v13092_v40 = vld [vmem:[#allocation89_spill] sm:$0xff]  ;;  %v13093_v6 = vld [vmem:[#allocation15_spill] sm:$0xff] }
 0x1bd   : > { %5723 = vmatmul.mubr.msk.bf16.gmra.mrb[8].mxu0 %vm2274_vm5, %v2212_v63  ;;  %v2133_v59 = vsel %vm2126_vm14, %v2091_v41, %v6532_v37  ;;  %v2134_v58 = vsel %vm2126_vm14, %v2092_v0, %v6533_v29  ;;  %v6238_v54 = vunpack.i.h.bf16 %v13090_v27  ;;  %v6237_v32 = vunpack.i.l.bf16 %v13090_v27  ;;  %v13095_v41 = vld [vmem:[#allocation4_spill] sm:$0xff] }
 0x1be   : > { %5726 = vmatprep.mubr.msk.bf16.mxu0 %vm7559_vm7, %v12985_v30  ;;  %v2175_v20 = vsel %vm2168_vm15, %v2133_v59, %v6632_v8  ;;  %v2176_v19 = vsel %vm2168_vm15, %v2134_v58, %v6633_v50  ;;  %v5963_v25 = vunpack.i.h.bf16 %v13091_v38  ;;  %v1925_v2 = vsel %vm1917_vm9, %v9231_v26, %v6033_v57  ;;  %v13096_v58 = vld [vmem:[#allocation67_spill] sm:$0xff] }
 0x1bf   : > { %v6338_v4 = vunpack.i.h.bf16 %v13092_v40  ;;  %v6337_v3 = vunpack.i.l.bf16 %v13092_v40  ;;  %v1926_v47 = vsel %vm1917_vm9, %v9272_v1, %v6037_v34  ;;  %v1967_v61 = vsel %vm1958_vm10, %v1925_v2, %v6137_v15  ;;  %v13097_v2 = vld [vmem:[#allocation88_spill] sm:$0xff] }
 0x1c0   : > { %v6438_v60 = vunpack.i.h.bf16 %v8896_v33  ;;  %v6437_v43 = vunpack.i.l.bf16 %v8896_v33  ;;  %v1968_v23 = vsel %vm1958_vm10, %v1926_v47, %v6138_v35  ;;  %v6538_v29 = vunpack.i.h.bf16 %v9005_v46 }
 0x1c1   : > { %v6537_v26 = vunpack.i.l.bf16 %v9005_v46  ;;  %v2213_v37 = vpack.c.bf16 %v2176_v19, %v2175_v20  ;;  %v2009_v63 = vsel %vm2000_vm11, %v1967_v61, %v6237_v32  ;;  %v2010_v31 = vsel %vm2000_vm11, %v1968_v23, %v6238_v54  ;;  %v13094_v46 = vld [vmem:[#allocation44_spill] sm:$0xff]  ;;  %v13098_v61 = vld [vmem:[#allocation106_spill] sm:$0xff] }
 0x1c2   : > { %v6638_v22 = vunpack.i.h.bf16 %v6636_v53  ;;  %v6637_v50 = vunpack.i.l.bf16 %v6636_v53  ;;  %v5962_v1 = vunpack.i.l.bf16 %v13091_v38  ;;  %v6038_v8 = vunpack.i.h.bf16 %v13088_v49 }
 0x1c3   : > { %v2051_v57 = vsel %vm2042_vm12, %v2009_v63, %v6337_v3  ;;  %v2052_v33 = vsel %vm2042_vm12, %v2010_v31, %v6338_v4  ;;  %v6042_v16 = vunpack.i.l.bf16 %v13093_v6  ;;  %v6142_v34 = vunpack.i.l.bf16 %v13094_v46  ;;  %v6641_v3 = vpop.permute.xlu0 %6640 }
 0x1c4   : > { %v2093_v11 = vsel %vm2084_vm13, %v2051_v57, %v6437_v43  ;;  %v2094_v15 = vsel %vm2084_vm13, %v2052_v33, %v6438_v60  ;;  %v5958_v0 = vunpack.i.h.bf16 %v13095_v41  ;;  %v6143_v49 = vunpack.i.h.bf16 %v13094_v46 }
 0x1c5   : > { %5727 = vmatmul.mubr.msk.bf16.gmra.mrb[12].mxu0 %vm2274_vm5, %v2213_v37  ;;  %v2135_v35 = vsel %vm2126_vm14, %v2093_v11, %v6537_v26  ;;  %v2136_v59 = vsel %vm2126_vm14, %v2094_v15, %v6538_v29  ;;  %v6243_v27 = vunpack.i.h.bf16 %v13096_v58  ;;  %v6242_v54 = vunpack.i.l.bf16 %v13096_v58 }
 0x1c6   : > { %5730 = vmatprep.mubr.msk.bf16.mxu0 %vm7559_vm7, %v12985_v30  ;;  %v2177_v32 = vsel %vm2168_vm15, %v2135_v35, %v6637_v50  ;;  %v2178_v20 = vsel %vm2168_vm15, %v2136_v59, %v6638_v22  ;;  %v5957_v19 = vunpack.i.l.bf16 %v13095_v41  ;;  %v1927_v38 = vsel %vm1917_vm9, %v9268_v39, %v6038_v8 }
 0x1c7   : > { %v6343_v40 = vunpack.i.h.bf16 %v13097_v2  ;;  %v6342_v4 = vunpack.i.l.bf16 %v13097_v2  ;;  %v1928_v53 = vsel %vm1917_vm9, %v9260_v14, %v6042_v16  ;;  %v1969_v47 = vsel %vm1958_vm10, %v1927_v38, %v6142_v34  ;;  %v13100_v16 = vld [vmem:[#allocation47_spill] sm:$0xff]  ;;  %v6646_v2 = vpop.permute.xlu1 %6645 }
 0x1c8   : > { %v6443_v60 = vunpack.i.h.bf16 %v13098_v61  ;;  %v6442_v43 = vunpack.i.l.bf16 %v13098_v61  ;;  %v1970_v23 = vsel %vm1958_vm10, %v1928_v53, %v6143_v49  ;;  %v6543_v29 = vunpack.i.h.bf16 %v9051_v17  ;;  %v13102_v49 = vld [vmem:[#allocation66_spill] sm:$0xff] }
 0x1c9   : > { %v6542_v39 = vunpack.i.l.bf16 %v9051_v17  ;;  %v2214_v26 = vpack.c.bf16 %v2178_v20, %v2177_v32  ;;  %v2012_v37 = vsel %vm2000_vm11, %v1970_v23, %v6243_v27  ;;  %v2011_v63 = vsel %vm2000_vm11, %v1969_v47, %v6242_v54  ;;  %v13099_v17 = vld [vmem:[#allocation22_spill] sm:$0xff]  ;;  %v13103_v32 = vld [vmem:[#allocation91_spill] sm:$0xff] }
 0x1ca   : > { %v6643_v31 = vunpack.i.h.bf16 %v6641_v3  ;;  %v6642_v22 = vunpack.i.l.bf16 %v6641_v3  ;;  %v9491_v14 = vsel %vm1876_vm8, %v9084_v42, %v5963_v25  ;;  %v6043_v50 = vunpack.i.h.bf16 %v13093_v6  ;;  %v13101_v42 = vld [vmem:[#allocation121_spill] sm:$0xff] }
 0x1cb   : > { %v2053_v8 = vsel %vm2042_vm12, %v2011_v63, %v6342_v4  ;;  %v2054_v57 = vsel %vm2042_vm12, %v2012_v37, %v6343_v40  ;;  %v6047_v33 = vunpack.i.l.bf16 %v13099_v17  ;;  %v6147_v46 = vunpack.i.l.bf16 %v13100_v16  ;;  %v13104_v3 = vld [vmem:[#allocation105_spill] sm:$0xff] }
 0x1cc   : > { %v2095_v34 = vsel %vm2084_vm13, %v2053_v8, %v6442_v43  ;;  %v2096_v11 = vsel %vm2084_vm13, %v2054_v57, %v6443_v60  ;;  %v9505_v25 = vsel %vm1876_vm8, %v13101_v42, %v5962_v1  ;;  %v6148_v6 = vunpack.i.h.bf16 %v13100_v16 }
 0x1cd   : > { %5731 = vmatmul.mubr.msk.bf16.gmra.mrb[16].mxu0 %vm2274_vm5, %v2214_v26  ;;  %v2137_v15 = vsel %vm2126_vm14, %v2095_v34, %v6542_v39  ;;  %v2138_v41 = vsel %vm2126_vm14, %v2096_v11, %v6543_v29  ;;  %v6248_v35 = vunpack.i.h.bf16 %v13102_v49  ;;  %v6247_v59 = vunpack.i.l.bf16 %v13102_v49  ;;  %v13109_v34 = vld [vmem:[#allocation69_spill] sm:$0xff] }
 0x1ce   : > { %5734 = vmatprep.mubr.msk.bf16.mxu0 %vm7559_vm7, %v12985_v30  ;;  %v2179_v58 = vsel %vm2168_vm15, %v2137_v15, %v6642_v22  ;;  %v2180_v27 = vsel %vm2168_vm15, %v2138_v41, %v6643_v31  ;;  %v9516_v54 = vsel %vm1876_vm8, %v9101_v21, %v5958_v0  ;;  %v1929_v1 = vsel %vm1917_vm9, %v9256_v5, %v6043_v50  ;;  %v13105_v0 = vld [vmem:[#allocation120_spill] sm:$0xff]  ;;  %v13106_v31 = vld [vmem:[#allocation21_spill] sm:$0xff]  ;;  %v13107_v50 = vld [vmem:[#allocation46_spill] sm:$0xff] }
 0x1cf   : > { %v6348_v20 = vunpack.i.h.bf16 %v13103_v32  ;;  %v6347_v38 = vunpack.i.l.bf16 %v13103_v32  ;;  %v1930_v40 = vsel %vm1917_vm9, %v9431_v9, %v6047_v33  ;;  %v1971_v4 = vsel %vm1958_vm10, %v1929_v1, %v6147_v46 }
 0x1d0   : > { %v6448_v53 = vunpack.i.h.bf16 %v13104_v3  ;;  %v6447_v47 = vunpack.i.l.bf16 %v13104_v3  ;;  %v1972_v21 = vsel %vm1958_vm10, %v1930_v40, %v6148_v6  ;;  %v6548_v61 = vunpack.i.h.bf16 %v13105_v0 }
 0x1d1   : > { %v6547_v5 = vunpack.i.l.bf16 %v13105_v0  ;;  %v2215_v60 = vpack.c.bf16 %v2180_v27, %v2179_v58  ;;  %v2013_v43 = vsel %vm2000_vm11, %v1971_v4, %v6247_v59  ;;  %v2014_v23 = vsel %vm2000_vm11, %v1972_v21, %v6248_v35  ;;  %v13110_v35 = vld [vmem:[#allocation90_spill] sm:$0xff]  ;;  %v6651_v27 = vpop.permute.xlu0 %6650  ;;  %v13112_v4 = vld [vmem:[#allocation123_spill] sm:$0xff] }
 0x1d2   : > { %v6648_v29 = vunpack.i.h.bf16 %v6646_v2  ;;  %v6647_v39 = vunpack.i.l.bf16 %v6646_v2  ;;  %v1893_v9 = vsel %vm1876_vm8, %v9087_v7, %v5957_v19  ;;  %v6048_v26 = vunpack.i.h.bf16 %v13099_v17  ;;  %v13108_v7 = vld [vmem:[#allocation5_spill] sm:$0xff] }
 0x1d3   : > { %v2055_v37 = vsel %vm2042_vm12, %v2013_v43, %v6347_v38  ;;  %v2056_v63 = vsel %vm2042_vm12, %v2014_v23, %v6348_v20  ;;  %v6052_v22 = vunpack.i.l.bf16 %v13106_v31  ;;  %v6152_v8 = vunpack.i.l.bf16 %v13107_v50  ;;  %v13111_v20 = vld [vmem:[#allocation108_spill] sm:$0xff] }
 0x1d4   : > { %v2097_v57 = vsel %vm2084_vm13, %v2055_v37, %v6447_v47  ;;  %v2098_v33 = vsel %vm2084_vm13, %v2056_v63, %v6448_v53  ;;  %v5973_v19 = vunpack.i.h.bf16 %v13108_v7  ;;  %v6153_v17 = vunpack.i.h.bf16 %v13107_v50 }
 0x1d5   : > { %5735 = vmatmul.mubr.msk.bf16.gmra.mrb[20].mxu0 %vm2274_vm5, %v2215_v60  ;;  %v2139_v16 = vsel %vm2126_vm14, %v2097_v57, %v6547_v5  ;;  %v2140_v46 = vsel %vm2126_vm14, %v2098_v33, %v6548_v61  ;;  %v6253_v11 = vunpack.i.h.bf16 %v13109_v34  ;;  %v6252_v42 = vunpack.i.l.bf16 %v13109_v34  ;;  %v13116_v33 = vld [vmem:[#allocation68_spill] sm:$0xff] }
 0x1d6   : > { %5738 = vmatprep.mubr.msk.bf16.mxu0 %vm7559_vm7, %v12985_v30  ;;  %v2181_v6 = vsel %vm2168_vm15, %v2139_v16, %v6647_v39  ;;  %v2182_v15 = vsel %vm2168_vm15, %v2140_v46, %v6648_v29  ;;  %v5972_v41 = vunpack.i.l.bf16 %v13108_v7  ;;  %v1931_v49 = vsel %vm1917_vm9, %v9417_v48, %v6048_v26  ;;  %v13114_v29 = vld [vmem:[#allocation24_spill] sm:$0xff]  ;;  %v13115_v26 = vld [vmem:[#allocation49_spill] sm:$0xff] }
 0x1d7   : > { %v6353_v59 = vunpack.i.h.bf16 %v13110_v35  ;;  %v6352_v58 = vunpack.i.l.bf16 %v13110_v35  ;;  %v1932_v1 = vsel %vm1917_vm9, %v9399_v56, %v6052_v22  ;;  %v1973_v32 = vsel %vm1958_vm10, %v1931_v49, %v6152_v8  ;;  %v13113_v56 = vld [vmem:[#allocation6_spill] sm:$0xff]  ;;  %v6656_v49 = vpop.permute.xlu1 %6655 }
 0x1d8   : > { %v6453_v38 = vunpack.i.h.bf16 %v13111_v20  ;;  %v6452_v2 = vunpack.i.l.bf16 %v13111_v20  ;;  %v1974_v40 = vsel %vm1958_vm10, %v1932_v1, %v6153_v17  ;;  %v6553_v3 = vunpack.i.h.bf16 %v13112_v4 }
 0x1d9   : > { %v6552_v48 = vunpack.i.l.bf16 %v13112_v4  ;;  %v2216_v53 = vpack.c.bf16 %v2182_v15, %v2181_v6  ;;  %v2016_v47 = vsel %vm2000_vm11, %v1974_v40, %v6253_v11  ;;  %v2015_v21 = vsel %vm2000_vm11, %v1973_v32, %v6252_v42  ;;  %v13117_v42 = vld [vmem:[#allocation93_spill] sm:$0xff] }
 0x1da   : > { %v6653_v0 = vunpack.i.h.bf16 %v6651_v27  ;;  %v6652_v61 = vunpack.i.l.bf16 %v6651_v27  ;;  %v5968_v5 = vunpack.i.h.bf16 %v13113_v56  ;;  %v6053_v60 = vunpack.i.h.bf16 %v13106_v31 }
 0x1db   : > { %v2057_v43 = vsel %vm2042_vm12, %v2015_v21, %v6352_v58  ;;  %v2058_v23 = vsel %vm2042_vm12, %v2016_v47, %v6353_v59  ;;  %v6057_v39 = vunpack.i.l.bf16 %v13114_v29  ;;  %v6157_v37 = vunpack.i.l.bf16 %v13115_v26  ;;  %v13118_v58 = vld [vmem:[#allocation107_spill] sm:$0xff] }
 0x1dc   : > { %v2099_v63 = vsel %vm2084_vm13, %v2057_v43, %v6452_v2  ;;  %v2100_v22 = vsel %vm2084_vm13, %v2058_v23, %v6453_v38  ;;  %v5967_v50 = vunpack.i.l.bf16 %v13113_v56  ;;  %v6158_v31 = vunpack.i.h.bf16 %v13115_v26  ;;  %v13120_v47 = vld [vmem:[#allocation19_spill] sm:$0xff] }
 0x1dd   : > { %5739 = vmatmul.mubr.msk.bf16.gmra.mrb[24].mxu0 %vm2274_vm5, %v2216_v53  ;;  %v2141_v8 = vsel %vm2126_vm14, %v2099_v63, %v6552_v48  ;;  %v2142_v57 = vsel %vm2126_vm14, %v2100_v22, %v6553_v3  ;;  %v6258_v7 = vunpack.i.h.bf16 %v13116_v33  ;;  %v6257_v17 = vunpack.i.l.bf16 %v13116_v33 }
 0x1de   : > { %5742 = vmatprep.mubr.msk.bf16.mxu0 %vm7559_vm7, %v12985_v30  ;;  %v2183_v16 = vsel %vm2168_vm15, %v2141_v8, %v6652_v61  ;;  %v2184_v46 = vsel %vm2168_vm15, %v2142_v57, %v6653_v0  ;;  %v9588_v34 = vsel %vm1876_vm8, %v9107_v36, %v5973_v19  ;;  %v1933_v11 = vsel %vm1917_vm9, %v9388_v55, %v6053_v60  ;;  %v13119_v36 = vld [vmem:[#allocation122_spill] sm:$0xff]  ;;  %v13121_v0 = vld [vmem:[#allocation48_spill] sm:$0xff]  ;;  %v6661_v57 = vpop.permute.xlu0 %6660 }
 0x1df   : > { %v6358_v6 = vunpack.i.h.bf16 %v13117_v42  ;;  %v6357_v15 = vunpack.i.l.bf16 %v13117_v42  ;;  %v1934_v35 = vsel %vm1917_vm9, %v1893_v9, %v6057_v39  ;;  %v1975_v59 = vsel %vm1958_vm10, %v1933_v11, %v6157_v37 }
 0x1e0   : > { %v6458_v27 = vunpack.i.h.bf16 %v13118_v58  ;;  %v6457_v1 = vunpack.i.l.bf16 %v13118_v58  ;;  %v1976_v32 = vsel %vm1958_vm10, %v1934_v35, %v6158_v31  ;;  %v6558_v19 = vunpack.i.h.bf16 %v13119_v36 }
 0x1e1   : > { %v6557_v20 = vunpack.i.l.bf16 %v13119_v36  ;;  %v2217_v55 = vpack.c.bf16 %v2184_v46, %v2183_v16  ;;  %v2017_v38 = vsel %vm2000_vm11, %v1975_v59, %v6257_v17  ;;  %v2018_v2 = vsel %vm2000_vm11, %v1976_v32, %v6258_v7  ;;  %v13124_v17 = vld [vmem:[#allocation110_spill] sm:$0xff] }
 0x1e2   : > { %v6658_v40 = vunpack.i.h.bf16 %v6656_v49  ;;  %v6657_v4 = vunpack.i.l.bf16 %v6656_v49  ;;  %v9605_v9 = vsel %vm1876_vm8, %v9104_v52, %v5972_v41  ;;  %v6058_v3 = vunpack.i.h.bf16 %v13114_v29  ;;  %v13122_v29 = vld [vmem:[#allocation71_spill] sm:$0xff] }
 0x1e3   : > { %v2059_v48 = vsel %vm2042_vm12, %v2017_v38, %v6357_v15  ;;  %v2060_v53 = vsel %vm2042_vm12, %v2018_v2, %v6358_v6  ;;  %v6062_v21 = vunpack.i.l.bf16 %v13120_v47  ;;  %v6162_v61 = vunpack.i.l.bf16 %v13121_v0 }
 0x1e4   : > { %v2101_v56 = vsel %vm2084_vm13, %v2059_v48, %v6457_v1  ;;  %v2102_v60 = vsel %vm2084_vm13, %v2060_v53, %v6458_v27  ;;  %v9619_v52 = vsel %vm1876_vm8, %v9127_v28, %v5968_v5  ;;  %v6163_v41 = vunpack.i.h.bf16 %v13121_v0  ;;  %v13123_v5 = vld [vmem:[#allocation92_spill] sm:$0xff]  ;;  %v13126_v1 = vld [vmem:[#allocation26_spill] sm:$0xff] }
 0x1e5   : > { %5743 = vmatmul.mubr.msk.bf16.gmra.mrb[28].mxu0 %vm2274_vm5, %v2217_v55  ;;  %v2143_v43 = vsel %vm2126_vm14, %v2101_v56, %v6557_v20  ;;  %v2144_v23 = vsel %vm2126_vm14, %v2102_v60, %v6558_v19  ;;  %v6263_v39 = vunpack.i.h.bf16 %v13122_v29  ;;  %v6262_v26 = vunpack.i.l.bf16 %v13122_v29  ;;  %v13130_v56 = vld [vmem:[#allocation95_spill] sm:$0xff] }
 0x1e6   : > { %5746 = vmatprep.mubr.msk.bf16.mxu0 %vm7559_vm7, %v12985_v30  ;;  %v2185_v37 = vsel %vm2168_vm15, %v2143_v43, %v6657_v4  ;;  %v2186_v63 = vsel %vm2168_vm15, %v2144_v23, %v6658_v40  ;;  %v1897_v22 = vsel %vm1876_vm8, %v9124_v44, %v5967_v50  ;;  %v1935_v28 = vsel %vm1917_vm9, %v9516_v54, %v6058_v3  ;;  %v13128_v4 = vld [vmem:[#allocation70_spill] sm:$0xff]  ;;  %v6666_v43 = vpop.permute.xlu1 %6665 }
 0x1e7   : > { %v6363_v31 = vunpack.i.h.bf16 %v13123_v5  ;;  %v6362_v8 = vunpack.i.l.bf16 %v13123_v5  ;;  %v1936_v33 = vsel %vm1917_vm9, %v9505_v25, %v6062_v21  ;;  %v1977_v7 = vsel %vm1958_vm10, %v1935_v28, %v6162_v61  ;;  %v13125_v25 = vld [vmem:[#allocation3_spill] sm:$0xff]  ;;  %v13129_v21 = vld [vmem:[#allocation8_spill] sm:$0xff] }
 0x1e8   : > { %v6463_v16 = vunpack.i.h.bf16 %v13124_v17  ;;  %v6462_v46 = vunpack.i.l.bf16 %v13124_v17  ;;  %v1978_v11 = vsel %vm1958_vm10, %v1936_v33, %v6163_v41  ;;  %v6563_v44 = vunpack.i.h.bf16 %v9135_v24 }
 0x1e9   : > { %v6562_v54 = vunpack.i.l.bf16 %v9135_v24  ;;  %v2218_v50 = vpack.c.bf16 %v2186_v63, %v2185_v37  ;;  %v2020_v42 = vsel %vm2000_vm11, %v1978_v11, %v6263_v39  ;;  %v2019_v6 = vsel %vm2000_vm11, %v1977_v7, %v6262_v26  ;;  %v13127_v24 = vld [vmem:[#allocation51_spill] sm:$0xff]  ;;  %v13131_v39 = vld [vmem:[#allocation109_spill] sm:$0xff] }
 0x1ea   : > { %v6663_v15 = vunpack.i.h.bf16 %v6661_v57  ;;  %v6662_v49 = vunpack.i.l.bf16 %v6661_v57  ;;  %v5983_v35 = vunpack.i.h.bf16 %v13125_v25  ;;  %v6063_v59 = vunpack.i.h.bf16 %v13120_v47 }
 0x1eb   : > { %v2061_v58 = vsel %vm2042_vm12, %v2019_v6, %v6362_v8  ;;  %v2062_v27 = vsel %vm2042_vm12, %v2020_v42, %v6363_v31  ;;  %v6067_v32 = vunpack.i.l.bf16 %v13126_v1  ;;  %v6167_v36 = vunpack.i.l.bf16 %v13127_v24 }
 0x1ec   : > { %v2103_v19 = vsel %vm2084_vm13, %v2061_v58, %v6462_v46  ;;  %v2104_v20 = vsel %vm2084_vm13, %v2062_v27, %v6463_v16  ;;  %v5982_v55 = vunpack.i.l.bf16 %v13125_v25  ;;  %v6168_v38 = vunpack.i.h.bf16 %v13127_v24  ;;  %v13132_v46 = vld [vmem:[#allocation25_spill] sm:$0xff] }
 0x1ed   : > { %5747 = vmatmul.mubr.msk.bf16.gmra.mrb[32].mxu0 %vm2274_vm5, %v2218_v50  ;;  %v2145_v2 = vsel %vm2126_vm14, %v2103_v19, %v6562_v54  ;;  %v2146_v40 = vsel %vm2126_vm14, %v2104_v20, %v6563_v44  ;;  %v6268_v3 = vunpack.i.h.bf16 %v13128_v4  ;;  %v6267_v48 = vunpack.i.l.bf16 %v13128_v4  ;;  %v13134_v25 = vld [vmem:[#allocation73_spill] sm:$0xff]  ;;  %v6671_v19 = vpop.permute.xlu0 %6670 }
 0x1ee   : > { %5750 = vmatprep.mubr.msk.bf16.mxu0 %vm7559_vm7, %v12985_v30  ;;  %v2187_v53 = vsel %vm2168_vm15, %v2145_v2, %v6662_v49  ;;  %v2188_v47 = vsel %vm2168_vm15, %v2146_v40, %v6663_v15  ;;  %v5978_v0 = vunpack.i.h.bf16 %v13129_v21  ;;  %v1937_v61 = vsel %vm1917_vm9, %v9491_v14, %v6063_v59  ;;  %v13136_v2 = vld [vmem:[#allocation112_spill] sm:$0xff] }
 0x1ef   : > { %v6368_v60 = vunpack.i.h.bf16 %v13130_v56  ;;  %v6367_v41 = vunpack.i.l.bf16 %v13130_v56  ;;  %v1938_v23 = vsel %vm1917_vm9, %v1897_v22, %v6067_v32  ;;  %v1979_v29 = vsel %vm1958_vm10, %v1937_v61, %v6167_v36 }
 0x1f0   : > { %v6468_v26 = vunpack.i.h.bf16 %v13131_v39  ;;  %v6467_v37 = vunpack.i.l.bf16 %v13131_v39  ;;  %v1980_v63 = vsel %vm1958_vm10, %v1938_v23, %v6168_v38  ;;  %v6568_v28 = vunpack.i.h.bf16 %v9121_v62 }
 0x1f1   : > { %v6567_v5 = vunpack.i.l.bf16 %v9121_v62  ;;  %v2219_v14 = vpack.c.bf16 %v2188_v47, %v2187_v53  ;;  %v2021_v31 = vsel %vm2000_vm11, %v1979_v29, %v6267_v48  ;;  %v2022_v8 = vsel %vm2000_vm11, %v1980_v63, %v6268_v3  ;;  %v13133_v62 = vld [vmem:[#allocation50_spill] sm:$0xff]  ;;  %v13139_v63 = vld [vmem:[#allocation72_spill] sm:$0xff] }
 0x1f2   : > { %v6668_v57 = vunpack.i.h.bf16 %v6666_v43  ;;  %v6667_v33 = vunpack.i.l.bf16 %v6666_v43  ;;  %v5977_v22 = vunpack.i.l.bf16 %v13129_v21  ;;  %v6068_v7 = vunpack.i.h.bf16 %v13126_v1  ;;  %v13138_v43 = vld [vmem:[#allocation53_spill] sm:$0xff] }
 0x1f3   : > { %v2063_v17 = vsel %vm2042_vm12, %v2021_v31, %v6367_v41  ;;  %v2064_v16 = vsel %vm2042_vm12, %v2022_v8, %v6368_v60  ;;  %v6072_v11 = vunpack.i.l.bf16 %v13132_v46  ;;  %v6172_v44 = vunpack.i.l.bf16 %v13133_v62  ;;  %v13137_v41 = vld [vmem:[#allocation27_spill] sm:$0xff]  ;;  %v13140_v8 = vld [vmem:[#allocation9_spill] sm:$0xff] }
 0x1f4   : > { %v2105_v54 = vsel %vm2084_vm13, %v2063_v17, %v6467_v37  ;;  %v2106_v50 = vsel %vm2084_vm13, %v2064_v16, %v6468_v26  ;;  %v9690_v42 = vsel %vm1876_vm8, %v9133_v12, %v5983_v35  ;;  %v6173_v6 = vunpack.i.h.bf16 %v13133_v62  ;;  %v13135_v35 = vld [vmem:[#allocation94_spill] sm:$0xff]  ;;  %v6676_v17 = vpop.permute.xlu1 %6675 }
 0x1f5   : > { %5751 = vmatmul.mubr.msk.bf16.gmra.mrb[36].mxu0 %vm2274_vm5, %v2219_v14  ;;  %v2147_v15 = vsel %vm2126_vm14, %v2105_v54, %v6567_v5  ;;  %v2148_v49 = vsel %vm2126_vm14, %v2106_v50, %v6568_v28  ;;  %v6273_v59 = vunpack.i.h.bf16 %v13134_v25  ;;  %v6272_v58 = vunpack.i.l.bf16 %v13134_v25  ;;  %v13143_v50 = vld [vmem:[#allocation131_spill] sm:$0xff] }
 0x1f6   : > { %5754 = vmatprep.mubr.msk.bf16.mxu0 %vm7559_vm7, %v12985_v30  ;;  %v2189_v27 = vsel %vm2168_vm15, %v2147_v15, %v6667_v33  ;;  %v2190_v1 = vsel %vm2168_vm15, %v2148_v49, %v6668_v57  ;;  %v9701_v32 = vsel %vm1876_vm8, %v9130_v51, %v5982_v55  ;;  %v1939_v12 = vsel %vm1917_vm9, %v9619_v52, %v6068_v7 }
 0x1f7   : > { %v6373_v24 = vunpack.i.h.bf16 %v13135_v35  ;;  %v6372_v36 = vunpack.i.l.bf16 %v13135_v35  ;;  %v1940_v20 = vsel %vm1917_vm9, %v9605_v9, %v6072_v11  ;;  %v1981_v38 = vsel %vm1958_vm10, %v1939_v12, %v6172_v44  ;;  %v13142_v11 = vld [vmem:[#allocation111_spill] sm:$0xff] }
 0x1f8   : > { %v6473_v40 = vunpack.i.h.bf16 %v13136_v2  ;;  %v6472_v4 = vunpack.i.l.bf16 %v13136_v2  ;;  %v1982_v51 = vsel %vm1958_vm10, %v1940_v20, %v6173_v6  ;;  %v6573_v55 = vunpack.i.h.bf16 %v9183_v10 }
 0x1f9   : > { %v6572_v52 = vunpack.i.l.bf16 %v9183_v10  ;;  %v2220_v3 = vpack.c.bf16 %v2190_v1, %v2189_v27  ;;  %v2024_v48 = vsel %vm2000_vm11, %v1982_v51, %v6273_v59  ;;  %v2023_v53 = vsel %vm2000_vm11, %v1981_v38, %v6272_v58 }
 0x1fa   : > { %v6673_v47 = vunpack.i.h.bf16 %v6671_v19  ;;  %v6672_v21 = vunpack.i.l.bf16 %v6671_v19  ;;  %v1902_v9 = vsel %vm1876_vm8, %v9147_v45, %v5978_v0  ;;  %v6073_v61 = vunpack.i.h.bf16 %v13132_v46  ;;  %v13145_v19 = vld [vmem:[#allocation52_spill] sm:$0xff] }
 0x1fb   : > { %v2065_v56 = vsel %vm2042_vm12, %v2023_v53, %v6372_v36  ;;  %v2066_v60 = vsel %vm2042_vm12, %v2024_v48, %v6373_v24  ;;  %v6077_v10 = vunpack.i.l.bf16 %v13137_v41  ;;  %v6177_v23 = vunpack.i.l.bf16 %v13138_v43  ;;  %v13144_v24 = vld [vmem:[#allocation23_spill] sm:$0xff] }
 0x1fc   : > { %v2107_v29 = vsel %vm2084_vm13, %v2065_v56, %v6472_v4  ;;  %v2108_v39 = vsel %vm2084_vm13, %v2066_v60, %v6473_v40  ;;  %v1901_v45 = vsel %vm1876_vm8, %v9138_v18, %v5977_v22  ;;  %v6178_v0 = vunpack.i.h.bf16 %v13138_v43  ;;  %v13141_v18 = vld [vmem:[#allocation97_spill] sm:$0xff]  ;;  %v13146_v40 = vld [vmem:[#allocation10_spill] sm:$0xff]  ;;  %v13148_v60 = vld [vmem:[#allocation96_spill] sm:$0xff]  ;;  %v6681_v43 = vpop.permute.xlu0 %6680 }
 0x1fd   : > { %5755 = vmatmul.mubr.msk.bf16.gmra.mrb[40].mxu0 %vm2274_vm5, %v2220_v3  ;;  %v2149_v26 = vsel %vm2126_vm14, %v2107_v29, %v6572_v52  ;;  %v2150_v37 = vsel %vm2126_vm14, %v2108_v39, %v6573_v55  ;;  %v6278_v28 = vunpack.i.h.bf16 %v13139_v63  ;;  %v6277_v5 = vunpack.i.l.bf16 %v13139_v63  ;;  %v13147_v3 = vld [vmem:[#allocation75_spill] sm:$0xff]  ;;  %v13149_v39 = vld [vmem:[#allocation114_spill] sm:$0xff] }
 0x1fe   : > { %5758 = vmatprep.mubr.msk.bf16.mxu0 %vm7559_vm7, %v12985_v30  ;;  %v2191_v14 = vsel %vm2168_vm15, %v2149_v26, %v6672_v21  ;;  %v2192_v31 = vsel %vm2168_vm15, %v2150_v37, %v6673_v47  ;;  %v5993_v57 = vunpack.i.h.bf16 %v13140_v8  ;;  %v1941_v33 = vsel %vm1917_vm9, %v9588_v34, %v6073_v61  ;;  %v13150_v37 = vld [vmem:[#allocation29_spill] sm:$0xff] }
 0x1ff   : > { %v6378_v22 = vunpack.i.h.bf16 %v13141_v18  ;;  %v6377_v7 = vunpack.i.l.bf16 %v13141_v18  ;;  %v1942_v16 = vsel %vm1917_vm9, %v1901_v45, %v6077_v10  ;;  %v1983_v46 = vsel %vm1958_vm10, %v1941_v33, %v6177_v23 }
 0x200   : > { %v6478_v62 = vunpack.i.h.bf16 %v13142_v11  ;;  %v6477_v44 = vunpack.i.l.bf16 %v13142_v11  ;;  %v1984_v54 = vsel %vm1958_vm10, %v1942_v16, %v6178_v0  ;;  %v6578_v6 = vunpack.i.h.bf16 %v13143_v50 }
 0x201   : > { %v6577_v15 = vunpack.i.l.bf16 %v13143_v50  ;;  %v2221_v34 = vpack.c.bf16 %v2192_v31, %v2191_v14  ;;  %v2025_v49 = vsel %vm2000_vm11, %v1983_v46, %v6277_v5  ;;  %v2026_v25 = vsel %vm2000_vm11, %v1984_v54, %v6278_v28  ;;  %v13153_v46 = vld [vmem:[#allocation55_spill] sm:$0xff] }
 0x202   : > { %v6678_v59 = vunpack.i.h.bf16 %v6676_v17  ;;  %v6677_v58 = vunpack.i.l.bf16 %v6676_v17  ;;  %v5992_v27 = vunpack.i.l.bf16 %v13140_v8  ;;  %v6078_v1 = vunpack.i.h.bf16 %v13137_v41  ;;  %v13152_v17 = vld [vmem:[#allocation35_spill] sm:$0xff] }
 0x203   : > { %v2067_v12 = vsel %vm2042_vm12, %v2025_v49, %v6377_v7  ;;  %v2068_v35 = vsel %vm2042_vm12, %v2026_v25, %v6378_v22  ;;  %v6082_v36 = vunpack.i.l.bf16 %v13144_v24  ;;  %v6182_v20 = vunpack.i.l.bf16 %v13145_v19 }
 0x204   : > { %v2109_v38 = vsel %vm2084_vm13, %v2067_v12, %v6477_v44  ;;  %v2110_v2 = vsel %vm2084_vm13, %v2068_v35, %v6478_v62  ;;  %v5988_v4 = vunpack.i.h.bf16 %v13146_v40  ;;  %v6183_v51 = vunpack.i.h.bf16 %v13145_v19  ;;  %v13157_v35 = vld [vmem:[#allocation99_spill] sm:$0xff]  ;;  %v6686_v19 = vpop.permute.xlu1 %6685 }
 0x205   : > { %5759 = vmatmul.mubr.msk.bf16.gmra.mrb[44].mxu0 %vm2274_vm5, %v2221_v34  ;;  %v2151_v55 = vsel %vm2126_vm14, %v2109_v38, %v6577_v15  ;;  %v2152_v52 = vsel %vm2126_vm14, %v2110_v2, %v6578_v6  ;;  %v6283_v48 = vunpack.i.h.bf16 %v13147_v3  ;;  %v6282_v53 = vunpack.i.l.bf16 %v13147_v3  ;;  %v13155_v34 = vld [vmem:[#allocation74_spill] sm:$0xff]  ;;  %v13158_v2 = vld [vmem:[#allocation113_spill] sm:$0xff] }
 0x206   : > { %5762 = vmatprep.mubr.msk.bf16.mxu0 %vm7559_vm7, %v12985_v30  ;;  %v2193_v47 = vsel %vm2168_vm15, %v2151_v55, %v6677_v58  ;;  %v2194_v21 = vsel %vm2168_vm15, %v2152_v52, %v6678_v59  ;;  %v5987_v61 = vunpack.i.l.bf16 %v13146_v40  ;;  %v1943_v56 = vsel %vm1917_vm9, %v1902_v9, %v6078_v1  ;;  %v13156_v1 = vld [vmem:[#allocation126_spill] sm:$0xff]  ;;  %v13159_v52 = vld [vmem:[#allocation28_spill] sm:$0xff] }
 0x207   : > { %v6383_v41 = vunpack.i.h.bf16 %v13148_v60  ;;  %v6382_v10 = vunpack.i.l.bf16 %v13148_v60  ;;  %v1944_v23 = vsel %vm1917_vm9, %v9701_v32, %v6082_v36  ;;  %v1985_v29 = vsel %vm1958_vm10, %v1943_v56, %v6182_v20  ;;  %v13151_v32 = vld [vmem:[#allocation125_spill] sm:$0xff]  ;;  %v13160_v56 = vld [vmem:[#allocation127_spill] sm:$0xff] }
 0x208   : > { %v6483_v45 = vunpack.i.h.bf16 %v13149_v39  ;;  %v6482_v0 = vunpack.i.l.bf16 %v13149_v39  ;;  %v1986_v26 = vsel %vm1958_vm10, %v1944_v23, %v6183_v51  ;;  %v6583_v63 = vunpack.i.h.bf16 %v13150_v37  ;;  %v13161_v23 = vld [vmem:[#allocation34_spill] sm:$0xff] }
 0x209   : > { %v6582_v9 = vunpack.i.l.bf16 %v13150_v37  ;;  %v2222_v28 = vpack.c.bf16 %v2194_v21, %v2193_v47  ;;  %v2028_v5 = vsel %vm2000_vm11, %v1986_v26, %v6283_v48  ;;  %v2027_v14 = vsel %vm2000_vm11, %v1985_v29, %v6282_v53  ;;  %v13162_v39 = vld [vmem:[#allocation54_spill] sm:$0xff] }
 0x20a   : > { %v6683_v31 = vunpack.i.h.bf16 %v6681_v43  ;;  %v6682_v8 = vunpack.i.l.bf16 %v6681_v43  ;;  %v9787_v33 = vsel %vm1876_vm8, %v13151_v32, %v5993_v57  ;;  %v6083_v18 = vunpack.i.h.bf16 %v13144_v24  ;;  %v13154_v57 = vld [vmem:[#allocation124_spill] sm:$0xff] }
 0x20b   : > { %v2069_v22 = vsel %vm2042_vm12, %v2027_v14, %v6382_v10  ;;  %v2070_v7 = vsel %vm2042_vm12, %v2028_v5, %v6383_v41  ;;  %v6087_v16 = vunpack.i.l.bf16 %v13152_v17  ;;  %v6187_v11 = vunpack.i.l.bf16 %v13153_v46  ;;  %v13164_v5 = vld [vmem:[#allocation77_spill] sm:$0xff] }
 0x20c   : > { %v2111_v62 = vsel %vm2084_vm13, %v2069_v22, %v6482_v0  ;;  %v2112_v44 = vsel %vm2084_vm13, %v2070_v7, %v6483_v45  ;;  %v1907_v54 = vsel %vm1876_vm8, %v13154_v57, %v5992_v27  ;;  %v6188_v50 = vunpack.i.h.bf16 %v13153_v46  ;;  %v13165_v7 = vld [vmem:[#allocation98_spill] sm:$0xff]  ;;  %v6691_v46 = vpop.permute.xlu0 %6690 }
 0x20d   : > { %5763 = vmatmul.mubr.msk.bf16.gmra.mrb[48].mxu0 %vm2274_vm5, %v2222_v28  ;;  %v2153_v6 = vsel %vm2126_vm14, %v2111_v62, %v6582_v9  ;;  %v2154_v15 = vsel %vm2126_vm14, %v2112_v44, %v6583_v63  ;;  %v6288_v49 = vunpack.i.h.bf16 %v13155_v34  ;;  %v6287_v25 = vunpack.i.l.bf16 %v13155_v34  ;;  %v13166_v44 = vld [vmem:[#allocation116_spill] sm:$0xff] }
 0x20e   : > { %5766 = vmatprep.mubr.msk.bf16.mxu0 %vm7559_vm7, %v12985_v30  ;;  %v2195_v59 = vsel %vm2168_vm15, %v2153_v6, %v6682_v8  ;;  %v2196_v58 = vsel %vm2168_vm15, %v2154_v15, %v6683_v31  ;;  %v1905_v12 = vsel %vm1876_vm8, %v13156_v1, %v5987_v61  ;;  %v1945_v27 = vsel %vm1917_vm9, %v9690_v42, %v6083_v18  ;;  %v13167_v15 = vld [vmem:[#allocation31_spill] sm:$0xff] }
 0x20f   : > { %v6388_v24 = vunpack.i.h.bf16 %v13157_v35  ;;  %v6387_v36 = vunpack.i.l.bf16 %v13157_v35  ;;  %v1946_v20 = vsel %vm1917_vm9, %v1905_v12, %v6087_v16  ;;  %v1987_v38 = vsel %vm1958_vm10, %v1945_v27, %v6187_v11 }
 0x210   : > { %v6488_v40 = vunpack.i.h.bf16 %v13158_v2  ;;  %v6487_v51 = vunpack.i.l.bf16 %v13158_v2  ;;  %v1988_v55 = vsel %vm1958_vm10, %v1946_v20, %v6188_v50  ;;  %v6588_v3 = vunpack.i.h.bf16 %v13159_v52 }
 0x211   : > { %v6587_v48 = vunpack.i.l.bf16 %v13159_v52  ;;  %v2223_v42 = vpack.c.bf16 %v2196_v58, %v2195_v59  ;;  %v2029_v53 = vsel %vm2000_vm11, %v1987_v38, %v6287_v25  ;;  %v2030_v47 = vsel %vm2000_vm11, %v1988_v55, %v6288_v49  ;;  %v13170_v38 = vld [vmem:[#allocation57_spill] sm:$0xff] }
 0x212   : > { %v6688_v21 = vunpack.i.h.bf16 %v6686_v19  ;;  %v6687_v61 = vunpack.i.l.bf16 %v6686_v19  ;;  %v1906_v60 = vsel %vm1876_vm8, %v13160_v56, %v5988_v4  ;;  %v6088_v41 = vunpack.i.h.bf16 %v13152_v17  ;;  %v13163_v4 = vld [vmem:[#allocation7_spill] sm:$0xff]  ;;  %v13169_v19 = vld [vmem:[#allocation37_spill] sm:$0xff]  ;;  %v13172_v56 = vld [vmem:[#allocation130_spill] sm:$0xff] }
 0x213   : > { %v2071_v10 = vsel %vm2042_vm12, %v2029_v53, %v6387_v36  ;;  %v2072_v43 = vsel %vm2042_vm12, %v2030_v47, %v6388_v24  ;;  %v6092_v29 = vunpack.i.l.bf16 %v13161_v23  ;;  %v6192_v45 = vunpack.i.l.bf16 %v13162_v39 }
 0x214   : > { %v2113_v0 = vsel %vm2084_vm13, %v2071_v10, %v6487_v51  ;;  %v2114_v26 = vsel %vm2084_vm13, %v2072_v43, %v6488_v40  ;;  %v6003_v37 = vunpack.i.h.bf16 %v13163_v4  ;;  %v6193_v63 = vunpack.i.h.bf16 %v13162_v39  ;;  %v13173_v10 = vld [vmem:[#allocation101_spill] sm:$0xff] }
 0x215   : > { %5767 = vmatmul.mubr.msk.bf16.gmra.mrb[52].mxu0 %vm2274_vm5, %v2223_v42  ;;  %v2155_v9 = vsel %vm2126_vm14, %v2113_v0, %v6587_v48  ;;  %v2156_v28 = vsel %vm2126_vm14, %v2114_v26, %v6588_v3  ;;  %v6293_v14 = vunpack.i.h.bf16 %v13164_v5  ;;  %v6292_v31 = vunpack.i.l.bf16 %v13164_v5  ;;  %v13171_v42 = vld [vmem:[#allocation76_spill] sm:$0xff]  ;;  %v13174_v0 = vld [vmem:[#allocation115_spill] sm:$0xff] }
 0x216   : > { %5770 = vmatprep.mubr.msk.bf16.mxu0 %vm7559_vm7, %v12985_v30  ;;  %v2197_v8 = vsel %vm2168_vm15, %v2155_v9, %v6687_v61  ;;  %v2198_v32 = vsel %vm2168_vm15, %v2156_v28, %v6688_v21  ;;  %v6002_v18 = vunpack.i.l.bf16 %v13163_v4  ;;  %v1947_v22 = vsel %vm1917_vm9, %v1906_v60, %v6088_v41  ;;  %v13175_v28 = vld [vmem:[#allocation30_spill] sm:$0xff] }
 0x217   : > { %v6393_v17 = vunpack.i.h.bf16 %v13165_v7  ;;  %v6392_v16 = vunpack.i.l.bf16 %v13165_v7  ;;  %v1948_v11 = vsel %vm1917_vm9, %v1907_v54, %v6092_v29  ;;  %v1989_v62 = vsel %vm1958_vm10, %v1947_v22, %v6192_v45  ;;  %v13168_v54 = vld [vmem:[#allocation12_spill] sm:$0xff]  ;;  %v6696_v29 = vpop.permute.xlu1 %6695  ;;  %v13176_v7 = vld [vmem:[#allocation129_spill] sm:$0xff] }
 0x218   : > { %v6493_v57 = vunpack.i.h.bf16 %v13166_v44  ;;  %v6492_v50 = vunpack.i.l.bf16 %v13166_v44  ;;  %v1990_v6 = vsel %vm1958_vm10, %v1948_v11, %v6193_v63  ;;  %v6593_v34 = vunpack.i.h.bf16 %v13167_v15 }
 0x219   : > { %v6592_v49 = vunpack.i.l.bf16 %v13167_v15  ;;  %v2224_v25 = vpack.c.bf16 %v2198_v32, %v2197_v8  ;;  %v2032_v59 = vsel %vm2000_vm11, %v1990_v6, %v6293_v14  ;;  %v2031_v58 = vsel %vm2000_vm11, %v1989_v62, %v6292_v31  ;;  %v13177_v62 = vld [vmem:[#allocation36_spill] sm:$0xff] }
 0x21a   : > { %v6693_v1 = vunpack.i.h.bf16 %v6691_v46  ;;  %v6692_v12 = vunpack.i.l.bf16 %v6691_v46  ;;  %v5997_v27 = vunpack.i.l.bf16 %v13168_v54  ;;  %v6093_v35 = vunpack.i.h.bf16 %v13161_v23 }
 0x21b   : > { %v2073_v24 = vsel %vm2042_vm12, %v2031_v58, %v6392_v16  ;;  %v2074_v36 = vsel %vm2042_vm12, %v2032_v59, %v6393_v17  ;;  %v6097_v20 = vunpack.i.l.bf16 %v13169_v19  ;;  %v6197_v2 = vunpack.i.l.bf16 %v13170_v38  ;;  %v13180_v58 = vld [vmem:[#allocation81_spill] sm:$0xff] }
 0x21c   : > { %v2115_v40 = vsel %vm2084_vm13, %v2073_v24, %v6492_v50  ;;  %v2116_v51 = vsel %vm2084_vm13, %v2074_v36, %v6493_v57  ;;  %v5998_v55 = vunpack.i.h.bf16 %v13168_v54  ;;  %v6198_v52 = vunpack.i.h.bf16 %v13170_v38  ;;  %v13178_v57 = vld [vmem:[#allocation56_spill] sm:$0xff] }
 0x21d   : > { %5771 = vmatmul.mubr.msk.bf16.gmra.mrb[56].mxu0 %vm2274_vm5, %v2224_v25  ;;  %v2157_v3 = vsel %vm2126_vm14, %v2115_v40, %v6592_v49  ;;  %v2158_v48 = vsel %vm2126_vm14, %v2116_v51, %v6593_v34  ;;  %v6298_v53 = vunpack.i.h.bf16 %v13171_v42  ;;  %v6297_v47 = vunpack.i.l.bf16 %v13171_v42 }
 0x21e   : > { %5774 = vmatprep.mubr.msk.bf16.mxu0 %vm7559_vm7, %v12985_v30  ;;  %v2199_v21 = vsel %vm2168_vm15, %v2157_v3, %v6692_v12  ;;  %v2200_v61 = vsel %vm2168_vm15, %v2158_v48, %v6693_v1  ;;  %v1909_v60 = vsel %vm1876_vm8, %v13172_v56, %v5997_v27  ;;  %v1949_v41 = vsel %vm1917_vm9, %v9787_v33, %v6093_v35  ;;  %v13181_v35 = vld [vmem:[#allocation128_spill] sm:$0xff] }
 0x21f   : > { %v6398_v43 = vunpack.i.h.bf16 %v13173_v10  ;;  %v6397_v23 = vunpack.i.l.bf16 %v13173_v10  ;;  %v1950_v39 = vsel %vm1917_vm9, %v1909_v60, %v6097_v20  ;;  %v1991_v45 = vsel %vm1958_vm10, %v1949_v41, %v6197_v2  ;;  %v6701_v2 = vpop.permute.xlu0 %6700  ;;  %v13184_v48 = vld [vmem:[#allocation40_spill] sm:$0xff]  ;;  %v13185_v60 = vld [vmem:[#allocation14_spill] sm:$0xff] }
 0x220   : > { %v6498_v26 = vunpack.i.h.bf16 %v13174_v0  ;;  %v6497_v63 = vunpack.i.l.bf16 %v13174_v0  ;;  %v1992_v9 = vsel %vm1958_vm10, %v1950_v39, %v6198_v52  ;;  %v6598_v5 = vunpack.i.h.bf16 %v13175_v28 }
 0x221   : > { %v6597_v14 = vunpack.i.l.bf16 %v13175_v28  ;;  %v2225_v33 = vpack.c.bf16 %v2200_v61, %v2199_v21  ;;  %v2033_v31 = vsel %vm2000_vm11, %v1991_v45, %v6297_v47  ;;  %v2034_v8 = vsel %vm2000_vm11, %v1992_v9, %v6298_v53  ;;  %v13187_v45 = vld [vmem:[#allocation59_spill] sm:$0xff] }
 0x222   : > { %v6698_v32 = vunpack.i.h.bf16 %v6696_v29  ;;  %v6697_v22 = vunpack.i.l.bf16 %v6696_v29  ;;  %v1912_v17 = vsel %vm1876_vm8, %v13176_v7, %v6003_v37  ;;  %v6098_v16 = vunpack.i.h.bf16 %v13169_v19  ;;  %v13179_v37 = vld [vmem:[#allocation132_spill] sm:$0xff]  ;;  %v13186_v29 = vld [vmem:[#allocation39_spill] sm:$0xff]  ;;  %v13189_v7 = vld [vmem:[#allocation134_spill] sm:$0xff] }
 0x223   : > { %v2075_v46 = vsel %vm2042_vm12, %v2033_v31, %v6397_v23  ;;  %v2076_v11 = vsel %vm2042_vm12, %v2034_v8, %v6398_v43  ;;  %v6102_v44 = vunpack.i.l.bf16 %v13177_v62  ;;  %v6202_v50 = vunpack.i.l.bf16 %v13178_v57  ;;  %v13182_v19 = vld [vmem:[#allocation100_spill] sm:$0xff] }
 0x224   : > { %v2117_v6 = vsel %vm2084_vm13, %v2075_v46, %v6497_v63  ;;  %v2118_v15 = vsel %vm2084_vm13, %v2076_v11, %v6498_v26  ;;  %v1910_v34 = vsel %vm1876_vm8, %v13179_v37, %v5998_v55  ;;  %v6203_v49 = vunpack.i.h.bf16 %v13178_v57  ;;  %v13183_v55 = vld [vmem:[#allocation118_spill] sm:$0xff]  ;;  %v13190_v11 = vld [vmem:[#allocation103_spill] sm:$0xff]  ;;  %v6706_v57 = vpop.permute.xlu1 %6705 }
 0x225   : > { %5775 = vmatmul.mubr.msk.bf16.gmra.mrb[60].mxu0 %vm2274_vm5, %v2225_v33  ;;  %v2159_v25 = vsel %vm2126_vm14, %v2117_v6, %v6597_v14  ;;  %v2160_v59 = vsel %vm2126_vm14, %v2118_v15, %v6598_v5  ;;  %v6303_v1 = vunpack.i.h.bf16 %v13180_v58  ;;  %v6302_v12 = vunpack.i.l.bf16 %v13180_v58  ;;  %v13188_v33 = vld [vmem:[#allocation80_spill] sm:$0xff]  ;;  %v13191_v15 = vld [vmem:[#allocation117_spill] sm:$0xff] }
 0x226   : > { %5778 = vmatprep.mubr.msk.bf16.mxu0 %vm7559_vm7, %v12985_v30  ;;  %v2201_v54 = vsel %vm2168_vm15, %v2159_v25, %v6697_v22  ;;  %v2202_v27 = vsel %vm2168_vm15, %v2160_v59, %v6698_v32  ;;  %v1911_v24 = vsel %vm1876_vm8, %v13181_v35, %v6002_v18  ;;  %v1951_v36 = vsel %vm1917_vm9, %v1910_v34, %v6098_v16  ;;  %v13192_v25 = vld [vmem:[#allocation16_spill] sm:$0xff]  ;;  %v13193_v35 = vld [vmem:[#allocation13_spill] sm:$0xff] }
 0x227   : > { %v6403_v20 = vunpack.i.h.bf16 %v13182_v19  ;;  %v6402_v38 = vunpack.i.l.bf16 %v13182_v19  ;;  %v1952_v40 = vsel %vm1917_vm9, %v1911_v24, %v6102_v44  ;;  %v1993_v51 = vsel %vm1958_vm10, %v1951_v36, %v6202_v50 }
 0x228   : > { %v6503_v52 = vunpack.i.h.bf16 %v13183_v55  ;;  %v6502_v3 = vunpack.i.l.bf16 %v13183_v55  ;;  %v1994_v4 = vsel %vm1958_vm10, %v1952_v40, %v6203_v49  ;;  %v6603_v42 = vunpack.i.h.bf16 %v13184_v48  ;;  %v13195_v40 = vld [vmem:[#allocation58_spill] sm:$0xff] }
 0x229   : > { %v6602_v18 = vunpack.i.l.bf16 %v13184_v48  ;;  %v2226_v53 = vpack.c.bf16 %v2202_v27, %v2201_v54  ;;  %v2036_v47 = vsel %vm2000_vm11, %v1994_v4, %v6303_v1  ;;  %v2035_v21 = vsel %vm2000_vm11, %v1993_v51, %v6302_v12 }
 0x22a   : > { %v6703_v61 = vunpack.i.h.bf16 %v6701_v2  ;;  %v6702_v56 = vunpack.i.l.bf16 %v6701_v2  ;;  %v6007_v41 = vunpack.i.l.bf16 %v13185_v60  ;;  %v6103_v10 = vunpack.i.h.bf16 %v13177_v62 }
 0x22b   : > { %v2077_v43 = vsel %vm2042_vm12, %v2035_v21, %v6402_v38  ;;  %v2078_v23 = vsel %vm2042_vm12, %v2036_v47, %v6403_v20  ;;  %v6107_v39 = vunpack.i.l.bf16 %v13186_v29  ;;  %v6207_v0 = vunpack.i.l.bf16 %v13187_v45  ;;  %v13194_v38 = vld [vmem:[#allocation38_spill] sm:$0xff] }
 0x22c   : > { %v2119_v26 = vsel %vm2084_vm13, %v2077_v43, %v6502_v3  ;;  %v2120_v63 = vsel %vm2084_vm13, %v2078_v23, %v6503_v52  ;;  %v6008_v9 = vunpack.i.h.bf16 %v13185_v60  ;;  %v6208_v28 = vunpack.i.h.bf16 %v13187_v45  ;;  %v13196_v3 = vld [vmem:[#allocation135_spill] sm:$0xff]  ;;  %v13198_v60 = vld [vmem:[#allocation133_spill] sm:$0xff]  ;;  %v13199_v43 = vld [vmem:[#allocation102_spill] sm:$0xff] }
 0x22d   : > { %5779 = vmatmul.mubr.msk.bf16.gmra.mrb[64].mxu0 %vm2274_vm5, %v2226_v53  ;;  %v2161_v5 = vsel %vm2126_vm14, %v2119_v26, %v6602_v18  ;;  %v2162_v14 = vsel %vm2126_vm14, %v2120_v63, %v6603_v42  ;;  %v6308_v31 = vunpack.i.h.bf16 %v13188_v33  ;;  %v6307_v8 = vunpack.i.l.bf16 %v13188_v33  ;;  %v13197_v53 = vld [vmem:[#allocation83_spill] sm:$0xff] }
 0x22e   : > { %5782 = vmatprep.mubr.msk.bf16.mxu0 %vm7559_vm7, %v12985_v30  ;;  %v2203_v32 = vsel %vm2168_vm15, %v2161_v5, %v6702_v56  ;;  %v2204_v22 = vsel %vm2168_vm15, %v2162_v14, %v6703_v61  ;;  %v1913_v16 = vsel %vm1876_vm8, %v13189_v7, %v6007_v41  ;;  %v1953_v46 = vsel %vm1917_vm9, %v1912_v17, %v6103_v10  ;;  %v13200_v26 = vld [vmem:[#allocation119_spill] sm:$0xff] }
 0x22f   : > { %v6408_v62 = vunpack.i.h.bf16 %v13190_v11  ;;  %v6407_v44 = vunpack.i.l.bf16 %v13190_v11  ;;  %v1954_v50 = vsel %vm1917_vm9, %v1913_v16, %v6107_v39  ;;  %v1995_v6 = vsel %vm1958_vm10, %v1953_v46, %v6207_v0  ;;  %v6711_v39 = vpop.permute.xlu0 %6710 }
 0x230   : > { %v6508_v37 = vunpack.i.h.bf16 %v13191_v15  ;;  %v6507_v34 = vunpack.i.l.bf16 %v13191_v15  ;;  %v1996_v49 = vsel %vm1958_vm10, %v1954_v50, %v6208_v28  ;;  %v6608_v59 = vunpack.i.h.bf16 %v13192_v25 }
 0x231   : > { %v6607_v58 = vunpack.i.l.bf16 %v13192_v25  ;;  %v2227_v17 = vpack.c.bf16 %v2204_v22, %v2203_v32  ;;  %v2037_v1 = vsel %vm2000_vm11, %v1995_v6, %v6307_v8  ;;  %v2038_v12 = vsel %vm2000_vm11, %v1996_v49, %v6308_v31 }
 0x232   : > { %v6708_v54 = vunpack.i.h.bf16 %v6706_v57  ;;  %v6707_v27 = vunpack.i.l.bf16 %v6706_v57  ;;  %v6012_v24 = vunpack.i.l.bf16 %v13193_v35  ;;  %v6108_v36 = vunpack.i.h.bf16 %v13186_v29 }
 0x233   : > { %v2079_v19 = vsel %vm2042_vm12, %v2037_v1, %v6407_v44  ;;  %v2080_v20 = vsel %vm2042_vm12, %v2038_v12, %v6408_v62  ;;  %v6112_v2 = vunpack.i.l.bf16 %v13194_v38  ;;  %v6212_v51 = vunpack.i.l.bf16 %v13195_v40  ;;  %v13204_v62 = vld [vmem:[#allocation78_spill] sm:$0xff]  ;;  %v13206_v44 = vld [vmem:[#allocation79_spill] sm:$0xff] }
 0x234   : > { %v2121_v55 = vsel %vm2084_vm13, %v2079_v19, %v6507_v34  ;;  %v2122_v52 = vsel %vm2084_vm13, %v2080_v20, %v6508_v37  ;;  %v1914_v4 = vsel %vm1876_vm8, %v13196_v3, %v6008_v9  ;;  %v6213_v48 = vunpack.i.h.bf16 %v13195_v40 }
 0x235   : > { %5783 = vmatmul.mubr.msk.bf16.gmra.mrb[68].mxu0 %vm2274_vm5, %v2227_v17  ;;  %v2163_v42 = vsel %vm2126_vm14, %v2121_v55, %v6607_v58  ;;  %v2164_v18 = vsel %vm2126_vm14, %v2122_v52, %v6608_v59  ;;  %v6313_v47 = vunpack.i.h.bf16 %v13197_v53  ;;  %v6312_v21 = vunpack.i.l.bf16 %v13197_v53  ;;  %v13208_v17 = vld [vmem:[#allocation61_spill] sm:$0xff]  ;;  %v2627_v52 = vpop.permute.xlu1 %2626 }
 0x236   : > { %5786 = vmatprep.mubr.msk.bf16.mxu0 %vm7559_vm7, %v12985_v30  ;;  %v2205_v61 = vsel %vm2168_vm15, %v2163_v42, %v6707_v27  ;;  %v2206_v56 = vsel %vm2168_vm15, %v2164_v18, %v6708_v54  ;;  %v1915_v41 = vsel %vm1876_vm8, %v13198_v60, %v6012_v24  ;;  %v1955_v10 = vsel %vm1917_vm9, %v1914_v4, %v6108_v36  ;;  %v13209_v54 = vld [vmem:[#allocation82_spill] sm:$0xff] }
 0x237   : > { %v6413_v23 = vunpack.i.h.bf16 %v13199_v43  ;;  %v6412_v29 = vunpack.i.l.bf16 %v13199_v43  ;;  %v1956_v45 = vsel %vm1917_vm9, %v1915_v41, %v6112_v2  ;;  %v1997_v0 = vsel %vm1958_vm10, %v1955_v10, %v6212_v51  ;;  %v10042_v2 = vld [vmem:[%s12527_s3] ss:$0 sm:$0xff] }
 0x238   : > { %v9988_v63 = vunpack.i.h.bf16 %v13200_v26  ;;  %v6512_v9 = vunpack.i.l.bf16 %v13200_v26  ;;  %v1998_v28 = vsel %vm1958_vm10, %v1956_v45, %v6213_v48  ;;  %v9993_v5 = vunpack.i.h.bf16 %v9317_v13 }
 0x239   : > { %v6612_v14 = vunpack.i.l.bf16 %v9317_v13  ;;  %v2228_v33 = vpack.c.bf16 %v2206_v56, %v2205_v61  ;;  %v2040_v31 = vsel %vm2000_vm11, %v1998_v28, %v6313_v47  ;;  %v2039_v8 = vsel %vm2000_vm11, %v1997_v0, %v6312_v21  ;;  %v2632_v47 = vpop.permute.xlu0 %2631  ;;  %v2637_v60 = vpop.permute.xlu1 %2636 }
 0x23a   : > { %13201 = vst [vmem:[#allocation41_spill] sm:$0xff] %v9988_v63  ;;  %13202 = vst [vmem:[#allocation60_spill] sm:$0xff] %v9993_v5  ;;  %v9998_v32 = vunpack.i.h.bf16 %v6711_v39  ;;  %v6712_v22 = vunpack.i.l.bf16 %v6711_v39  ;;  %v6013_v7 = vunpack.i.h.bf16 %v13193_v35  ;;  %v2081_v16 = vsel %vm2042_vm12, %v2039_v8, %v6412_v29  ;;  %v13210_v35 = vld [vmem:[#allocation104_spill] sm:$0xff] }
 0x23b   : > { %v2082_v46 = vsel %vm2042_vm12, %v2040_v31, %v6413_v23  ;;  %v6113_v11 = vunpack.i.h.bf16 %v13194_v38  ;;  %v13205_v13 = vrot.slane %v13204_v62, 5  ;;  %v13207_v57 = vrot.slane %v13206_v44, 5 }
 0x23c   : > { %13203 = vst [vmem:[#allocation85_spill] sm:$0xff] %v9998_v32  ;;  %v2123_v6 = vsel %vm2084_vm13, %v2081_v16, %v6512_v9  ;;  %v2124_v15 = vsel %vm2084_vm13, %v2082_v46, %v9988_v63 }
 0x23d   : > { %5787 = vmatmul.mubr.msk.bf16.gmra.mrb[72].mxu0 %vm2274_vm5, %v2228_v33  ;;  %v450_v50 = vsel %vm373_vm3, %v13207_v57, %v13205_v13  ;;  %v2165_v37 = vsel %vm2126_vm14, %v2123_v6, %v6612_v14  ;;  %v2166_v34 = vsel %vm2126_vm14, %v2124_v15, %v9993_v5  ;;  %v2642_v44 = vpop.permute.xlu1 %2641 }
 0x23e   : > { %5790 = vmatprep.mubr.msk.bf16.mxu0 %vm7559_vm7, %v12985_v30  ;;  %v2207_v49 = vsel %vm2168_vm15, %v2165_v37, %v6712_v22  ;;  %v2208_v25 = vsel %vm2168_vm15, %v2166_v34, %v9998_v32  ;;  %v1916_v59 = vsel %vm1876_vm8, %v450_v50, %v6013_v7 }
 0x23f   : > { %v1957_v58 = vsel %vm1917_vm9, %v1916_v59, %v6113_v11  ;;  %v2229_v12 = vpack.c.bf16 %v2208_v25, %v2207_v49 }
 0x240   : > { %v1999_v1 = vsel %vm1958_vm10, %v1957_v58, %v13208_v17 }
 0x241   : > { %v2041_v27 = vsel %vm2000_vm11, %v1999_v1, %v13209_v54 }
 0x242   : > { %v2083_v24 = vsel %vm2042_vm12, %v2041_v27, %v13210_v35 }
 0x243   : > { %v2125_v36 = vsel %vm2084_vm13, %v2083_v24, %v9988_v63 }
 0x244   : > { %v2167_v19 = vsel %vm2126_vm14, %v2125_v36, %v9993_v5 }
 0x245   : > { %5791 = vmatmul.mubr.msk.bf16.gmra.mrb[76].mxu0 %vm2274_vm5, %v2229_v12  ;;  %v2209_v20 = vsel %vm2168_vm15, %v2167_v19, %v9998_v32 }
 0x246   : > { %5794 = vmatprep.mubr.msk.bf16.mxu0 %vm7559_vm7, %v12985_v30  ;;  %v2230_v38 = vpack.c.bf16 %v2209_v20, %v2209_v20 }
 0x24d   : > { %5795 = vmatmul.mubr.msk.bf16.gmra.mrb[80].mxu0 %vm2274_vm5, %v2230_v38 }
 0x280   : > { %v2376_v40 = vpop.f32.mrb[0].mxu0 }
 0x281   : > { %v2377_v51 = vadd.f32 %v10042_v2, %v2376_v40  ;;  %v5716_v55 = vpop.f32.mrb[1].mxu0 }
 0x282   : > { %v2379_v3 = vpop.f32.mrb[2].mxu0 }
 0x283   : > { %v2542_v4 = vmax.f32 %v2377_v51, 0.0  ;;  %v2380_v48 = vadd.f32 %v10042_v2, %v2379_v3  ;;  %v5717_v42 = vpop.f32.mrb[3].mxu0  ;;  %v2647_v3 = vpop.permute.xlu0 %2646 }
 0x285   : > { %v10046_v18 = vmul.f32 %v2627_v52, %v2542_v4  ;;  %v2543_v53 = vmax.f32 %v2380_v48, 0.0 }
 0x287   : > { %v10048_v21 = vmul.f32 %v2632_v47, %v2543_v53  ;;  %v3026_v61 = vrot.slane %v10046_v18, 6  ;;  %v3105_v56 = vrot.slane %v10046_v18, 7  ;;  %v12714_v39 = vrot.slane %v10046_v18, 5 }
 0x288   : > { %v2384_v41 = vpop.f32.mrb[4].mxu0  ;;  %v3190_v57 = vrot.slane %v10046_v18, 1 }
 0x289   : > { %v2385_v10 = vadd.f32 %v10042_v2, %v2384_v41  ;;  %v5720_v43 = vpop.f32.mrb[5].mxu0  ;;  %v3027_v23 = vrot.slane %v10048_v21, 6  ;;  %v3106_v29 = vrot.slane %v10048_v21, 7  ;;  %v3104_v0 = vsel %vm12806_vm0, 0.0, %v3026_v61 }
 0x28a   : > { %v2387_v45 = vpop.f32.mrb[6].mxu0  ;;  %v3183_v26 = vsel %vm571_vm1, 0.0, %v3105_v56  ;;  %v2910_v9 = vrot.slane %v10048_v21, 5  ;;  %v3191_v13 = vrot.slane %v10048_v21, 1 }
 0x28b   : > { %v2544_v14 = vmax.f32 %v2385_v10, 0.0  ;;  %v2388_v33 = vadd.f32 %v10042_v2, %v2387_v45  ;;  %v5721_v31 = vpop.f32.mrb[7].mxu0  ;;  %v3028_v8 = vsel %vm12806_vm0, %v3026_v61, %v3027_v23  ;;  %v3107_v22 = vsel %vm571_vm1, %v3105_v56, %v3106_v29 }
 0x28c   : > { %v6716_v7 = vpack.i.bf16 %v3028_v8, %v3104_v0  ;;  %v10064_v16 = vpack.i.bf16 %v3107_v22, %v3183_v26  ;;  %v10069_v46 = vsel %vm373_vm3, %v12714_v39, %v2910_v9  ;;  %v10083_v25 = vsel %vm657_vm2, %v3190_v57, %v3191_v13 }
 0x28d   : > { %13211 = vst [vmem:[#allocation63_spill] sm:$0xff] %v10069_v46  ;;  %v10071_v11 = vmul.f32 %v2637_v60, %v2544_v14  ;;  %v2545_v62 = vmax.f32 %v2388_v33, 0.0  ;;  %v2652_v60 = vpop.permute.xlu1 %2651 }
 0x28e   : > { %6717 = vrot.lane.b32.xlu1 %v6716_v7, %s7552_s30 }
 0x28f   : > { %v10076_v50 = vmul.f32 %v2642_v44, %v2545_v62  ;;  %v3029_v6 = vrot.slane %v10071_v11, 6  ;;  %v3108_v15 = vrot.slane %v10071_v11, 7  ;;  %v2912_v37 = vrot.slane %v10071_v11, 5 }
 0x290   : > { %v2392_v34 = vpop.f32.mrb[8].mxu0  ;;  %v3193_v49 = vrot.slane %v10071_v11, 1  ;;  %v3352_v59 = vrot.slane %v10071_v11, 3  ;;  %v3273_v58 = vrot.slane %v10071_v11, 2 }
 0x291   : > { %v2393_v17 = vadd.f32 %v10042_v2, %v2392_v34  ;;  %v5724_v1 = vpop.f32.mrb[9].mxu0  ;;  %v3030_v12 = vsel %vm12806_vm0, %v3027_v23, %v3029_v6  ;;  %v3031_v54 = vrot.slane %v10076_v50, 6  ;;  %v3110_v27 = vrot.slane %v10076_v50, 7 }
 0x292   : > { %v2395_v35 = vpop.f32.mrb[10].mxu0  ;;  %v3109_v24 = vsel %vm571_vm1, %v3106_v29, %v3108_v15  ;;  %v10093_v36 = vsel %vm373_vm3, %v2910_v9, %v2912_v37  ;;  %v2914_v19 = vrot.slane %v10076_v50, 5  ;;  %v3195_v20 = vrot.slane %v10076_v50, 1 }
 0x293   : > { %13212 = vst [vmem:[#allocation84_spill] sm:$0xff] %v10093_v36  ;;  %v2546_v38 = vmax.f32 %v2393_v17, 0.0  ;;  %v2396_v40 = vadd.f32 %v10042_v2, %v2395_v35  ;;  %v5725_v51 = vpop.f32.mrb[11].mxu0  ;;  %v3032_v55 = vsel %vm12806_vm0, %v3029_v6, %v3031_v54  ;;  %v3111_v52 = vsel %vm571_vm1, %v3108_v15, %v3110_v27 }
 0x294   : > { %v6721_v4 = vpack.i.bf16 %v3032_v55, %v3030_v12  ;;  %v10100_v48 = vpack.i.bf16 %v3111_v52, %v3109_v24  ;;  %v10103_v42 = vsel %vm373_vm3, %v2912_v37, %v2914_v19  ;;  %v3196_v61 = vsel %vm657_vm2, %v3193_v49, %v3195_v20  ;;  %v2657_v12 = vpop.permute.xlu0 %2656 }
 0x295   : > { %13213 = vst [vmem:[#allocation32_spill] sm:$0xff] %v10103_v42  ;;  %v10105_v53 = vmul.f32 %v2647_v3, %v2546_v38  ;;  %v2547_v47 = vmax.f32 %v2396_v40, 0.0  ;;  %v10109_v56 = vsel %vm657_vm2, %v3191_v13, %v3193_v49  ;;  %v3353_v10 = vrot.slane %v10076_v50, 3  ;;  %v2662_v40 = vpop.permute.xlu1 %2661 }
 0x296   : > { %6722 = vrot.lane.b32.xlu0 %v6721_v4, %s7552_s30  ;;  %v3274_v43 = vrot.slane %v10076_v50, 2 }
 0x297   : > { %13214 = vst [vmem:[#allocation18_spill] sm:$0xff] %v10105_v53  ;;  %v10118_v29 = vmul.f32 %v2652_v60, %v2547_v47  ;;  %v3033_v45 = vrot.slane %v10105_v53, 6  ;;  %v3112_v0 = vrot.slane %v10105_v53, 7  ;;  %v2916_v26 = vrot.slane %v10105_v53, 5 }
 0x298   : > { %v2400_v9 = vpop.f32.mrb[12].mxu0  ;;  %v3197_v14 = vrot.slane %v10105_v53, 1  ;;  %v10125_v33 = vsel %vm821_vm6, %v3352_v59, %v3353_v10  ;;  %v3355_v31 = vrot.slane %v10105_v53, 3  ;;  %v10129_v8 = vsel %vm741_vm4, %v3273_v58, %v3274_v43 }
 0x299   : > { %13215 = vst [vmem:[#allocation43_spill] sm:$0xff] %v10118_v29  ;;  %v2401_v22 = vadd.f32 %v10042_v2, %v2400_v9  ;;  %v5728_v7 = vpop.f32.mrb[13].mxu0  ;;  %v3034_v62 = vsel %vm12806_vm0, %v3031_v54, %v3033_v45  ;;  %v3035_v13 = vrot.slane %v10118_v29, 6  ;;  %v3113_v44 = vsel %vm571_vm1, %v3110_v27, %v3112_v0 }
 0x29a   : > { %v2403_v57 = vpop.f32.mrb[14].mxu0  ;;  %v3114_v6 = vrot.slane %v10118_v29, 7  ;;  %v10137_v15 = vsel %vm373_vm3, %v2914_v19, %v2916_v26  ;;  %v2918_v37 = vrot.slane %v10118_v29, 5  ;;  %v3198_v34 = vsel %vm657_vm2, %v3195_v20, %v3197_v14 }
 0x29b   : > { %13216 = vst [vmem:[#allocation62_spill] sm:$0xff] %v10137_v15  ;;  %v2548_v49 = vmax.f32 %v2401_v22, 0.0  ;;  %v2404_v59 = vadd.f32 %v10042_v2, %v2403_v57  ;;  %v5729_v58 = vpop.f32.mrb[15].mxu0  ;;  %v3036_v17 = vsel %vm12806_vm0, %v3033_v45, %v3035_v13  ;;  %v10145_v1 = vpack.i.bf16 %v3198_v34, %v3196_v61 }
 0x29c   : > { %v6726_v54 = vpack.i.bf16 %v3036_v17, %v3034_v62  ;;  %v3115_v27 = vsel %vm571_vm1, %v3112_v0, %v3114_v6  ;;  %v10149_v35 = vsel %vm373_vm3, %v2916_v26, %v2918_v37  ;;  %v10154_v24 = vsel %vm821_vm6, %v3353_v10, %v3355_v31 }
 0x29d   : > { %13217 = vst [vmem:[#allocation33_spill] sm:$0xff] %v10149_v35  ;;  %v10156_v19 = vmul.f32 %v2657_v12, %v2548_v49  ;;  %v2549_v20 = vmax.f32 %v2404_v59, 0.0  ;;  %v10158_v38 = vpack.i.bf16 %v3115_v27, %v3113_v44  ;;  %v3276_v55 = vrot.slane %v10105_v53, 2 }
 0x29e   : > { %6727 = vrot.lane.b32.xlu1 %v6726_v54, %s7552_s30  ;;  %v3278_v52 = vrot.slane %v10118_v29, 2  ;;  %v3199_v26 = vrot.slane %v10118_v29, 1  ;;  %v2667_v54 = vpop.permute.xlu0 %2666 }
 0x29f   : > { %13218 = vst [vmem:[#allocation87_spill] sm:$0xff] %v10156_v19  ;;  %v10165_v3 = vmul.f32 %v2662_v40, %v2549_v20  ;;  %v3037_v4 = vrot.slane %v10156_v19, 6  ;;  %v3116_v47 = vrot.slane %v10156_v19, 7  ;;  %v2920_v61 = vrot.slane %v10156_v19, 5 }
 0x2a0   : > { %v2408_v60 = vpop.f32.mrb[16].mxu0  ;;  %v10171_v10 = vsel %vm741_vm4, %v3274_v43, %v3276_v55  ;;  %v10174_v45 = vsel %vm741_vm4, %v3276_v55, %v3278_v52  ;;  %v12715_v0 = vrot.slane %v10156_v19, 2 }
 0x2a1   : > { %13219 = vst [vmem:[#allocation17_spill] sm:$0xff] %v10165_v3  ;;  %13220 = vst [vmem:[#allocation42_spill] sm:$0xff] %v10174_v45  ;;  %v2409_v9 = vadd.f32 %v10042_v2, %v2408_v60  ;;  %v5732_v22 = vpop.f32.mrb[17].mxu0  ;;  %v3038_v7 = vsel %vm12806_vm0, %v3035_v13, %v3037_v4  ;;  %v3039_v62 = vrot.slane %v10165_v3, 6  ;;  %v3117_v44 = vsel %vm571_vm1, %v3114_v6, %v3116_v47 }
 0x2a2   : > { %v2411_v57 = vpop.f32.mrb[18].mxu0  ;;  %v3118_v43 = vrot.slane %v10165_v3, 7  ;;  %v10184_v34 = vsel %vm373_vm3, %v2918_v37, %v2920_v61  ;;  %v2922_v49 = vrot.slane %v10165_v3, 5  ;;  %v10194_v6 = vsel %vm741_vm4, %v3278_v52, %v12715_v0  ;;  %v2677_v41 = vpop.permute.xlu0 %2676 }
 0x2a3   : > { %13221 = vst [vmem:[#allocation65_spill] sm:$0xff] %v10184_v34  ;;  %v2550_v58 = vmax.f32 %v2409_v9, 0.0  ;;  %v2412_v17 = vadd.f32 %v10042_v2, %v2411_v57  ;;  %v5733_v12 = vpop.f32.mrb[19].mxu0  ;;  %v3040_v13 = vsel %vm12806_vm0, %v3037_v4, %v3039_v62  ;;  %13222 = vst [vmem:[#allocation86_spill] sm:$0xff] %v10194_v6  ;;  %v2672_v4 = vpop.permute.xlu1 %2671  ;;  %v3200_v52 = vsel %vm657_vm2, %v3197_v14, %v3199_v26 }
 0x2a4   : > { %v6731_v27 = vpack.i.bf16 %v3040_v13, %v3038_v7  ;;  %v3119_v37 = vsel %vm571_vm1, %v3116_v47, %v3118_v43  ;;  %v10198_v20 = vsel %vm373_vm3, %v2920_v61, %v2922_v49  ;;  %v3201_v47 = vrot.slane %v10156_v19, 1 }
 0x2a5   : > { %13223 = vst [vmem:[#allocation20_spill] sm:$0xff] %v10198_v20  ;;  %v10202_v55 = vmul.f32 %v2667_v54, %v2550_v58  ;;  %v2551_v60 = vmax.f32 %v2412_v17, 0.0  ;;  %v10204_v9 = vpack.i.bf16 %v3119_v37, %v3117_v44  ;;  %v3357_v22 = vrot.slane %v10118_v29, 3 }
 0x2a6   : > { %6732 = vrot.lane.b32.xlu0 %v6731_v27, %s7552_s30  ;;  %v3202_v12 = vsel %vm657_vm2, %v3199_v26, %v3201_v47  ;;  %v3359_v13 = vrot.slane %v10156_v19, 3  ;;  %v3203_v54 = vrot.slane %v10165_v3, 1 }
 0x2a7   : > { %13224 = vst [vmem:[#allocation45_spill] sm:$0xff] %v10202_v55  ;;  %v10214_v7 = vmul.f32 %v2672_v4, %v2551_v60  ;;  %v3041_v57 = vrot.slane %v10202_v55, 6  ;;  %v3120_v44 = vrot.slane %v10202_v55, 7  ;;  %v2924_v58 = vrot.slane %v10202_v55, 5 }
 0x2a8   : > { %v2416_v17 = vpop.f32.mrb[20].mxu0  ;;  %v10223_v14 = vsel %vm821_vm6, %v3355_v31, %v3357_v22  ;;  %v10236_v23 = vpack.i.bf16 %v3202_v12, %v3200_v52  ;;  %v10249_v52 = vsel %vm821_vm6, %v3357_v22, %v3359_v13  ;;  %v2682_v12 = vpop.permute.xlu1 %2681  ;;  %v13236_v63 = vrot.slane %v10202_v55, 3 }
 0x2a9   : > { %13225 = vst [vmem:[#allocation64_spill] sm:$0xff] %v10214_v7  ;;  %13226 = vst [vmem:[#allocation2_spill] sm:$0xff] %v10223_v14  ;;  %v2417_v27 = vadd.f32 %v10042_v2, %v2416_v17  ;;  %v5736_v37 = vpop.f32.mrb[21].mxu0  ;;  %v3042_v60 = vsel %vm12806_vm0, %v3039_v62, %v3041_v57  ;;  %v3043_v4 = vrot.slane %v10214_v7, 6  ;;  %v3122_v39 = vrot.slane %v10214_v7, 7 }
 0x2aa   : > { %v2419_v61 = vpop.f32.mrb[22].mxu0  ;;  %v3121_v26 = vsel %vm571_vm1, %v3118_v43, %v3120_v44  ;;  %v10233_v40 = vsel %vm373_vm3, %v2922_v49, %v2924_v58  ;;  %v2926_v31 = vrot.slane %v10214_v7, 5  ;;  %13228 = vst [vmem:[#allocation15_spill] sm:$0xff] %v10236_v23  ;;  %13231 = vst [vmem:[#allocation67_spill] sm:$0xff] %v10249_v52 }
 0x2ab   : > { %13227 = vst [vmem:[#allocation89_spill] sm:$0xff] %v10233_v40  ;;  %v2552_v59 = vmax.f32 %v2417_v27, 0.0  ;;  %v2420_v17 = vadd.f32 %v10042_v2, %v2419_v61  ;;  %v5737_v37 = vpop.f32.mrb[23].mxu0  ;;  %v3044_v62 = vsel %vm12806_vm0, %v3041_v57, %v3043_v4  ;;  %v3123_v51 = vsel %vm571_vm1, %v3120_v44, %v3122_v39  ;;  %v2687_v40 = vpop.permute.xlu0 %2686 }
 0x2ac   : > { %v6736_v28 = vpack.i.bf16 %v3044_v62, %v3042_v60  ;;  %v10241_v0 = vpack.i.bf16 %v3123_v51, %v3121_v26  ;;  %v10244_v43 = vsel %vm373_vm3, %v2924_v58, %v2926_v31  ;;  %v3204_v61 = vsel %vm657_vm2, %v3201_v47, %v3203_v54 }
 0x2ad   : > { %13229 = vst [vmem:[#allocation44_spill] sm:$0xff] %v10244_v43  ;;  %v10246_v49 = vmul.f32 %v2677_v41, %v2552_v59  ;;  %v2553_v32 = vmax.f32 %v2420_v17, 0.0  ;;  %v12720_v51 = vrot.slane %v10202_v55, 1  ;;  %v3361_v44 = vrot.slane %v10165_v3, 3 }
 0x2ae   : > { %6737 = vrot.lane.b32.xlu1 %v6736_v28, %s7552_s30  ;;  %v3282_v26 = vrot.slane %v10165_v3, 2 }
 0x2af   : > { %13230 = vst [vmem:[#allocation4_spill] sm:$0xff] %v10246_v49  ;;  %v10257_v58 = vmul.f32 %v2682_v12, %v2553_v32  ;;  %v3045_v41 = vrot.slane %v10246_v49, 6  ;;  %v3124_v59 = vrot.slane %v10246_v49, 7  ;;  %v2928_v22 = vrot.slane %v10246_v49, 5 }
 0x2b0   : > { %v2424_v27 = vpop.f32.mrb[24].mxu0  ;;  %v3206_v28 = vsel %vm657_vm2, %v3203_v54, %v12720_v51  ;;  %v10266_v47 = vsel %vm821_vm6, %v3359_v13, %v3361_v44 }
 0x2b1   : > { %13232 = vst [vmem:[#allocation88_spill] sm:$0xff] %v10257_v58  ;;  %13233 = vst [vmem:[#allocation106_spill] sm:$0xff] %v10266_v47  ;;  %v2425_v32 = vadd.f32 %v10042_v2, %v2424_v27  ;;  %v5740_v17 = vpop.f32.mrb[25].mxu0  ;;  %v3046_v37 = vsel %vm12806_vm0, %v3043_v4, %v3045_v41  ;;  %v3047_v62 = vrot.slane %v10257_v58, 6  ;;  %v3125_v12 = vsel %vm571_vm1, %v3122_v39, %v3124_v59 }
 0x2b2   : > { %v2427_v57 = vpop.f32.mrb[26].mxu0  ;;  %v3126_v5 = vrot.slane %v10257_v58, 7  ;;  %v10276_v54 = vsel %vm373_vm3, %v2926_v31, %v2928_v22  ;;  %v2930_v13 = vrot.slane %v10257_v58, 5  ;;  %v10279_v51 = vpack.i.bf16 %v3206_v28, %v3204_v61 }
 0x2b3   : > { %13234 = vst [vmem:[#allocation22_spill] sm:$0xff] %v10276_v54  ;;  %v2554_v60 = vmax.f32 %v2425_v32, 0.0  ;;  %v2428_v27 = vadd.f32 %v10042_v2, %v2427_v57  ;;  %v5741_v17 = vpop.f32.mrb[27].mxu0  ;;  %v3048_v4 = vsel %vm12806_vm0, %v3045_v41, %v3047_v62  ;;  %v10286_v39 = vsel %vm821_vm6, %v3361_v44, %v13236_v63  ;;  %v2692_v41 = vpop.permute.xlu1 %2691 }
 0x2b4   : > { %13235 = vst [vmem:[#allocation47_spill] sm:$0xff] %v10279_v51  ;;  %13237 = vst [vmem:[#allocation121_spill] sm:$0xff] %v10286_v39  ;;  %v6741_v43 = vpack.i.bf16 %v3048_v4, %v3046_v37  ;;  %v3127_v31 = vsel %vm571_vm1, %v3124_v59, %v3126_v5  ;;  %v10290_v54 = vsel %vm373_vm3, %v2928_v22, %v2930_v13  ;;  %v13240_v63 = vrot.slane %v10156_v19, 2 }
 0x2b5   : > { %13238 = vst [vmem:[#allocation66_spill] sm:$0xff] %v10290_v54  ;;  %v10294_v28 = vmul.f32 %v2687_v40, %v2554_v60  ;;  %v2555_v57 = vmax.f32 %v2428_v27, 0.0  ;;  %v10296_v32 = vpack.i.bf16 %v3127_v31, %v3125_v12  ;;  %v3284_v59 = vrot.slane %v10202_v55, 2 }
 0x2b6   : > { %6742 = vrot.lane.b32.xlu0 %v6741_v43, %s7552_s30  ;;  %v10302_v44 = vsel %vm741_vm4, %v13240_v63, %v3282_v26  ;;  %v3286_v17 = vrot.slane %v10214_v7, 2  ;;  %v3207_v31 = vrot.slane %v10214_v7, 1 }
 0x2b7   : > { %13239 = vst [vmem:[#allocation91_spill] sm:$0xff] %v10294_v28  ;;  %13241 = vst [vmem:[#allocation105_spill] sm:$0xff] %v10302_v44  ;;  %v10307_v37 = vmul.f32 %v2692_v41, %v2555_v57  ;;  %v3049_v40 = vrot.slane %v10294_v28, 6  ;;  %v3128_v60 = vrot.slane %v10294_v28, 7  ;;  %v2932_v12 = vrot.slane %v10294_v28, 5 }
 0x2b8   : > { %v2432_v27 = vpop.f32.mrb[28].mxu0  ;;  %v10313_v43 = vsel %vm741_vm4, %v3282_v26, %v3284_v59  ;;  %v10332_v35 = vsel %vm741_vm4, %v3284_v59, %v3286_v17 }
 0x2b9   : > { %13242 = vst [vmem:[#allocation120_spill] sm:$0xff] %v10307_v37  ;;  %13243 = vst [vmem:[#allocation21_spill] sm:$0xff] %v10313_v43  ;;  %v2433_v63 = vadd.f32 %v10042_v2, %v2432_v27  ;;  %v5744_v57 = vpop.f32.mrb[29].mxu0  ;;  %v3050_v41 = vsel %vm12806_vm0, %v3047_v62, %v3049_v40  ;;  %v3051_v22 = vrot.slane %v10307_v37, 6  ;;  %v3129_v61 = vsel %vm571_vm1, %v3126_v5, %v3128_v60  ;;  %v2697_v5 = vpop.permute.xlu0 %2696 }
 0x2ba   : > { %v2435_v54 = vpop.f32.mrb[30].mxu0  ;;  %v3130_v20 = vrot.slane %v10307_v37, 7  ;;  %v10324_v26 = vsel %vm373_vm3, %v2930_v13, %v2932_v12  ;;  %v2934_v34 = vrot.slane %v10307_v37, 5  ;;  %13245 = vst [vmem:[#allocation5_spill] sm:$0xff] %v10332_v35 }
 0x2bb   : > { %13244 = vst [vmem:[#allocation46_spill] sm:$0xff] %v10324_v26  ;;  %v2556_v15 = vmax.f32 %v2433_v63, 0.0  ;;  %v2436_v27 = vadd.f32 %v10042_v2, %v2435_v54  ;;  %v5745_v57 = vpop.f32.mrb[31].mxu0  ;;  %v3052_v62 = vsel %vm12806_vm0, %v3049_v40, %v3051_v22  ;;  %v13247_v26 = vrot.slane %v10246_v49, 2  ;;  %v2702_v40 = vpop.permute.xlu1 %2701 }
 0x2bc   : > { %v6746_v42 = vpack.i.bf16 %v3052_v62, %v3050_v41  ;;  %v3131_v36 = vsel %vm571_vm1, %v3128_v60, %v3130_v20  ;;  %v10336_v13 = vsel %vm373_vm3, %v2932_v12, %v2934_v34  ;;  %v13250_v60 = vrot.slane %v10202_v55, 1 }
 0x2bd   : > { %13246 = vst [vmem:[#allocation69_spill] sm:$0xff] %v10336_v13  ;;  %v10341_v4 = vsel %vm741_vm4, %v3286_v17, %v13247_v26  ;;  %v10343_v63 = vmul.f32 %v2697_v5, %v2556_v15  ;;  %v2557_v54 = vmax.f32 %v2436_v27, 0.0  ;;  %v10345_v57 = vpack.i.bf16 %v3131_v36, %v3129_v61  ;;  %v2707_v44 = vpop.permute.xlu0 %2706 }
 0x2be   : > { %13248 = vst [vmem:[#allocation90_spill] sm:$0xff] %v10341_v4  ;;  %6747 = vrot.lane.b32.xlu1 %v6746_v42, %s7552_s30  ;;  %v3208_v12 = vsel %vm657_vm2, %v13250_v60, %v3207_v31  ;;  %v3209_v41 = vrot.slane %v10246_v49, 1  ;;  %v3365_v62 = vrot.slane %v10214_v7, 3  ;;  %v3367_v5 = vrot.slane %v10246_v49, 3 }
 0x2bf   : > { %13249 = vst [vmem:[#allocation108_spill] sm:$0xff] %v10343_v63  ;;  %v10356_v15 = vmul.f32 %v2702_v40, %v2557_v54  ;;  %v3053_v36 = vrot.slane %v10343_v63, 6  ;;  %v3132_v61 = vrot.slane %v10343_v63, 7  ;;  %v2936_v42 = vrot.slane %v10343_v63, 5 }
 0x2c0   : > { %v2440_v26 = vpop.f32.mrb[32].mxu0  ;;  %v3210_v27 = vsel %vm657_vm2, %v3207_v31, %v3209_v41  ;;  %v3211_v60 = vrot.slane %v10257_v58, 1 }
 0x2c1   : > { %13251 = vst [vmem:[#allocation123_spill] sm:$0xff] %v10356_v15  ;;  %v2441_v59 = vadd.f32 %v10042_v2, %v2440_v26  ;;  %v5748_v17 = vpop.f32.mrb[33].mxu0  ;;  %v3054_v54 = vsel %vm12806_vm0, %v3051_v22, %v3053_v36  ;;  %v3055_v40 = vrot.slane %v10356_v15, 6  ;;  %v3134_v13 = vrot.slane %v10356_v15, 7 }
 0x2c2   : > { %v2443_v46 = vpop.f32.mrb[34].mxu0  ;;  %v3133_v35 = vsel %vm571_vm1, %v3130_v20, %v3132_v61  ;;  %v10371_v31 = vsel %vm373_vm3, %v2934_v34, %v2936_v42  ;;  %v2938_v7 = vrot.slane %v10356_v15, 5  ;;  %v10374_v4 = vpack.i.bf16 %v3210_v27, %v3208_v12 }
 0x2c3   : > { %13252 = vst [vmem:[#allocation6_spill] sm:$0xff] %v10371_v31  ;;  %v2558_v19 = vmax.f32 %v2441_v59, 0.0  ;;  %v2444_v26 = vadd.f32 %v10042_v2, %v2443_v46  ;;  %v5749_v17 = vpop.f32.mrb[35].mxu0  ;;  %v3056_v22 = vsel %vm12806_vm0, %v3053_v36, %v3055_v40  ;;  %v3135_v3 = vsel %vm571_vm1, %v3132_v61, %v3134_v13  ;;  %v2712_v36 = vpop.permute.xlu1 %2711 }
 0x2c4   : > { %13253 = vst [vmem:[#allocation24_spill] sm:$0xff] %v10374_v4  ;;  %v6751_v43 = vpack.i.bf16 %v3056_v22, %v3054_v54  ;;  %v10379_v47 = vpack.i.bf16 %v3135_v3, %v3133_v35  ;;  %v10382_v20 = vsel %vm373_vm3, %v2936_v42, %v2938_v7  ;;  %v13256_v12 = vrot.slane %v10202_v55, 3 }
 0x2c5   : > { %13254 = vst [vmem:[#allocation49_spill] sm:$0xff] %v10382_v20  ;;  %v10384_v34 = vmul.f32 %v2707_v44, %v2558_v19  ;;  %v2559_v31 = vmax.f32 %v2444_v26, 0.0  ;;  %v10392_v46 = vsel %vm821_vm6, %v3365_v62, %v3367_v5  ;;  %v3212_v3 = vsel %vm657_vm2, %v3209_v41, %v3211_v60 }
 0x2c6   : > { %v10389_v59 = vsel %vm821_vm6, %v13256_v12, %v3365_v62  ;;  %13258 = vst [vmem:[#allocation107_spill] sm:$0xff] %v10392_v46  ;;  %6752 = vrot.lane.b32.xlu0 %v6751_v43, %s7552_s30  ;;  %v12731_v19 = vrot.slane %v10294_v28, 1  ;;  %v3369_v54 = vrot.slane %v10257_v58, 3  ;;  %v3290_v41 = vrot.slane %v10257_v58, 2 }
 0x2c7   : > { %13255 = vst [vmem:[#allocation68_spill] sm:$0xff] %v10384_v34  ;;  %13257 = vst [vmem:[#allocation93_spill] sm:$0xff] %v10389_v59  ;;  %v10399_v44 = vmul.f32 %v2712_v36, %v2559_v31  ;;  %v3057_v61 = vrot.slane %v10384_v34, 6  ;;  %v3136_v42 = vrot.slane %v10384_v34, 7  ;;  %v2940_v27 = vrot.slane %v10384_v34, 5 }
 0x2c8   : > { %v2448_v62 = vpop.f32.mrb[36].mxu0  ;;  %v3214_v43 = vsel %vm657_vm2, %v3211_v60, %v12731_v19  ;;  %v10424_v46 = vsel %vm821_vm6, %v3367_v5, %v3369_v54 }
 0x2c9   : > { %13259 = vst [vmem:[#allocation122_spill] sm:$0xff] %v10399_v44  ;;  %v2449_v31 = vadd.f32 %v10042_v2, %v2448_v62  ;;  %v5752_v17 = vpop.f32.mrb[37].mxu0  ;;  %v3058_v22 = vsel %vm12806_vm0, %v3055_v40, %v3057_v61  ;;  %v3059_v12 = vrot.slane %v10399_v44, 6  ;;  %v3137_v36 = vsel %vm571_vm1, %v3134_v13, %v3136_v42  ;;  %13262 = vst [vmem:[#allocation71_spill] sm:$0xff] %v10424_v46  ;;  %v2717_v13 = vpop.permute.xlu0 %2716 }
 0x2ca   : > { %v2451_v35 = vpop.f32.mrb[38].mxu0  ;;  %v3138_v20 = vrot.slane %v10399_v44, 7  ;;  %v10416_v60 = vsel %vm373_vm3, %v2938_v7, %v2940_v27  ;;  %v2942_v19 = vrot.slane %v10399_v44, 5  ;;  %v10419_v26 = vpack.i.bf16 %v3214_v43, %v3212_v3 }
 0x2cb   : > { %13260 = vst [vmem:[#allocation19_spill] sm:$0xff] %v10416_v60  ;;  %v2560_v59 = vmax.f32 %v2449_v31, 0.0  ;;  %v2452_v62 = vadd.f32 %v10042_v2, %v2451_v35  ;;  %v5753_v17 = vpop.f32.mrb[39].mxu0  ;;  %v3060_v40 = vsel %vm12806_vm0, %v3057_v61, %v3059_v12  ;;  %v13264_v60 = vrot.slane %v10294_v28, 3  ;;  %v2722_v61 = vpop.permute.xlu1 %2721 }
 0x2cc   : > { %13261 = vst [vmem:[#allocation48_spill] sm:$0xff] %v10419_v26  ;;  %v6756_v55 = vpack.i.bf16 %v3060_v40, %v3058_v22  ;;  %v3139_v4 = vsel %vm571_vm1, %v3136_v42, %v3138_v20  ;;  %v10428_v7 = vsel %vm373_vm3, %v2940_v27, %v2942_v19  ;;  %v13267_v42 = vrot.slane %v10246_v49, 2 }
 0x2cd   : > { %13263 = vst [vmem:[#allocation92_spill] sm:$0xff] %v10428_v7  ;;  %v10433_v3 = vsel %vm821_vm6, %v3369_v54, %v13264_v60  ;;  %v10435_v43 = vmul.f32 %v2717_v13, %v2560_v59  ;;  %v2561_v35 = vmax.f32 %v2452_v62, 0.0  ;;  %v10437_v31 = vpack.i.bf16 %v3139_v4, %v3137_v36  ;;  %v2727_v46 = vpop.permute.xlu0 %2726 }
 0x2ce   : > { %13265 = vst [vmem:[#allocation110_spill] sm:$0xff] %v10433_v3  ;;  %6757 = vrot.lane.b32.xlu1 %v6756_v55, %s7552_s30  ;;  %v10445_v27 = vsel %vm741_vm4, %v13267_v42, %v3290_v41  ;;  %v3292_v22 = vrot.slane %v10294_v28, 2  ;;  %v3294_v17 = vrot.slane %v10307_v37, 2 }
 0x2cf   : > { %13266 = vst [vmem:[#allocation3_spill] sm:$0xff] %v10435_v43  ;;  %13268 = vst [vmem:[#allocation26_spill] sm:$0xff] %v10445_v27  ;;  %v10448_v54 = vmul.f32 %v2722_v61, %v2561_v35  ;;  %v3061_v59 = vrot.slane %v10435_v43, 6  ;;  %v3140_v4 = vrot.slane %v10435_v43, 7  ;;  %v2944_v36 = vrot.slane %v10435_v43, 5 }
 0x2d0   : > { %v2456_v60 = vpop.f32.mrb[40].mxu0  ;;  %v10454_v55 = vsel %vm741_vm4, %v3290_v41, %v3292_v22  ;;  %v10476_v58 = vsel %vm741_vm4, %v3292_v22, %v3294_v17  ;;  %v3375_v22 = vrot.slane %v10343_v63, 3 }
 0x2d1   : > { %13269 = vst [vmem:[#allocation51_spill] sm:$0xff] %v10448_v54  ;;  %13270 = vst [vmem:[#allocation70_spill] sm:$0xff] %v10454_v55  ;;  %v2457_v13 = vadd.f32 %v10042_v2, %v2456_v60  ;;  %v5756_v35 = vpop.f32.mrb[41].mxu0  ;;  %v3062_v61 = vsel %vm12806_vm0, %v3059_v12, %v3061_v59  ;;  %v3063_v42 = vrot.slane %v10448_v54, 6  ;;  %v3141_v5 = vsel %vm571_vm1, %v3138_v20, %v3140_v4  ;;  %v2737_v51 = vpop.permute.xlu0 %2736 }
 0x2d2   : > { %6762 = vrot.lane.b32.xlu1 %v10064_v16, %s7553_s8  ;;  %v2459_v41 = vpop.f32.mrb[42].mxu0  ;;  %v3142_v7 = vrot.slane %v10448_v54, 7  ;;  %v10468_v62 = vsel %vm373_vm3, %v2942_v19, %v2944_v36  ;;  %v2946_v40 = vrot.slane %v10448_v54, 5  ;;  %13272 = vst [vmem:[#allocation95_spill] sm:$0xff] %v10476_v58 }
 0x2d3   : > { %13271 = vst [vmem:[#allocation8_spill] sm:$0xff] %v10468_v62  ;;  %v2562_v35 = vmax.f32 %v2457_v13, 0.0  ;;  %v2460_v12 = vadd.f32 %v10042_v2, %v2459_v41  ;;  %v5757_v49 = vpop.f32.mrb[43].mxu0  ;;  %v3064_v20 = vsel %vm12806_vm0, %v3061_v59, %v3063_v42  ;;  %v13274_v62 = vrot.slane %v10343_v63, 2  ;;  %v2732_v59 = vpop.permute.xlu1 %2731 }
 0x2d4   : > { %v6766_v3 = vpack.i.bf16 %v3064_v20, %v3062_v61  ;;  %v3143_v26 = vsel %vm571_vm1, %v3140_v4, %v3142_v7  ;;  %v10480_v19 = vsel %vm373_vm3, %v2944_v36, %v2946_v40  ;;  %v3215_v4 = vrot.slane %v10307_v37, 1 }
 0x2d5   : > { %13273 = vst [vmem:[#allocation109_spill] sm:$0xff] %v10480_v19  ;;  %v10485_v60 = vsel %vm741_vm4, %v3294_v17, %v13274_v62  ;;  %v10487_v13 = vmul.f32 %v2727_v46, %v2562_v35  ;;  %v2563_v49 = vmax.f32 %v2460_v12, 0.0  ;;  %v10489_v41 = vpack.i.bf16 %v3143_v26, %v3141_v5 }
 0x2d6   : > { %13275 = vst [vmem:[#allocation25_spill] sm:$0xff] %v10485_v60  ;;  %6777 = vrot.lane.b32.xlu1 %v10158_v38, %s7553_s8  ;;  %6767 = vrot.lane.b32.xlu0 %v6766_v3, %s7552_s30  ;;  %v3217_v36 = vrot.slane %v10343_v63, 1  ;;  %v13277_v3 = vrot.slane %v10294_v28, 1  ;;  %v3373_v20 = vrot.slane %v10307_v37, 3 }
 0x2d7   : > { %v10500_v62 = vmul.f32 %v2732_v59, %v2563_v49  ;;  %v3065_v26 = vrot.slane %v10487_v13, 6  ;;  %v3144_v5 = vrot.slane %v10487_v13, 7  ;;  %v2948_v17 = vrot.slane %v10487_v13, 5 }
 0x2d8   : > { %v2464_v61 = vpop.f32.mrb[44].mxu0  ;;  %v3216_v35 = vsel %vm657_vm2, %v13277_v3, %v3215_v4  ;;  %v3218_v12 = vsel %vm657_vm2, %v3215_v4, %v3217_v36 }
 0x2d9   : > { %13276 = vst [vmem:[#allocation50_spill] sm:$0xff] %v10500_v62  ;;  %v2465_v49 = vadd.f32 %v10042_v2, %v2464_v61  ;;  %v5760_v59 = vpop.f32.mrb[45].mxu0  ;;  %v3066_v46 = vsel %vm12806_vm0, %v3063_v42, %v3065_v26  ;;  %v3067_v19 = vrot.slane %v10500_v62, 6  ;;  %v3146_v58 = vrot.slane %v10500_v62, 7 }
 0x2da   : > { %6772 = vrot.lane.b32.xlu0 %v10100_v48, %s7553_s8  ;;  %v2467_v60 = vpop.f32.mrb[46].mxu0  ;;  %v3145_v3 = vsel %vm571_vm1, %v3142_v7, %v3144_v5  ;;  %v10519_v4 = vsel %vm373_vm3, %v2946_v40, %v2948_v17  ;;  %v12750_v37 = vrot.slane %v10500_v62, 5  ;;  %v10522_v27 = vpack.i.bf16 %v3218_v12, %v3216_v35 }
 0x2db   : > { %13278 = vst [vmem:[#allocation73_spill] sm:$0xff] %v10519_v4  ;;  %v2564_v61 = vmax.f32 %v2465_v49, 0.0  ;;  %v2468_v42 = vadd.f32 %v10042_v2, %v2467_v60  ;;  %v5761_v59 = vpop.f32.mrb[47].mxu0  ;;  %v3068_v55 = vsel %vm12806_vm0, %v3065_v26, %v3067_v19  ;;  %v3147_v39 = vsel %vm571_vm1, %v3144_v5, %v3146_v58  ;;  %v2742_v5 = vpop.permute.xlu1 %2741 }
 0x2dc   : > { %13279 = vst [vmem:[#allocation94_spill] sm:$0xff] %v10522_v27  ;;  %v6786_v14 = vpack.i.bf16 %v3068_v55, %v3066_v46  ;;  %v10527_v52 = vpack.i.bf16 %v3147_v39, %v3145_v3  ;;  %v10532_v7 = vsel %vm373_vm3, %v2948_v17, %v12750_v37  ;;  %v13282_v12 = vrot.slane %v10294_v28, 3  ;;  %v2747_v4 = vpop.permute.xlu0 %2746 }
 0x2dd   : > { %13280 = vst [vmem:[#allocation112_spill] sm:$0xff] %v10532_v7  ;;  %v10534_v40 = vmul.f32 %v2737_v51, %v2564_v61  ;;  %v2565_v35 = vmax.f32 %v2468_v42, 0.0  ;;  %v10542_v26 = vsel %vm821_vm6, %v3373_v20, %v3375_v22  ;;  %v3219_v51 = vrot.slane %v10356_v15, 1 }
 0x2de   : > { %v10539_v60 = vsel %vm821_vm6, %v13282_v12, %v3373_v20  ;;  %13284 = vst [vmem:[#allocation72_spill] sm:$0xff] %v10542_v26  ;;  %6782 = vrot.lane.b32.xlu0 %v10204_v9, %s7553_s8  ;;  %6787 = vrot.lane.b32.xlu1 %v6786_v14, %s7552_s30  ;;  %v12751_v55 = vrot.slane %v10384_v34, 1  ;;  %v3377_v14 = vrot.slane %v10356_v15, 3  ;;  %v13288_v26 = vrot.slane %v10384_v34, 3 }
 0x2df   : > { %13281 = vst [vmem:[#allocation27_spill] sm:$0xff] %v10534_v40  ;;  %13283 = vst [vmem:[#allocation53_spill] sm:$0xff] %v10539_v60  ;;  %v10551_v46 = vmul.f32 %v2742_v5, %v2565_v35  ;;  %v3069_v17 = vrot.slane %v10534_v40, 6  ;;  %v3220_v20 = vsel %vm657_vm2, %v3217_v36, %v3219_v51  ;;  %v3148_v35 = vrot.slane %v10534_v40, 7 }
 0x2e0   : > { %v2472_v49 = vpop.f32.mrb[48].mxu0  ;;  %v3222_v3 = vsel %vm657_vm2, %v3219_v51, %v12751_v55  ;;  %v10574_v61 = vsel %vm821_vm6, %v3375_v22, %v3377_v14 }
 0x2e1   : > { %13285 = vst [vmem:[#allocation9_spill] sm:$0xff] %v10551_v46  ;;  %v2473_v42 = vadd.f32 %v10042_v2, %v2472_v49  ;;  %v5764_v59 = vpop.f32.mrb[49].mxu0  ;;  %v3071_v12 = vrot.slane %v10551_v46, 6  ;;  %v3070_v5 = vsel %vm12806_vm0, %v3067_v19, %v3069_v17  ;;  %v3150_v51 = vrot.slane %v10551_v46, 7  ;;  %13287 = vst [vmem:[#allocation111_spill] sm:$0xff] %v10574_v61  ;;  %v2757_v61 = vpop.permute.xlu0 %2756 }
 0x2e2   : > { %6797 = vrot.lane.b32.xlu0 %v10296_v32, %s7553_s8  ;;  %6792 = vrot.lane.b32.xlu1 %v10241_v0, %s7553_s8  ;;  %v2475_v36 = vpop.f32.mrb[50].mxu0  ;;  %v10569_v37 = vpack.i.bf16 %v3222_v3, %v3220_v20  ;;  %v10580_v19 = vsel %vm821_vm6, %v3377_v14, %v13288_v26 }
 0x2e3   : > { %v2566_v39 = vmax.f32 %v2473_v42, 0.0  ;;  %v2476_v49 = vadd.f32 %v10042_v2, %v2475_v36  ;;  %v5765_v59 = vpop.f32.mrb[51].mxu0  ;;  %v3072_v55 = vsel %vm12806_vm0, %v3069_v17, %v3071_v12  ;;  %v3151_v60 = vsel %vm571_vm1, %v3148_v35, %v3150_v51  ;;  %13289 = vst [vmem:[#allocation131_spill] sm:$0xff] %v10580_v19  ;;  %v2752_v36 = vpop.permute.xlu1 %2751 }
 0x2e4   : > { %13286 = vst [vmem:[#allocation97_spill] sm:$0xff] %v10569_v37  ;;  %v6806_v7 = vpack.i.bf16 %v3072_v55, %v3070_v5  ;;  %v3149_v42 = vsel %vm571_vm1, %v3146_v58, %v3148_v35  ;;  %v3298_v55 = vrot.slane %v10356_v15, 2  ;;  %v3300_v17 = vrot.slane %v10384_v34, 2 }
 0x2e5   : > { %v10582_v20 = vmul.f32 %v2747_v4, %v2566_v39  ;;  %v2567_v3 = vmax.f32 %v2476_v49, 0.0  ;;  %v10595_v39 = vpack.i.bf16 %v3151_v60, %v3149_v42  ;;  %v13290_v35 = vrot.slane %v10343_v63, 2  ;;  %v2767_v53 = vpop.permute.xlu0 %2766 }
 0x2e6   : > { %6802 = vrot.lane.b32.xlu1 %v10345_v57, %s7553_s8  ;;  %6807 = vrot.lane.b32.xlu0 %v6806_v7, %s7552_s30  ;;  %v10604_v5 = vsel %vm741_vm4, %v3298_v55, %v3300_v17  ;;  %v3302_v59 = vrot.slane %v10399_v44, 2 }
 0x2e7   : > { %v10592_v26 = vmul.f32 %v2752_v36, %v2567_v3  ;;  %v3073_v4 = vrot.slane %v10582_v20, 6  ;;  %v3152_v58 = vrot.slane %v10582_v20, 7  ;;  %v10601_v7 = vsel %vm741_vm4, %v13290_v35, %v3298_v55  ;;  %13292 = vst [vmem:[#allocation52_spill] sm:$0xff] %v10604_v5 }
 0x2e8   : > { %v2480_v14 = vpop.f32.mrb[52].mxu0  ;;  %13291 = vst [vmem:[#allocation23_spill] sm:$0xff] %v10601_v7  ;;  %v10625_v15 = vsel %vm741_vm4, %v3300_v17, %v3302_v59  ;;  %v13294_v37 = vrot.slane %v10582_v20, 5  ;;  %v3225_v17 = vrot.slane %v10435_v43, 1  ;;  %v13302_v5 = vrot.slane %v10384_v34, 3 }
 0x2e9   : > { %v2481_v3 = vadd.f32 %v10042_v2, %v2480_v14  ;;  %v5768_v60 = vpop.f32.mrb[53].mxu0  ;;  %v3074_v42 = vsel %vm12806_vm0, %v3071_v12, %v3073_v4  ;;  %v3075_v36 = vrot.slane %v10592_v26, 6  ;;  %v3153_v35 = vsel %vm571_vm1, %v3150_v51, %v3152_v58  ;;  %13293 = vst [vmem:[#allocation10_spill] sm:$0xff] %v10625_v15 }
 0x2ea   : > { %6817 = vrot.lane.b32.xlu1 %v10437_v31, %s7553_s8  ;;  %6812 = vrot.lane.b32.xlu0 %v10379_v47, %s7553_s8  ;;  %v2483_v55 = vpop.f32.mrb[54].mxu0  ;;  %v3154_v49 = vrot.slane %v10592_v26, 7  ;;  %v2958_v14 = vrot.slane %v10592_v26, 5  ;;  %v12762_v12 = vrot.slane %v10435_v43, 2 }
 0x2eb   : > { %v2568_v60 = vmax.f32 %v2481_v3, 0.0  ;;  %v2484_v46 = vadd.f32 %v10042_v2, %v2483_v55  ;;  %v5769_v22 = vpop.f32.mrb[55].mxu0  ;;  %v3076_v63 = vsel %vm12806_vm0, %v3073_v4, %v3075_v36  ;;  %v2762_v4 = vpop.permute.xlu1 %2761 }
 0x2ec   : > { %v6826_v19 = vpack.i.bf16 %v3076_v63, %v3074_v42  ;;  %v3155_v51 = vsel %vm571_vm1, %v3152_v58, %v3154_v49  ;;  %v10631_v28 = vsel %vm373_vm3, %v13294_v37, %v2958_v14  ;;  %v10644_v63 = vsel %vm741_vm4, %v3302_v59, %v12762_v12 }
 0x2ed   : > { %13295 = vst [vmem:[#allocation75_spill] sm:$0xff] %v10631_v28  ;;  %v10634_v3 = vmul.f32 %v2757_v61, %v2568_v60  ;;  %v2569_v2 = vmax.f32 %v2484_v46, 0.0  ;;  %v10636_v22 = vpack.i.bf16 %v3155_v51, %v3153_v35  ;;  %13297 = vst [vmem:[#allocation114_spill] sm:$0xff] %v10644_v63  ;;  %v3223_v37 = vrot.slane %v10399_v44, 1 }
 0x2ee   : > { %6822 = vrot.lane.b32.xlu0 %v10489_v41, %s7553_s8  ;;  %6827 = vrot.lane.b32.xlu1 %v6826_v19, %s7552_s30  ;;  %v13299_v35 = vrot.slane %v10384_v34, 1  ;;  %v3381_v46 = vrot.slane %v10399_v44, 3 }
 0x2ef   : > { %13296 = vst [vmem:[#allocation96_spill] sm:$0xff] %v10634_v3  ;;  %v10650_v61 = vmul.f32 %v2762_v4, %v2569_v2  ;;  %v3077_v58 = vrot.slane %v10634_v3, 6  ;;  %v3156_v42 = vrot.slane %v10634_v3, 7  ;;  %v2960_v19 = vrot.slane %v10634_v3, 5  ;;  %v10665_v2 = vld [vmem:[%s12527_s3] ss:$0 sm:$0xff] }
 0x2f0   : > { %v2488_v55 = vpop.f32.mrb[56].mxu0  ;;  %v3224_v60 = vsel %vm657_vm2, %v13299_v35, %v3223_v37  ;;  %v3226_v51 = vsel %vm657_vm2, %v3223_v37, %v3225_v17  ;;  %v10687_v27 = vsel %vm821_vm6, %v13302_v5, %v3381_v46  ;;  %v12773_v5 = vrot.slane %v10487_v13, 1 }
 0x2f1   : > { %13298 = vst [vmem:[#allocation29_spill] sm:$0xff] %v10650_v61  ;;  %v2489_v4 = vadd.f32 %v10665_v2, %v2488_v55  ;;  %v5772_v12 = vpop.f32.mrb[57].mxu0  ;;  %v3078_v28 = vsel %vm12806_vm0, %v3075_v36, %v3077_v58  ;;  %v3079_v59 = vrot.slane %v10650_v61, 6  ;;  %v3157_v15 = vsel %vm571_vm1, %v3154_v49, %v3156_v42  ;;  %13303 = vst [vmem:[#allocation55_spill] sm:$0xff] %v10687_v27 }
 0x2f2   : > { %6837 = vrot.lane.b32.xlu0 %v10595_v39, %s7553_s8  ;;  %6832 = vrot.lane.b32.xlu1 %v10527_v52, %s7553_s8  ;;  %v2491_v37 = vpop.f32.mrb[58].mxu0  ;;  %v3158_v35 = vrot.slane %v10650_v61, 7  ;;  %v10677_v44 = vsel %vm373_vm3, %v2958_v14, %v2960_v19  ;;  %v2962_v12 = vrot.slane %v10650_v61, 5  ;;  %v10680_v55 = vpack.i.bf16 %v3226_v51, %v3224_v60 }
 0x2f3   : > { %13300 = vst [vmem:[#allocation125_spill] sm:$0xff] %v10677_v44  ;;  %v2570_v36 = vmax.f32 %v2489_v4, 0.0  ;;  %v2492_v63 = vadd.f32 %v10665_v2, %v2491_v37  ;;  %v5773_v49 = vpop.f32.mrb[59].mxu0  ;;  %v3080_v7 = vsel %vm12806_vm0, %v3077_v58, %v3079_v59  ;;  %v3383_v60 = vrot.slane %v10435_v43, 3  ;;  %v2772_v58 = vpop.permute.xlu1 %2771 }
 0x2f4   : > { %13301 = vst [vmem:[#allocation35_spill] sm:$0xff] %v10680_v55  ;;  %v6846_v29 = vpack.i.bf16 %v3080_v7, %v3078_v28  ;;  %v3159_v14 = vsel %vm571_vm1, %v3156_v42, %v3158_v35  ;;  %v10691_v44 = vsel %vm373_vm3, %v2960_v19, %v2962_v12  ;;  %v3227_v7 = vrot.slane %v10448_v54, 1  ;;  %v2777_v55 = vpop.permute.xlu0 %2776 }
 0x2f5   : > { %13304 = vst [vmem:[#allocation124_spill] sm:$0xff] %v10691_v44  ;;  %v10694_v51 = vmul.f32 %v2767_v53, %v2570_v36  ;;  %v2571_v4 = vmax.f32 %v2492_v63, 0.0  ;;  %v10696_v37 = vpack.i.bf16 %v3159_v14, %v3157_v15  ;;  %v10702_v28 = vsel %vm821_vm6, %v3381_v46, %v3383_v60 }
 0x2f6   : > { %6842 = vrot.lane.b32.xlu1 %v10636_v22, %s7553_s8  ;;  %6847 = vrot.lane.b32.xlu0 %v6846_v29, %s7552_s30  ;;  %13306 = vst [vmem:[#allocation126_spill] sm:$0xff] %v10702_v28  ;;  %v3228_v29 = vsel %vm657_vm2, %v3225_v17, %v3227_v7  ;;  %v3230_v46 = vsel %vm657_vm2, %v3227_v7, %v12773_v5  ;;  %v3385_v49 = vrot.slane %v10448_v54, 3 }
 0x2f7   : > { %13305 = vst [vmem:[#allocation74_spill] sm:$0xff] %v10694_v51  ;;  %v10706_v42 = vmul.f32 %v2772_v58, %v2571_v4  ;;  %v3081_v53 = vrot.slane %v10694_v51, 6  ;;  %v3160_v15 = vrot.slane %v10694_v51, 7  ;;  %v2964_v63 = vrot.slane %v10694_v51, 5 }
 0x2f8   : > { %v2496_v19 = vpop.f32.mrb[60].mxu0  ;;  %v10729_v5 = vpack.i.bf16 %v3230_v46, %v3228_v29 }
 0x2f9   : > { %13307 = vst [vmem:[#allocation99_spill] sm:$0xff] %v10706_v42  ;;  %v2497_v14 = vadd.f32 %v10665_v2, %v2496_v19  ;;  %v5776_v4 = vpop.f32.mrb[61].mxu0  ;;  %v3082_v58 = vsel %vm12806_vm0, %v3079_v59, %v3081_v53  ;;  %v3083_v44 = vrot.slane %v10706_v42, 6  ;;  %v3161_v34 = vsel %vm571_vm1, %v3158_v35, %v3160_v15 }
 0x2fa   : > { %6852 = vrot.lane.b32.xlu0 %v10696_v37, %s7553_s8  ;;  %v2499_v36 = vpop.f32.mrb[62].mxu0  ;;  %v3162_v17 = vrot.slane %v10706_v42, 7  ;;  %v10726_v27 = vsel %vm373_vm3, %v2962_v12, %v2964_v63  ;;  %v2966_v7 = vrot.slane %v10706_v42, 5  ;;  %13309 = vst [vmem:[#allocation28_spill] sm:$0xff] %v10729_v5  ;;  %v10734_v35 = vsel %vm821_vm6, %v3383_v60, %v3385_v49 }
 0x2fb   : > { %13308 = vst [vmem:[#allocation113_spill] sm:$0xff] %v10726_v27  ;;  %v2572_v19 = vmax.f32 %v2497_v14, 0.0  ;;  %v2500_v59 = vadd.f32 %v10665_v2, %v2499_v36  ;;  %v5777_v4 = vpop.f32.mrb[63].mxu0  ;;  %v3084_v28 = vsel %vm12806_vm0, %v3081_v53, %v3083_v44  ;;  %13310 = vst [vmem:[#allocation127_spill] sm:$0xff] %v10734_v35  ;;  %v12778_v27 = vrot.slane %v10487_v13, 3  ;;  %v2782_v36 = vpop.permute.xlu1 %2781 }
 0x2fc   : > { %v6856_v23 = vpack.i.bf16 %v3084_v28, %v3082_v58  ;;  %v3163_v45 = vsel %vm571_vm1, %v3160_v15, %v3162_v17  ;;  %v10738_v12 = vsel %vm373_vm3, %v2964_v63, %v2966_v7  ;;  %v3306_v28 = vrot.slane %v10448_v54, 2 }
 0x2fd   : > { %13311 = vst [vmem:[#allocation34_spill] sm:$0xff] %v10738_v12  ;;  %v10741_v29 = vmul.f32 %v2777_v55, %v2572_v19  ;;  %v2573_v46 = vmax.f32 %v2500_v59, 0.0  ;;  %v10743_v14 = vpack.i.bf16 %v3163_v45, %v3161_v34  ;;  %v10751_v60 = vsel %vm821_vm6, %v3385_v49, %v12778_v27 }
 0x2fe   : > { %6872 = vrot.lane.b32.xlu0 %v10100_v48, %s7554_s9  ;;  %6857 = vrot.lane.b32.xlu1 %v6856_v23, %s7552_s30  ;;  %13313 = vst [vmem:[#allocation7_spill] sm:$0xff] %v10751_v60  ;;  %v3308_v53 = vrot.slane %v10487_v13, 2  ;;  %v13315_v63 = vrot.slane %v10435_v43, 2 }
 0x2ff   : > { %13312 = vst [vmem:[#allocation54_spill] sm:$0xff] %v10741_v29  ;;  %v10755_v55 = vmul.f32 %v2782_v36, %v2573_v46  ;;  %v3085_v45 = vrot.slane %v10741_v29, 6  ;;  %v3164_v34 = vrot.slane %v10741_v29, 7  ;;  %v2968_v15 = vrot.slane %v10741_v29, 5 }
 0x300   : > { %v2504_v48 = vpop.f32.mrb[64].mxu0  ;;  %v10765_v49 = vsel %vm741_vm4, %v13315_v63, %v3306_v28  ;;  %v10768_v58 = vsel %vm741_vm4, %v3306_v28, %v3308_v53 }
 0x301   : > { %13314 = vst [vmem:[#allocation77_spill] sm:$0xff] %v10755_v55  ;;  %13316 = vst [vmem:[#allocation98_spill] sm:$0xff] %v10765_v49  ;;  %v2505_v59 = vadd.f32 %v10665_v2, %v2504_v48  ;;  %v5780_v4 = vpop.f32.mrb[65].mxu0  ;;  %v3086_v46 = vsel %vm12806_vm0, %v3083_v44, %v3085_v45  ;;  %v3087_v23 = vrot.slane %v10755_v55, 6  ;;  %v3165_v63 = vsel %vm571_vm1, %v3162_v17, %v3164_v34 }
 0x302   : > { %13317 = vst [vmem:[#allocation116_spill] sm:$0xff] %v10768_v58  ;;  %6862 = vrot.lane.b32.xlu1 %v10743_v14, %s7553_s8  ;;  %v2507_v36 = vpop.f32.mrb[66].mxu0  ;;  %v3166_v27 = vrot.slane %v10755_v55, 7  ;;  %v10780_v28 = vsel %vm373_vm3, %v2966_v7, %v2968_v15  ;;  %v2787_v4 = vpop.permute.xlu0 %2786  ;;  %v2970_v54 = vrot.slane %v10755_v55, 5 }
 0x303   : > { %13318 = vst [vmem:[#allocation31_spill] sm:$0xff] %v10780_v28  ;;  %v2574_v12 = vmax.f32 %v2505_v59, 0.0  ;;  %v2508_v19 = vadd.f32 %v10665_v2, %v2507_v36  ;;  %v5781_v48 = vpop.f32.mrb[67].mxu0  ;;  %v3088_v44 = vsel %vm12806_vm0, %v3085_v45, %v3087_v23  ;;  %v2792_v59 = vpop.permute.xlu1 %2791  ;;  %v3310_v45 = vrot.slane %v10500_v62, 2 }
 0x304   : > { %v3167_v43 = vsel %vm571_vm1, %v3164_v34, %v3166_v27  ;;  %v6881_v5 = vpack.i.bf16 %v3088_v44, %v3086_v46  ;;  %v10795_v36 = vsel %vm373_vm3, %v2968_v15, %v2970_v54  ;;  %v12784_v34 = vrot.slane %v10534_v40, 2 }
 0x305   : > { %v10788_v17 = vmul.f32 %v2787_v4, %v2574_v12  ;;  %v2575_v60 = vmax.f32 %v2508_v19, 0.0  ;;  %v10790_v7 = vpack.i.bf16 %v3167_v43, %v3165_v63  ;;  %13320 = vst [vmem:[#allocation37_spill] sm:$0xff] %v10795_v36  ;;  %v3231_v4 = vrot.slane %v10500_v62, 1 }
 0x306   : > { %6867 = vrot.lane.b32.xlu1 %v10064_v16, %s7554_s9  ;;  %6882 = vrot.lane.b32.xlu0 %v6881_v5, %s7552_s30  ;;  %v10806_v16 = vsel %vm741_vm4, %v3308_v53, %v3310_v45  ;;  %v10811_v15 = vsel %vm741_vm4, %v3310_v45, %v12784_v34  ;;  %v2797_v44 = vpop.permute.xlu0 %2796 }
 0x307   : > { %13319 = vst [vmem:[#allocation12_spill] sm:$0xff] %v10788_v17  ;;  %v10799_v48 = vmul.f32 %v2792_v59, %v2575_v60  ;;  %v3089_v12 = vrot.slane %v10788_v17, 6  ;;  %v3168_v43 = vrot.slane %v10788_v17, 7  ;;  %v2972_v19 = vrot.slane %v10788_v17, 5  ;;  %v2802_v58 = vpop.permute.xlu1 %2801 }
 0x308   : > { %v2512_v46 = vpop.f32.mrb[68].mxu0 }
 0x309   : > { %13321 = vst [vmem:[#allocation57_spill] sm:$0xff] %v10799_v48  ;;  %v2513_v60 = vadd.f32 %v10665_v2, %v2512_v46  ;;  %v5784_v63 = vpop.f32.mrb[69].mxu0  ;;  %v3090_v5 = vsel %vm12806_vm0, %v3087_v23, %v3089_v12  ;;  %v3091_v53 = vrot.slane %v10799_v48, 6  ;;  %v3169_v35 = vsel %vm571_vm1, %v3166_v27, %v3168_v43 }
 0x30a   : > { %6877 = vrot.lane.b32.xlu1 %v10158_v38, %s7554_s9  ;;  %v2515_v59 = vpop.f32.mrb[70].mxu0  ;;  %v3170_v45 = vrot.slane %v10799_v48, 7  ;;  %v10823_v34 = vsel %vm373_vm3, %v2970_v54, %v2972_v19  ;;  %6887 = vrot.lane.b32.xlu0 %v10790_v7, %s7553_s8  ;;  %v2974_v28 = vrot.slane %v10799_v48, 5 }
 0x30b   : > { %13322 = vst [vmem:[#allocation76_spill] sm:$0xff] %v10823_v34  ;;  %v2576_v46 = vmax.f32 %v2513_v60, 0.0  ;;  %v2516_v23 = vadd.f32 %v10665_v2, %v2515_v59  ;;  %v5785_v63 = vpop.f32.mrb[71].mxu0  ;;  %v3092_v38 = vsel %vm12806_vm0, %v3089_v12, %v3091_v53 }
 0x30c   : > { %v3171_v36 = vsel %vm571_vm1, %v3168_v43, %v3170_v45  ;;  %v6896_v60 = vpack.i.bf16 %v3092_v38, %v3090_v5  ;;  %v10838_v59 = vsel %vm373_vm3, %v2972_v19, %v2974_v28  ;;  %v13326_v63 = vrot.slane %v10487_v13, 1 }
 0x30d   : > { %v10833_v49 = vmul.f32 %v2797_v44, %v2576_v46  ;;  %v2577_v54 = vmax.f32 %v2516_v23, 0.0  ;;  %v10835_v34 = vpack.i.bf16 %v3171_v36, %v3169_v35  ;;  %13325 = vst [vmem:[#allocation115_spill] sm:$0xff] %v10838_v59  ;;  %v13327_v43 = vrot.slane %v10534_v40, 1 }
 0x30e   : > { %v3232_v12 = vsel %vm657_vm2, %v13326_v63, %v3231_v4  ;;  %6892 = vrot.lane.b32.xlu0 %v10204_v9, %s7554_s9  ;;  %6897 = vrot.lane.b32.xlu1 %v6896_v60, %s7552_s30 }
 0x30f   : > { %13323 = vst [vmem:[#allocation130_spill] sm:$0xff] %v10833_v49  ;;  %13324 = vst [vmem:[#allocation101_spill] sm:$0xff] %v10835_v34  ;;  %v3234_v6 = vsel %vm657_vm2, %v3231_v4, %v13327_v43  ;;  %v10848_v46 = vmul.f32 %v2802_v58, %v2577_v54  ;;  %v3093_v35 = vrot.slane %v10833_v49, 6  ;;  %v3172_v36 = vrot.slane %v10833_v49, 7 }
 0x310   : > { %v2976_v19 = vrot.slane %v10833_v49, 5  ;;  %v2520_v5 = vpop.f32.mrb[72].mxu0  ;;  %v10856_v23 = vpack.i.bf16 %v3234_v6, %v3232_v12  ;;  %v3389_v4 = vrot.slane %v10500_v62, 3 }
 0x311   : > { %13328 = vst [vmem:[#allocation30_spill] sm:$0xff] %v10848_v46  ;;  %v2521_v38 = vadd.f32 %v10665_v2, %v2520_v5  ;;  %v5788_v58 = vpop.f32.mrb[73].mxu0  ;;  %v3094_v54 = vsel %vm12806_vm0, %v3091_v53, %v3093_v35  ;;  %v3095_v60 = vrot.slane %v10848_v46, 6  ;;  %v3173_v43 = vsel %vm571_vm1, %v3170_v45, %v3172_v36  ;;  %v2807_v5 = vpop.permute.xlu0 %2806 }
 0x312   : > { %v2523_v63 = vpop.f32.mrb[74].mxu0  ;;  %v3174_v44 = vrot.slane %v10848_v46, 7  ;;  %v10866_v27 = vsel %vm373_vm3, %v2974_v28, %v2976_v19  ;;  %6912 = vrot.lane.b32.xlu0 %v10296_v32, %s7554_s9  ;;  %6902 = vrot.lane.b32.xlu1 %v10835_v34, %s7553_s8  ;;  %v2978_v9 = vrot.slane %v10848_v46, 5  ;;  %v13330_v28 = vrot.slane %v10487_v13, 3 }
 0x313   : > { %13329 = vst [vmem:[#allocation129_spill] sm:$0xff] %v10866_v27  ;;  %v2578_v6 = vmax.f32 %v2521_v38, 0.0  ;;  %v2524_v53 = vadd.f32 %v10665_v2, %v2523_v63  ;;  %v5789_v12 = vpop.f32.mrb[75].mxu0  ;;  %v3096_v58 = vsel %vm12806_vm0, %v3093_v35, %v3095_v60  ;;  %v2812_v63 = vpop.permute.xlu1 %2811  ;;  %v13334_v35 = vrot.slane %v10534_v40, 3 }
 0x314   : > { %v3175_v45 = vsel %vm571_vm1, %v3172_v36, %v3174_v44  ;;  %v10879_v38 = vsel %vm821_vm6, %v13330_v28, %v3389_v4  ;;  %v6921_v59 = vpack.i.bf16 %v3096_v58, %v3094_v54  ;;  %v10886_v12 = vsel %vm373_vm3, %v2976_v19, %v2978_v9 }
 0x315   : > { %v10881_v27 = vmul.f32 %v2807_v5, %v2578_v6  ;;  %v2579_v32 = vmax.f32 %v2524_v53, 0.0  ;;  %v10883_v34 = vpack.i.bf16 %v3175_v45, %v3173_v43  ;;  %13333 = vst [vmem:[#allocation132_spill] sm:$0xff] %v10886_v12  ;;  %v10891_v36 = vsel %vm821_vm6, %v3389_v4, %v13334_v35 }
 0x316   : > { %6907 = vrot.lane.b32.xlu1 %v10241_v0, %s7554_s9  ;;  %6922 = vrot.lane.b32.xlu0 %v6921_v59, %s7552_s30 }
 0x317   : > { %13331 = vst [vmem:[#allocation36_spill] sm:$0xff] %v10881_v27  ;;  %13332 = vst [vmem:[#allocation56_spill] sm:$0xff] %v10883_v34  ;;  %v10893_v62 = vmul.f32 %v2812_v63, %v2579_v32  ;;  %v3097_v54 = vrot.slane %v10881_v27, 6  ;;  %v3176_v43 = vrot.slane %v10881_v27, 7  ;;  %v2980_v6 = vrot.slane %v10881_v27, 5 }
 0x318   : > { %v2528_v19 = vpop.f32.mrb[76].mxu0 }
 0x319   : > { %13335 = vst [vmem:[#allocation81_spill] sm:$0xff] %v10893_v62  ;;  %v2529_v4 = vadd.f32 %v10665_v2, %v2528_v19  ;;  %v5792_v5 = vpop.f32.mrb[77].mxu0  ;;  %v3098_v58 = vsel %vm12806_vm0, %v3095_v60, %v3097_v54  ;;  %v3099_v0 = vrot.slane %v10893_v62, 6  ;;  %v3177_v59 = vsel %vm571_vm1, %v3174_v44, %v3176_v43  ;;  %v2817_v19 = vpop.permute.xlu0 %2816 }
 0x31a   : > { %v2531_v45 = vpop.f32.mrb[78].mxu0  ;;  %v3178_v28 = vrot.slane %v10893_v62, 7  ;;  %v10909_v32 = vsel %vm373_vm3, %v2978_v9, %v2980_v6  ;;  %6917 = vrot.lane.b32.xlu1 %v10345_v57, %s7554_s9  ;;  %6927 = vrot.lane.b32.xlu0 %v10883_v34, %s7553_s8  ;;  %v2982_v53 = vrot.slane %v10893_v62, 5  ;;  %v2822_v57 = vpop.permute.xlu1 %2821 }
 0x31b   : > { %13336 = vst [vmem:[#allocation128_spill] sm:$0xff] %v10909_v32  ;;  %v2580_v63 = vmax.f32 %v2529_v4, 0.0  ;;  %v2532_v35 = vadd.f32 %v10665_v2, %v2531_v45  ;;  %v5793_v60 = vpop.f32.mrb[79].mxu0  ;;  %v3100_v5 = vsel %vm12806_vm0, %v3097_v54, %v3099_v0 }
 0x31c   : > { %v3179_v44 = vsel %vm571_vm1, %v3176_v43, %v3178_v28  ;;  %v6936_v4 = vpack.i.bf16 %v3100_v5, %v3098_v58  ;;  %v10924_v40 = vsel %vm373_vm3, %v2980_v6, %v2982_v53 }
 0x31d   : > { %v10919_v12 = vmul.f32 %v2817_v19, %v2580_v63  ;;  %v2581_v9 = vmax.f32 %v2532_v35, 0.0  ;;  %v10921_v32 = vpack.i.bf16 %v3179_v44, %v3177_v59  ;;  %13339 = vst [vmem:[#allocation40_spill] sm:$0xff] %v10924_v40  ;;  %v3318_v44 = vrot.slane %v10592_v26, 2 }
 0x31e   : > { %6932 = vrot.lane.b32.xlu0 %v10379_v47, %s7554_s9  ;;  %6937 = vrot.lane.b32.xlu1 %v6936_v4, %s7552_s30  ;;  %v12797_v4 = vrot.slane %v10582_v20, 3 }
 0x31f   : > { %13337 = vst [vmem:[#allocation100_spill] sm:$0xff] %v10919_v12  ;;  %13338 = vst [vmem:[#allocation118_spill] sm:$0xff] %v10921_v32  ;;  %v10926_v34 = vmul.f32 %v2822_v57, %v2581_v9  ;;  %v3101_v54 = vrot.slane %v10919_v12, 6  ;;  %v3180_v43 = vrot.slane %v10919_v12, 7  ;;  %v2984_v45 = vrot.slane %v10919_v12, 5 }
 0x320   : > { %v10934_v58 = vpop.f32.mrb[80].mxu0  ;;  %v3320_v57 = vrot.slane %v10634_v3, 2  ;;  %v3243_v9 = vrot.slane %v10650_v61, 1 }
 0x321   : > { %13340 = vst [vmem:[#allocation14_spill] sm:$0xff] %v10926_v34  ;;  %v5796_v59 = vpop.f32.mrb[81].mxu0  ;;  %v3102_v63 = vsel %vm12806_vm0, %v3099_v0, %v3101_v54  ;;  %v10938_v35 = vsel %vm571_vm1, %v3178_v28, %v3180_v43  ;;  %v12796_v60 = vrot.slane %v10926_v34, 7  ;;  %v10942_v47 = vsel %vm373_vm3, %v2982_v53, %v2984_v45  ;;  %v7496_v53 = vld [vmem:[%s12528_s4] sm:$0xff]  }
 0x322   : > { %v2539_v6 = vpop.f32.mrb[82].mxu0  ;;  %13341 = vst [vmem:[#allocation39_spill] sm:$0xff] %v10938_v35  ;;  %13342 = vst [vmem:[#allocation59_spill] sm:$0xff] %v10942_v47  ;;  %6942 = vrot.lane.b32.xlu1 %v10921_v32, %s7553_s8  ;;  %3508 = vrot.lane.b32.xlu0 %v3102_v63, %s7552_s30  ;;  %v12795_v0 = vrot.slane %v10582_v20, 1  ;;  %v12794_v28 = vrot.slane %v10582_v20, 2  ;;  %v3239_v54 = vrot.slane %v10592_v26, 1 }
 0x323   : > { %v5797_v19 = vpop.f32.mrb[83].mxu0  ;;  %v10950_v5 = vsel %vm571_vm1, %v3180_v43, %v12796_v60  ;;  %5799 = vmatpush3.bf16.msra.mxu1 %v7496_v53  ;;  %v3241_v45 = vrot.slane %v10634_v3, 1  ;;  %v3397_v63 = vrot.slane %v10592_v26, 3  ;;  %v10977_v6 = vsel %vm741_vm4, %v3318_v44, %v3320_v57 }
 0x324   : > { %13343 = vst [vmem:[#allocation80_spill] sm:$0xff] %v10950_v5  ;;  %v10966_v43 = vsel %vm741_vm4, %v12794_v28, %v3318_v44  ;;  %v3240_v19 = vsel %vm657_vm2, %v12795_v0, %v3239_v54  ;;  %v3399_v53 = vrot.slane %v10634_v3, 3  ;;  %5800 = vmatprep.subr.bf16.mxu1 %v12985_v30  ;;  %v3245_v0 = vrot.slane %v10694_v51, 1  ;;  %v11077_v5 = vpop.permute.xlu0 %2826 }
 0x325   : > { %v3242_v44 = vsel %vm657_vm2, %v3239_v54, %v3241_v45  ;;  %v10994_v28 = vsel %vm821_vm6, %v12797_v4, %v3397_v63  ;;  %v3244_v59 = vsel %vm657_vm2, %v3241_v45, %v3243_v9  ;;  %v3403_v45 = vrot.slane %v10694_v51, 3 }
 0x326   : > { %6947 = vrot.lane.b32.xlu1 %v10437_v31, %s7554_s9  ;;  %3626 = vrot.lane.b32.xlu0 %v10938_v35, %s7553_s8  ;;  %v7497_v31 = vld [vmem:[%s12528_s4 + $0x8] sm:$0xff]   ;;  %v10997_v60 = vpack.i.bf16 %v3242_v44, %v3240_v19  ;;  %v11000_v47 = vsel %vm821_vm6, %v3397_v63, %v3399_v53  ;;  %v3246_v54 = vsel %vm657_vm2, %v3243_v9, %v3245_v0  ;;  %v3401_v19 = vrot.slane %v10650_v61, 3  ;;  %v7498_v63 = vld [vmem:[%s12528_s4 + $0x10] sm:$0xff]  }
 0x327   : > { %5801 = vmatpush3.bf16.msra.mxu1 %v7497_v31  ;;  %v11010_v4 = vpack.i.bf16 %v3246_v54, %v3244_v59  ;;  %v3322_v9 = vrot.slane %v10650_v61, 2  ;;  %v3324_v31 = vrot.slane %v10694_v51, 2  ;;  %v3326_v59 = vrot.slane %v10706_v42, 2 }
 0x328   : > { %5802 = vmatprep.subr.bf16.mxu1 %v12985_v30  ;;  %v3328_v44 = vrot.slane %v10741_v29, 2  ;;  %v11028_v54 = vsel %vm821_vm6, %v3401_v19, %v3403_v45  ;;  %v3330_v51 = vrot.slane %v10755_v55, 2  ;;  %vm13347_vm0 = vcmask 1043456  }
 0x329   : > { %v11031_v40 = vsel %vm741_vm4, %v3320_v57, %v3322_v9  ;;  %v11034_v35 = vsel %vm741_vm4, %v3322_v9, %v3324_v31  ;;  %v11046_v57 = vsel %vm741_vm4, %v3324_v31, %v3326_v59  ;;  %v3249_v9 = vrot.slane %v10741_v29, 1 }
 0x32a   : > { %6957 = vrot.lane.b32.xlu1 %v10527_v52, %s7554_s9  ;;  %6952 = vrot.lane.b32.xlu0 %v10489_v41, %s7554_s9  ;;  %v11021_v52 = vsel %vm821_vm6, %v3399_v53, %v3401_v19  ;;  %v3247_v53 = vrot.slane %v10706_v42, 1  ;;  %13344 = vst [vmem:[#allocation134_spill] sm:$0xff] %v11046_v57  ;;  %v11049_v41 = vpop.permute.xlu1 %6717  ;;  %v3405_v31 = vrot.slane %v10706_v42, 3  ;;  %v3253_v19 = vrot.slane %v10788_v17, 1 }
 0x32b   : > { %5803 = vmatpush3.bf16.msra.mxu1 %v7498_v63  ;;  %v3332_v42 = vrot.slane %v10788_v17, 2 }
 0x32c   : > { %5804 = vmatprep.subr.bf16.mxu1 %v12985_v30  ;;  %v3248_v63 = vsel %vm657_vm2, %v3245_v0, %v3247_v53  ;;  %v3250_v32 = vsel %vm657_vm2, %v3247_v53, %v3249_v9  ;;  %v11068_v61 = vsel %vm821_vm6, %v3403_v45, %v3405_v31  ;;  %v3251_v0 = vrot.slane %v10755_v55, 1 }
 0x32d   : > { %v11065_v3 = vpack.i.bf16 %v3250_v32, %v3248_v63  ;;  %v7500_v32 = vld [vmem:[%s12528_s4 + $0x20] ss:$0 sps:$4 sm:$0xff]   ;;  %v3409_v63 = vrot.slane %v10755_v55, 3 }
 0x32e   : > { %6967 = vrot.lane.b32.xlu1 %v10636_v22, %s7554_s9  ;;  %6962 = vrot.lane.b32.xlu0 %v10595_v39, %s7554_s9  ;;  %v7499_v22 = vld [vmem:[%s12528_s4 + $0x18] sm:$0xff]   ;;  %v11056_v39 = vsel %vm741_vm4, %v3326_v59, %v3328_v44  ;;  %v3407_v59 = vrot.slane %v10741_v29, 3  ;;  %v11079_v53 = vpop.permute.xlu1 %6727 }
 0x32f   : > { %5805 = vmatpush3.bf16.msra.mxu1 %v7499_v22  ;;  %13345 = vst [vmem:[#allocation103_spill] sm:$0xff] %v11065_v3  ;;  %13346 = vst [vmem:[#allocation117_spill] sm:$0xff] %v11079_v53  ;;  %v3254_v53 = vsel %vm657_vm2, %v3251_v0, %v3253_v19  ;;  %v4842_v3 = vsel %vm13347_vm0, %v7500_v32, 0  ;;  %v13349_v22 = vpack.i.bf16 %v10048_v21, %v10046_v18  ;;  %v3334_v32 = vrot.slane %v10799_v48, 2 }
 0x330   : > { %5806 = vmatprep.subr.bf16.mxu1 %v12985_v30  ;;  %v11086_v45 = vsel %vm821_vm6, %v3405_v31, %v3407_v59  ;;  %v11100_v31 = vsel %vm821_vm6, %v3407_v59, %v3409_v63  ;;  %v11117_v59 = vsel %vm741_vm4, %v3330_v51, %v3332_v42  ;;  %v2537_v21 = vadd.f32 %v10665_v2, %v10934_v58 }
 0x331   : > { %13348 = vst [vmem:[#allocation16_spill] sm:$0xff] %v11100_v31  ;;  %v3257_v31 = vrot.slane %v10833_v49, 1  ;;  %vm13585_vm0 = vcmask 1041408  }
 0x332   : > { %6977 = vrot.lane.b32.xlu1 %v10743_v14, %s7554_s9  ;;  %6972 = vrot.lane.b32.xlu0 %v10696_v37, %s7554_s9  ;;  %v3252_v14 = vsel %vm657_vm2, %v3249_v9, %v3251_v0  ;;  %v3411_v37 = vrot.slane %v10788_v17, 3 }
 0x333   : > { %v11097_v57 = vpack.i.bf16 %v3254_v53, %v3252_v14  ;;  %v11114_v53 = vsel %vm741_vm4, %v3328_v44, %v3330_v51  ;;  %v11120_v14 = vpop.permute.xlu0 %6722  ;;  %5807 = vmatpush3.bf16.msra.mxu1 %v4842_v3  ;;  %v11130_v44 = vsel %vm741_vm4, %v3332_v42, %v3334_v32  ;;  %v3255_v51 = vrot.slane %v10799_v48, 1 }
 0x334   : > { %v11103_v9 = vsel %vm821_vm6, %v3409_v63, %v3411_v37  ;;  %v11122_v63 = vpop.permute.xlu1 %6737  ;;  %v3413_v3 = vrot.slane %v10799_v48, 3  ;;  %v13351_v42 = vpack.i.bf16 %v10109_v56, %v10083_v25  ;;  %v13354_v25 = vpack.i.bf16 %v10154_v24, %v10125_v33 }
 0x335   : > { %13350 = vst [vmem:[#allocation13_spill] sm:$0xff] %v11122_v63  ;;  %v3256_v55 = vsel %vm657_vm2, %v3253_v19, %v3255_v51  ;;  %v3258_v2 = vsel %vm657_vm2, %v3255_v51, %v3257_v31  ;;  %v3340_v19 = vrot.slane %v10881_v27, 2  ;;  %v3259_v51 = vrot.slane %v10848_v46, 1 }
 0x336   : > { %6987 = vrot.lane.b32.xlu1 %v13349_v22, %s7555_s10  ;;  %6982 = vrot.lane.b32.xlu0 %v10790_v7, %s7554_s9  ;;  %v3336_v22 = vrot.slane %v10833_v49, 2  ;;  %v11156_v58 = vsel %vm821_vm6, %v3411_v37, %v3413_v3  ;;  %v11160_v56 = vpack.i.bf16 %v3258_v2, %v3256_v55  ;;  %v3338_v7 = vrot.slane %v10848_v46, 2 }
 0x337   : > { %v11149_v63 = vpop.permute.xlu0 %6732  ;;  %13353 = vst [vmem:[#allocation58_spill] sm:$0xff] %v11156_v58  ;;  %v3261_v37 = vrot.slane %v10881_v27, 1  ;;  %v13355_v55 = vpack.i.bf16 %v10171_v10, %v10129_v8  ;;  %v3417_v2 = vrot.slane %v10848_v46, 3  ;;  %v3260_v33 = vsel %vm657_vm2, %v3257_v31, %v3259_v51  ;;  %v13376_v8 = vld [vmem:[#allocation2_spill] sm:$0xff] }
 0x338   : > { %v11134_v0 = vsel %vm741_vm4, %v3334_v32, %v3336_v22  ;;  %v3415_v32 = vrot.slane %v10833_v49, 3  ;;  %v11151_v29 = vpop.permute.xlu1 %6747  ;;  %v11189_v58 = vsel %vm741_vm4, %v3338_v7, %v3340_v19  ;;  %v2582_v10 = vmax.f32 %v2537_v21, 0.0 }
 0x339   : > { %13352 = vst [vmem:[#allocation38_spill] sm:$0xff] %v11151_v29  ;;  %v3419_v29 = vrot.slane %v10881_v27, 3  ;;  %v3262_v24 = vsel %vm657_vm2, %v3259_v51, %v3261_v37  ;;  %v13358_v31 = vpack.i.bf16 %v10076_v50, %v10071_v11  ;;  %v3344_v51 = vrot.slane %v10919_v12, 2 }
 0x33a   : > { %6997 = vrot.lane.b32.xlu1 %v10145_v1, %s7557_s12  ;;  %6992 = vrot.lane.b32.xlu0 %v13351_v42, %s7556_s11  ;;  %v11163_v42 = vsel %vm821_vm6, %v3413_v3, %v3415_v32  ;;  %v11180_v3 = vsel %vm741_vm4, %v3336_v22, %v3338_v7  ;;  %v3342_v7 = vrot.slane %v10893_v62, 2  ;;  %v3421_v50 = vrot.slane %v10893_v62, 3 }
 0x33b   : > { %v11184_v17 = vpop.permute.xlu0 %6742  ;;  %v3423_v22 = vrot.slane %v10919_v12, 3  ;;  %v3346_v46 = vrot.slane %v10926_v34, 2 }
 0x33c   : > { %13356 = vst [vmem:[#allocation135_spill] sm:$0xff] %v11184_v17  ;;  %v11226_v11 = vsel %vm741_vm4, %v3342_v7, %v3344_v51 }
 0x33d   : > { %13362 = vst [vmem:[#allocation78_spill] sm:$0xff] %v11226_v11 }
 0x33e   : > { %7007 = vrot.lane.b32.xlu1 %v13354_v25, %s7560_s26  ;;  %7002 = vrot.lane.b32.xlu0 %v13355_v55, %s7558_s13  ;;  %v11197_v25 = vpack.i.bf16 %v3262_v24, %v3260_v33  ;;  %v11200_v55 = vsel %vm821_vm6, %v3415_v32, %v3417_v2  ;;  %v3263_v33 = vrot.slane %v10893_v62, 1  ;;  %v3265_v24 = vrot.slane %v10919_v12, 1 }
 0x33f   : > { %v11215_v32 = vpop.permute.xlu0 %6752 }
 0x340   : > { %v11186_v48 = vpop.permute.xlu1 %6757  ;;  %13359 = vst [vmem:[#allocation133_spill] sm:$0xff] %v11215_v32  ;;  %v3266_v21 = vsel %vm657_vm2, %v3263_v33, %v3265_v24  ;;  %v13363_v32 = vld [vmem:[#allocation86_spill] sm:$0xff] }
 0x341   : > { %13357 = vst [vmem:[#allocation83_spill] sm:$0xff] %v11186_v48  ;;  %v11203_v48 = vsel %vm821_vm6, %v3417_v2, %v3419_v29  ;;  %v11218_v2 = vsel %vm741_vm4, %v3340_v19, %v3342_v7  ;;  %v3264_v19 = vsel %vm657_vm2, %v3261_v37, %v3263_v33  ;;  %v13366_v7 = vld [vmem:[#allocation15_spill] sm:$0xff]  ;;  %v11248_v37 = vsel %vm821_vm6, %v3419_v29, %v3421_v50  ;;  %v13373_v29 = vld [vmem:[#allocation18_spill] sm:$0xff] }
 0x342   : > { %7017 = vrot.lane.b32.xlu1 %v10145_v1, %s7556_s11  ;;  %7012 = vrot.lane.b32.xlu0 %v13358_v31, %s7555_s10  ;;  %13360 = vst [vmem:[#allocation102_spill] sm:$0xff] %v11218_v2  ;;  %v11223_v1 = vmul.f32 %v11077_v5, %v2582_v10  ;;  %v13364_v5 = vld [vmem:[#allocation42_spill] sm:$0xff]  ;;  %v11242_v49 = vpack.i.bf16 %v3266_v21, %v3264_v19  ;;  %13369 = vst [vmem:[#allocation82_spill] sm:$0xff] %v11248_v37  ;;  %v3267_v19 = vrot.slane %v10926_v34, 1 }
 0x343   : > { %v13365_v10 = vpack.i.bf16 %v13363_v32, %v13364_v5  ;;  %v11251_v33 = vsel %vm821_vm6, %v3421_v50, %v3423_v22  ;;  %v11258_v5 = vsel %vm741_vm4, %v3344_v51, %v3346_v46 }
 0x344   : > { %13361 = vst [vmem:[#allocation119_spill] sm:$0xff] %v11223_v1  ;;  %v11229_v31 = vpop.permute.xlu1 %6762  ;;  %13367 = vst [vmem:[#allocation79_spill] sm:$0xff] %v11242_v49  ;;  %v12827_v21 = vrot.slane %v11223_v1, 2  ;;  %v13375_v49 = vld [vmem:[#allocation67_spill] sm:$0xff]  ;;  %v3268_v62 = vsel %vm657_vm2, %v3265_v24, %v3267_v19  ;;  %v12828_v37 = vrot.slane %v11223_v1, 1 }
 0x345   : > { %13370 = vst [vmem:[#allocation104_spill] sm:$0xff] %v11251_v33  ;;  %13371 = vst [vmem:[#allocation86_spill] sm:$0xff] %v11258_v5  ;;  %v13377_v27 = vpack.i.bf16 %v13375_v49, %v13376_v8  ;;  %v13380_v8 = vld [vmem:[#allocation47_spill] sm:$0xff] }
 0x346   : > { %7027 = vrot.lane.b32.xlu1 %v13365_v10, %s7558_s13  ;;  %7022 = vrot.lane.b32.xlu0 %v13366_v7, %s7557_s12  ;;  %v13372_v10 = vld [vmem:[#allocation43_spill] sm:$0xff]  ;;  %v11277_v51 = vsel %vm741_vm4, %v3346_v46, %v12827_v21  ;;  %v3270_v49 = vsel %vm657_vm2, %v3267_v19, %v12828_v37  ;;  %v3188_v46 = vrot.slane %v11223_v1, 7 }
 0x347   : > { %13378 = vst [vmem:[#allocation42_spill] sm:$0xff] %v11277_v51  ;;  %v11295_v24 = vpack.i.bf16 %v3270_v49, %v3268_v62  ;;  %v13384_v62 = vld [vmem:[#allocation121_spill] sm:$0xff]  ;;  %v13385_v49 = vld [vmem:[#allocation106_spill] sm:$0xff] }
 0x348   : > { %v11245_v17 = vpop.permute.xlu0 %6767  ;;  %v11266_v50 = vpop.permute.xlu1 %6777 }
 0x349   : > { %13368 = vst [vmem:[#allocation61_spill] sm:$0xff] %v11245_v17  ;;  %v13374_v17 = vpack.i.bf16 %v13372_v10, %v13373_v29  ;;  %v12829_v29 = vrot.slane %v11223_v1, 3  ;;  %13381 = vst [vmem:[#allocation43_spill] sm:$0xff] %v11295_v24  ;;  %v13386_v10 = vpack.i.bf16 %v13384_v62, %v13385_v49  ;;  %v13392_v62 = vld [vmem:[#allocation17_spill] sm:$0xff] }
 0x34a   : > { %7032 = vrot.lane.b32.xlu0 %v13377_v27, %s7560_s26 }
 0x34b   : > { %7037 = vrot.lane.b32.xlu1 %v13374_v17, %s7555_s10  ;;  %v3425_v17 = vrot.slane %v10926_v34, 3 }
 0x34c   : > { %v11272_v32 = vpop.permute.xlu0 %6772 }
 0x34d   : > { %v11289_v27 = vsel %vm821_vm6, %v3423_v22, %v3425_v17  ;;  %v11300_v21 = vsel %vm821_vm6, %v3425_v17, %v12829_v29  ;;  %v13387_v17 = vld [vmem:[#allocation21_spill] sm:$0xff] }
 0x34e   : > { %13379 = vst [vmem:[#allocation15_spill] sm:$0xff] %v11289_v27  ;;  %13382 = vst [vmem:[#allocation18_spill] sm:$0xff] %v11300_v21  ;;  %7042 = vrot.lane.b32.xlu0 %v13366_v7, %s7556_s11  ;;  %v13388_v29 = vld [vmem:[#allocation105_spill] sm:$0xff] }
 0x34f   : > { %7047 = vrot.lane.b32.xlu1 %v13380_v8, %s7557_s12  ;;  %v13389_v12 = vpack.i.bf16 %v13387_v17, %v13388_v29  ;;  %v13397_v29 = vld [vmem:[#allocation90_spill] sm:$0xff]  ;;  %v13398_v17 = vld [vmem:[#allocation5_spill] sm:$0xff] }
 0x350   : > { %v11304_v19 = vpop.permute.xlu0 %6782  ;;  %v11306_v22 = vpop.permute.xlu1 %6787  ;;  %v13399_v27 = vpack.i.bf16 %v13397_v29, %v13398_v17  ;;  %v13411_v29 = vld [vmem:[#allocation48_spill] sm:$0xff] }
 0x351   : > { %13383 = vst [vmem:[#allocation67_spill] sm:$0xff] %v11306_v22  ;;  %v13390_v22 = vrot.slane %v10926_v34, 7 }
 0x352   : > { %7052 = vrot.lane.b32.xlu0 %v13389_v12, %s7558_s13 }
 0x353   : > { %7057 = vrot.lane.b32.xlu1 %v13386_v10, %s7560_s26  ;;  %v11326_v37 = vsel %vm571_vm1, %v13390_v22, %v3188_v46  ;;  %v13393_v10 = vld [vmem:[#allocation87_spill] sm:$0xff]  ;;  %v13400_v46 = vld [vmem:[#allocation24_spill] sm:$0xff] }
 0x354   : > { %v11319_v7 = vpop.permute.xlu0 %6797  ;;  %v11321_v24 = vpop.permute.xlu1 %6792  ;;  %13391 = vst [vmem:[#allocation2_spill] sm:$0xff] %v11326_v37  ;;  %v13394_v49 = vpack.i.bf16 %v13392_v62, %v13393_v10  ;;  %v13403_v37 = vld [vmem:[#allocation64_spill] sm:$0xff]  ;;  %v13404_v62 = vld [vmem:[#allocation45_spill] sm:$0xff] }
 0x355   : > { %v13405_v10 = vpack.i.bf16 %v13403_v37, %v13404_v62  ;;  %v13414_v37 = vld [vmem:[#allocation110_spill] sm:$0xff]  ;;  %v13415_v62 = vld [vmem:[#allocation71_spill] sm:$0xff] }
 0x356   : > { %7062 = vrot.lane.b32.xlu0 %v13394_v49, %s7555_s10  ;;  %v13406_v49 = vld [vmem:[#allocation107_spill] sm:$0xff] }
 0x357   : > { %7067 = vrot.lane.b32.xlu1 %v13380_v8, %s7556_s11 }
 0x358   : > { %v11334_v1 = vpop.permute.xlu1 %6802  ;;  %v11336_v12 = vpop.permute.xlu0 %6807 }
 0x359   : > { %13395 = vst [vmem:[#allocation47_spill] sm:$0xff] %v11334_v1  ;;  %13396 = vst [vmem:[#allocation121_spill] sm:$0xff] %v11336_v12  ;;  %v13407_v12 = vld [vmem:[#allocation93_spill] sm:$0xff] }
 0x35a   : > { %7072 = vrot.lane.b32.xlu0 %v13400_v46, %s7557_s12  ;;  %v13408_v34 = vpack.i.bf16 %v13406_v49, %v13407_v12  ;;  %v13418_v12 = vld [vmem:[#allocation26_spill] sm:$0xff] }
 0x35b   : > { %7077 = vrot.lane.b32.xlu1 %v13399_v27, %s7558_s13 }
 0x35c   : > { %v11344_v22 = vpop.permute.xlu1 %6817  ;;  %v11346_v8 = vpop.permute.xlu0 %6812 }
 0x35d   : > { %13401 = vst [vmem:[#allocation106_spill] sm:$0xff] %v11344_v22  ;;  %13402 = vst [vmem:[#allocation21_spill] sm:$0xff] %v11346_v8 }
 0x35e   : > { %7082 = vrot.lane.b32.xlu0 %v13408_v34, %s7560_s26  ;;  %v13417_v34 = vld [vmem:[#allocation70_spill] sm:$0xff] }
 0x35f   : > { %7087 = vrot.lane.b32.xlu1 %v13405_v10, %s7555_s10  ;;  %v13416_v10 = vpack.i.bf16 %v13414_v37, %v13415_v62  ;;  %v13419_v49 = vpack.i.bf16 %v13417_v34, %v13418_v12  ;;  %v13426_v37 = vld [vmem:[#allocation25_spill] sm:$0xff]  ;;  %v13427_v62 = vld [vmem:[#allocation95_spill] sm:$0xff]  ;;  %v13429_v34 = vld [vmem:[#allocation94_spill] sm:$0xff] }
 0x360   : > { %v11356_v21 = vpop.permute.xlu0 %6822  ;;  %v11358_v27 = vpop.permute.xlu1 %6827 }
 0x361   : > { %13409 = vst [vmem:[#allocation105_spill] sm:$0xff] %v11356_v21  ;;  %13410 = vst [vmem:[#allocation17_spill] sm:$0xff] %v11358_v27 }
 0x362   : > { %7092 = vrot.lane.b32.xlu0 %v13400_v46, %s7556_s11 }
 0x363   : > { %7097 = vrot.lane.b32.xlu1 %v13411_v29, %s7557_s12 }
 0x364   : > { %v11364_v17 = vpop.permute.xlu0 %6837  ;;  %v11366_v22 = vpop.permute.xlu1 %6832 }
 0x365   : > { %13412 = vst [vmem:[#allocation87_spill] sm:$0xff] %v11364_v17  ;;  %13413 = vst [vmem:[#allocation90_spill] sm:$0xff] %v11366_v22  ;;  %v13422_v17 = vld [vmem:[#allocation88_spill] sm:$0xff] }
 0x366   : > { %7102 = vrot.lane.b32.xlu0 %v13419_v49, %s7558_s13  ;;  %v13423_v22 = vld [vmem:[#allocation4_spill] sm:$0xff]  ;;  %v13432_v49 = vld [vmem:[#allocation91_spill] sm:$0xff] }
 0x367   : > { %7107 = vrot.lane.b32.xlu1 %v13416_v10, %s7560_s26  ;;  %v13424_v21 = vpack.i.bf16 %v13422_v17, %v13423_v22  ;;  %v13428_v10 = vpack.i.bf16 %v13426_v37, %v13427_v62  ;;  %v13434_v22 = vld [vmem:[#allocation72_spill] sm:$0xff]  ;;  %v13438_v37 = vld [vmem:[#allocation97_spill] sm:$0xff] }
 0x368   : > { %v11376_v27 = vpop.permute.xlu0 %6847  ;;  %v11380_v46 = vpop.permute.xlu1 %6842 }
 0x369   : > { %13420 = vst [vmem:[#allocation5_spill] sm:$0xff] %v11376_v27  ;;  %13421 = vst [vmem:[#allocation24_spill] sm:$0xff] %v11380_v46 }
 0x36a   : > { %7112 = vrot.lane.b32.xlu0 %v13424_v21, %s7555_s10  ;;  %v13435_v21 = vld [vmem:[#allocation53_spill] sm:$0xff] }
 0x36b   : > { %7117 = vrot.lane.b32.xlu1 %v13411_v29, %s7556_s11  ;;  %v13431_v29 = vld [vmem:[#allocation120_spill] sm:$0xff]  ;;  %v13436_v17 = vpack.i.bf16 %v13434_v22, %v13435_v21  ;;  %v13444_v21 = vld [vmem:[#allocation23_spill] sm:$0xff] }
 0x36c   : > { %v11386_v8 = vpop.permute.xlu0 %6852  ;;  %v13433_v27 = vpack.i.bf16 %v13431_v29, %v13432_v49  ;;  %v13441_v29 = vld [vmem:[#allocation111_spill] sm:$0xff]  ;;  %v13443_v22 = vld [vmem:[#allocation52_spill] sm:$0xff] }
 0x36d   : > { %13425 = vst [vmem:[#allocation64_spill] sm:$0xff] %v11386_v8 }
 0x36e   : > { %7122 = vrot.lane.b32.xlu0 %v13429_v34, %s7557_s12 }
 0x36f   : > { %7127 = vrot.lane.b32.xlu1 %v13428_v10, %s7558_s13 }
 0x370   : > { %v11394_v12 = vpop.permute.xlu1 %6857  ;;  %v11406_v46 = vpop.permute.xlu0 %6872 }
 0x371   : > { %13430 = vst [vmem:[#allocation45_spill] sm:$0xff] %v11394_v12 }
 0x372   : > { %7132 = vrot.lane.b32.xlu0 %v13436_v17, %s7560_s26  ;;  %v13445_v17 = vpack.i.bf16 %v13443_v22, %v13444_v21  ;;  %v13454_v21 = vld [vmem:[#allocation35_spill] sm:$0xff] }
 0x373   : > { %7137 = vrot.lane.b32.xlu1 %v13433_v27, %s7555_s10  ;;  %v13440_v27 = vld [vmem:[#allocation131_spill] sm:$0xff] }
 0x374   : > { %v11404_v8 = vpop.permute.xlu1 %6862  ;;  %v13442_v49 = vpack.i.bf16 %v13440_v27, %v13441_v29  ;;  %v13451_v29 = vld [vmem:[#allocation114_spill] sm:$0xff] }
 0x375   : > { %13437 = vst [vmem:[#allocation107_spill] sm:$0xff] %v11404_v8 }
 0x376   : > { %7142 = vrot.lane.b32.xlu0 %v13429_v34, %s7556_s11  ;;  %v13447_v34 = vld [vmem:[#allocation123_spill] sm:$0xff] }
 0x377   : > { %7147 = vrot.lane.b32.xlu1 %v13438_v37, %s7557_s12 }
 0x378   : > { %v11412_v62 = vpop.permute.xlu1 %6867  ;;  %v11414_v10 = vpop.permute.xlu0 %6882 }
 0x379   : > { %13439 = vst [vmem:[#allocation93_spill] sm:$0xff] %v11414_v10  ;;  %v13448_v10 = vld [vmem:[#allocation108_spill] sm:$0xff] }
 0x37a   : > { %7152 = vrot.lane.b32.xlu0 %v13445_v17, %s7558_s13  ;;  %v13449_v5 = vpack.i.bf16 %v13447_v34, %v13448_v10  ;;  %v13457_v10 = vld [vmem:[#allocation68_spill] sm:$0xff]  ;;  %v13459_v34 = vld [vmem:[#allocation126_spill] sm:$0xff] }
 0x37b   : > { %7157 = vrot.lane.b32.xlu1 %v13442_v49, %s7560_s26  ;;  %v13452_v49 = vld [vmem:[#allocation10_spill] sm:$0xff] }
 0x37c   : > { %v11424_v8 = vpop.permute.xlu1 %6877  ;;  %v11426_v12 = vpop.permute.xlu0 %6887  ;;  %v13453_v22 = vpack.i.bf16 %v13451_v29, %v13452_v49  ;;  %v13463_v49 = vld [vmem:[#allocation28_spill] sm:$0xff] }
 0x37d   : > { %13446 = vst [vmem:[#allocation48_spill] sm:$0xff] %v11426_v12  ;;  %v13456_v12 = vld [vmem:[#allocation122_spill] sm:$0xff] }
 0x37e   : > { %7162 = vrot.lane.b32.xlu0 %v13449_v5, %s7555_s10  ;;  %v13458_v5 = vpack.i.bf16 %v13456_v12, %v13457_v10  ;;  %v13466_v12 = vld [vmem:[#allocation7_spill] sm:$0xff] }
 0x37f   : > { %7167 = vrot.lane.b32.xlu1 %v13438_v37, %s7556_s11  ;;  %v13467_v10 = vld [vmem:[#allocation127_spill] sm:$0xff] }
 0x380   : > { %v11434_v51 = vpop.permute.xlu0 %6892  ;;  %v11436_v27 = vpop.permute.xlu1 %6897 }
 0x381   : > { %13450 = vst [vmem:[#allocation110_spill] sm:$0xff] %v11436_v27  ;;  %v13460_v27 = vld [vmem:[#allocation55_spill] sm:$0xff] }
 0x382   : > { %7172 = vrot.lane.b32.xlu0 %v13454_v21, %s7557_s12  ;;  %v13461_v33 = vpack.i.bf16 %v13459_v34, %v13460_v27  ;;  %v13470_v27 = vld [vmem:[#allocation98_spill] sm:$0xff] }
 0x383   : > { %7177 = vrot.lane.b32.xlu1 %v13453_v22, %s7558_s13 }
 0x384   : > { %v11444_v17 = vpop.permute.xlu0 %6912  ;;  %v11446_v37 = vpop.permute.xlu1 %6902 }
 0x385   : > { %13455 = vst [vmem:[#allocation71_spill] sm:$0xff] %v11446_v37 }
 0x386   : > { %7182 = vrot.lane.b32.xlu0 %v13461_v33, %s7560_s26  ;;  %v13469_v33 = vld [vmem:[#allocation116_spill] sm:$0xff] }
 0x387   : > { %7187 = vrot.lane.b32.xlu1 %v13458_v5, %s7555_s10  ;;  %v13468_v5 = vpack.i.bf16 %v13466_v12, %v13467_v10  ;;  %v13471_v34 = vpack.i.bf16 %v13469_v33, %v13470_v27  ;;  %v13478_v10 = vpack.i.bf16 %v10811_v15, %v10806_v16  ;;  %v13485_v16 = vpack.i.bf16 %v10891_v36, %v10879_v38  ;;  %v13486_v15 = vld [vmem:[#allocation27_spill] sm:$0xff] }
 0x388   : > { %v11456_v1 = vpop.permute.xlu1 %6907  ;;  %v11458_v29 = vpop.permute.xlu0 %6922  ;;  %v13490_v38 = vrot.slane %v10582_v20, 2 }
 0x389   : > { %13462 = vst [vmem:[#allocation70_spill] sm:$0xff] %v11458_v29 }
 0x38a   : > { %7192 = vrot.lane.b32.xlu0 %v13454_v21, %s7556_s11  ;;  %v13473_v21 = vld [vmem:[#allocation51_spill] sm:$0xff] }
 0x38b   : > { %7197 = vrot.lane.b32.xlu1 %v13463_v49, %s7557_s12 }
 0x38c   : > { %v11464_v22 = vpop.permute.xlu1 %6917  ;;  %v11466_v37 = vpop.permute.xlu0 %6927 }
 0x38d   : > { %13464 = vst [vmem:[#allocation26_spill] sm:$0xff] %v11464_v22  ;;  %13465 = vst [vmem:[#allocation88_spill] sm:$0xff] %v11466_v37  ;;  %v13474_v37 = vld [vmem:[#allocation3_spill] sm:$0xff] }
 0x38e   : > { %7202 = vrot.lane.b32.xlu0 %v13471_v34, %s7558_s13  ;;  %v13475_v11 = vpack.i.bf16 %v13473_v21, %v13474_v37  ;;  %v13483_v34 = vld [vmem:[#allocation50_spill] sm:$0xff] }
 0x38f   : > { %7207 = vrot.lane.b32.xlu1 %v13468_v5, %s7560_s26  ;;  %v13479_v5 = vld [vmem:[#allocation9_spill] sm:$0xff]  ;;  %v13484_v21 = vpack.i.bf16 %v13483_v34, %v10487_v13  ;;  %v13489_v13 = vrot.slane %v10582_v20, 3 }
 0x390   : > { %v11476_v29 = vpop.permute.xlu0 %6932  ;;  %v11478_v2 = vpop.permute.xlu1 %6937  ;;  %v3235_v33 = vrot.slane %v13479_v5, 1 }
 0x391   : > { %13472 = vst [vmem:[#allocation4_spill] sm:$0xff] %v11478_v2 }
 0x392   : > { %7212 = vrot.lane.b32.xlu0 %v13475_v11, %s7555_s10  ;;  %v13482_v11 = vrot.slane %v10582_v20, 1 }
 0x393   : > { %7217 = vrot.lane.b32.xlu1 %v13463_v49, %s7556_s11 }
 0x394   : > { %v11486_v22 = vpop.permute.xlu1 %6942  ;;  %v11488_v12 = vpop.permute.xlu0 %3508  ;;  %v3238_v37 = vsel %vm657_vm2, %v3235_v33, %v13482_v11 }
 0x395   : > { %13476 = vst [vmem:[#allocation25_spill] sm:$0xff] %v11486_v22  ;;  %13477 = vst [vmem:[#allocation95_spill] sm:$0xff] %v11488_v12 }
 0x396   : > { %7222 = vrot.lane.b32.xlu0 %v10856_v23, %s7557_s12 }
 0x397   : > { %7227 = vrot.lane.b32.xlu1 %v13478_v10, %s7558_s13  ;;  %v13487_v10 = vrot.slane %v13486_v15, 1 }
 0x398   : > { %v11497_v49 = vpop.permute.xlu1 %6947  ;;  %v11499_v27 = vpop.permute.xlu0 %3626 }
 0x399   : > { %13480 = vst [vmem:[#allocation94_spill] sm:$0xff] %v11497_v49  ;;  %13481 = vst [vmem:[#allocation120_spill] sm:$0xff] %v11499_v27  ;;  %v3236_v12 = vsel %vm657_vm2, %v13487_v10, %v3235_v33  ;;  %v3393_v27 = vrot.slane %v13479_v5, 3  ;;  %v3314_v49 = vrot.slane %v13479_v5, 2  ;;  %v13491_v33 = vrot.slane %v13486_v15, 3 }
 0x39a   : > { %7232 = vrot.lane.b32.xlu0 %v13485_v16, %s7560_s26  ;;  %v7246_v11 = vpack.i.bf16 %v3238_v37, %v3236_v12  ;;  %vm5375_vm2 = vcmask 125952  }
 0x39b   : > { %7237 = vrot.lane.b32.xlu1 %v13484_v21, %s7555_s10  ;;  %v3396_v21 = vsel %vm821_vm6, %v3393_v27, %v13489_v13  ;;  %v3317_v36 = vsel %vm741_vm4, %v3314_v49, %v13490_v38  ;;  %v3394_v16 = vsel %vm821_vm6, %v13491_v33, %v3393_v27  ;;  %v13493_v13 = vrot.slane %v13486_v15, 2 }
 0x39c   : > { %v11516_v22 = vpop.permute.xlu1 %6957  ;;  %v11518_v2 = vpop.permute.xlu0 %6952  ;;  %v7256_v10 = vpack.i.bf16 %v3396_v21, %v3394_v16  ;;  %v7261_v27 = vpack.i.bf16 %v13479_v5, %v13486_v15  ;;  %v13497_v16 = vpack.i.bf16 %v10977_v6, %v10966_v43  ;;  %v13499_v6 = vpack.i.bf16 %v10592_v26, %v10582_v20 }
 0x39d   : > { %13488 = vst [vmem:[#allocation91_spill] sm:$0xff] %v11516_v22  ;;  %v3315_v34 = vsel %vm741_vm4, %v13493_v13, %v3314_v49  ;;  %v6870_v49 = vunpack.i.h.bf16 %v11412_v62  ;;  %v13498_v13 = vld [vmem:[#allocation11_spill] sm:$0xff]  ;;  %vm5416_vm4 = vcmask 123904  }
 0x39e   : > { %7242 = vrot.lane.b32.xlu0 %v10856_v23, %s7556_s11  ;;  %v7251_v22 = vpack.i.bf16 %v3317_v36, %v3315_v34  ;;  %v6869_v34 = vunpack.i.l.bf16 %v11412_v62 }
 0x39f   : > { %7247 = vrot.lane.b32.xlu1 %v7246_v11, %s7557_s12 }
 0x3a0   : > { %v11533_v12 = vpop.permute.xlu1 %6967  ;;  %v11535_v37 = vpop.permute.xlu0 %6962 }
 0x3a1   : > { %13492 = vst [vmem:[#allocation72_spill] sm:$0xff] %v11533_v12 }
 0x3a2   : > { %7252 = vrot.lane.b32.xlu0 %v7251_v22, %s7558_s13 }
 0x3a3   : > { %7257 = vrot.lane.b32.xlu1 %v7256_v10, %s7560_s26 }
 0x3a4   : > { %v11542_v38 = vpop.permute.xlu1 %6977  ;;  %v11544_v23 = vpop.permute.xlu0 %6972 }
 0x3a5   : > { %13494 = vst [vmem:[#allocation53_spill] sm:$0xff] %v11542_v38  ;;  %13495 = vst [vmem:[#allocation97_spill] sm:$0xff] %v11544_v23 }
 0x3a6   : > { %7262 = vrot.lane.b32.xlu0 %v7261_v27, %s7555_s10  ;;  %v4469_v27 = vsel %vm1958_vm10, %v13498_v13, %v6870_v49 }
 0x3a7   : > { %7267 = vrot.lane.b32.xlu1 %v7246_v11, %s7556_s11 }
 0x3a8   : > { %v6988_v21 = vpop.permute.xlu1 %6987  ;;  %v11550_v33 = vpop.permute.xlu0 %6982 }
 0x3a9   : > { %13496 = vst [vmem:[#allocation131_spill] sm:$0xff] %v11550_v33  ;;  %v6990_v36 = vunpack.i.h.bf16 %v6988_v21  ;;  %v6989_v22 = vunpack.i.l.bf16 %v6988_v21  ;;  %v4468_v33 = vsel %vm1958_vm10, %v13498_v13, %v6869_v34  ;;  %v13500_v34 = vpack.i.bf16 %v11000_v47, %v10994_v28 }
 0x3aa   : > { %7272 = vrot.lane.b32.xlu0 %v10997_v60, %s7557_s12  ;;  %v6875_v47 = vunpack.i.h.bf16 %v11406_v46  ;;  %v6874_v28 = vunpack.i.l.bf16 %v11406_v46  ;;  %v13502_v46 = vld [vmem:[#allocation63_spill] sm:$0xff] }
 0x3ab   : > { %7277 = vrot.lane.b32.xlu1 %v13497_v16, %s7558_s13  ;;  %v4510_v21 = vsel %vm2000_vm11, %v4469_v27, %v6990_v36  ;;  %v4509_v23 = vsel %vm2000_vm11, %v4468_v33, %v6989_v22  ;;  %v6720_v36 = vunpack.i.h.bf16 %v11049_v41  ;;  %v6719_v33 = vunpack.i.l.bf16 %v11049_v41 }
 0x3ac   : > { %v6998_v11 = vpop.permute.xlu1 %6997  ;;  %v6993_v10 = vpop.permute.xlu0 %6992 }
 0x3ad   : > { %v6995_v38 = vunpack.i.h.bf16 %v6993_v10  ;;  %v6994_v62 = vunpack.i.l.bf16 %v6993_v10  ;;  %v7000_v12 = vunpack.i.h.bf16 %v6998_v11  ;;  %v6999_v43 = vunpack.i.l.bf16 %v6998_v11 }
 0x3ae   : > { %7282 = vrot.lane.b32.xlu0 %v13500_v34, %s7560_s26 }
 0x3af   : > { %7287 = vrot.lane.b32.xlu1 %v13499_v6, %s7555_s10  ;;  %v4551_v16 = vsel %vm2042_vm12, %v4510_v21, %v6995_v38  ;;  %v4550_v49 = vsel %vm2042_vm12, %v4509_v23, %v6994_v62  ;;  %v6765_v6 = vunpack.i.h.bf16 %v11229_v31  ;;  %v6764_v38 = vunpack.i.l.bf16 %v11229_v31 }
 0x3b0   : > { %v7008_v22 = vpop.permute.xlu1 %7007  ;;  %v7003_v11 = vpop.permute.xlu0 %7002  ;;  %v4591_v23 = vsel %vm2084_vm13, %v4550_v49, %v6999_v43  ;;  %v4592_v62 = vsel %vm2084_vm13, %v4551_v16, %v7000_v12  ;;  %v13501_v31 = vrot.slane %v10046_v18, 5  ;;  %v13503_v18 = vpack.i.bf16 %v11028_v54, %v11021_v52 }
 0x3b1   : > { %v7010_v10 = vunpack.i.h.bf16 %v7008_v22  ;;  %v7009_v13 = vunpack.i.l.bf16 %v7008_v22  ;;  %v7005_v27 = vunpack.i.h.bf16 %v7003_v11  ;;  %v7004_v26 = vunpack.i.l.bf16 %v7003_v11 }
 0x3b2   : > { %7292 = vrot.lane.b32.xlu0 %v10997_v60, %s7556_s11  ;;  %v3025_v43 = vsel %vm373_vm3, 0.0, %v13501_v31  ;;  %v4391_v11 = vsel %vm1876_vm8, %v13502_v46, %v6720_v36  ;;  %v13504_v36 = vpack.i.bf16 %v11034_v35, %v11031_v40 }
 0x3b3   : > { %7297 = vrot.lane.b32.xlu1 %v11010_v4, %s7557_s12  ;;  %v4632_v41 = vsel %vm2126_vm14, %v4591_v23, %v7004_v26  ;;  %v4633_v21 = vsel %vm2126_vm14, %v4592_v62, %v7005_v27  ;;  %v4390_v22 = vsel %vm1876_vm8, %v3025_v43, %v6719_v33  ;;  %v4430_v23 = vsel %vm1917_vm9, %v4391_v11, %v6765_v6  ;;  %v13505_v43 = vld [vmem:[#allocation29_spill] sm:$0xff] }
 0x3b4   : > { %v7018_v49 = vpop.permute.xlu1 %7017  ;;  %v7013_v12 = vpop.permute.xlu0 %7012  ;;  %v4673_v16 = vsel %vm2168_vm15, %v4632_v41, %v7009_v13  ;;  %v4674_v34 = vsel %vm2168_vm15, %v4633_v21, %v7010_v10  ;;  %v4429_v60 = vsel %vm1917_vm9, %v4390_v22, %v6764_v38  ;;  %v4471_v13 = vsel %vm1958_vm10, %v4430_v23, %v6875_v47 }
 0x3b5   : > { %v7015_v26 = vunpack.i.h.bf16 %v7013_v12  ;;  %v7014_v27 = vunpack.i.l.bf16 %v7013_v12  ;;  %v4714_v62 = vpack.c.bf16 %v4674_v34, %v4673_v16  ;;  %v4470_v10 = vsel %vm1958_vm10, %v4429_v60, %v6874_v28 }
 0x3b6   : > { %v7020_v33 = vunpack.i.h.bf16 %v7018_v49  ;;  %v7019_v41 = vunpack.i.l.bf16 %v7018_v49  ;;  %7302 = vrot.lane.b32.xlu0 %v13504_v36, %s7558_s13  ;;  %v13506_v49 = vld [vmem:[#allocation96_spill] sm:$0xff]  ;;  %v6725_v16 = vunpack.i.h.bf16 %v11120_v14  ;;  %v6724_v34 = vunpack.i.l.bf16 %v11120_v14 }
 0x3b7   : > { %7307 = vrot.lane.b32.xlu1 %v13503_v18, %s7560_s26  ;;  %v4512_v6 = vsel %vm2000_vm11, %v4471_v13, %v7015_v26  ;;  %v4511_v38 = vsel %vm2000_vm11, %v4470_v10, %v7014_v27  ;;  %5809 = vmatmul.mubr.msk.bf16.vlgmr.msra.gmra.mrb[0].mxu1 %vm2274_vm5, %v4714_v62  ;;  %v13507_v12 = vpack.i.bf16 %v13505_v43, %v13506_v49  ;;  %v6775_v11 = vunpack.i.h.bf16 %v11272_v32  ;;  %v13508_v13 = vld [vmem:[#allocation134_spill] sm:$0xff] }
 0x3b8   : > { %v7028_v52 = vpop.permute.xlu1 %7027  ;;  %v7023_v54 = vpop.permute.xlu0 %7022  ;;  %5812 = vmatprep.mubr.msk.bf16.mxu1 %vm7559_vm7, %v12985_v30  ;;  %v4552_v40 = vsel %vm2042_vm12, %v4511_v38, %v7019_v41  ;;  %v4553_v35 = vsel %vm2042_vm12, %v4512_v6, %v7020_v33  ;;  %v6774_v26 = vunpack.i.l.bf16 %v11272_v32  ;;  %v6880_v23 = vunpack.i.h.bf16 %v11424_v8  ;;  %v13510_v32 = vld [vmem:[#allocation103_spill] sm:$0xff]  ;;  %v13511_v6 = vld [vmem:[#allocation84_spill] sm:$0xff] }
 0x3b9   : > { %v7025_v21 = vunpack.i.h.bf16 %v7023_v54  ;;  %v7024_v31 = vunpack.i.l.bf16 %v7023_v54  ;;  %v7030_v47 = vunpack.i.h.bf16 %v7028_v52  ;;  %v7029_v28 = vunpack.i.l.bf16 %v7028_v52 }
 0x3ba   : > { %7312 = vrot.lane.b32.xlu0 %v13507_v12, %s7555_s10  ;;  %v6879_v60 = vunpack.i.l.bf16 %v11424_v8  ;;  %v13509_v14 = vpack.i.bf16 %v11056_v39, %v13508_v13  ;;  %v4392_v38 = vsel %vm1876_vm8, %v13511_v6, %v6724_v34  ;;  %v13512_v8 = vld [vmem:[#allocation32_spill] sm:$0xff]  ;;  %v13513_v34 = vld [vmem:[#allocation99_spill] sm:$0xff] }
 0x3bb   : > { %7317 = vrot.lane.b32.xlu1 %v11010_v4, %s7556_s11  ;;  %v4593_v22 = vsel %vm2084_vm13, %v4552_v40, %v7024_v31  ;;  %v4594_v46 = vsel %vm2084_vm13, %v4553_v35, %v7025_v21  ;;  %v4393_v52 = vsel %vm1876_vm8, %v13512_v8, %v6725_v16  ;;  %v13514_v16 = vld [vmem:[#allocation74_spill] sm:$0xff]  ;;  %v6894_v8 = vunpack.i.l.bf16 %v11434_v51 }
 0x3bc   : > { %v7033_v27 = vpop.permute.xlu0 %7032  ;;  %v4634_v41 = vsel %vm2126_vm14, %v4593_v22, %v7029_v28  ;;  %v4635_v36 = vsel %vm2126_vm14, %v4594_v46, %v7030_v47  ;;  %v4432_v31 = vsel %vm1917_vm9, %v4393_v52, %v6775_v11  ;;  %v4431_v28 = vsel %vm1917_vm9, %v4392_v38, %v6774_v26 }
 0x3bd   : > { %v7038_v4 = vpop.permute.xlu1 %7037  ;;  %v7035_v18 = vunpack.i.h.bf16 %v7033_v27  ;;  %v7034_v62 = vunpack.i.l.bf16 %v7033_v27  ;;  %v4473_v35 = vsel %vm1958_vm10, %v4432_v31, %v6880_v23  ;;  %v4472_v43 = vsel %vm1958_vm10, %v4431_v28, %v6879_v60  ;;  %v13517_v23 = vld [vmem:[#allocation117_spill] sm:$0xff] }
 0x3be   : > { %v7040_v10 = vunpack.i.h.bf16 %v7038_v4  ;;  %v7039_v33 = vunpack.i.l.bf16 %v7038_v4  ;;  %7322 = vrot.lane.b32.xlu0 %v13510_v32, %s7557_s12  ;;  %v13515_v22 = vpack.i.bf16 %v13513_v34, %v13514_v16  ;;  %v13516_v26 = vpack.i.bf16 %v11086_v45, %v11068_v61  ;;  %v13520_v16 = vld [vmem:[#allocation16_spill] sm:$0xff] }
 0x3bf   : > { %7327 = vrot.lane.b32.xlu1 %v13509_v14, %s7558_s13  ;;  %v4675_v54 = vsel %vm2168_vm15, %v4634_v41, %v7034_v62  ;;  %v4676_v39 = vsel %vm2168_vm15, %v4635_v36, %v7035_v18  ;;  %v6730_v60 = vunpack.i.h.bf16 %v13517_v23  ;;  %v6729_v14 = vunpack.i.l.bf16 %v13517_v23 }
 0x3c0   : > { %v7043_v40 = vpop.permute.xlu0 %7042  ;;  %v4715_v47 = vpack.c.bf16 %v4676_v39, %v4675_v54  ;;  %v4514_v46 = vsel %vm2000_vm11, %v4473_v35, %v7040_v10  ;;  %v4513_v4 = vsel %vm2000_vm11, %v4472_v43, %v7039_v33  ;;  %v6780_v10 = vunpack.i.h.bf16 %v11266_v50  ;;  %v13518_v39 = vld [vmem:[#allocation33_spill] sm:$0xff] }
 0x3c1   : > { %v7048_v21 = vpop.permute.xlu1 %7047  ;;  %v7045_v49 = vunpack.i.h.bf16 %v7043_v40  ;;  %v7044_v12 = vunpack.i.l.bf16 %v7043_v40  ;;  %v6779_v45 = vunpack.i.l.bf16 %v11266_v50  ;;  %v6895_v38 = vunpack.i.h.bf16 %v11434_v51  ;;  %v13519_v40 = vld [vmem:[#allocation62_spill] sm:$0xff] }
 0x3c2   : > { %v7050_v11 = vunpack.i.h.bf16 %v7048_v21  ;;  %v7049_v27 = vunpack.i.l.bf16 %v7048_v21  ;;  %7332 = vrot.lane.b32.xlu0 %v13516_v26, %s7560_s26  ;;  %5813 = vmatmul.mubr.msk.bf16.gmra.mrb[4].mxu1 %vm2274_vm5, %v4715_v47  ;;  %v4395_v21 = vsel %vm1876_vm8, %v13518_v39, %v6730_v60  ;;  %v4394_v47 = vsel %vm1876_vm8, %v13519_v40, %v6729_v14 }
 0x3c3   : > { %7337 = vrot.lane.b32.xlu1 %v13515_v22, %s7555_s10  ;;  %v4555_v18 = vsel %vm2042_vm12, %v4514_v46, %v7045_v49  ;;  %v4554_v62 = vsel %vm2042_vm12, %v4513_v4, %v7044_v12  ;;  %5816 = vmatprep.mubr.msk.bf16.mxu1 %vm7559_vm7, %v12985_v30  ;;  %v4434_v51 = vsel %vm1917_vm9, %v4395_v21, %v6780_v10  ;;  %v6910_v21 = vunpack.i.h.bf16 %v11456_v1 }
 0x3c4   : > { %v7053_v61 = vpop.permute.xlu0 %7052  ;;  %v4595_v52 = vsel %vm2084_vm13, %v4554_v62, %v7049_v27  ;;  %v4596_v54 = vsel %vm2084_vm13, %v4555_v18, %v7050_v11  ;;  %v13521_v22 = vpack.i.bf16 %v11103_v9, %v13520_v16  ;;  %v4475_v4 = vsel %vm1958_vm10, %v4434_v51, %v6895_v38 }
 0x3c5   : > { %v7058_v13 = vpop.permute.xlu1 %7057  ;;  %v7055_v36 = vunpack.i.h.bf16 %v7053_v61  ;;  %v7054_v6 = vunpack.i.l.bf16 %v7053_v61  ;;  %v13522_v23 = vpack.i.bf16 %v11117_v59, %v11114_v53  ;;  %v13524_v61 = vld [vmem:[#allocation54_spill] sm:$0xff] }
 0x3c6   : > { %v7060_v33 = vunpack.i.h.bf16 %v7058_v13  ;;  %v7059_v41 = vunpack.i.l.bf16 %v7058_v13  ;;  %7342 = vrot.lane.b32.xlu0 %v13510_v32, %s7556_s11  ;;  %v4433_v32 = vsel %vm1917_vm9, %v4394_v47, %v6779_v45 }
 0x3c7   : > { %7347 = vrot.lane.b32.xlu1 %v11097_v57, %s7557_s12  ;;  %v4636_v50 = vsel %vm2126_vm14, %v4595_v52, %v7054_v6  ;;  %v4637_v31 = vsel %vm2126_vm14, %v4596_v54, %v7055_v36  ;;  %v4474_v11 = vsel %vm1958_vm10, %v4433_v32, %v6894_v8  ;;  %v6735_v36 = vunpack.i.h.bf16 %v11149_v63 }
 0x3c8   : > { %v7063_v35 = vpop.permute.xlu0 %7062  ;;  %v4677_v43 = vsel %vm2168_vm15, %v4636_v50, %v7059_v41  ;;  %v4678_v49 = vsel %vm2168_vm15, %v4637_v31, %v7060_v33  ;;  %v13523_v41 = vld [vmem:[#allocation77_spill] sm:$0xff]  ;;  %v6734_v6 = vunpack.i.l.bf16 %v11149_v63  ;;  %v6785_v52 = vunpack.i.h.bf16 %v11304_v19 }
 0x3c9   : > { %v7068_v28 = vpop.permute.xlu1 %7067  ;;  %v7065_v12 = vunpack.i.h.bf16 %v7063_v35  ;;  %v7064_v34 = vunpack.i.l.bf16 %v7063_v35  ;;  %v4716_v46 = vpack.c.bf16 %v4678_v49, %v4677_v43  ;;  %v13525_v45 = vpack.i.bf16 %v13523_v41, %v13524_v61 }
 0x3ca   : > { %v7070_v27 = vunpack.i.h.bf16 %v7068_v28  ;;  %v7069_v26 = vunpack.i.l.bf16 %v7068_v28  ;;  %7352 = vrot.lane.b32.xlu0 %v13522_v23, %s7558_s13  ;;  %v6784_v54 = vunpack.i.l.bf16 %v11304_v19  ;;  %v6909_v50 = vunpack.i.l.bf16 %v11456_v1  ;;  %v13527_v19 = vld [vmem:[#allocation65_spill] sm:$0xff]  ;;  %v13528_v1 = vld [vmem:[#allocation20_spill] sm:$0xff] }
 0x3cb   : > { %7357 = vrot.lane.b32.xlu1 %v13521_v22, %s7560_s26  ;;  %v4516_v60 = vsel %vm2000_vm11, %v4475_v4, %v7065_v12  ;;  %v4515_v18 = vsel %vm2000_vm11, %v4474_v11, %v7064_v34  ;;  %5817 = vmatmul.mubr.msk.bf16.gmra.mrb[8].mxu1 %vm2274_vm5, %v4716_v46  ;;  %v13526_v63 = vpack.i.bf16 %v11134_v0, %v11130_v44  ;;  %v6795_v61 = vunpack.i.h.bf16 %v11321_v24 }
 0x3cc   : > { %v7073_v62 = vpop.permute.xlu0 %7072  ;;  %5820 = vmatprep.mubr.msk.bf16.mxu1 %vm7559_vm7, %v12985_v30  ;;  %v4556_v53 = vsel %vm2042_vm12, %v4515_v18, %v7069_v26  ;;  %v4557_v59 = vsel %vm2042_vm12, %v4516_v60, %v7070_v27  ;;  %v4396_v43 = vsel %vm1876_vm8, %v13527_v19, %v6734_v6  ;;  %v4397_v49 = vsel %vm1876_vm8, %v13528_v1, %v6735_v36  ;;  %v13529_v26 = vld [vmem:[#allocation101_spill] sm:$0xff] }
 0x3cd   : > { %v7078_v9 = vpop.permute.xlu1 %7077  ;;  %v7075_v13 = vunpack.i.h.bf16 %v7073_v62  ;;  %v7074_v14 = vunpack.i.l.bf16 %v7073_v62  ;;  %v4436_v12 = vsel %vm1917_vm9, %v4397_v49, %v6785_v52  ;;  %v4435_v34 = vsel %vm1917_vm9, %v4396_v43, %v6784_v54  ;;  %v13530_v62 = vld [vmem:[#allocation58_spill] sm:$0xff] }
 0x3ce   : > { %v7080_v10 = vunpack.i.h.bf16 %v7078_v9  ;;  %v7079_v33 = vunpack.i.l.bf16 %v7078_v9  ;;  %7362 = vrot.lane.b32.xlu0 %v13525_v45, %s7555_s10  ;;  %v4477_v46 = vsel %vm1958_vm10, %v4436_v12, %v6910_v21  ;;  %v4476_v4 = vsel %vm1958_vm10, %v4435_v34, %v6909_v50  ;;  %v13533_v21 = vld [vmem:[#allocation57_spill] sm:$0xff]  ;;  %v13534_v50 = vld [vmem:[#allocation12_spill] sm:$0xff] }
 0x3cf   : > { %7367 = vrot.lane.b32.xlu1 %v11097_v57, %s7556_s11  ;;  %v4597_v38 = vsel %vm2084_vm13, %v4556_v53, %v7074_v14  ;;  %v4598_v8 = vsel %vm2084_vm13, %v4557_v59, %v7075_v13  ;;  %v13531_v13 = vpack.i.bf16 %v11163_v42, %v13530_v62  ;;  %v13532_v14 = vld [vmem:[#allocation13_spill] sm:$0xff]  ;;  %v6794_v6 = vunpack.i.l.bf16 %v11321_v24 }
 0x3d0   : > { %v7083_v39 = vpop.permute.xlu0 %7082  ;;  %v4638_v51 = vsel %vm2126_vm14, %v4597_v38, %v7079_v33  ;;  %v4639_v35 = vsel %vm2126_vm14, %v4598_v8, %v7080_v10  ;;  %v6740_v10 = vunpack.i.h.bf16 %v13532_v14  ;;  %v6739_v41 = vunpack.i.l.bf16 %v13532_v14 }
 0x3d1   : > { %v7088_v57 = vpop.permute.xlu1 %7087  ;;  %v7085_v31 = vunpack.i.h.bf16 %v7083_v39  ;;  %v7084_v28 = vunpack.i.l.bf16 %v7083_v39  ;;  %v6914_v52 = vunpack.i.l.bf16 %v11444_v17  ;;  %v13540_v62 = vpack.i.bf16 %v11203_v48, %v11200_v55 }
 0x3d2   : > { %v7090_v40 = vunpack.i.h.bf16 %v7088_v57  ;;  %v7089_v47 = vunpack.i.l.bf16 %v7088_v57  ;;  %7372 = vrot.lane.b32.xlu0 %v11160_v56, %s7557_s12  ;;  %v6915_v57 = vunpack.i.h.bf16 %v11444_v17 }
 0x3d3   : > { %7377 = vrot.lane.b32.xlu1 %v13526_v63, %s7558_s13  ;;  %v4679_v32 = vsel %vm2168_vm15, %v4638_v51, %v7084_v28  ;;  %v4680_v0 = vsel %vm2168_vm15, %v4639_v35, %v7085_v31  ;;  %v13535_v31 = vpack.i.bf16 %v13533_v21, %v13534_v50  ;;  %v13536_v28 = vld [vmem:[#allocation44_spill] sm:$0xff]  ;;  %v13546_v21 = vld [vmem:[#allocation22_spill] sm:$0xff] }
 0x3d4   : > { %v7093_v16 = vpop.permute.xlu0 %7092  ;;  %v4717_v22 = vpack.c.bf16 %v4680_v0, %v4679_v32  ;;  %v4518_v23 = vsel %vm2000_vm11, %v4477_v46, %v7090_v40  ;;  %v4517_v60 = vsel %vm2000_vm11, %v4476_v4, %v7089_v47  ;;  %v4399_v24 = vsel %vm1876_vm8, %v13536_v28, %v6740_v10  ;;  %v13537_v47 = vld [vmem:[#allocation89_spill] sm:$0xff] }
 0x3d5   : > { %v7098_v44 = vpop.permute.xlu1 %7097  ;;  %v7095_v11 = vunpack.i.h.bf16 %v7093_v16  ;;  %v7094_v27 = vunpack.i.l.bf16 %v7093_v16  ;;  %v4398_v17 = vsel %vm1876_vm8, %v13537_v47, %v6739_v41  ;;  %v4438_v51 = vsel %vm1917_vm9, %v4399_v24, %v6795_v61 }
 0x3d6   : > { %v7100_v18 = vunpack.i.h.bf16 %v7098_v44  ;;  %v7099_v9 = vunpack.i.l.bf16 %v7098_v44  ;;  %7382 = vrot.lane.b32.xlu0 %v13531_v13, %s7560_s26  ;;  %5821 = vmatmul.mubr.msk.bf16.gmra.mrb[12].mxu1 %vm2274_vm5, %v4717_v22  ;;  %v4437_v1 = vsel %vm1917_vm9, %v4398_v17, %v6794_v6  ;;  %v13538_v0 = vpack.i.bf16 %v11189_v58, %v11180_v3  ;;  %v13541_v13 = vld [vmem:[#allocation135_spill] sm:$0xff] }
 0x3d7   : > { %7387 = vrot.lane.b32.xlu1 %v13529_v26, %s7554_s9  ;;  %v4559_v33 = vsel %vm2042_vm12, %v4518_v23, %v7095_v11  ;;  %v4558_v53 = vsel %vm2042_vm12, %v4517_v60, %v7094_v27  ;;  %5824 = vmatprep.mubr.msk.bf16.mxu1 %vm7559_vm7, %v12985_v30  ;;  %v4479_v12 = vsel %vm1958_vm10, %v4438_v51, %v6915_v57  ;;  %v13539_v26 = vld [vmem:[#allocation56_spill] sm:$0xff]  ;;  %v6745_v14 = vunpack.i.h.bf16 %v13541_v13 }
 0x3d8   : > { %v7103_v42 = vpop.permute.xlu0 %7102  ;;  %v4599_v54 = vsel %vm2084_vm13, %v4558_v53, %v7099_v9  ;;  %v4600_v39 = vsel %vm2084_vm13, %v4559_v33, %v7100_v18  ;;  %v4478_v34 = vsel %vm1958_vm10, %v4437_v1, %v6914_v52  ;;  %v6744_v10 = vunpack.i.l.bf16 %v13541_v13  ;;  %v13548_v1 = vld [vmem:[#allocation78_spill] sm:$0xff] }
 0x3d9   : > { %v7108_v59 = vpop.permute.xlu1 %7107  ;;  %v7105_v38 = vunpack.i.h.bf16 %v7103_v42  ;;  %v7104_v8 = vunpack.i.l.bf16 %v7103_v42  ;;  %v6800_v41 = vunpack.i.h.bf16 %v11319_v7  ;;  %v6799_v61 = vunpack.i.l.bf16 %v11319_v7 }
 0x3da   : > { %v7110_v45 = vunpack.i.h.bf16 %v7108_v59  ;;  %v7109_v36 = vunpack.i.l.bf16 %v7108_v59  ;;  %7392 = vrot.lane.b32.xlu0 %v13535_v31, %s7555_s10  ;;  %v4400_v50 = vsel %vm1876_vm8, %v13546_v21, %v6744_v10  ;;  %v13547_v31 = vld [vmem:[#allocation66_spill] sm:$0xff]  ;;  %v6935_v10 = vunpack.i.h.bf16 %v11476_v29 }
 0x3db   : > { %7397 = vrot.lane.b32.xlu1 %v11160_v56, %s7556_s11  ;;  %v4640_v63 = vsel %vm2126_vm14, %v4599_v54, %v7104_v8  ;;  %v4641_v56 = vsel %vm2126_vm14, %v4600_v39, %v7105_v38  ;;  %v13543_v54 = vld [vmem:[#allocation30_spill] sm:$0xff]  ;;  %v4401_v28 = vsel %vm1876_vm8, %v13547_v31, %v6745_v14 }
 0x3dc   : > { %v7113_v35 = vpop.permute.xlu0 %7112  ;;  %v4681_v19 = vsel %vm2168_vm15, %v4640_v63, %v7109_v36  ;;  %v4682_v43 = vsel %vm2168_vm15, %v4641_v56, %v7110_v45  ;;  %v13542_v36 = vld [vmem:[#allocation26_spill] sm:$0xff]  ;;  %v4440_v56 = vsel %vm1917_vm9, %v4401_v28, %v6800_v41  ;;  %v13555_v41 = vld [vmem:[#allocation104_spill] sm:$0xff] }
 0x3dd   : > { %v7118_v40 = vpop.permute.xlu1 %7117  ;;  %v7115_v49 = vunpack.i.h.bf16 %v7113_v35  ;;  %v7114_v32 = vunpack.i.l.bf16 %v7113_v35  ;;  %v4718_v44 = vpack.c.bf16 %v4682_v43, %v4681_v19  ;;  %v6920_v42 = vunpack.i.h.bf16 %v13542_v36  ;;  %v13544_v39 = vld [vmem:[#allocation130_spill] sm:$0xff] }
 0x3de   : > { %v7120_v16 = vunpack.i.h.bf16 %v7118_v40  ;;  %v7119_v22 = vunpack.i.l.bf16 %v7118_v40  ;;  %7402 = vrot.lane.b32.xlu0 %v11197_v25, %s7557_s12  ;;  %v6919_v6 = vunpack.i.l.bf16 %v13542_v36  ;;  %v13545_v7 = vpack.i.bf16 %v13543_v54, %v13544_v39  ;;  %v13554_v14 = vld [vmem:[#allocation118_spill] sm:$0xff]  ;;  %v13558_v36 = vld [vmem:[#allocation69_spill] sm:$0xff] }
 0x3df   : > { %7407 = vrot.lane.b32.xlu1 %v13538_v0, %s7558_s13  ;;  %v4520_v46 = vsel %vm2000_vm11, %v4479_v12, %v7115_v49  ;;  %v4519_v4 = vsel %vm2000_vm11, %v4478_v34, %v7114_v32  ;;  %5825 = vmatmul.mubr.msk.bf16.gmra.mrb[16].mxu1 %vm2274_vm5, %v4718_v44  ;;  %v4439_v40 = vsel %vm1917_vm9, %v4400_v50, %v6799_v61  ;;  %v13549_v49 = vld [vmem:[#allocation102_spill] sm:$0xff] }
 0x3e0   : > { %v7123_v27 = vpop.permute.xlu0 %7122  ;;  %5828 = vmatprep.mubr.msk.bf16.mxu1 %vm7559_vm7, %v12985_v30  ;;  %v4560_v18 = vsel %vm2042_vm12, %v4519_v4, %v7119_v22  ;;  %v4561_v9 = vsel %vm2042_vm12, %v4520_v46, %v7120_v16  ;;  %v4481_v51 = vsel %vm1958_vm10, %v4440_v56, %v6920_v42  ;;  %v4480_v35 = vsel %vm1958_vm10, %v4439_v40, %v6919_v6  ;;  %v13551_v16 = vld [vmem:[#allocation79_spill] sm:$0xff]  ;;  %v13552_v22 = vld [vmem:[#allocation38_spill] sm:$0xff]  ;;  %v13561_v56 = vld [vmem:[#allocation36_spill] sm:$0xff] }
 0x3e1   : > { %v7128_v11 = vpop.permute.xlu1 %7127  ;;  %v7125_v58 = vunpack.i.h.bf16 %v7123_v27  ;;  %v7124_v3 = vunpack.i.l.bf16 %v7123_v27  ;;  %v13550_v32 = vpack.i.bf16 %v13548_v1, %v13549_v49  ;;  %v6750_v46 = vunpack.i.h.bf16 %v13552_v22  ;;  %v13556_v61 = vld [vmem:[#allocation82_spill] sm:$0xff] }
 0x3e2   : > { %v7130_v23 = vunpack.i.h.bf16 %v7128_v11  ;;  %v7129_v60 = vunpack.i.l.bf16 %v7128_v11  ;;  %7412 = vrot.lane.b32.xlu0 %v13540_v62, %s7560_s26  ;;  %v13563_v1 = vld [vmem:[#allocation42_spill] sm:$0xff] }
 0x3e3   : > { %7417 = vrot.lane.b32.xlu1 %v13539_v26, %s7554_s9  ;;  %v4601_v33 = vsel %vm2084_vm13, %v4560_v18, %v7124_v3  ;;  %v4602_v53 = vsel %vm2084_vm13, %v4561_v9, %v7125_v58  ;;  %v6749_v58 = vunpack.i.l.bf16 %v13552_v22  ;;  %v13553_v3 = vld [vmem:[#allocation47_spill] sm:$0xff]  ;;  %v4403_v42 = vsel %vm1876_vm8, %v13558_v36, %v6750_v46  ;;  %v13564_v49 = vld [vmem:[#allocation86_spill] sm:$0xff]  ;;  %v13567_v22 = vld [vmem:[#allocation133_spill] sm:$0xff] }
 0x3e4   : > { %v7133_v45 = vpop.permute.xlu0 %7132  ;;  %v4642_v57 = vsel %vm2126_vm14, %v4601_v33, %v7129_v60  ;;  %v4643_v52 = vsel %vm2126_vm14, %v4602_v53, %v7130_v23  ;;  %v6805_v26 = vunpack.i.h.bf16 %v13553_v3  ;;  %v6804_v9 = vunpack.i.l.bf16 %v13553_v3  ;;  %v13568_v3 = vld [vmem:[#allocation21_spill] sm:$0xff]  ;;  %v13573_v36 = vld [vmem:[#allocation18_spill] sm:$0xff] }
 0x3e5   : > { %v7138_v59 = vpop.permute.xlu1 %7137  ;;  %v7135_v48 = vunpack.i.h.bf16 %v7133_v45  ;;  %v7134_v55 = vunpack.i.l.bf16 %v7133_v45  ;;  %v6934_v33 = vunpack.i.l.bf16 %v11476_v29  ;;  %v13557_v45 = vpack.i.bf16 %v13555_v41, %v13556_v61 }
 0x3e6   : > { %v7140_v38 = vunpack.i.h.bf16 %v7138_v59  ;;  %v7139_v8 = vunpack.i.l.bf16 %v7138_v59  ;;  %7422 = vrot.lane.b32.xlu0 %v13545_v7, %s7555_s10  ;;  %v6755_v46 = vunpack.i.h.bf16 %v13567_v22 }
 0x3e7   : > { %7427 = vrot.lane.b32.xlu1 %v11197_v25, %s7556_s11  ;;  %v4683_v24 = vsel %vm2168_vm15, %v4642_v57, %v7134_v55  ;;  %v4684_v25 = vsel %vm2168_vm15, %v4643_v52, %v7135_v48 }
 0x3e8   : > { %v7143_v47 = vpop.permute.xlu0 %7142  ;;  %v4719_v17 = vpack.c.bf16 %v4684_v25, %v4683_v24  ;;  %v4522_v0 = vsel %vm2000_vm11, %v4481_v51, %v7140_v38  ;;  %v4521_v44 = vsel %vm2000_vm11, %v4480_v35, %v7139_v8  ;;  %v13559_v38 = vld [vmem:[#allocation46_spill] sm:$0xff]  ;;  %v4442_v8 = vsel %vm1917_vm9, %v4403_v42, %v6805_v26  ;;  %v13574_v42 = vld [vmem:[#allocation15_spill] sm:$0xff] }
 0x3e9   : > { %v7148_v63 = vpop.permute.xlu1 %7147  ;;  %v7145_v19 = vunpack.i.h.bf16 %v7143_v47  ;;  %v7144_v43 = vunpack.i.l.bf16 %v7143_v47  ;;  %v4402_v29 = vsel %vm1876_vm8, %v13559_v38, %v6749_v58  ;;  %v4483_v31 = vsel %vm1958_vm10, %v4442_v8, %v6935_v10  ;;  %v13570_v10 = vld [vmem:[#allocation80_spill] sm:$0xff]  ;;  %v13577_v38 = vld [vmem:[#allocation49_spill] sm:$0xff] }
 0x3ea   : > { %v7150_v12 = vunpack.i.h.bf16 %v7148_v63  ;;  %v7149_v34 = vunpack.i.l.bf16 %v7148_v63  ;;  %7432 = vrot.lane.b32.xlu0 %v13551_v16, %s7557_s12  ;;  %5829 = vmatmul.mubr.msk.bf16.gmra.mrb[20].mxu1 %vm2274_vm5, %v4719_v17  ;;  %v4441_v39 = vsel %vm1917_vm9, %v4402_v29, %v6804_v9  ;;  %v13560_v63 = vld [vmem:[#allocation81_spill] sm:$0xff]  ;;  %v6815_v26 = vunpack.i.h.bf16 %v13568_v3 }
 0x3eb   : > { %7437 = vrot.lane.b32.xlu1 %v13550_v32, %s7558_s13  ;;  %v4563_v4 = vsel %vm2042_vm12, %v4522_v0, %v7145_v19  ;;  %v4562_v11 = vsel %vm2042_vm12, %v4521_v44, %v7144_v43  ;;  %5832 = vmatprep.mubr.msk.bf16.mxu1 %vm7559_vm7, %v12985_v30  ;;  %v4482_v28 = vsel %vm1958_vm10, %v4441_v39, %v6934_v33  ;;  %v13571_v33 = vld [vmem:[#allocation39_spill] sm:$0xff] }
 0x3ec   : > { %v7153_v18 = vpop.permute.xlu0 %7152  ;;  %v4603_v53 = vsel %vm2084_vm13, %v4562_v11, %v7149_v34  ;;  %v4604_v59 = vsel %vm2084_vm13, %v4563_v4, %v7150_v12  ;;  %v13562_v40 = vpack.i.bf16 %v13560_v63, %v13561_v56  ;;  %v13565_v32 = vpack.i.bf16 %v13563_v1, %v13564_v49 }
 0x3ed   : > { %v7158_v27 = vpop.permute.xlu1 %7157  ;;  %v7155_v62 = vunpack.i.h.bf16 %v7153_v18  ;;  %v7154_v13 = vunpack.i.l.bf16 %v7153_v18  ;;  %v6754_v4 = vunpack.i.l.bf16 %v13567_v22  ;;  %v13569_v18 = vld [vmem:[#allocation94_spill] sm:$0xff]  ;;  %v4405_v29 = vsel %vm1876_vm8, %v13577_v38, %v6755_v46  ;;  %v13583_v22 = vld [vmem:[#allocation119_spill] sm:$0xff] }
 0x3ee   : > { %v7160_v23 = vunpack.i.h.bf16 %v7158_v27  ;;  %v7159_v60 = vunpack.i.l.bf16 %v7158_v27  ;;  %7442 = vrot.lane.b32.xlu0 %v13557_v45, %s7560_s26  ;;  %v6950_v9 = vunpack.i.h.bf16 %v13569_v18  ;;  %v13584_v46 = vrot.slane %v13583_v22, 2  ;;  %v13590_v38 = vld [vmem:[#allocation2_spill] sm:$0xff] }
 0x3ef   : > { %7447 = vrot.lane.b32.xlu1 %v13554_v14, %s7554_s9  ;;  %v4644_v6 = vsel %vm2126_vm14, %v4603_v53, %v7154_v13  ;;  %v4645_v48 = vsel %vm2126_vm14, %v4604_v59, %v7155_v62  ;;  %v6949_v62 = vunpack.i.l.bf16 %v13569_v18  ;;  %v13572_v53 = vpack.i.bf16 %v13570_v10, %v13571_v33 }
 0x3f0   : > { %v7163_v57 = vpop.permute.xlu0 %7162  ;;  %v4685_v52 = vsel %vm2168_vm15, %v4644_v6, %v7159_v60  ;;  %v4686_v54 = vsel %vm2168_vm15, %v4645_v48, %v7160_v23  ;;  %v6814_v23 = vunpack.i.l.bf16 %v13568_v3  ;;  %v13575_v6 = vpack.i.bf16 %v13573_v36, %v13574_v42  ;;  %v13576_v48 = vld [vmem:[#allocation6_spill] sm:$0xff] }
 0x3f1   : > { %v7168_v55 = vpop.permute.xlu1 %7167  ;;  %v7165_v7 = vunpack.i.h.bf16 %v7163_v57  ;;  %v7164_v21 = vunpack.i.l.bf16 %v7163_v57  ;;  %v4720_v50 = vpack.c.bf16 %v4686_v54, %v4685_v52  ;;  %v4444_v54 = vsel %vm1917_vm9, %v4405_v29, %v6815_v26 }
 0x3f2   : > { %v7170_v24 = vunpack.i.h.bf16 %v7168_v55  ;;  %v7169_v25 = vunpack.i.l.bf16 %v7168_v55  ;;  %7452 = vrot.lane.b32.xlu0 %v13562_v40, %s7555_s10  ;;  %v4404_v55 = vsel %vm1876_vm8, %v13576_v48, %v6754_v4  ;;  %v3351_v4 = vsel %vm13585_vm0, %v13584_v46, 0.0 }
 0x3f3   : > { %7457 = vrot.lane.b32.xlu1 %v13551_v16, %s7556_s11  ;;  %v4524_v47 = vsel %vm2000_vm11, %v4483_v31, %v7165_v7  ;;  %v4523_v17 = vsel %vm2000_vm11, %v4482_v28, %v7164_v21  ;;  %5833 = vmatmul.mubr.msk.bf16.gmra.mrb[24].mxu1 %vm2274_vm5, %v4720_v50  ;;  %v13566_v16 = vld [vmem:[#allocation43_spill] sm:$0xff]  ;;  %v4443_v39 = vsel %vm1917_vm9, %v4404_v55, %v6814_v23  ;;  %v13586_v3 = vrot.slane %v13583_v22, 1 }
 0x3f4   : > { %v7173_v35 = vpop.permute.xlu0 %7172  ;;  %5836 = vmatprep.mubr.msk.bf16.mxu1 %vm7559_vm7, %v12985_v30  ;;  %v4564_v12 = vsel %vm2042_vm12, %v4523_v17, %v7169_v25  ;;  %v4565_v34 = vsel %vm2042_vm12, %v4524_v47, %v7170_v24  ;;  %v4485_v50 = vsel %vm1958_vm10, %v4444_v54, %v6950_v9  ;;  %v4484_v31 = vsel %vm1958_vm10, %v4443_v39, %v6949_v62  ;;  %v13578_v47 = vld [vmem:[#allocation14_spill] sm:$0xff]  ;;  %v13579_v17 = vld [vmem:[#allocation100_spill] sm:$0xff]  ;;  %v13587_v62 = vld [vmem:[#allocation19_spill] sm:$0xff] }
 0x3f5   : > { %v7178_v51 = vpop.permute.xlu1 %7177  ;;  %v7175_v19 = vunpack.i.h.bf16 %v7173_v35  ;;  %v7174_v43 = vunpack.i.l.bf16 %v7173_v35  ;;  %v13581_v35 = vld [vmem:[#allocation83_spill] sm:$0xff]  ;;  %v3272_v26 = vsel %vm373_vm3, %v13586_v3, 0.0  ;;  %v6955_v23 = vunpack.i.h.bf16 %v11518_v2  ;;  %v13595_v3 = vld [vmem:[#allocation109_spill] sm:$0xff] }
 0x3f6   : > { %v7180_v0 = vunpack.i.h.bf16 %v7178_v51  ;;  %v7179_v44 = vunpack.i.l.bf16 %v7178_v51  ;;  %7462 = vrot.lane.b32.xlu0 %v13566_v16, %s7557_s12  ;;  %v13580_v51 = vpack.i.bf16 %v13578_v47, %v13579_v17 }
 0x3f7   : > { %7467 = vrot.lane.b32.xlu1 %v13565_v32, %s7558_s13  ;;  %v4605_v11 = vsel %vm2084_vm13, %v4564_v12, %v7174_v43  ;;  %v4606_v27 = vsel %vm2084_vm13, %v4565_v34, %v7175_v19  ;;  %v6760_v19 = vunpack.i.h.bf16 %v13581_v35  ;;  %v6759_v43 = vunpack.i.l.bf16 %v13581_v35 }
 0x3f8   : > { %v7183_v60 = vpop.permute.xlu0 %7182  ;;  %v4646_v61 = vsel %vm2126_vm14, %v4605_v11, %v7179_v44  ;;  %v4647_v45 = vsel %vm2126_vm14, %v4606_v27, %v7180_v0  ;;  %v13582_v0 = vld [vmem:[#allocation106_spill] sm:$0xff] }
 0x3f9   : > { %v7188_v58 = vpop.permute.xlu1 %7187  ;;  %v7185_v13 = vunpack.i.h.bf16 %v7183_v60  ;;  %v7184_v14 = vunpack.i.l.bf16 %v7183_v60  ;;  %v6820_v44 = vunpack.i.h.bf16 %v13582_v0  ;;  %v6819_v11 = vunpack.i.l.bf16 %v13582_v0  ;;  %v13593_v0 = vld [vmem:[#allocation91_spill] sm:$0xff] }
 0x3fa   : > { %v7190_v59 = vunpack.i.h.bf16 %v7188_v58  ;;  %v7189_v41 = vunpack.i.l.bf16 %v7188_v58  ;;  %7472 = vrot.lane.b32.xlu0 %v13575_v6, %s7560_s26  ;;  %v6954_v60 = vunpack.i.l.bf16 %v11518_v2 }
 0x3fb   : > { %7477 = vrot.lane.b32.xlu1 %v13572_v53, %s7554_s9  ;;  %v4687_v8 = vsel %vm2168_vm15, %v4646_v61, %v7184_v14  ;;  %v4688_v57 = vsel %vm2168_vm15, %v4647_v45, %v7185_v13  ;;  %v4406_v13 = vsel %vm1876_vm8, %v13587_v62, %v6759_v43  ;;  %v13588_v14 = vld [vmem:[#allocation92_spill] sm:$0xff]  ;;  %v13589_v61 = vrot.slane %v13583_v22, 3  ;;  %v13592_v43 = vld [vmem:[#allocation105_spill] sm:$0xff] }
 0x3fc   : > { %v7193_v7 = vpop.permute.xlu0 %7192  ;;  %v4721_v21 = vpack.c.bf16 %v4688_v57, %v4687_v8  ;;  %v4525_v25 = vsel %vm2000_vm11, %v4484_v31, %v7189_v41  ;;  %v4526_v63 = vsel %vm2000_vm11, %v4485_v50, %v7190_v59  ;;  %v4407_v10 = vsel %vm1876_vm8, %v13588_v14, %v6760_v19 }
 0x3fd   : > { %v7198_v52 = vpop.permute.xlu1 %7197  ;;  %v7195_v28 = vunpack.i.h.bf16 %v7193_v7  ;;  %v7194_v24 = vunpack.i.l.bf16 %v7193_v7  ;;  %v4446_v41 = vsel %vm1917_vm9, %v4407_v10, %v6820_v44  ;;  %v3430_v45 = vsel %vm571_vm1, %v13589_v61, 0.0 }
 0x3fe   : > { %v7200_v56 = vunpack.i.h.bf16 %v7198_v52  ;;  %v7199_v40 = vunpack.i.l.bf16 %v7198_v52  ;;  %5837 = vmatmul.mubr.msk.bf16.gmra.mrb[28].mxu1 %vm2274_vm5, %v4721_v21  ;;  %7482 = vrot.lane.b32.xlu0 %v13580_v51, %s7555_s10  ;;  %v4445_v6 = vsel %vm1917_vm9, %v4406_v13, %v6819_v11  ;;  %v4487_v8 = vsel %vm1958_vm10, %v4446_v41, %v6955_v23 }
 0x3ff   : > { %7487 = vrot.lane.b32.xlu1 %v13566_v16, %s7556_s11  ;;  %v4567_v1 = vsel %vm2042_vm12, %v4526_v63, %v7195_v28  ;;  %v4566_v49 = vsel %vm2042_vm12, %v4525_v25, %v7194_v24  ;;  %5840 = vmatprep.mubr.msk.bf16.mxu1 %vm7559_vm7, %v12985_v30  ;;  %v4486_v57 = vsel %vm1958_vm10, %v4445_v6, %v6954_v60  ;;  %v6960_v44 = vunpack.i.h.bf16 %v13593_v0 }
 0x400   : > { %v7203_v16 = vpop.permute.xlu0 %7202  ;;  %v4607_v18 = vsel %vm2084_vm13, %v4566_v49, %v7199_v40  ;;  %v4608_v9 = vsel %vm2084_vm13, %v4567_v1, %v7200_v56  ;;  %v13591_v40 = vld [vmem:[#allocation61_spill] sm:$0xff]  ;;  %v6825_v1 = vunpack.i.h.bf16 %v13592_v43  ;;  %v6824_v49 = vunpack.i.l.bf16 %v13592_v43 }
 0x401   : > { %v7208_v32 = vpop.permute.xlu1 %7207  ;;  %v7205_v27 = vunpack.i.h.bf16 %v7203_v16  ;;  %v7204_v58 = vunpack.i.l.bf16 %v7203_v16  ;;  %v6770_v47 = vunpack.i.h.bf16 %v13591_v40  ;;  %v6769_v17 = vunpack.i.l.bf16 %v13591_v40 }
 0x402   : > { %v7210_v12 = vunpack.i.h.bf16 %v7208_v32  ;;  %v7209_v34 = vunpack.i.l.bf16 %v7208_v32  ;;  %4113 = vrot.lane.b32.xlu0 %v3272_v26, %s7557_s12  ;;  %vm5209_vm1 = vcmask 257024  }
 0x403   : > { %4231 = vrot.lane.b32.xlu1 %v3351_v4, %s7558_s13  ;;  %v4648_v33 = vsel %vm2126_vm14, %v4607_v18, %v7204_v58  ;;  %v4649_v53 = vsel %vm2126_vm14, %v4608_v9, %v7205_v27  ;;  %v13594_v27 = vld [vmem:[#allocation8_spill] sm:$0xff] }
 0x404   : > { %v7213_v2 = vpop.permute.xlu0 %7212  ;;  %v4689_v36 = vsel %vm2168_vm15, %v4648_v33, %v7209_v34  ;;  %v4690_v42 = vsel %vm2168_vm15, %v4649_v53, %v7210_v12  ;;  %v6959_v12 = vunpack.i.l.bf16 %v13593_v0  ;;  %v4408_v58 = vsel %vm1876_vm8, %v13594_v27, %v6769_v17  ;;  %v13599_v17 = vld [vmem:[#allocation73_spill] sm:$0xff] }
 0x405   : > { %v7218_v59 = vpop.permute.xlu1 %7217  ;;  %v7215_v48 = vunpack.i.h.bf16 %v7213_v2  ;;  %v7214_v55 = vunpack.i.l.bf16 %v7213_v2  ;;  %v4722_v29 = vpack.c.bf16 %v4690_v42, %v4689_v36  ;;  %v4447_v62 = vsel %vm1917_vm9, %v4408_v58, %v6824_v49  ;;  %v13596_v36 = vld [vmem:[#allocation67_spill] sm:$0xff] }
 0x406   : > { %v7220_v52 = vunpack.i.h.bf16 %v7218_v59  ;;  %v7219_v54 = vunpack.i.l.bf16 %v7218_v59  ;;  %4349 = vrot.lane.b32.xlu0 %v3430_v45, %s7560_s26  ;;  %v4488_v33 = vsel %vm1958_vm10, %v4447_v62, %v6959_v12  ;;  %v6790_v42 = vunpack.i.h.bf16 %v13596_v36  ;;  %v13600_v62 = vld [vmem:[#allocation121_spill] sm:$0xff] }
 0x407   : > { %3747 = vrot.lane.b32.xlu1 %v13590_v38, %s7554_s9  ;;  %v4527_v39 = vsel %vm2000_vm11, %v4486_v57, %v7214_v55  ;;  %v4528_v7 = vsel %vm2000_vm11, %v4487_v8, %v7215_v48  ;;  %5841 = vmatmul.mubr.msk.bf16.gmra.mrb[32].mxu1 %vm2274_vm5, %v4722_v29  ;;  %v6789_v38 = vunpack.i.l.bf16 %v13596_v36  ;;  %v13597_v29 = vld [vmem:[#allocation90_spill] sm:$0xff]  ;;  %v2954_v27 = vrot.slane %v13479_v5, 5  ;;  %s5893_s9 = smul.u32 164, %s13643_s25 }
 0x408   : > { %v7223_v50 = vpop.permute.xlu0 %7222  ;;  %5844 = vmatprep.mubr.msk.bf16.mxu1 %vm7559_vm7, %v12985_v30  ;;  %v4568_v63 = vsel %vm2042_vm12, %v4527_v39, %v7219_v54  ;;  %v4569_v56 = vsel %vm2042_vm12, %v4528_v7, %v7220_v52  ;;  %v6835_v8 = vunpack.i.h.bf16 %v13597_v29  ;;  %v6834_v39 = vunpack.i.l.bf16 %v13597_v29 }
 0x409   : > { %v7228_v21 = vpop.permute.xlu1 %7227  ;;  %v7225_v31 = vunpack.i.h.bf16 %v7223_v50  ;;  %v7224_v28 = vunpack.i.l.bf16 %v7223_v50  ;;  %v6965_v50 = vunpack.i.h.bf16 %v11535_v37  ;;  %s12269_s26 = scalar_lea.vmem %s12530_s6, %s5893_s9  ;;  %s12368_s20 = scalar_lea.vmem %s12531_s7, %s5893_s9 }
 0x40a   : > { %v7230_v24 = vunpack.i.h.bf16 %v7228_v21  ;;  %v7229_v25 = vunpack.i.l.bf16 %v7228_v21  ;;  %3870 = vrot.lane.b32.xlu0 %v13583_v22, %s7555_s10 }
 0x40b   : > { %3994 = vrot.lane.b32.xlu1 %v3272_v26, %s7556_s11  ;;  %v4609_v51 = vsel %vm2084_vm13, %v4568_v63, %v7224_v28  ;;  %v4610_v35 = vsel %vm2084_vm13, %v4569_v56, %v7225_v31  ;;  %v4409_v26 = vsel %vm1876_vm8, %v13595_v3, %v6770_v47  ;;  %v6964_v31 = vunpack.i.l.bf16 %v11535_v37 }
 0x40c   : > { %v7233_v32 = vpop.permute.xlu0 %7232  ;;  %v4650_v4 = vsel %vm2126_vm14, %v4609_v51, %v7229_v25  ;;  %v4651_v11 = vsel %vm2126_vm14, %v4610_v35, %v7230_v24  ;;  %v4448_v9 = vsel %vm1917_vm9, %v4409_v26, %v6825_v1  ;;  %v13598_v25 = vld [vmem:[#allocation112_spill] sm:$0xff]  ;;  %v4410_v51 = vsel %vm1876_vm8, %v13599_v17, %v6789_v38 }
 0x40d   : > { %v7238_v19 = vpop.permute.xlu1 %7237  ;;  %v7235_v34 = vunpack.i.h.bf16 %v7233_v32  ;;  %v7234_v16 = vunpack.i.l.bf16 %v7233_v32  ;;  %v4489_v10 = vsel %vm1958_vm10, %v4448_v9, %v6960_v44  ;;  %v4411_v63 = vsel %vm1876_vm8, %v13598_v25, %v6790_v42  ;;  %v13604_v42 = vld [vmem:[#allocation72_spill] sm:$0xff] }
 0x40e   : > { %v7240_v22 = vunpack.i.h.bf16 %v7238_v19  ;;  %v7239_v46 = vunpack.i.l.bf16 %v7238_v19  ;;  %v4450_v35 = vsel %vm1917_vm9, %v4411_v63, %v6835_v8  ;;  %v4449_v1 = vsel %vm1917_vm9, %v4410_v51, %v6834_v39 }
 0x40f   : > { %v4691_v23 = vsel %vm2168_vm15, %v4650_v4, %v7234_v16  ;;  %v4692_v60 = vsel %vm2168_vm15, %v4651_v11, %v7235_v34  ;;  %v4491_v44 = vsel %vm1958_vm10, %v4450_v35, %v6965_v50  ;;  %v4490_v12 = vsel %vm1958_vm10, %v4449_v1, %v6964_v31 }
 0x410   : > { %v7243_v13 = vpop.permute.xlu0 %7242  ;;  %v4723_v14 = vpack.c.bf16 %v4692_v60, %v4691_v23  ;;  %v4529_v41 = vsel %vm2000_vm11, %v4488_v33, %v7239_v46  ;;  %v4530_v2 = vsel %vm2000_vm11, %v4489_v10, %v7240_v22  ;;  %v2952_v11 = vrot.slane %v13486_v15, 5  ;;  %v13601_v33 = vld [vmem:[#allocation50_spill] sm:$0xff] }
 0x411   : > { %v7248_v18 = vpop.permute.xlu1 %7247  ;;  %v7245_v53 = vunpack.i.h.bf16 %v7243_v13  ;;  %v7244_v59 = vunpack.i.l.bf16 %v7243_v13  ;;  %v6810_v13 = vunpack.i.h.bf16 %v13600_v62 }
 0x412   : > { %v7250_v61 = vunpack.i.h.bf16 %v7248_v18  ;;  %v7249_v45 = vunpack.i.l.bf16 %v7248_v18  ;;  %5845 = vmatmul.mubr.msk.bf16.gmra.mrb[36].mxu1 %vm2274_vm5, %v4723_v14  ;;  %v6809_v14 = vunpack.i.l.bf16 %v13600_v62 }
 0x413   : > { %v4571_v6 = vsel %vm2042_vm12, %v4530_v2, %v7245_v53  ;;  %v4570_v48 = vsel %vm2042_vm12, %v4529_v41, %v7244_v59  ;;  %5848 = vmatprep.mubr.msk.bf16.mxu1 %vm7559_vm7, %v12985_v30  ;;  %v13602_v53 = vrot.slane %v13601_v33, 5  ;;  %v2955_v41 = vsel %vm373_vm3, %v2952_v11, %v2954_v27  ;;  %v13603_v2 = vld [vmem:[#allocation87_spill] sm:$0xff] }
 0x414   : > { %v7253_v54 = vpop.permute.xlu0 %7252  ;;  %v4611_v28 = vsel %vm2084_vm13, %v4570_v48, %v7249_v45  ;;  %v4612_v24 = vsel %vm2084_vm13, %v4571_v6, %v7250_v61  ;;  %v6840_v61 = vunpack.i.h.bf16 %v13603_v2  ;;  %v6839_v45 = vunpack.i.l.bf16 %v13603_v2 }
 0x415   : > { %v7258_v55 = vpop.permute.xlu1 %7257  ;;  %v7255_v7 = vunpack.i.h.bf16 %v7253_v54  ;;  %v7254_v21 = vunpack.i.l.bf16 %v7253_v54  ;;  %v2953_v59 = vsel %vm373_vm3, %v13602_v53, %v2952_v11  ;;  %v6970_v6 = vunpack.i.h.bf16 %v13604_v42 }
 0x416   : > { %v7260_v57 = vunpack.i.h.bf16 %v7258_v55  ;;  %v7259_v52 = vunpack.i.l.bf16 %v7258_v55  ;;  %v6969_v48 = vunpack.i.l.bf16 %v13604_v42  ;;  %v4412_v54 = vsel %vm1876_vm8, %v2953_v59, %v6809_v14 }
 0x417   : > { %v4652_v56 = vsel %vm2126_vm14, %v4611_v28, %v7254_v21  ;;  %v4653_v40 = vsel %vm2126_vm14, %v4612_v24, %v7255_v7  ;;  %v4413_v39 = vsel %vm1876_vm8, %v2955_v41, %v6810_v13  ;;  %v4451_v31 = vsel %vm1917_vm9, %v4412_v54, %v6839_v45 }
 0x418   : > { %v7263_v19 = vpop.permute.xlu0 %7262  ;;  %v4693_v37 = vsel %vm2168_vm15, %v4652_v56, %v7259_v52  ;;  %v4694_v43 = vsel %vm2168_vm15, %v4653_v40, %v7260_v57  ;;  %v4452_v28 = vsel %vm1917_vm9, %v4413_v39, %v6840_v61  ;;  %v4492_v56 = vsel %vm1958_vm10, %v4451_v31, %v6969_v48 }
 0x419   : > { %v7268_v47 = vpop.permute.xlu1 %7267  ;;  %v7265_v49 = vunpack.i.h.bf16 %v7263_v19  ;;  %v7264_v32 = vunpack.i.l.bf16 %v7263_v19  ;;  %v4724_v0 = vpack.c.bf16 %v4694_v43, %v4693_v37  ;;  %v4493_v63 = vsel %vm1958_vm10, %v4452_v28, %v6970_v6  ;;  %v13605_v37 = vld [vmem:[#allocation17_spill] sm:$0xff] }
 0x41a   : > { %v7270_v34 = vunpack.i.h.bf16 %v7268_v47  ;;  %v7269_v16 = vunpack.i.l.bf16 %v7268_v47  ;;  %v6829_v43 = vunpack.i.l.bf16 %v13605_v37 }
 0x41b   : > { %v4531_v22 = vsel %vm2000_vm11, %v4490_v12, %v7264_v32  ;;  %v4532_v46 = vsel %vm2000_vm11, %v4491_v44, %v7265_v49  ;;  %5849 = vmatmul.mubr.msk.bf16.gmra.mrb[40].mxu1 %vm2274_vm5, %v4724_v0  ;;  %v6830_v0 = vunpack.i.h.bf16 %v13605_v37  ;;  %v13606_v44 = vld [vmem:[#allocation24_spill] sm:$0xff] }
 0x41c   : > { %v7273_v58 = vpop.permute.xlu0 %7272  ;;  %5852 = vmatprep.mubr.msk.bf16.mxu1 %vm7559_vm7, %v12985_v30  ;;  %v4572_v18 = vsel %vm2042_vm12, %v4531_v22, %v7269_v16  ;;  %v4573_v9 = vsel %vm2042_vm12, %v4532_v46, %v7270_v34  ;;  %v6844_v12 = vunpack.i.l.bf16 %v13606_v44  ;;  %v13607_v46 = vrot.slane %v10582_v20, 5 }
 0x41d   : > { %v7278_v4 = vpop.permute.xlu1 %7277  ;;  %v7275_v3 = vunpack.i.h.bf16 %v7273_v58  ;;  %v7274_v26 = vunpack.i.l.bf16 %v7273_v58  ;;  %v6845_v11 = vunpack.i.h.bf16 %v13606_v44 }
 0x41e   : > { %v7280_v23 = vunpack.i.h.bf16 %v7278_v4  ;;  %v7279_v60 = vunpack.i.l.bf16 %v7278_v4  ;;  %v2957_v4 = vsel %vm373_vm3, %v2954_v27, %v13607_v46  ;;  %v13609_v27 = vld [vmem:[#allocation75_spill] sm:$0xff]  ;;  %vm5250_vm3 = vcmask 254976  }
 0x41f   : > { %v4613_v15 = vsel %vm2084_vm13, %v4572_v18, %v7274_v26  ;;  %v4614_v5 = vsel %vm2084_vm13, %v4573_v9, %v7275_v3  ;;  %v13608_v26 = vld [vmem:[#allocation97_spill] sm:$0xff]  ;;  %v4414_v62 = vsel %vm1876_vm8, %v2957_v4, %v6829_v43 }
 0x420   : > { %v7283_v36 = vpop.permute.xlu0 %7282  ;;  %v4654_v57 = vsel %vm2126_vm14, %v4613_v15, %v7279_v60  ;;  %v4655_v52 = vsel %vm2126_vm14, %v4614_v5, %v7280_v23  ;;  %v6975_v23 = vunpack.i.h.bf16 %v13608_v26  ;;  %v6974_v60 = vunpack.i.l.bf16 %v13608_v26 }
 0x421   : > { %v7288_v10 = vpop.permute.xlu1 %7287  ;;  %v7285_v55 = vunpack.i.h.bf16 %v7283_v36  ;;  %v7284_v38 = vunpack.i.l.bf16 %v7283_v36  ;;  %v4415_v15 = vsel %vm1876_vm8, %v13609_v27, %v6830_v0  ;;  %v4453_v5 = vsel %vm1917_vm9, %v4414_v62, %v6844_v12  ;;  %v13613_v0 = vld [vmem:[#allocation125_spill] sm:$0xff]  ;;  %v13614_v12 = vld [vmem:[#allocation124_spill] sm:$0xff] }
 0x422   : > { %v7290_v29 = vunpack.i.h.bf16 %v7288_v10  ;;  %v7289_v8 = vunpack.i.l.bf16 %v7288_v10  ;;  %v4454_v59 = vsel %vm1917_vm9, %v4415_v15, %v6845_v11  ;;  %v4494_v36 = vsel %vm1958_vm10, %v4453_v5, %v6974_v60 }
 0x423   : > { %v4695_v7 = vsel %vm2168_vm15, %v4654_v57, %v7284_v38  ;;  %v4696_v21 = vsel %vm2168_vm15, %v4655_v52, %v7285_v55  ;;  %v4495_v45 = vsel %vm1958_vm10, %v4454_v59, %v6975_v23 }
 0x424   : > { %v4725_v24 = vpack.c.bf16 %v4696_v21, %v4695_v7  ;;  %v7293_v25 = vpop.permute.xlu0 %7292  ;;  %v4533_v17 = vsel %vm2000_vm11, %v4492_v56, %v7289_v8  ;;  %v4534_v51 = vsel %vm2000_vm11, %v4493_v63, %v7290_v29  ;;  %v13610_v21 = vld [vmem:[#allocation5_spill] sm:$0xff]  ;;  %v13611_v63 = vld [vmem:[#allocation64_spill] sm:$0xff] }
 0x425   : > { %v7298_v50 = vpop.permute.xlu1 %7297  ;;  %v7295_v40 = vunpack.i.h.bf16 %v7293_v25  ;;  %v7294_v47 = vunpack.i.l.bf16 %v7293_v25  ;;  %v6849_v31 = vunpack.i.l.bf16 %v13610_v21  ;;  %v6855_v56 = vunpack.i.h.bf16 %v13611_v63 }
 0x426   : > { %v7300_v35 = vunpack.i.h.bf16 %v7298_v50  ;;  %v7299_v19 = vunpack.i.l.bf16 %v7298_v50  ;;  %5853 = vmatmul.mubr.msk.bf16.gmra.mrb[44].mxu1 %vm2274_vm5, %v4725_v24  ;;  %v6850_v50 = vunpack.i.h.bf16 %v13610_v21 }
 0x427   : > { %v4575_v1 = vsel %vm2042_vm12, %v4534_v51, %v7295_v40  ;;  %v4574_v49 = vsel %vm2042_vm12, %v4533_v17, %v7294_v47  ;;  %5856 = vmatprep.mubr.msk.bf16.mxu1 %vm7559_vm7, %v12985_v30  ;;  %v6854_v40 = vunpack.i.l.bf16 %v13611_v63  ;;  %v13612_v17 = vld [vmem:[#allocation53_spill] sm:$0xff]  ;;  %v4416_v44 = vsel %vm1876_vm8, %v13613_v0, %v6849_v31 }
 0x428   : > { %v7303_v22 = vpop.permute.xlu0 %7302  ;;  %v4615_v18 = vsel %vm2084_vm13, %v4574_v49, %v7299_v19  ;;  %v4616_v9 = vsel %vm2084_vm13, %v4575_v1, %v7300_v35  ;;  %v6980_v51 = vunpack.i.h.bf16 %v13612_v17  ;;  %v6979_v35 = vunpack.i.l.bf16 %v13612_v17 }
 0x429   : > { %v7308_v32 = vpop.permute.xlu1 %7307  ;;  %v7305_v58 = vunpack.i.h.bf16 %v7303_v22  ;;  %v7304_v3 = vunpack.i.l.bf16 %v7303_v22  ;;  %v4455_v4 = vsel %vm1917_vm9, %v4416_v44, %v6854_v40 }
 0x42a   : > { %v7310_v34 = vunpack.i.h.bf16 %v7308_v32  ;;  %v7309_v16 = vunpack.i.l.bf16 %v7308_v32  ;;  %v4496_v23 = vsel %vm1958_vm10, %v4455_v4, %v6979_v35  ;;  %v13620_v4 = vld [vmem:[#allocation93_spill] sm:$0xff] }
 0x42b   : > { %v4656_v13 = vsel %vm2126_vm14, %v4615_v18, %v7304_v3  ;;  %v4657_v20 = vsel %vm2126_vm14, %v4616_v9, %v7305_v58 }
 0x42c   : > { %v7313_v10 = vpop.permute.xlu0 %7312  ;;  %v4697_v33 = vsel %vm2168_vm15, %v4656_v13, %v7309_v16  ;;  %v4698_v53 = vsel %vm2168_vm15, %v4657_v20, %v7310_v34  ;;  %v4417_v34 = vsel %vm1876_vm8, %v13614_v12, %v6850_v50 }
 0x42d   : > { %v7318_v14 = vpop.permute.xlu1 %7317  ;;  %v7315_v41 = vunpack.i.h.bf16 %v7313_v10  ;;  %v7314_v2 = vunpack.i.l.bf16 %v7313_v10  ;;  %v4726_v61 = vpack.c.bf16 %v4698_v53, %v4697_v33  ;;  %v4456_v11 = vsel %vm1917_vm9, %v4417_v34, %v6855_v56  ;;  %v13616_v53 = vld [vmem:[#allocation107_spill] sm:$0xff] }
 0x42e   : > { %v7320_v42 = vunpack.i.h.bf16 %v7318_v14  ;;  %v7319_v6 = vunpack.i.l.bf16 %v7318_v14  ;;  %v4497_v26 = vsel %vm1958_vm10, %v4456_v11, %v6980_v51  ;;  %v13615_v14 = vld [vmem:[#allocation45_spill] sm:$0xff]  ;;  %v6864_v59 = vunpack.i.l.bf16 %v13616_v53 }
 0x42f   : > { %v4535_v48 = vsel %vm2000_vm11, %v4494_v36, %v7314_v2  ;;  %v4536_v55 = vsel %vm2000_vm11, %v4495_v45, %v7315_v41  ;;  %5857 = vmatmul.mubr.msk.bf16.gmra.mrb[48].mxu1 %vm2274_vm5, %v4726_v61  ;;  %v6859_v27 = vunpack.i.l.bf16 %v13615_v14  ;;  %v6860_v33 = vunpack.i.h.bf16 %v13615_v14 }
 0x430   : > { %v7323_v29 = vpop.permute.xlu0 %7322  ;;  %5860 = vmatprep.mubr.msk.bf16.mxu1 %vm7559_vm7, %v12985_v30  ;;  %v4576_v39 = vsel %vm2042_vm12, %v4535_v48, %v7319_v6  ;;  %v4577_v7 = vsel %vm2042_vm12, %v4536_v55, %v7320_v42  ;;  %v6865_v45 = vunpack.i.h.bf16 %v13616_v53  ;;  %v13617_v6 = vld [vmem:[#allocation131_spill] sm:$0xff]  ;;  %v6885_v11 = vunpack.i.h.bf16 %v13620_v4  ;;  %v13623_v53 = vld [vmem:[#allocation37_spill] sm:$0xff] }
 0x431   : > { %v7328_v38 = vpop.permute.xlu1 %7327  ;;  %v7325_v8 = vunpack.i.h.bf16 %v7323_v29  ;;  %v7324_v57 = vunpack.i.l.bf16 %v7323_v29  ;;  %v6985_v48 = vunpack.i.h.bf16 %v13617_v6  ;;  %v6984_v55 = vunpack.i.l.bf16 %v13617_v6 }
 0x432   : > { %v7330_v52 = vunpack.i.h.bf16 %v7328_v38  ;;  %v7329_v54 = vunpack.i.l.bf16 %v7328_v38 }
 0x433   : > { %v4617_v28 = vsel %vm2084_vm13, %v4576_v39, %v7324_v57  ;;  %v4618_v24 = vsel %vm2084_vm13, %v4577_v7, %v7325_v8  ;;  %v13618_v8 = vld [vmem:[#allocation113_spill] sm:$0xff]  ;;  %v13619_v7 = vld [vmem:[#allocation34_spill] sm:$0xff] }
 0x434   : > { %v7333_v47 = vpop.permute.xlu0 %7332  ;;  %v4658_v49 = vsel %vm2126_vm14, %v4617_v28, %v7329_v54  ;;  %v4659_v32 = vsel %vm2126_vm14, %v4618_v24, %v7330_v52  ;;  %v4418_v57 = vsel %vm1876_vm8, %v13618_v8, %v6859_v27  ;;  %v4419_v21 = vsel %vm1876_vm8, %v13619_v7, %v6860_v33 }
 0x435   : > { %v7338_v25 = vpop.permute.xlu1 %7337  ;;  %v7335_v19 = vunpack.i.h.bf16 %v7333_v47  ;;  %v7334_v37 = vunpack.i.l.bf16 %v7333_v47  ;;  %v4457_v50 = vsel %vm1917_vm9, %v4418_v57, %v6864_v59  ;;  %v4421_v59 = vsel %vm1876_vm8, %v13623_v53, %v6885_v11 }
 0x436   : > { %v7340_v43 = vunpack.i.h.bf16 %v7338_v25  ;;  %v7339_v1 = vunpack.i.l.bf16 %v7338_v25  ;;  %v4458_v25 = vsel %vm1917_vm9, %v4419_v21, %v6865_v45  ;;  %v4498_v17 = vsel %vm1958_vm10, %v4457_v50, %v6984_v55 }
 0x437   : > { %v4699_v16 = vsel %vm2168_vm15, %v4658_v49, %v7334_v37  ;;  %v4700_v22 = vsel %vm2168_vm15, %v4659_v32, %v7335_v19  ;;  %v4499_v47 = vsel %vm1958_vm10, %v4458_v25, %v6985_v48 }
 0x438   : > { %v4727_v58 = vpack.c.bf16 %v4700_v22, %v4699_v16  ;;  %v7343_v3 = vpop.permute.xlu0 %7342  ;;  %v4537_v9 = vsel %vm2000_vm11, %v4496_v23, %v7339_v1  ;;  %v4538_v62 = vsel %vm2000_vm11, %v4497_v26, %v7340_v43  ;;  %v13621_v26 = vld [vmem:[#allocation48_spill] sm:$0xff] }
 0x439   : > { %v7348_v46 = vpop.permute.xlu1 %7347  ;;  %v7345_v60 = vunpack.i.h.bf16 %v7343_v3  ;;  %v7344_v18 = vunpack.i.l.bf16 %v7343_v3  ;;  %v6890_v23 = vunpack.i.h.bf16 %v13621_v26 }
 0x43a   : > { %v7350_v13 = vunpack.i.h.bf16 %v7348_v46  ;;  %v7349_v20 = vunpack.i.l.bf16 %v7348_v46  ;;  %5861 = vmatmul.mubr.msk.bf16.gmra.mrb[52].mxu1 %vm2274_vm5, %v4727_v58  ;;  %v6884_v58 = vunpack.i.l.bf16 %v13620_v4 }
 0x43b   : > { %v4579_v15 = vsel %vm2042_vm12, %v4538_v62, %v7345_v60  ;;  %v4578_v5 = vsel %vm2042_vm12, %v4537_v9, %v7344_v18  ;;  %5864 = vmatprep.mubr.msk.bf16.mxu1 %vm7559_vm7, %v12985_v30  ;;  %v6889_v60 = vunpack.i.l.bf16 %v13621_v26  ;;  %v4460_v45 = vsel %vm1917_vm9, %v4421_v59, %v6890_v23 }
 0x43c   : > { %v7353_v61 = vpop.permute.xlu0 %7352  ;;  %v4619_v38 = vsel %vm2084_vm13, %v4578_v5, %v7349_v20  ;;  %v4620_v29 = vsel %vm2084_vm13, %v4579_v15, %v7350_v13 }
 0x43d   : > { %v7358_v10 = vpop.permute.xlu1 %7357  ;;  %v7355_v36 = vunpack.i.h.bf16 %v7353_v61  ;;  %v7354_v42 = vunpack.i.l.bf16 %v7353_v61 }
 0x43e   : > { %v7360_v41 = vunpack.i.h.bf16 %v7358_v10  ;;  %v7359_v2 = vunpack.i.l.bf16 %v7358_v10  ;;  %v13622_v10 = vld [vmem:[#allocation31_spill] sm:$0xff] }
 0x43f   : > { %v4660_v52 = vsel %vm2126_vm14, %v4619_v38, %v7354_v42  ;;  %v4661_v54 = vsel %vm2126_vm14, %v4620_v29, %v7355_v36  ;;  %v4420_v33 = vsel %vm1876_vm8, %v13622_v10, %v6884_v58 }
 0x440   : > { %v7363_v31 = vpop.permute.xlu0 %7362  ;;  %v4701_v28 = vsel %vm2168_vm15, %v4660_v52, %v7359_v2  ;;  %v4702_v24 = vsel %vm2168_vm15, %v4661_v54, %v7360_v41  ;;  %v4459_v61 = vsel %vm1917_vm9, %v4420_v33, %v6889_v60 }
 0x441   : > { %v7368_v39 = vpop.permute.xlu1 %7367  ;;  %v7365_v63 = vunpack.i.h.bf16 %v7363_v31  ;;  %v7364_v56 = vunpack.i.l.bf16 %v7363_v31  ;;  %v4728_v40 = vpack.c.bf16 %v4702_v24, %v4701_v28 }
 0x442   : > { %v7370_v51 = vunpack.i.h.bf16 %v7368_v39  ;;  %v7369_v35 = vunpack.i.l.bf16 %v7368_v39 }
 0x443   : > { %v4539_v19 = vsel %vm2000_vm11, %v4498_v17, %v7364_v56  ;;  %v4540_v37 = vsel %vm2000_vm11, %v4499_v47, %v7365_v63  ;;  %5865 = vmatmul.mubr.msk.bf16.gmra.mrb[56].mxu1 %vm2274_vm5, %v4728_v40  ;;  %v13624_v63 = vld [vmem:[#allocation110_spill] sm:$0xff]  ;;  %v13625_v17 = vld [vmem:[#allocation71_spill] sm:$0xff] }
 0x444   : > { %v7373_v1 = vpop.permute.xlu0 %7372  ;;  %5868 = vmatprep.mubr.msk.bf16.mxu1 %vm7559_vm7, %v12985_v30  ;;  %v4580_v12 = vsel %vm2042_vm12, %v4539_v19, %v7369_v35  ;;  %v4581_v34 = vsel %vm2042_vm12, %v4540_v37, %v7370_v51  ;;  %v6900_v56 = vunpack.i.h.bf16 %v13624_v63  ;;  %v6899_v40 = vunpack.i.l.bf16 %v13624_v63 }
 0x445   : > { %v7378_v43 = vpop.permute.xlu1 %7377  ;;  %v7375_v49 = vunpack.i.h.bf16 %v7373_v1  ;;  %v7374_v32 = vunpack.i.l.bf16 %v7373_v1  ;;  %v6905_v51 = vunpack.i.h.bf16 %v13625_v17  ;;  %v6904_v35 = vunpack.i.l.bf16 %v13625_v17 }
 0x446   : > { %v7380_v0 = vunpack.i.h.bf16 %v7378_v43  ;;  %v7379_v44 = vunpack.i.l.bf16 %v7378_v43 }
 0x447   : > { %v4621_v16 = vsel %vm2084_vm13, %v4580_v12, %v7374_v32  ;;  %v4622_v22 = vsel %vm2084_vm13, %v4581_v34, %v7375_v49  ;;  %v13626_v34 = vld [vmem:[#allocation76_spill] sm:$0xff] }
 0x448   : > { %v7383_v3 = vpop.permute.xlu0 %7382  ;;  %v4662_v20 = vsel %vm2126_vm14, %v4621_v16, %v7379_v44  ;;  %v4663_v14 = vsel %vm2126_vm14, %v4622_v22, %v7380_v0  ;;  %v4422_v16 = vsel %vm1876_vm8, %v13626_v34, %v6899_v40  ;;  %v13627_v22 = vld [vmem:[#allocation115_spill] sm:$0xff] }
 0x449   : > { %v7388_v46 = vpop.permute.xlu1 %7387  ;;  %v7385_v18 = vunpack.i.h.bf16 %v7383_v3  ;;  %v7384_v9 = vunpack.i.l.bf16 %v7383_v3  ;;  %v4461_v58 = vsel %vm1917_vm9, %v4422_v16, %v6904_v35 }
 0x44a   : > { %v7390_v62 = vunpack.i.h.bf16 %v7388_v46  ;;  %v7389_v13 = vunpack.i.l.bf16 %v7388_v46  ;;  %v4423_v46 = vsel %vm1876_vm8, %v13627_v22, %v6900_v56 }
 0x44b   : > { %v4703_v27 = vsel %vm2168_vm15, %v4662_v20, %v7384_v9  ;;  %v4704_v15 = vsel %vm2168_vm15, %v4663_v14, %v7385_v18  ;;  %v4462_v3 = vsel %vm1917_vm9, %v4423_v46, %v6905_v51 }
 0x44c   : > { %v4729_v41 = vpack.c.bf16 %v4704_v15, %v4703_v27  ;;  %v7393_v2 = vpop.permute.xlu0 %7392  ;;  %v4501_v6 = vsel %vm1958_vm10, %v4460_v45, %v7390_v62  ;;  %v4500_v48 = vsel %vm1958_vm10, %v4459_v61, %v7389_v13  ;;  %v13628_v45 = vld [vmem:[#allocation70_spill] sm:$0xff] }
 0x44d   : > { %v7398_v5 = vpop.permute.xlu1 %7397  ;;  %v7395_v36 = vunpack.i.h.bf16 %v7393_v2  ;;  %v7394_v42 = vunpack.i.l.bf16 %v7393_v2 }
 0x44e   : > { %v7400_v55 = vunpack.i.h.bf16 %v7398_v5  ;;  %v7399_v38 = vunpack.i.l.bf16 %v7398_v5  ;;  %5869 = vmatmul.mubr.msk.bf16.gmra.mrb[60].mxu1 %vm2274_vm5, %v4729_v41 }
 0x44f   : > { %v4542_v29 = vsel %vm2000_vm11, %v4501_v6, %v7395_v36  ;;  %v4541_v8 = vsel %vm2000_vm11, %v4500_v48, %v7394_v42  ;;  %5872 = vmatprep.mubr.msk.bf16.mxu1 %vm7559_vm7, %v12985_v30  ;;  %v6925_v36 = vunpack.i.h.bf16 %v13628_v45  ;;  %v6924_v42 = vunpack.i.l.bf16 %v13628_v45  ;;  %v13629_v48 = vld [vmem:[#allocation88_spill] sm:$0xff] }
 0x450   : > { %v7403_v52 = vpop.permute.xlu0 %7402  ;;  %v4582_v50 = vsel %vm2042_vm12, %v4541_v8, %v7399_v38  ;;  %v4583_v31 = vsel %vm2042_vm12, %v4542_v29, %v7400_v55  ;;  %v6930_v55 = vunpack.i.h.bf16 %v13629_v48  ;;  %v6929_v38 = vunpack.i.l.bf16 %v13629_v48 }
 0x451   : > { %v7408_v57 = vpop.permute.xlu1 %7407  ;;  %v7405_v54 = vunpack.i.h.bf16 %v7403_v52  ;;  %v7404_v39 = vunpack.i.l.bf16 %v7403_v52 }
 0x452   : > { %v7410_v7 = vunpack.i.h.bf16 %v7408_v57  ;;  %v7409_v21 = vunpack.i.l.bf16 %v7408_v57 }
 0x453   : > { %v4623_v28 = vsel %vm2084_vm13, %v4582_v50, %v7404_v39  ;;  %v4624_v24 = vsel %vm2084_vm13, %v4583_v31, %v7405_v54  ;;  %v13630_v31 = vld [vmem:[#allocation129_spill] sm:$0xff] }
 0x454   : > { %v7413_v47 = vpop.permute.xlu0 %7412  ;;  %v4664_v49 = vsel %vm2126_vm14, %v4623_v28, %v7409_v21  ;;  %v4665_v32 = vsel %vm2126_vm14, %v4624_v24, %v7410_v7  ;;  %v4424_v28 = vsel %vm1876_vm8, %v13630_v31, %v6924_v42  ;;  %v13631_v24 = vld [vmem:[#allocation132_spill] sm:$0xff] }
 0x455   : > { %v7418_v25 = vpop.permute.xlu1 %7417  ;;  %v7415_v19 = vunpack.i.h.bf16 %v7413_v47  ;;  %v7414_v37 = vunpack.i.l.bf16 %v7413_v47  ;;  %v4463_v40 = vsel %vm1917_vm9, %v4424_v28, %v6929_v38  ;;  %v13636_v28 = vld [vmem:[#allocation41_spill] sm:$0xff] }
 0x456   : > { %v7420_v43 = vunpack.i.h.bf16 %v7418_v25  ;;  %v7419_v1 = vunpack.i.l.bf16 %v7418_v25  ;;  %v4425_v25 = vsel %vm1876_vm8, %v13631_v24, %v6925_v36 }
 0x457   : > { %v4705_v0 = vsel %vm2168_vm15, %v4664_v49, %v7414_v37  ;;  %v4706_v44 = vsel %vm2168_vm15, %v4665_v32, %v7415_v19  ;;  %v4464_v47 = vsel %vm1917_vm9, %v4425_v25, %v6930_v55  ;;  %v13637_v25 = vld [vmem:[#allocation60_spill] sm:$0xff] }
 0x458   : > { %v4730_v4 = vpack.c.bf16 %v4706_v44, %v4705_v0  ;;  %v7423_v11 = vpop.permute.xlu0 %7422  ;;  %v4503_v60 = vsel %vm1958_vm10, %v4462_v3, %v7420_v43  ;;  %v4502_v18 = vsel %vm1958_vm10, %v4461_v58, %v7419_v1 }
 0x459   : > { %v7428_v12 = vpop.permute.xlu1 %7427  ;;  %v7425_v26 = vunpack.i.h.bf16 %v7423_v11  ;;  %v7424_v23 = vunpack.i.l.bf16 %v7423_v11 }
 0x45a   : > { %v7430_v9 = vunpack.i.h.bf16 %v7428_v12  ;;  %v7429_v62 = vunpack.i.l.bf16 %v7428_v12  ;;  %5873 = vmatmul.mubr.msk.bf16.gmra.mrb[64].mxu1 %vm2274_vm5, %v4730_v4  ;;  %v13632_v4 = vld [vmem:[#allocation4_spill] sm:$0xff] }
 0x45b   : > { %v4544_v13 = vsel %vm2000_vm11, %v4503_v60, %v7425_v26  ;;  %v4543_v20 = vsel %vm2000_vm11, %v4502_v18, %v7424_v23  ;;  %5876 = vmatprep.mubr.msk.bf16.mxu1 %vm7559_vm7, %v12985_v30  ;;  %v6939_v11 = vunpack.i.l.bf16 %v13632_v4  ;;  %v6940_v23 = vunpack.i.h.bf16 %v13632_v4  ;;  %v13633_v18 = vld [vmem:[#allocation25_spill] sm:$0xff] }
 0x45c   : > { %v7433_v27 = vpop.permute.xlu0 %7432  ;;  %v4584_v53 = vsel %vm2042_vm12, %v4543_v20, %v7429_v62  ;;  %v4585_v59 = vsel %vm2042_vm12, %v4544_v13, %v7430_v9  ;;  %v6945_v9 = vunpack.i.h.bf16 %v13633_v18  ;;  %v6944_v62 = vunpack.i.l.bf16 %v13633_v18 }
 0x45d   : > { %v7438_v14 = vpop.permute.xlu1 %7437  ;;  %v7435_v15 = vunpack.i.h.bf16 %v7433_v27  ;;  %v7434_v5 = vunpack.i.l.bf16 %v7433_v27 }
 0x45e   : > { %v7440_v10 = vunpack.i.h.bf16 %v7438_v14  ;;  %v7439_v33 = vunpack.i.l.bf16 %v7438_v14 }
 0x45f   : > { %v4625_v41 = vsel %vm2084_vm13, %v4584_v53, %v7434_v5  ;;  %v4626_v2 = vsel %vm2084_vm13, %v4585_v59, %v7435_v15 }
 0x460   : > { %v7443_v6 = vpop.permute.xlu0 %7442  ;;  %v4666_v54 = vsel %vm2126_vm14, %v4625_v41, %v7439_v33  ;;  %v4667_v39 = vsel %vm2126_vm14, %v4626_v2, %v7440_v10  ;;  %v13634_v10 = vld [vmem:[#allocation128_spill] sm:$0xff] }
 0x461   : > { %v7448_v61 = vpop.permute.xlu1 %7447  ;;  %v7445_v29 = vunpack.i.h.bf16 %v7443_v6  ;;  %v7444_v8 = vunpack.i.l.bf16 %v7443_v6  ;;  %v4426_v33 = vsel %vm1876_vm8, %v13634_v10, %v6939_v11  ;;  %v13635_v2 = vld [vmem:[#allocation40_spill] sm:$0xff] }
 0x462   : > { %v7450_v57 = vunpack.i.h.bf16 %v7448_v61  ;;  %v7449_v52 = vunpack.i.l.bf16 %v7448_v61  ;;  %v4427_v61 = vsel %vm1876_vm8, %v13635_v2, %v6940_v23  ;;  %v4465_v48 = vsel %vm1917_vm9, %v4426_v33, %v6944_v62 }
 0x463   : > { %v4707_v7 = vsel %vm2168_vm15, %v4666_v54, %v7444_v8  ;;  %v4708_v21 = vsel %vm2168_vm15, %v4667_v39, %v7445_v29  ;;  %v4466_v55 = vsel %vm1917_vm9, %v4427_v61, %v6945_v9 }
 0x464   : > { %v4731_v63 = vpack.c.bf16 %v4708_v21, %v4707_v7  ;;  %v7453_v56 = vpop.permute.xlu0 %7452  ;;  %v4505_v35 = vsel %vm1958_vm10, %v4464_v47, %v7450_v57  ;;  %v4504_v19 = vsel %vm1958_vm10, %v4463_v40, %v7449_v52 }
 0x465   : > { %v7458_v50 = vpop.permute.xlu1 %7457  ;;  %v7455_v17 = vunpack.i.h.bf16 %v7453_v56  ;;  %v7454_v51 = vunpack.i.l.bf16 %v7453_v56 }
 0x466   : > { %v7460_v37 = vunpack.i.h.bf16 %v7458_v50  ;;  %v7459_v43 = vunpack.i.l.bf16 %v7458_v50  ;;  %5877 = vmatmul.mubr.msk.bf16.gmra.mrb[68].mxu1 %vm2274_vm5, %v4731_v63 }
 0x467   : > { %v4546_v1 = vsel %vm2000_vm11, %v4505_v35, %v7455_v17  ;;  %v4545_v49 = vsel %vm2000_vm11, %v4504_v19, %v7454_v51  ;;  %5880 = vmatprep.mubr.msk.bf16.mxu1 %vm7559_vm7, %v12985_v30  ;;  %v13638_v51 = vld [vmem:[#allocation85_spill] sm:$0xff]  ;;  %v13639_v19 = vld [vmem:[#allocation95_spill] sm:$0xff] }
 0x468   : > { %v7463_v0 = vpop.permute.xlu0 %7462  ;;  %v4586_v22 = vsel %vm2042_vm12, %v4545_v49, %v7459_v43  ;;  %v4587_v46 = vsel %vm2042_vm12, %v4546_v1, %v7460_v37  ;;  %v13640_v37 = vld [vmem:[#allocation59_spill] sm:$0xff]  ;;  %v13641_v49 = vld [vmem:[#allocation120_spill] sm:$0xff] }
 0x469   : > { %v7468_v32 = vpop.permute.xlu1 %7467  ;;  %v7465_v44 = vunpack.i.h.bf16 %v7463_v0  ;;  %v7464_v12 = vunpack.i.l.bf16 %v7463_v0  ;;  %v4428_v43 = vsel %vm1876_vm8, %v13640_v37, %v13639_v19 }
 0x46a   : > { %v7470_v34 = vunpack.i.h.bf16 %v7468_v32  ;;  %v7469_v16 = vunpack.i.l.bf16 %v7468_v32  ;;  %v4467_v32 = vsel %vm1917_vm9, %v4428_v43, %v13641_v49 }
 0x46b   : > { %v4628_v58 = vsel %vm2084_vm13, %v4587_v46, %v7465_v44  ;;  %v4627_v3 = vsel %vm2084_vm13, %v4586_v22, %v7464_v12 }
 0x46c   : > { %v7473_v60 = vpop.permute.xlu0 %7472  ;;  %v4668_v15 = vsel %vm2126_vm14, %v4627_v3, %v7469_v16  ;;  %v4669_v5 = vsel %vm2126_vm14, %v4628_v58, %v7470_v34  ;;  %v12261_v58 = vld [vmem:[%s12529_s5] ss:$0 sm:$0xff] }
 0x46d   : > { %v7478_v26 = vpop.permute.xlu1 %7477  ;;  %v7475_v13 = vunpack.i.h.bf16 %v7473_v60  ;;  %v7474_v20 = vunpack.i.l.bf16 %v7473_v60 }
 0x46e   : > { %v7480_v14 = vunpack.i.h.bf16 %v7478_v26  ;;  %v7479_v27 = vunpack.i.l.bf16 %v7478_v26 }
 0x46f   : > { %v4709_v53 = vsel %vm2168_vm15, %v4668_v15, %v7474_v20  ;;  %v4710_v59 = vsel %vm2168_vm15, %v4669_v5, %v7475_v13 }
 0x470   : > { %v4732_v45 = vpack.c.bf16 %v4710_v59, %v4709_v53  ;;  %v7483_v6 = vpop.permute.xlu0 %7482  ;;  %v4507_v8 = vsel %vm1958_vm10, %v4466_v55, %v7480_v14  ;;  %v4506_v57 = vsel %vm1958_vm10, %v4465_v48, %v7479_v27 }
 0x471   : > { %v7488_v41 = vpop.permute.xlu1 %7487  ;;  %v7485_v38 = vunpack.i.h.bf16 %v7483_v6  ;;  %v7484_v29 = vunpack.i.l.bf16 %v7483_v6 }
 0x472   : > { %v7490_v36 = vunpack.i.h.bf16 %v7488_v41  ;;  %v7489_v42 = vunpack.i.l.bf16 %v7488_v41  ;;  %5881 = vmatmul.mubr.msk.bf16.gmra.mrb[72].mxu1 %vm2274_vm5, %v4732_v45 }
 0x473   : > { %v4548_v52 = vsel %vm2000_vm11, %v4507_v8, %v7485_v38  ;;  %v4547_v39 = vsel %vm2000_vm11, %v4506_v57, %v7484_v29  ;;  %5884 = vmatprep.mubr.msk.bf16.mxu1 %vm7559_vm7, %v12985_v30 }
 0x474   : > { %v4589_v7 = vsel %vm2042_vm12, %v4548_v52, %v7490_v36  ;;  %v4114_v21 = vpop.permute.xlu0 %4113  ;;  %v4588_v50 = vsel %vm2042_vm12, %v4547_v39, %v7489_v42 }
 0x475   : > { %v4232_v54 = vpop.permute.xlu1 %4231  ;;  %v4629_v31 = vsel %vm2084_vm13, %v4588_v50, %v4114_v21  ;;  %v4630_v24 = vsel %vm2084_vm13, %v4589_v7, %v13636_v28 }
 0x476   : > { %v4671_v63 = vsel %vm2126_vm14, %v4630_v24, %v13637_v25  ;;  %v4670_v47 = vsel %vm2126_vm14, %v4629_v31, %v4232_v54 }
 0x477   : > { %v4712_v35 = vsel %vm2168_vm15, %v4671_v63, %v13638_v51 }
 0x478   : > { %v4350_v40 = vpop.permute.xlu0 %4349 }
 0x479   : > { %v3748_v56 = vpop.permute.xlu1 %3747  ;;  %v4711_v17 = vsel %vm2168_vm15, %v4670_v47, %v4350_v40 }
 0x47a   : > { %v4733_v1 = vpack.c.bf16 %v4712_v35, %v4711_v17  ;;  %v4508_v44 = vsel %vm1958_vm10, %v4467_v32, %v3748_v56 }
 0x47c   : > { %v3871_v12 = vpop.permute.xlu0 %3870  ;;  %5885 = vmatmul.mubr.msk.bf16.gmra.mrb[76].mxu1 %vm2274_vm5, %v4733_v1 }
 0x47d   : > { %v3995_v0 = vpop.permute.xlu1 %3994  ;;  %v4549_v34 = vsel %vm2000_vm11, %v4508_v44, %v3871_v12  ;;  %5888 = vmatprep.mubr.msk.bf16.mxu1 %vm7559_vm7, %v12985_v30 }
 0x47e   : > { %v4590_v16 = vsel %vm2042_vm12, %v4549_v34, %v3995_v0 }
 0x47f   : > { %v4631_v22 = vsel %vm2084_vm13, %v4590_v16, %v13636_v28 }
 0x480   : > { %v4672_v46 = vsel %vm2126_vm14, %v4631_v22, %v13637_v25 }
 0x481   : > { %v4713_v4 = vsel %vm2168_vm15, %v4672_v46, %v13638_v51 }
 0x482   : > { %v4734_v11 = vpack.c.bf16 %v4713_v4, %v4713_v4 }
 0x484   : > { %5889 = vmatmul.mubr.msk.bf16.gmra.mrb[80].mxu1 %vm2274_vm5, %v4734_v11 }
 0x48a   : > { %v4878_v30 = vpop.f32.mrb[0].mxu1 }
 0x48b   : > { %v4879_v3 = vadd.f32 %v12261_v58, %v4878_v30  ;;  %v5810_v26 = vpop.f32.mrb[1].mxu1 }
 0x48c   : > { %v4881_v23 = vpop.f32.mrb[2].mxu1 }
 0x48d   : > { %v5611_v60 = vpack.c.bf16 %v4879_v3, %v4879_v3  ;;  %v4882_v18 = vadd.f32 %v12261_v58, %v4881_v23  ;;  %v5811_v9 = vpop.f32.mrb[3].mxu1 }
 0x48f   : > { %5210 = vst.msk [vmem:[%s12269_s26] sm:$0xf] %vm5209_vm1, %v5611_v60  ;;  %v5612_v62 = vpack.c.bf16 %v4882_v18, %v4882_v18  ;;  %5252 = vrot.lane.b32.xlu0 %v5611_v60, %s7562_s18 }
 0x491   : > { %5211 = vst.msk [vmem:[%s12269_s26 + $0x4] sm:$0xf] %vm5209_vm1, %v5612_v62  ;;  %5254 = vrot.lane.b32.xlu1 %v5612_v62, %s7562_s18 }
 0x495   : > { %v4886_v13 = vpop.f32.mrb[4].mxu1 }
 0x496   : > { %v4887_v20 = vadd.f32 %v12261_v58, %v4886_v13  ;;  %v5814_v14 = vpop.f32.mrb[5].mxu1 }
 0x497   : > { %v4889_v27 = vpop.f32.mrb[6].mxu1 }
 0x498   : > { %v5613_v15 = vpack.c.bf16 %v4887_v20, %v4887_v20  ;;  %v4890_v5 = vadd.f32 %v12261_v58, %v4889_v27  ;;  %v5815_v10 = vpop.f32.mrb[7].mxu1 }
 0x49a   : > { %5212 = vst.msk [vmem:[%s12269_s26 + $0x8] sm:$0xf] %vm5209_vm1, %v5613_v15  ;;  %v5614_v33 = vpack.c.bf16 %v4890_v5, %v4890_v5  ;;  %5256 = vrot.lane.b32.xlu0 %v5613_v15, %s7562_s18 }
 0x49c   : > { %5213 = vst.msk [vmem:[%s12269_s26 + $0xc] sm:$0xf] %vm5209_vm1, %v5614_v33  ;;  %5258 = vrot.lane.b32.xlu1 %v5614_v33, %s7562_s18 }
 0x49e   : > { %v4894_v53 = vpop.f32.mrb[8].mxu1 }
 0x49f   : > { %v4895_v59 = vadd.f32 %v12261_v58, %v4894_v53  ;;  %v5818_v41 = vpop.f32.mrb[9].mxu1 }
 0x4a0   : > { %v4897_v2 = vpop.f32.mrb[10].mxu1 }
 0x4a1   : > { %v5615_v61 = vpack.c.bf16 %v4895_v59, %v4895_v59  ;;  %v4898_v45 = vadd.f32 %v12261_v58, %v4897_v2  ;;  %v5819_v36 = vpop.f32.mrb[11].mxu1 }
 0x4a3   : > { %5214 = vst.msk [vmem:[%s12269_s26 + $0x10] sm:$0xf] %vm5209_vm1, %v5615_v61  ;;  %v5616_v42 = vpack.c.bf16 %v4898_v45, %v4898_v45  ;;  %5260 = vrot.lane.b32.xlu0 %v5615_v61, %s7562_s18 }
 0x4a5   : > { %5215 = vst.msk [vmem:[%s12269_s26 + $0x14] sm:$0xf] %vm5209_vm1, %v5616_v42  ;;  %5262 = vrot.lane.b32.xlu1 %v5616_v42, %s7562_s18 }
 0x4a9   : > { %v4902_v6 = vpop.f32.mrb[12].mxu1 }
 0x4aa   : > { %v4903_v48 = vadd.f32 %v12261_v58, %v4902_v6  ;;  %v5822_v55 = vpop.f32.mrb[13].mxu1 }
 0x4ab   : > { %v4905_v38 = vpop.f32.mrb[14].mxu1 }
 0x4ac   : > { %v5617_v29 = vpack.c.bf16 %v4903_v48, %v4903_v48  ;;  %v4906_v8 = vadd.f32 %v12261_v58, %v4905_v38  ;;  %v5823_v57 = vpop.f32.mrb[15].mxu1 }
 0x4ae   : > { %5216 = vst.msk [vmem:[%s12269_s26 + $0x18] sm:$0xf] %vm5209_vm1, %v5617_v29  ;;  %v5618_v52 = vpack.c.bf16 %v4906_v8, %v4906_v8  ;;  %5264 = vrot.lane.b32.xlu0 %v5617_v29, %s7562_s18 }
 0x4b0   : > { %5217 = vst.msk [vmem:[%s12269_s26 + $0x1c] sm:$0xf] %vm5209_vm1, %v5618_v52  ;;  %5266 = vrot.lane.b32.xlu1 %v5618_v52, %s7562_s18 }
 0x4b2   : > { %v4910_v54 = vpop.f32.mrb[16].mxu1 }
 0x4b3   : > { %v4911_v39 = vadd.f32 %v12261_v58, %v4910_v54  ;;  %v5826_v7 = vpop.f32.mrb[17].mxu1 }
 0x4b4   : > { %v4913_v21 = vpop.f32.mrb[18].mxu1 }
 0x4b5   : > { %v5619_v50 = vpack.c.bf16 %v4911_v39, %v4911_v39  ;;  %v4914_v31 = vadd.f32 %v12261_v58, %v4913_v21  ;;  %v5827_v28 = vpop.f32.mrb[19].mxu1 }
 0x4b7   : > { %5218 = vst.msk [vmem:[%s12269_s26 + $0x20] sm:$0xf] %vm5209_vm1, %v5619_v50  ;;  %v5620_v24 = vpack.c.bf16 %v4914_v31, %v4914_v31  ;;  %5268 = vrot.lane.b32.xlu0 %v5619_v50, %s7562_s18 }
 0x4b9   : > { %5219 = vst.msk [vmem:[%s12269_s26 + $0x24] sm:$0xf] %vm5209_vm1, %v5620_v24  ;;  %5270 = vrot.lane.b32.xlu1 %v5620_v24, %s7562_s18 }
 0x4bd   : > { %v4918_v25 = vpop.f32.mrb[20].mxu1 }
 0x4be   : > { %v4919_v63 = vadd.f32 %v12261_v58, %v4918_v25  ;;  %v5830_v56 = vpop.f32.mrb[21].mxu1 }
 0x4bf   : > { %v4921_v40 = vpop.f32.mrb[22].mxu1 }
 0x4c0   : > { %v5621_v47 = vpack.c.bf16 %v4919_v63, %v4919_v63  ;;  %v4922_v17 = vadd.f32 %v12261_v58, %v4921_v40  ;;  %v5831_v51 = vpop.f32.mrb[23].mxu1 }
 0x4c2   : > { %5220 = vst.msk [vmem:[%s12269_s26 + $0x28] sm:$0xf] %vm5209_vm1, %v5621_v47  ;;  %v5622_v35 = vpack.c.bf16 %v4922_v17, %v4922_v17  ;;  %5272 = vrot.lane.b32.xlu0 %v5621_v47, %s7562_s18 }
 0x4c4   : > { %5221 = vst.msk [vmem:[%s12269_s26 + $0x2c] sm:$0xf] %vm5209_vm1, %v5622_v35  ;;  %5274 = vrot.lane.b32.xlu1 %v5622_v35, %s7562_s18 }
 0x4c6   : > { %v4926_v19 = vpop.f32.mrb[24].mxu1 }
 0x4c7   : > { %v4927_v37 = vadd.f32 %v12261_v58, %v4926_v19  ;;  %v5834_v43 = vpop.f32.mrb[25].mxu1 }
 0x4c8   : > { %v4929_v1 = vpop.f32.mrb[26].mxu1 }
 0x4c9   : > { %v5623_v49 = vpack.c.bf16 %v4927_v37, %v4927_v37  ;;  %v4930_v32 = vadd.f32 %v12261_v58, %v4929_v1  ;;  %v5835_v0 = vpop.f32.mrb[27].mxu1 }
 0x4cb   : > { %5222 = vst.msk [vmem:[%s12269_s26 + $0x30] sm:$0xf] %vm5209_vm1, %v5623_v49  ;;  %v5624_v44 = vpack.c.bf16 %v4930_v32, %v4930_v32  ;;  %5276 = vrot.lane.b32.xlu0 %v5623_v49, %s7562_s18 }
 0x4cd   : > { %5223 = vst.msk [vmem:[%s12269_s26 + $0x34] sm:$0xf] %vm5209_vm1, %v5624_v44  ;;  %5278 = vrot.lane.b32.xlu1 %v5624_v44, %s7562_s18 }
 0x4d1   : > { %v4934_v12 = vpop.f32.mrb[28].mxu1 }
 0x4d2   : > { %v4935_v34 = vadd.f32 %v12261_v58, %v4934_v12  ;;  %v5838_v16 = vpop.f32.mrb[29].mxu1 }
 0x4d3   : > { %v4937_v22 = vpop.f32.mrb[30].mxu1 }
 0x4d4   : > { %v5625_v46 = vpack.c.bf16 %v4935_v34, %v4935_v34  ;;  %v4938_v4 = vadd.f32 %v12261_v58, %v4937_v22  ;;  %v5839_v11 = vpop.f32.mrb[31].mxu1 }
 0x4d6   : > { %5224 = vst.msk [vmem:[%s12269_s26 + $0x38] sm:$0xf] %vm5209_vm1, %v5625_v46  ;;  %v5626_v30 = vpack.c.bf16 %v4938_v4, %v4938_v4  ;;  %5280 = vrot.lane.b32.xlu0 %v5625_v46, %s7562_s18 }
 0x4d8   : > { %5225 = vst.msk [vmem:[%s12269_s26 + $0x3c] sm:$0xf] %vm5209_vm1, %v5626_v30  ;;  %5282 = vrot.lane.b32.xlu1 %v5626_v30, %s7562_s18 }
 0x4da   : > { %v4942_v3 = vpop.f32.mrb[32].mxu1 }
 0x4db   : > { %v4943_v26 = vadd.f32 %v12261_v58, %v4942_v3  ;;  %v5842_v23 = vpop.f32.mrb[33].mxu1 }
 0x4dc   : > { %v4945_v60 = vpop.f32.mrb[34].mxu1 }
 0x4dd   : > { %v5627_v18 = vpack.c.bf16 %v4943_v26, %v4943_v26  ;;  %v4946_v9 = vadd.f32 %v12261_v58, %v4945_v60  ;;  %v5843_v62 = vpop.f32.mrb[35].mxu1 }
 0x4df   : > { %5226 = vst.msk [vmem:[%s12269_s26 + $0x40] sm:$0xf] %vm5209_vm1, %v5627_v18  ;;  %v5628_v13 = vpack.c.bf16 %v4946_v9, %v4946_v9  ;;  %5284 = vrot.lane.b32.xlu0 %v5627_v18, %s7562_s18 }
 0x4e1   : > { %5227 = vst.msk [vmem:[%s12269_s26 + $0x44] sm:$0xf] %vm5209_vm1, %v5628_v13  ;;  %5286 = vrot.lane.b32.xlu1 %v5628_v13, %s7562_s18 }
 0x4e5   : > { %v4950_v20 = vpop.f32.mrb[36].mxu1 }
 0x4e6   : > { %v4951_v14 = vadd.f32 %v12261_v58, %v4950_v20  ;;  %v5846_v27 = vpop.f32.mrb[37].mxu1 }
 0x4e7   : > { %v4953_v15 = vpop.f32.mrb[38].mxu1 }
 0x4e8   : > { %v5629_v5 = vpack.c.bf16 %v4951_v14, %v4951_v14  ;;  %v4954_v10 = vadd.f32 %v12261_v58, %v4953_v15  ;;  %v5847_v33 = vpop.f32.mrb[39].mxu1 }
 0x4ea   : > { %5228 = vst.msk [vmem:[%s12269_s26 + $0x48] sm:$0xf] %vm5209_vm1, %v5629_v5  ;;  %v5630_v53 = vpack.c.bf16 %v4954_v10, %v4954_v10  ;;  %5288 = vrot.lane.b32.xlu0 %v5629_v5, %s7562_s18 }
 0x4ec   : > { %5229 = vst.msk [vmem:[%s12269_s26 + $0x4c] sm:$0xf] %vm5209_vm1, %v5630_v53  ;;  %5290 = vrot.lane.b32.xlu1 %v5630_v53, %s7562_s18 }
 0x4ee   : > { %v4958_v59 = vpop.f32.mrb[40].mxu1 }
 0x4ef   : > { %v4959_v41 = vadd.f32 %v12261_v58, %v4958_v59  ;;  %v5850_v2 = vpop.f32.mrb[41].mxu1 }
 0x4f0   : > { %v4961_v61 = vpop.f32.mrb[42].mxu1 }
 0x4f1   : > { %v5631_v45 = vpack.c.bf16 %v4959_v41, %v4959_v41  ;;  %v4962_v36 = vadd.f32 %v12261_v58, %v4961_v61  ;;  %v5851_v42 = vpop.f32.mrb[43].mxu1 }
 0x4f3   : > { %5230 = vst.msk [vmem:[%s12269_s26 + $0x50] sm:$0xf] %vm5209_vm1, %v5631_v45  ;;  %v5632_v6 = vpack.c.bf16 %v4962_v36, %v4962_v36  ;;  %5292 = vrot.lane.b32.xlu0 %v5631_v45, %s7562_s18 }
 0x4f5   : > { %5231 = vst.msk [vmem:[%s12269_s26 + $0x54] sm:$0xf] %vm5209_vm1, %v5632_v6  ;;  %5294 = vrot.lane.b32.xlu1 %v5632_v6, %s7562_s18 }
 0x4f9   : > { %v4966_v48 = vpop.f32.mrb[44].mxu1 }
 0x4fa   : > { %v4967_v55 = vadd.f32 %v12261_v58, %v4966_v48  ;;  %v5854_v38 = vpop.f32.mrb[45].mxu1 }
 0x4fb   : > { %v4969_v29 = vpop.f32.mrb[46].mxu1 }
 0x4fc   : > { %v5633_v8 = vpack.c.bf16 %v4967_v55, %v4967_v55  ;;  %v4970_v57 = vadd.f32 %v12261_v58, %v4969_v29  ;;  %v5855_v52 = vpop.f32.mrb[47].mxu1 }
 0x4fe   : > { %5232 = vst.msk [vmem:[%s12269_s26 + $0x58] sm:$0xf] %vm5209_vm1, %v5633_v8  ;;  %v5634_v54 = vpack.c.bf16 %v4970_v57, %v4970_v57  ;;  %5296 = vrot.lane.b32.xlu0 %v5633_v8, %s7562_s18 }
 0x500   : > { %5233 = vst.msk [vmem:[%s12269_s26 + $0x5c] sm:$0xf] %vm5209_vm1, %v5634_v54  ;;  %5298 = vrot.lane.b32.xlu1 %v5634_v54, %s7562_s18 }
 0x501   : > { %v5253_v39 = vpop.permute.xlu0 %5252 }
 0x502   : > { %5376 = vst.msk [vmem:[%s12368_s20] sm:$0xf] %vm5375_vm2, %v5253_v39  ;;  %v4974_v7 = vpop.f32.mrb[48].mxu1 }
 0x503   : > { %v4975_v21 = vadd.f32 %v12261_v58, %v4974_v7  ;;  %v5858_v50 = vpop.f32.mrb[49].mxu1  ;;  %v5255_v31 = vpop.permute.xlu1 %5254 }
 0x504   : > { %5377 = vst.msk [vmem:[%s12368_s20 + $0x4] sm:$0xf] %vm5375_vm2, %v5255_v31  ;;  %v4977_v28 = vpop.f32.mrb[50].mxu1 }
 0x505   : > { %v5635_v24 = vpack.c.bf16 %v4975_v21, %v4975_v21  ;;  %v4978_v25 = vadd.f32 %v12261_v58, %v4977_v28  ;;  %v5859_v63 = vpop.f32.mrb[51].mxu1 }
 0x507   : > { %5234 = vst.msk [vmem:[%s12269_s26 + $0x60] sm:$0xf] %vm5209_vm1, %v5635_v24  ;;  %v5636_v56 = vpack.c.bf16 %v4978_v25, %v4978_v25  ;;  %5300 = vrot.lane.b32.xlu0 %v5635_v24, %s7562_s18 }
 0x509   : > { %5235 = vst.msk [vmem:[%s12269_s26 + $0x64] sm:$0xf] %vm5209_vm1, %v5636_v56  ;;  %5302 = vrot.lane.b32.xlu1 %v5636_v56, %s7562_s18 }
 0x50c   : > { %v5257_v40 = vpop.permute.xlu0 %5256 }
 0x50d   : > { %5378 = vst.msk [vmem:[%s12368_s20 + $0x8] sm:$0xf] %vm5375_vm2, %v5257_v40  ;;  %v4982_v47 = vpop.f32.mrb[52].mxu1 }
 0x50e   : > { %v4983_v17 = vadd.f32 %v12261_v58, %v4982_v47  ;;  %v5862_v51 = vpop.f32.mrb[53].mxu1  ;;  %v5259_v35 = vpop.permute.xlu1 %5258 }
 0x50f   : > { %5379 = vst.msk [vmem:[%s12368_s20 + $0xc] sm:$0xf] %vm5375_vm2, %v5259_v35  ;;  %v4985_v19 = vpop.f32.mrb[54].mxu1 }
 0x510   : > { %v5637_v37 = vpack.c.bf16 %v4983_v17, %v4983_v17  ;;  %v4986_v43 = vadd.f32 %v12261_v58, %v4985_v19  ;;  %v5863_v1 = vpop.f32.mrb[55].mxu1 }
 0x512   : > { %5236 = vst.msk [vmem:[%s12269_s26 + $0x68] sm:$0xf] %vm5209_vm1, %v5637_v37  ;;  %v5638_v49 = vpack.c.bf16 %v4986_v43, %v4986_v43  ;;  %5304 = vrot.lane.b32.xlu0 %v5637_v37, %s7562_s18 }
 0x514   : > { %5237 = vst.msk [vmem:[%s12269_s26 + $0x6c] sm:$0xf] %vm5209_vm1, %v5638_v49  ;;  %5306 = vrot.lane.b32.xlu1 %v5638_v49, %s7562_s18 }
 0x515   : > { %v5261_v32 = vpop.permute.xlu0 %5260 }
 0x516   : > { %5380 = vst.msk [vmem:[%s12368_s20 + $0x10] sm:$0xf] %vm5375_vm2, %v5261_v32  ;;  %v4990_v0 = vpop.f32.mrb[56].mxu1 }
 0x517   : > { %v4991_v44 = vadd.f32 %v12261_v58, %v4990_v0  ;;  %v5866_v12 = vpop.f32.mrb[57].mxu1  ;;  %v5263_v34 = vpop.permute.xlu1 %5262 }
 0x518   : > { %5381 = vst.msk [vmem:[%s12368_s20 + $0x14] sm:$0xf] %vm5375_vm2, %v5263_v34  ;;  %v4993_v16 = vpop.f32.mrb[58].mxu1 }
 0x519   : > { %v5639_v22 = vpack.c.bf16 %v4991_v44, %v4991_v44  ;;  %v4994_v46 = vadd.f32 %v12261_v58, %v4993_v16  ;;  %v5867_v4 = vpop.f32.mrb[59].mxu1 }
 0x51b   : > { %5238 = vst.msk [vmem:[%s12269_s26 + $0x70] sm:$0xf] %vm5209_vm1, %v5639_v22  ;;  %v5640_v11 = vpack.c.bf16 %v4994_v46, %v4994_v46  ;;  %5308 = vrot.lane.b32.xlu0 %v5639_v22, %s7562_s18 }
 0x51d   : > { %5239 = vst.msk [vmem:[%s12269_s26 + $0x74] sm:$0xf] %vm5209_vm1, %v5640_v11  ;;  %5310 = vrot.lane.b32.xlu1 %v5640_v11, %s7562_s18 }
 0x520   : > { %v5265_v30 = vpop.permute.xlu0 %5264 }
 0x521   : > { %5382 = vst.msk [vmem:[%s12368_s20 + $0x18] sm:$0xf] %vm5375_vm2, %v5265_v30  ;;  %v4998_v3 = vpop.f32.mrb[60].mxu1 }
 0x522   : > { %v4999_v26 = vadd.f32 %v12261_v58, %v4998_v3  ;;  %v5870_v23 = vpop.f32.mrb[61].mxu1  ;;  %v5267_v60 = vpop.permute.xlu1 %5266 }
 0x523   : > { %5383 = vst.msk [vmem:[%s12368_s20 + $0x1c] sm:$0xf] %vm5375_vm2, %v5267_v60  ;;  %v5001_v18 = vpop.f32.mrb[62].mxu1 }
 0x524   : > { %v5641_v9 = vpack.c.bf16 %v4999_v26, %v4999_v26  ;;  %v5002_v62 = vadd.f32 %v12261_v58, %v5001_v18  ;;  %v5871_v13 = vpop.f32.mrb[63].mxu1 }
 0x526   : > { %5240 = vst.msk [vmem:[%s12269_s26 + $0x78] sm:$0xf] %vm5209_vm1, %v5641_v9  ;;  %v5642_v20 = vpack.c.bf16 %v5002_v62, %v5002_v62  ;;  %5312 = vrot.lane.b32.xlu0 %v5641_v9, %s7562_s18 }
 0x528   : > { %5241 = vst.msk [vmem:[%s12269_s26 + $0x7c] sm:$0xf] %vm5209_vm1, %v5642_v20  ;;  %5314 = vrot.lane.b32.xlu1 %v5642_v20, %s7562_s18 }
 0x529   : > { %v5269_v14 = vpop.permute.xlu0 %5268 }
 0x52a   : > { %5384 = vst.msk [vmem:[%s12368_s20 + $0x20] sm:$0xf] %vm5375_vm2, %v5269_v14 }
 0x52b   : > { %v5271_v27 = vpop.permute.xlu1 %5270 }
 0x52c   : > { %5385 = vst.msk [vmem:[%s12368_s20 + $0x24] sm:$0xf] %vm5375_vm2, %v5271_v27 }
 0x52d   : > { %v5006_v15 = vpop.f32.mrb[64].mxu1 }
 0x52e   : > { %v5007_v5 = vadd.f32 %v12261_v58, %v5006_v15  ;;  %v5874_v10 = vpop.f32.mrb[65].mxu1 }
 0x52f   : > { %v5009_v33 = vpop.f32.mrb[66].mxu1 }
 0x530   : > { %v5643_v53 = vpack.c.bf16 %v5007_v5, %v5007_v5  ;;  %v5010_v59 = vadd.f32 %v12261_v58, %v5009_v33  ;;  %v5875_v41 = vpop.f32.mrb[67].mxu1 }
 0x532   : > { %5242 = vst.msk [vmem:[%s12269_s26 + $0x80] sm:$0xf] %vm5209_vm1, %v5643_v53  ;;  %v5644_v2 = vpack.c.bf16 %v5010_v59, %v5010_v59  ;;  %5316 = vrot.lane.b32.xlu0 %v5643_v53, %s7562_s18 }
 0x534   : > { %5243 = vst.msk [vmem:[%s12269_s26 + $0x84] sm:$0xf] %vm5209_vm1, %v5644_v2  ;;  %v5273_v61 = vpop.permute.xlu0 %5272  ;;  %5318 = vrot.lane.b32.xlu1 %v5644_v2, %s7562_s18 }
 0x535   : > { %5386 = vst.msk [vmem:[%s12368_s20 + $0x28] sm:$0xf] %vm5375_vm2, %v5273_v61 }
 0x536   : > { %v5275_v45 = vpop.permute.xlu1 %5274 }
 0x537   : > { %5387 = vst.msk [vmem:[%s12368_s20 + $0x2c] sm:$0xf] %vm5375_vm2, %v5275_v45 }
 0x539   : > { %v5014_v36 = vpop.f32.mrb[68].mxu1 }
 0x53a   : > { %v5015_v42 = vadd.f32 %v12261_v58, %v5014_v36  ;;  %v5878_v6 = vpop.f32.mrb[69].mxu1 }
 0x53b   : > { %v5017_v48 = vpop.f32.mrb[70].mxu1 }
 0x53c   : > { %v5645_v55 = vpack.c.bf16 %v5015_v42, %v5015_v42  ;;  %v5018_v38 = vadd.f32 %v12261_v58, %v5017_v48  ;;  %v5879_v29 = vpop.f32.mrb[71].mxu1 }
 0x53d   : > { %v5277_v8 = vpop.permute.xlu0 %5276 }
 0x53e   : > { %5244 = vst.msk [vmem:[%s12269_s26 + $0x88] sm:$0xf] %vm5209_vm1, %v5645_v55  ;;  %v5646_v57 = vpack.c.bf16 %v5018_v38, %v5018_v38  ;;  %5320 = vrot.lane.b32.xlu0 %v5645_v55, %s7562_s18 }
 0x53f   : > { %5388 = vst.msk [vmem:[%s12368_s20 + $0x30] sm:$0xf] %vm5375_vm2, %v5277_v8  ;;  %v5279_v52 = vpop.permute.xlu1 %5278 }
 0x540   : > { %5245 = vst.msk [vmem:[%s12269_s26 + $0x8c] sm:$0xf] %vm5209_vm1, %v5646_v57  ;;  %5322 = vrot.lane.b32.xlu1 %v5646_v57, %s7562_s18 }
 0x541   : > { %5389 = vst.msk [vmem:[%s12368_s20 + $0x34] sm:$0xf] %vm5375_vm2, %v5279_v52 }
 0x545   : > { %v5022_v54 = vpop.f32.mrb[72].mxu1 }
 0x546   : > { %v5023_v39 = vadd.f32 %v12261_v58, %v5022_v54  ;;  %v5882_v7 = vpop.f32.mrb[73].mxu1 }
 0x547   : > { %v5025_v21 = vpop.f32.mrb[74].mxu1 }
 0x548   : > { %v5647_v50 = vpack.c.bf16 %v5023_v39, %v5023_v39  ;;  %v5026_v31 = vadd.f32 %v12261_v58, %v5025_v21  ;;  %v5281_v28 = vpop.permute.xlu0 %5280  ;;  %v5883_v24 = vpop.f32.mrb[75].mxu1 }
 0x549   : > { %5390 = vst.msk [vmem:[%s12368_s20 + $0x38] sm:$0xf] %vm5375_vm2, %v5281_v28 }
 0x54a   : > { %5246 = vst.msk [vmem:[%s12269_s26 + $0x90] sm:$0xf] %vm5209_vm1, %v5647_v50  ;;  %v5648_v25 = vpack.c.bf16 %v5026_v31, %v5026_v31  ;;  %5324 = vrot.lane.b32.xlu0 %v5647_v50, %s7562_s18  ;;  %v5283_v63 = vpop.permute.xlu1 %5282 }
 0x54b   : > { %5391 = vst.msk [vmem:[%s12368_s20 + $0x3c] sm:$0xf] %vm5375_vm2, %v5283_v63 }
 0x54c   : > { %5247 = vst.msk [vmem:[%s12269_s26 + $0x94] sm:$0xf] %vm5209_vm1, %v5648_v25  ;;  %5326 = vrot.lane.b32.xlu1 %v5648_v25, %s7562_s18 }
 0x54f   : > { %v5030_v56 = vpop.f32.mrb[76].mxu1 }
 0x550   : > { %v5031_v40 = vadd.f32 %v12261_v58, %v5030_v56  ;;  %v5886_v47 = vpop.f32.mrb[77].mxu1 }
 0x551   : > { %v5285_v17 = vpop.permute.xlu0 %5284  ;;  %v5033_v51 = vpop.f32.mrb[78].mxu1 }
 0x552   : > { %v5649_v35 = vpack.c.bf16 %v5031_v40, %v5031_v40  ;;  %5392 = vst.msk [vmem:[%s12368_s20 + $0x40] sm:$0xf] %vm5375_vm2, %v5285_v17  ;;  %v5034_v19 = vadd.f32 %v12261_v58, %v5033_v51  ;;  %v5887_v37 = vpop.f32.mrb[79].mxu1 }
 0x553   : > { %v5287_v43 = vpop.permute.xlu1 %5286 }
 0x554   : > { %5248 = vst.msk [vmem:[%s12269_s26 + $0x98] sm:$0xf] %vm5209_vm1, %v5649_v35  ;;  %v5650_v1 = vpack.c.bf16 %v5034_v19, %v5034_v19  ;;  %5328 = vrot.lane.b32.xlu0 %v5649_v35, %s7562_s18 }
 0x555   : > { %5393 = vst.msk [vmem:[%s12368_s20 + $0x44] sm:$0xf] %vm5375_vm2, %v5287_v43 }
 0x556   : > { %5249 = vst.msk [vmem:[%s12269_s26 + $0x9c] sm:$0xf] %vm5209_vm1, %v5650_v1  ;;  %5330 = vrot.lane.b32.xlu1 %v5650_v1, %s7562_s18 }
 0x557   : > { %v5038_v49 = vpop.f32.mrb[80].mxu1 }
 0x558   : > { %v5039_v32 = vadd.f32 %v12261_v58, %v5038_v49  ;;  %v5890_v0 = vpop.f32.mrb[81].mxu1 }
 0x559   : > { %v5041_v44 = vpop.f32.mrb[82].mxu1 }
 0x55a   : > { %v5651_v12 = vpack.c.bf16 %v5039_v32, %v5039_v32  ;;  %v5891_v34 = vpop.f32.mrb[83].mxu1 }
 0x55c   : > { %5251 = vst.msk [vmem:[%s12269_s26 + $0xa0] sm:$0x3] %vm5250_vm3, %v5651_v12  ;;  %v5289_v16 = vpop.permute.xlu0 %5288  ;;  %5332 = vrot.lane.b32.xlu0 %v5651_v12, %s7562_s18 }
 0x55d   : > { %5394 = vst.msk [vmem:[%s12368_s20 + $0x48] sm:$0xf] %vm5375_vm2, %v5289_v16 }
 0x55e   : > { %v5291_v22 = vpop.permute.xlu1 %5290 }
 0x55f   : > { %5395 = vst.msk [vmem:[%s12368_s20 + $0x4c] sm:$0xf] %vm5375_vm2, %v5291_v22 }
 0x565   : > { %v5293_v58 = vpop.permute.xlu0 %5292 }
 0x566   : > { %5396 = vst.msk [vmem:[%s12368_s20 + $0x50] sm:$0xf] %vm5375_vm2, %v5293_v58 }
 0x567   : > { %v5295_v46 = vpop.permute.xlu1 %5294 }
 0x568   : > { %5397 = vst.msk [vmem:[%s12368_s20 + $0x54] sm:$0xf] %vm5375_vm2, %v5295_v46 }
 0x570   : > { %v5297_v4 = vpop.permute.xlu0 %5296 }
 0x571   : > { %5398 = vst.msk [vmem:[%s12368_s20 + $0x58] sm:$0xf] %vm5375_vm2, %v5297_v4 }
 0x572   : > { %v5299_v11 = vpop.permute.xlu1 %5298 }
 0x573   : > { %5399 = vst.msk [vmem:[%s12368_s20 + $0x5c] sm:$0xf] %vm5375_vm2, %v5299_v11 }
 0x579   : > { %v5301_v30 = vpop.permute.xlu0 %5300 }
 0x57a   : > { %5400 = vst.msk [vmem:[%s12368_s20 + $0x60] sm:$0xf] %vm5375_vm2, %v5301_v30 }
 0x57b   : > { %v5303_v3 = vpop.permute.xlu1 %5302 }
 0x57c   : > { %5401 = vst.msk [vmem:[%s12368_s20 + $0x64] sm:$0xf] %vm5375_vm2, %v5303_v3 }
 0x584   : > { %v5305_v26 = vpop.permute.xlu0 %5304 }
 0x585   : > { %5402 = vst.msk [vmem:[%s12368_s20 + $0x68] sm:$0xf] %vm5375_vm2, %v5305_v26 }
 0x586   : > { %v5307_v23 = vpop.permute.xlu1 %5306 }
 0x587   : > { %5403 = vst.msk [vmem:[%s12368_s20 + $0x6c] sm:$0xf] %vm5375_vm2, %v5307_v23 }
 0x58d   : > { %v5309_v60 = vpop.permute.xlu0 %5308 }
 0x58e   : > { %5404 = vst.msk [vmem:[%s12368_s20 + $0x70] sm:$0xf] %vm5375_vm2, %v5309_v60 }
 0x58f   : > { %v5311_v18 = vpop.permute.xlu1 %5310 }
 0x590   : > { %5405 = vst.msk [vmem:[%s12368_s20 + $0x74] sm:$0xf] %vm5375_vm2, %v5311_v18 }
 0x598   : > { %v5313_v9 = vpop.permute.xlu0 %5312 }
 0x599   : > { %5406 = vst.msk [vmem:[%s12368_s20 + $0x78] sm:$0xf] %vm5375_vm2, %v5313_v9 }
 0x59a   : > { %v5315_v62 = vpop.permute.xlu1 %5314 }
 0x59b   : > { %5407 = vst.msk [vmem:[%s12368_s20 + $0x7c] sm:$0xf] %vm5375_vm2, %v5315_v62 }
 0x5a4   : > { %v5317_v13 = vpop.permute.xlu0 %5316 }
 0x5a5   : > { %5408 = vst.msk [vmem:[%s12368_s20 + $0x80] sm:$0xf] %vm5375_vm2, %v5317_v13 }
 0x5a6   : > { %v5319_v20 = vpop.permute.xlu1 %5318 }
 0x5a7   : > { %5409 = vst.msk [vmem:[%s12368_s20 + $0x84] sm:$0xf] %vm5375_vm2, %v5319_v20 }
 0x5b0   : > { %v5321_v14 = vpop.permute.xlu0 %5320 }
 0x5b1   : > { %5410 = vst.msk [vmem:[%s12368_s20 + $0x88] sm:$0xf] %vm5375_vm2, %v5321_v14 }
 0x5b2   : > { %v5323_v27 = vpop.permute.xlu1 %5322 }
 0x5b3   : > { %5411 = vst.msk [vmem:[%s12368_s20 + $0x8c] sm:$0xf] %vm5375_vm2, %v5323_v27 }
 0x5bc   : > { %v5325_v15 = vpop.permute.xlu0 %5324 }
 0x5bd   : > { %5412 = vst.msk [vmem:[%s12368_s20 + $0x90] sm:$0xf] %vm5375_vm2, %v5325_v15 }
 0x5be   : > { %v5327_v5 = vpop.permute.xlu1 %5326 }
 0x5bf   : > { %5413 = vst.msk [vmem:[%s12368_s20 + $0x94] sm:$0xf] %vm5375_vm2, %v5327_v5 }
 0x5c6   : > { %v5329_v10 = vpop.permute.xlu0 %5328 }
 0x5c7   : > { %5414 = vst.msk [vmem:[%s12368_s20 + $0x98] sm:$0xf] %vm5375_vm2, %v5329_v10 }
 0x5c8   : > { %v5331_v33 = vpop.permute.xlu1 %5330 }
 0x5c9   : > { %5415 = vst.msk [vmem:[%s12368_s20 + $0x9c] sm:$0xf] %vm5375_vm2, %v5331_v33 }
 0x5ce   : > { %v5333_v53 = vpop.permute.xlu0 %5332 }
 0x5cf   : > { %5417 = vst.msk [vmem:[%s12368_s20 + $0xa0] sm:$0x3] %vm5416_vm4, %v5333_v53 }
 0x5d0 PF: > { %s18_s24 = sadd.s32 1, %s7549_s24  }
 0x5d1   : > { %p15_p4 = scmp.ge.s32.totalorder %s18_s24, 4  }
 0x5d3   :  { %17 = sbr.rel (!%p15_p4) target bundleno = 1 (0x1), region = 86 }

// kernel: elte_forward.3
= control target key start
LH: loop header
LB: loop body
LE: loop exit
PB: predicated region body
PF: predicated region fallthrough
CT: control target
= control target key end

     0   :  { %s2111_s30 = smov 0   ;;  %s2113_s10 = smov 0   ;;  %s2678_s0 = inlined_call_operand.vmem [shape: bf16[2,32,256], index: 0, kind: input, shape index: {}]   ;;  %s2679_s1 = inlined_call_operand.vmem [shape: bf16[2,16,256], index: 1, kind: input, shape index: {}]   ;;  %s2680_s2 = inlined_call_operand.vmem [shape: f32[2,4,256], index: 2, kind: input, shape index: {}]   ;;  %s2681_s3 = inlined_call_operand.vmem [shape: f32[2,3,64], index: 3, kind: input, shape index: {}]   ;;  %s2682_s4 = inlined_call_operand.vmem [shape: f32[16,4], index: 4, kind: input, shape index: {}]   ;;  %s2683_s5 = inlined_call_operand.vmem [shape: bf16[32,32], index: 5, kind: input, shape index: {}]   ;;  %s2684_s6 = inlined_call_operand.vmem [shape: f32[32,1], index: 6, kind: input, shape index: {}]   ;;  %s2685_s7 = inlined_call_operand.vmem [shape: bf16[3,32], index: 7, kind: input, shape index: {}]   ;;  %s2686_s8 = inlined_call_operand.vmem [shape: f32[3,1], index: 8, kind: input, shape index: {}]   ;;  %s2687_s9 = inlined_call_operand.vmem [shape: f32[2,3,64], index: 9, kind: output, shape index: {}]  }
   0x1   :  { %s2115_s11 = smov 0  }
   0x2 LB: > { %s31_s12 = sadd.s32 1, %s2042_s10  ;;  %p1880_p0 = scmp.ge.s32.totalorder %s2046_s11, 1  ;;  %s2046_s11 = sphi %s2115_s11, %s19_s11   ;;  %s2042_s10 = sphi %s2113_s10, %s2695_s10   ;;  %s2038_s30 = sphi %s2111_s30, %s2694_s30  }
   0x3   : > { %p33_p1 = scmp.ge.s32.totalorder %s31_s12, 2  ;;  %p356_p2 = scmp.lt.s32.totalorder %s2046_s11, 3 }
   0x5   : > { %s2697_s12 = smov (%p33_p1, %s31_s12), 0  ;;  %p357_p3 = pnand %p1880_p0, %p356_p2 }
   0x6   : > { %v479_v0 = vld [vmem:[%s2682_s4] sm:$0xff] (!%p357_p3)  ;;  %v2048_v1 = vmov (!%p357_p3), 1   ;;  %v2049_v2 = vmov (!%p357_p3), 0   ;;  %p424_p4 = scmp.lt.s32.totalorder (!%p357_p3), %s2038_s30, 1  ;;  %v480_v3 = vld [vmem:[%s2682_s4 + $0x8] sm:$0xff] (!%p357_p3)  ;;  %v2050_v6 = vmov (!%p357_p3), 2   ;;  %v492_v12 = vlaneseq (!%p357_p3) }
   0x7   : > { %360 = sbr.rel (%p357_p3) target bundleno = 878 (0x36e), region = 56  ;;  %1997 = vset.pattern.permute.xlu1 (!%p357_p3), %v2048_v1  ;;  %1996 = vset.pattern.permute.xlu0 (!%p357_p3), %v2049_v2  ;;  %v2051_v9 = vmov (!%p357_p3), 3   ;;  %s2052_s21 = smov (!%p357_p3), 64   ;;  %v1477_v11 = vld [vmem:[%s2684_s6 + $0x8] sm:$0xff] (!%p357_p3) }
   0x8   : > { %515 = vperm.xlu1 (!%p357_p3), %1997, %v479_v0   ;;  %483 = vperm.xlu0 (!%p357_p3), %1996, %v479_v0   ;;  %v493_v13 = vshrl.u32 (!%p357_p3), %v492_v12, 7 }
   0x9   : > { %1549 = vmatprep.mubr.bf16.mxu0 (!%p357_p3), %v2049_v2 }
   0xa   : > { %v524_v14 = vsub.s32 (!%p357_p3), 1, %v493_v13  ;;  %v2156_v15 = vsub.s32 (!%p357_p3), 0, %v493_v13  ;;  %v528_v18 = vsub.s32 (!%p357_p3), 5, %v493_v13  ;;  %v498_v19 = vsub.s32 (!%p357_p3), 4, %v493_v13 }
   0xb   : > { %v558_v22 = vsub.s32 (!%p357_p3), 2, %v493_v13  ;;  %v562_v29 = vsub.s32 (!%p357_p3), 6, %v493_v13  ;;  %v588_v33 = vsub.s32 (!%p357_p3), 3, %v493_v13  ;;  %v592_v34 = vsub.s32 (!%p357_p3), 7, %v493_v13 }
   0xc   : > { %519 = vperm.xlu1 (!%p357_p3), %1997, %v480_v3   ;;  %488 = vperm.xlu0 (!%p357_p3), %1996, %v480_v3  }
   0xe   : > { %s2699_s30 = smov (!%p424_p4, %s2038_s30), 1 }
   0xf   : > { %s1931_s17 = sshll.u32 %s2699_s30, 3  ;;  %s1930_s24 = sshll.u32 %s2699_s30, 4 }
  0x10   : > { %s451_s20 = scalar_lea.vmem %s2680_s2, %s1931_s17  ;;  %1999 = vset.pattern.permute.xlu1 %v2050_v6  ;;  %1998 = vset.pattern.permute.xlu0 %v2050_v6  ;;  %s441_s27 = scalar_lea.vmem %s2679_s1, %s1930_s24 }
  0x11   : > { %v2143_v4 = vld [vmem:[%s451_s20] sm:$0xff]  ;;  %553 = vperm.xlu1 %1999, %v480_v3   ;;  %549 = vperm.xlu0 %1998, %v479_v0   ;;  %v473_v50 = vld [vmem:[%s441_s27 + $0x8] sm:$0xff]  ;;  %s1929_s17 = sshll.u32 %s2699_s30, 5  ;;  %s1887_s29 = sshll.u32 %s2699_s30, 2 }
  0x12   : > { %v1925_v5 = vrot.slane %v2143_v4, 9  ;;  %v525_v16 = vrot.slane %v2143_v4, %v524_v14  ;;  %v495_v17 = vrot.slane %v2143_v4, %v2156_v15  ;;  %v529_v23 = vrot.slane %v2143_v4, %v528_v18  ;;  %v472_v45 = vld [vmem:[%s441_s27] sm:$0xff]  ;;  %s2521_s20 = scalar_lea.vmem %s2678_s0, %s1929_s17  ;;  %s459_s15 = scalar_lea.vmem %s2681_s3, %s1887_s29 }
  0x13   : > { %v499_v26 = vrot.slane %v2143_v4, %v498_v19  ;;  %v559_v30 = vrot.slane %v2143_v4, %v558_v22  ;;  %v563_v40 = vrot.slane %v2143_v4, %v562_v29  ;;  %v589_v43 = vrot.slane %v2143_v4, %v588_v33  ;;  %s466_s18 = scalar_lea.vmem %s2687_s9, %s1887_s29 }
  0x14   : > { %v1581_v7 = vmul.f32 %v1925_v5, %v2143_v4  ;;  %v535_v20 = vrot.slane %v525_v16, %v524_v14  ;;  %v505_v21 = vrot.slane %v495_v17, %v2156_v15  ;;  %v539_v31 = vrot.slane %v529_v23, %v524_v14 }
  0x15   : > { %2000 = vset.pattern.permute.xlu1 %v2051_v9  ;;  %2001 = vset.pattern.permute.xlu0 %v2051_v9  ;;  %v509_v35 = vrot.slane %v499_v26, %v2156_v15  ;;  %v569_v41 = vrot.slane %v559_v30, %v558_v22  ;;  %v593_v44 = vrot.slane %v2143_v4, %v592_v34  ;;  %v474_v55 = vunpack.c.l.bf16 %v472_v45 }
  0x16   : > { %v1582_v8 = vand.u32 2147483647, %v1581_v7  ;;  %579 = vperm.xlu1 %2000, %v479_v0   ;;  %583 = vperm.xlu0 %2001, %v480_v3   ;;  %v573_v53 = vrot.slane %v563_v40, %v558_v22  ;;  %v475_v56 = vunpack.c.h.bf16 %v472_v45  ;;  %v599_v57 = vrot.slane %v589_v43, %v588_v33 }
  0x17   : > { %v603_v58 = vrot.slane %v593_v44, %v588_v33  ;;  %v476_v60 = vunpack.c.l.bf16 %v473_v50  ;;  %v477_v61 = vunpack.c.h.bf16 %v473_v50 }
  0x18   : > { %v2147_v10 = vadd.f32 1e-09, %v1582_v8 }
  0x1a   : > { %1585 = vrot.lane.b32.xlu1 %v2147_v10, %s2052_s21  ;;  %2003 = vset.pattern.permute.xlu0 %v2049_v2 }
  0x1b   : > { %2002 = vset.pattern.permute.xlu1 %v2049_v2  ;;  %1487 = vperm.xlu0 %2003, %v1477_v11  }
  0x87   : > { %v516_v24 = vpop.permute.xlu1 %515  ;;  %v484_v25 = vpop.permute.xlu0 %483 }
  0x88   : > { %v540_v27 = vmul.f32 %v535_v20, %v516_v24  ;;  %v510_v28 = vmul.f32 %v505_v21, %v484_v25  ;;  %v541_v42 = vmul.f32 %v539_v31, %v516_v24  ;;  %v511_v46 = vmul.f32 %v509_v35, %v484_v25 }
  0x8a   : > { %v544_v32 = vadd.f32 %v540_v27, %v510_v28  ;;  %v545_v59 = vadd.f32 %v541_v42, %v511_v46 }
  0x8b   : > { %v520_v36 = vpop.permute.xlu1 %519  ;;  %v489_v37 = vpop.permute.xlu0 %488 }
  0x8c   : > { %v542_v38 = vmul.f32 %v535_v20, %v520_v36  ;;  %v512_v39 = vmul.f32 %v505_v21, %v489_v37  ;;  %v543_v47 = vmul.f32 %v539_v31, %v520_v36  ;;  %v513_v48 = vmul.f32 %v509_v35, %v489_v37 }
  0x8d   : > { %v612_v9 = vmul.f32 %v544_v32, %v474_v55  ;;  %v613_v11 = vmul.f32 %v545_v59, %v475_v56  ;;  %v1589_v20 = vrot.slane %v2147_v10, 4  ;;  %v2053_v59 = vmov 683565275  }
  0x8e   : > { %v546_v49 = vadd.f32 %v542_v38, %v512_v39  ;;  %v547_v62 = vadd.f32 %v543_v47, %v513_v48 }
  0x90   : > { %v554_v51 = vpop.permute.xlu1 %553  ;;  %v550_v52 = vpop.permute.xlu0 %549  ;;  %v614_v12 = vmul.f32 %v546_v49, %v476_v60  ;;  %v615_v13 = vmul.f32 %v547_v62, %v477_v61 }
  0x91   : > { %v576_v54 = vmul.f32 %v569_v41, %v554_v51  ;;  %v577_v63 = vmul.f32 %v573_v53, %v554_v51  ;;  %v574_v0 = vmul.f32 %v569_v41, %v550_v52  ;;  %v575_v1 = vmul.f32 %v573_v53, %v550_v52 }
  0x95   : > { %v580_v3 = vpop.permute.xlu1 %579  ;;  %v584_v4 = vpop.permute.xlu0 %583 }
  0x96   : > { %v604_v5 = vmul.f32 %v599_v57, %v580_v3  ;;  %v605_v6 = vmul.f32 %v603_v58, %v580_v3  ;;  %v606_v7 = vmul.f32 %v599_v57, %v584_v4  ;;  %v607_v8 = vmul.f32 %v603_v58, %v584_v4 }
  0x97   : > { %v2055_v4 = vmov 2131351028  }
  0x98   : > { %v608_v14 = vadd.f32 %v604_v5, %v574_v0  ;;  %v609_v16 = vadd.f32 %v605_v6, %v575_v1  ;;  %v610_v17 = vadd.f32 %v606_v7, %v576_v54  ;;  %v611_v18 = vadd.f32 %v607_v8, %v577_v63 }
  0x99   : > { %v2173_v19 = vpop.permute.xlu1 %1585  ;;  %v2054_v0 = vmov 2475754826   ;;  %v2056_v7 = vmov 2102212464  }
  0x9a   : > { %v616_v21 = vadd.f32 %v612_v9, %v608_v14  ;;  %v617_v22 = vadd.f32 %v613_v11, %v609_v16  ;;  %v618_v23 = vadd.f32 %v614_v12, %v610_v17  ;;  %v619_v24 = vadd.f32 %v615_v13, %v611_v18 }
  0x9b   : > { %v1588_v25 = vadd.f32 %v2173_v19, %v2147_v10  ;;  %v1592_v26 = vrot.slane %v2173_v19, 4  ;;  %v2057_v11 = vmov 920167782   ;;  %v2058_v17 = vmov 1326507024  }
  0x9c   : > { %v2179_v27 = vmul.f32 3.1415927, %v616_v21  ;;  %v2181_v28 = vmul.f32 3.1415927, %v617_v22  ;;  %v2183_v29 = vmul.f32 3.1415927, %v619_v24 }
  0x9d   : > { %v1591_v30 = vadd.f32 %v1589_v20, %v1588_v25  ;;  %v2193_v40 = vmul.f32 3.1415927, %v618_v23 }
  0x9e   : > { %v627_v31 = vand.u32 2139095040, %v2179_v27  ;;  %v730_v32 = vand.u32 2139095040, %v2181_v28  ;;  %v936_v33 = vand.u32 2139095040, %v2183_v29  ;;  %v727_v35 = vand.u32 2147483647, %v2181_v28 }
  0x9f   : > { %v1594_v34 = vadd.f32 %v1592_v26, %v1591_v30  ;;  %v933_v43 = vand.u32 2147483647, %v2183_v29  ;;  %v833_v47 = vand.u32 2139095040, %v2193_v40  ;;  %vm729_vm14 = vcmp.lt.s32.totalorder %v2181_v28, 0 }
  0xa0   : > { %v731_v36 = vshrl.u32 %v730_v32, 23  ;;  %v937_v37 = vshrl.u32 %v936_v33, 23  ;;  %v628_v38 = vshrl.u32 %v627_v31, 23  ;;  %v734_v42 = vand.u32 8388607, %v727_v35 }
  0xa1   : > { %2006 = vrcp.f32 %v1594_v34  ;;  %v2201_v50 = vand.u32 8388607, %v933_v43  ;;  %v2205_v55 = vshrl.u32 %v833_v47, 23 }
  0xa2   : > { %v1893_v39 = vadd.s32 4294967169, %v731_v36  ;;  %v1901_v41 = vadd.s32 4294967169, %v937_v37  ;;  %v1889_v46 = vadd.s32 4294967169, %v628_v38  ;;  %v735_v49 = vor.u32 8388608, %v734_v42 }
  0xa3   : > { %v941_v62 = vor.u32 8388608, %v2201_v50 }
  0xa4   : > { %v737_v44 = vadd.s32 1, %v1893_v39  ;;  %v943_v45 = vadd.s32 1, %v1901_v41  ;;  %v2203_v53 = vadd.s32 1, %v1889_v46  ;;  %v2210_v61 = vshll.u32 %v735_v49, 8 }
  0xa6   : > { %vm738_vm0 = vcmp.gt.s32.totalorder %v737_v44, 0  ;;  %vm944_vm1 = vcmp.gt.s32.totalorder %v943_v45, 0  ;;  %vm635_vm6 = vcmp.gt.s32.totalorder %v2203_v53, 0 }
  0xa7   : > { %v739_v48 = vsel %vm738_vm0, %v737_v44, 0  ;;  %v945_v52 = vsel %vm944_vm1, %v943_v45, 0 }
  0xa8   : > { %v741_v51 = vand.u32 31, %v739_v48  ;;  %v947_v56 = vand.u32 31, %v945_v52  ;;  %v740_v58 = vshrl.u32 %v739_v48, 5  ;;  %v2228_v38 = vshrl.u32 %v945_v52, 5 }
  0xaa   : > { %v742_v54 = vsub.s32 32, %v741_v51  ;;  %v744_v60 = vshll.u32 %v2053_v59, %v741_v51  ;;  %v2213_v63 = vsub.s32 32, %v947_v56  ;;  %v747_v3 = vshll.u32 %v2054_v0, %v741_v51 }
  0xab   : > { %v2207_v57 = vpop.eup %2006  ;;  %v750_v5 = vshll.u32 %v2055_v4, %v741_v51  ;;  %v753_v9 = vshll.u32 %v2056_v7, %v741_v51  ;;  %v756_v16 = vshll.u32 %v2057_v11, %v741_v51  ;;  %vm759_vm2 = vcmp.lt.s32.totalorder %v740_v58, 1 }
  0xac   : > { %1639 = vrot.lane.b32.xlu0 %v2207_v57, %s2052_s21  ;;  %v745_v1 = vshrl.u32 %v2054_v0, %v742_v54  ;;  %v748_v6 = vshrl.u32 %v2055_v4, %v742_v54  ;;  %v751_v8 = vshrl.u32 %v2056_v7, %v742_v54  ;;  %v754_v12 = vshrl.u32 %v2057_v11, %v742_v54 }
  0xad   : > { %v743_v13 = vshrl.u32 %v2053_v59, %v742_v54  ;;  %v757_v18 = vshrl.u32 %v2058_v17, %v742_v54  ;;  %vm760_vm3 = vcmp.lt.s32.totalorder %v740_v58, 2  ;;  %vm761_vm4 = vcmp.lt.s32.totalorder %v740_v58, 3 }
  0xae   : > { %v746_v14 = vor.u32 %v745_v1, %v744_v60  ;;  %v749_v21 = vor.u32 %v748_v6, %v747_v3  ;;  %v752_v22 = vor.u32 %v751_v8, %v750_v5  ;;  %v755_v23 = vor.u32 %v754_v12, %v753_v9 }
  0xaf   : > { %v758_v24 = vor.u32 %v757_v18, %v756_v16  ;;  %vm762_vm5 = vcmp.lt.s32.totalorder %v740_v58, 4  ;;  %v950_v49 = vshll.u32 %v2053_v59, %v947_v56  ;;  %v951_v51 = vshrl.u32 %v2054_v0, %v2213_v63 }
  0xb0   : > { %v763_v25 = vsel %vm759_vm2, %v743_v13, %v746_v14  ;;  %v764_v30 = vsel %vm762_vm5, %v752_v22, 2102212464  ;;  %v767_v31 = vsel %vm759_vm2, %v746_v14, %v749_v21  ;;  %v768_v32 = vsel %vm762_vm5, %v755_v23, 920167782 }
  0xb1   : > { %v765_v33 = vsel %vm761_vm4, %v749_v21, %v764_v30  ;;  %v769_v34 = vsel %vm761_vm4, %v752_v22, %v768_v32  ;;  %v771_v36 = vsel %vm759_vm2, %v749_v21, %v752_v22  ;;  %v772_v37 = vsel %vm762_vm5, %v758_v24, 1326507024 }
  0xb2   : > { %v770_v39 = vsel %vm760_vm3, %v767_v31, %v769_v34  ;;  %v773_v41 = vsel %vm761_vm4, %v755_v23, %v772_v37  ;;  %v766_v42 = vsel %vm760_vm3, %v763_v25, %v765_v33  ;;  %v953_v52 = vshll.u32 %v2054_v0, %v947_v56 }
  0xb3   : > { %v774_v44 = vsel %vm760_vm3, %v771_v36, %v773_v41  ;;  %v2234_v45 = vmul.u32.u64.low %v2210_v61, %v770_v39  ;;  %v2235_v46 = vmul.u32.u64.high %v2210_v61, %v770_v39, %v2234_v45  ;;  %v954_v54 = vshrl.u32 %v2055_v4, %v2213_v63 }
  0xb4   : > { %v2239_v47 = vmul.u32.u64.low %v2210_v61, %v774_v44  ;;  %v2240_v48 = vmul.u32.u64.high %v2210_v61, %v774_v44, %v2239_v47  ;;  %v956_v58 = vshll.u32 %v2055_v4, %v947_v56  ;;  %v957_v60 = vshrl.u32 %v2056_v7, %v2213_v63 }
  0xb5   : > { %v952_v1 = vor.u32 %v951_v51, %v950_v49  ;;  %v959_v3 = vshll.u32 %v2056_v7, %v947_v56  ;;  %v960_v5 = vshrl.u32 %v2057_v11, %v2213_v63  ;;  %v962_v6 = vshll.u32 %v2057_v11, %v947_v56 }
  0xb6   : > { %v785_v8 = vadd.s32 1, %v2235_v46  ;;  %v955_v9 = vor.u32 %v954_v54, %v953_v52  ;;  %v958_v12 = vor.u32 %v957_v60, %v956_v58  ;;  %v963_v13 = vshrl.u32 %v2058_v17, %v2213_v63  ;;  %v1478_v54 = vld [vmem:[%s2684_s6 + $0x10] sm:$0xff] }
  0xb7   : > { %v636_v14 = vsel %vm635_vm6, %v2203_v53, 0  ;;  %v782_v16 = vmul.u32 %v2210_v61, %v766_v42  ;;  %vm784_vm7 = vc.u32 %v2240_v48, %v2234_v45  ;;  %v961_v18 = vor.u32 %v960_v5, %v959_v3 }
  0xb8   : > { %v786_v21 = vsel %vm784_vm7, %v785_v8, %v2235_v46  ;;  %v964_v56 = vor.u32 %v963_v13, %v962_v6  ;;  %vm965_vm8 = vcmp.lt.s32.totalorder %v2228_v38, 1  ;;  %v981_v22 = vshll.u32 %v941_v62, 8 }
  0xb9   : > { %v787_v23 = vadd.s32 %v786_v21, %v782_v16  ;;  %vm966_vm9 = vcmp.lt.s32.totalorder %v2228_v38, 2  ;;  %vm968_vm10 = vcmp.lt.s32.totalorder %v2228_v38, 4  ;;  %v973_v53 = vsel %vm965_vm8, %v952_v1, %v955_v9 }
  0xba   : > { %vm967_vm11 = vcmp.lt.s32.totalorder %v2228_v38, 3  ;;  %v974_v61 = vsel %vm968_vm10, %v961_v18, 920167782  ;;  %v977_v24 = vsel %vm965_vm8, %v955_v9, %v958_v12  ;;  %v978_v25 = vsel %vm968_vm10, %v964_v56, 1326507024 }
  0xbb   : > { %v788_v30 = vadd.s32 536870912, %v787_v23  ;;  %v970_v31 = vsel %vm968_vm10, %v958_v12, 2102212464  ;;  %v975_v50 = vsel %vm967_vm11, %v958_v12, %v974_v61  ;;  %v979_v62 = vsel %vm967_vm11, %v961_v18, %v978_v25 }
  0xbc   : > { %v1897_v32 = vadd.s32 4294967169, %v2205_v55  ;;  %v949_v33 = vshrl.u32 %v2053_v59, %v2213_v63  ;;  %v976_v34 = vsel %vm966_vm9, %v973_v53, %v975_v50  ;;  %v980_v36 = vsel %vm966_vm9, %v977_v24, %v979_v62  ;;  %v1476_v63 = vld [vmem:[%s2684_s6] sm:$0xff] }
  0xbd   : > { %v638_v37 = vand.u32 31, %v636_v14  ;;  %v789_v39 = vshrl.u32 %v788_v30, 30  ;;  %v2286_v41 = vmul.u32.u64.low %v981_v22, %v980_v36  ;;  %v2287_v42 = vmul.u32.u64.high %v981_v22, %v980_v36, %v2286_v41  ;;  %1482 = vperm.xlu1 %2002, %v1476_v63  }
  0xbe   : > { %v969_v44 = vsel %vm965_vm8, %v949_v33, %v952_v1  ;;  %v971_v55 = vsel %vm967_vm11, %v955_v9, %v970_v31  ;;  %v2293_v46 = vmul.u32.u64.low %v981_v22, %v976_v34  ;;  %v2294_v47 = vmul.u32.u64.high %v981_v22, %v976_v34, %v2293_v46  ;;  %v1479_v9 = vld [vmem:[%s2684_s6 + $0x18] sm:$0xff] }
  0xbf   : > { %v790_v49 = vshll.u32 %v789_v39, 30  ;;  %v840_v51 = vadd.s32 1, %v1897_v32  ;;  %v624_v52 = vand.u32 2147483647, %v2179_v27  ;;  %v2304_v58 = vsub.s32 32, %v638_v37 }
  0xc0   : > { %v972_v1 = vsel %vm966_vm9, %v969_v44, %v971_v55  ;;  %vm990_vm12 = vc.u32 %v2287_v42, %v2293_v46  ;;  %v991_v3 = vadd.s32 1, %v2294_v47  ;;  %v2316_v12 = vshrl.u32 %v636_v14, 5 }
  0xc1   : > { %v791_v60 = vsub.s32 %v787_v23, %v790_v49  ;;  %1492 = vperm.xlu1 %2002, %v1478_v54   ;;  %vm841_vm13 = vcmp.gt.s32.totalorder %v840_v51, 0  ;;  %v988_v6 = vmul.u32 %v981_v22, %v972_v1  ;;  %v631_v13 = vand.u32 8388607, %v624_v52 }
  0xc2   : > { %v992_v8 = vsel %vm990_vm12, %v991_v3, %v2294_v47  ;;  %v651_v16 = vshrl.u32 %v2057_v11, %v2304_v58  ;;  %v813_v18 = vsub.s32 4, %v789_v39  ;;  %v645_v56 = vshrl.u32 %v2055_v4, %v2304_v58 }
  0xc3   : > { %v793_v5 = vsub.s32 0, %v791_v60  ;;  %v993_v21 = vadd.s32 %v992_v8, %v988_v6  ;;  %v648_v22 = vshrl.u32 %v2056_v7, %v2304_v58  ;;  %v642_v14 = vshrl.u32 %v2054_v0, %v2304_v58 }
  0xc4   : > { %v650_v53 = vshll.u32 %v2056_v7, %v638_v37  ;;  %v654_v61 = vshrl.u32 %v2058_v17, %v2304_v58  ;;  %v644_v25 = vshll.u32 %v2054_v0, %v638_v37  ;;  %v647_v30 = vshll.u32 %v2055_v4, %v638_v37 }
  0xc5   : > { %v1894_v38 = vmin.u32 %v793_v5, %v791_v60  ;;  %1497 = vperm.xlu1 %2002, %v1479_v9   ;;  %v994_v24 = vadd.s32 536870912, %v993_v21  ;;  %v653_v31 = vshll.u32 %v2057_v11, %v638_v37  ;;  %v842_v50 = vsel %vm841_vm13, %v840_v51, 0 }
  0xc6   : > { %v641_v32 = vshll.u32 %v2053_v59, %v638_v37  ;;  %v652_v33 = vor.u32 %v651_v16, %v650_v53  ;;  %v646_v36 = vor.u32 %v645_v56, %v644_v25  ;;  %v649_v41 = vor.u32 %v648_v22, %v647_v30 }
  0xc7   : > { %v795_v23 = vclz %v1894_v38  ;;  %v2336_v34 = vshrl.u32 %v994_v24, 30  ;;  %v655_v44 = vor.u32 %v654_v61, %v653_v31  ;;  %v783_v55 = vadd.s32 %v2234_v45, %v2240_v48 }
  0xc8   : > { %v814_v47 = vsel %vm729_vm14, %v813_v18, %v789_v39  ;;  %v632_v63 = vor.u32 8388608, %v631_v13  ;;  %v643_v54 = vor.u32 %v642_v14, %v641_v32  ;;  %vm659_vm0 = vcmp.lt.s32.totalorder %v2316_v12, 4 }
  0xc9   : > { %v1895_v62 = vadd.s32 4294967294, %v795_v23  ;;  %v996_v51 = vshll.u32 %v2336_v34, 30  ;;  %vm656_vm1 = vcmp.lt.s32.totalorder %v2316_v12, 1  ;;  %v665_v3 = vsel %vm659_vm0, %v652_v33, 920167782 }
  0xca   : > { %vm658_vm2 = vcmp.lt.s32.totalorder %v2316_v12, 3  ;;  %v668_v45 = vsel %vm656_vm1, %v646_v36, %v649_v41  ;;  %v669_v48 = vsel %vm659_vm0, %v655_v44, 1326507024  ;;  %vm657_vm3 = vcmp.lt.s32.totalorder %v2316_v12, 2 }
  0xcb   : > { %vm1896_vm15 = vcmp.lt.s32.totalorder %v1895_v62, 0  ;;  %v2347_v5 = vsub.s32 %v993_v21, %v996_v51  ;;  %v670_v9 = vsel %vm658_vm2, %v652_v33, %v669_v48  ;;  %v664_v13 = vsel %vm656_vm1, %v643_v54, %v646_v36 }
  0xcc   : > { %v798_v49 = vsel %vm1896_vm15, 0, %v1895_v62  ;;  %v666_v16 = vsel %vm658_vm2, %v649_v41, %v665_v3  ;;  %vm2364_vm4 = vcmp.le.f32.partialorder %v727_v35, 0.7853982  ;;  %v671_v56 = vsel %vm657_vm3, %v668_v45, %v670_v9 }
  0xcd   : > { %v799_v37 = vsub.s32 32, %v798_v49  ;;  %v803_v1 = vsub.s32 4294967266, %v798_v49  ;;  %v800_v39 = vshll.u32 %v791_v60, %v798_v49  ;;  %v999_v38 = vsub.s32 0, %v2347_v5 }
  0xce   : > { %v2370_v22 = vand.u32 31, %v842_v50  ;;  %v661_v14 = vsel %vm659_vm0, %v649_v41, 2102212464  ;;  %v672_v53 = vshll.u32 %v632_v63, 8  ;;  %v816_v35 = vsel %vm2364_vm4, 0, %v814_v47 }
  0xcf   : > { %v801_v6 = vshrl.u32 %v783_v55, %v799_v37  ;;  %v804_v8 = vadd.s32 127, %v803_v1  ;;  %v1902_v23 = vmin.u32 %v999_v38, %v2347_v5  ;;  %v640_v24 = vshrl.u32 %v2053_v59, %v2304_v58 }
  0xd0   : > { %v667_v25 = vsel %vm657_vm3, %v664_v13, %v666_v16  ;;  %v2381_v31 = vmul.u32.u64.low %v672_v53, %v671_v56  ;;  %v2382_v62 = vmul.u32.u64.high %v672_v53, %v671_v56, %v2381_v31  ;;  %v662_v44 = vsel %vm658_vm2, %v646_v36, %v661_v14 }
  0xd1   : > { %v802_v60 = vor.u32 %v801_v6, %v800_v39  ;;  %v805_v21 = vshll.u32 %v804_v8, 23  ;;  %v1001_v30 = vclz %v1902_v23  ;;  %v660_v41 = vsel %vm656_vm1, %v640_v24, %v643_v54 }
  0xd2   : > { %v1233_v47 = vadd.s32 3, %v816_v35  ;;  %v2388_v63 = vmul.u32.u64.low %v672_v53, %v667_v25  ;;  %v2389_v49 = vmul.u32.u64.high %v672_v53, %v667_v25, %v2388_v63  ;;  %v2392_v58 = vshrl.u32 %v842_v50, 5 }
  0xd3   : > { %v806_v61 = vor.u32 4788187, %v805_v21  ;;  %v809_v33 = vcvt.s32.f32 %v802_v60  ;;  %v1903_v55 = vadd.s32 4294967294, %v1001_v30  ;;  %v2395_v51 = vsub.s32 32, %v2370_v22 }
  0xd4   : > { %v2397_v1 = vand.u32 3, %v816_v35  ;;  %v989_v54 = vadd.s32 %v2293_v46, %v2287_v42  ;;  %v663_v36 = vsel %vm657_vm3, %v660_v41, %v662_v44  ;;  %vm681_vm6 = vc.u32 %v2382_v62, %v2388_v63 }
  0xd5   : > { %v807_v32 = vand.u32 2147483647, %v806_v61  ;;  %vm1904_vm5 = vcmp.lt.s32.totalorder %v1903_v55, 0  ;;  %v830_v50 = vand.u32 2147483647, %v2193_v40  ;;  %v2406_v6 = vand.u32 3, %v1233_v47 }
  0xd6   : > { %v1004_v45 = vsel %vm1904_vm5, 0, %v1903_v55  ;;  %v682_v8 = vadd.s32 1, %v2389_v49  ;;  %v1019_v12 = vsub.s32 4, %v2336_v34  ;;  %v679_v9 = vmul.u32 %v672_v53, %v663_v36 }
  0xd7   : > { %v810_v37 = vmul.f32 %v809_v33, %v807_v32  ;;  %v1005_v48 = vsub.s32 32, %v1004_v45  ;;  %v1009_v39 = vsub.s32 4294967266, %v1004_v45  ;;  %v1006_v46 = vshll.u32 %v2347_v5, %v1004_v45 }
  0xd8   : > { %vm935_vm7 = vcmp.lt.s32.totalorder %v2183_v29, 0  ;;  %v683_v60 = vsel %vm681_vm6, %v682_v8, %v2389_v49  ;;  %v2420_v56 = vand.u32 8388607, %v830_v50  ;;  %v848_v5 = vshrl.u32 %v2054_v0, %v2395_v51 }
  0xd9   : > { %v811_v3 = vxor.u32 2147483648, %v810_v37  ;;  %v1007_v13 = vshrl.u32 %v989_v54, %v1005_v48  ;;  %v1010_v16 = vadd.s32 127, %v1009_v39  ;;  %v684_v21 = vadd.s32 %v683_v60, %v679_v9 }
  0xda   : > { %v851_v18 = vshrl.u32 %v2055_v4, %v2395_v51  ;;  %v854_v61 = vshrl.u32 %v2056_v7, %v2395_v51  ;;  %v856_v35 = vshll.u32 %v2056_v7, %v2370_v22  ;;  %v857_v24 = vshrl.u32 %v2057_v11, %v2395_v51 }
  0xdb   : > { %v812_v42 = vsel %vm729_vm14, %v811_v3, %v810_v37  ;;  %v1008_v23 = vor.u32 %v1007_v13, %v1006_v46  ;;  %v1011_v14 = vshll.u32 %v1010_v16, 23  ;;  %v685_v53 = vadd.s32 536870912, %v684_v21 }
  0xdc   : > { %v815_v38 = vsel %vm2364_vm4, %v2181_v28, %v812_v42  ;;  %vm2434_vm8 = vcmp.le.f32.partialorder %v933_v43, 0.7853982  ;;  %v847_v31 = vshll.u32 %v2053_v59, %v2370_v22  ;;  %v850_v32 = vshll.u32 %v2054_v0, %v2370_v22 }
  0xdd   : > { %2008 = vcosq.f32 %v815_v38  ;;  %v1012_v30 = vor.u32 4788187, %v1011_v14  ;;  %v860_v33 = vshrl.u32 %v2058_v17, %v2395_v51  ;;  %vm825_vm9 = vcmp.eq.s32.totalorder %v2397_v1, 2 }
  0xde   : > { %2010 = vsinq.f32 %v815_v38  ;;  %v2445_v7 = vshrl.u32 %v685_v53, 30  ;;  %v853_v43 = vshll.u32 %v2055_v4, %v2370_v22  ;;  %v858_v41 = vor.u32 %v857_v24, %v856_v35 }
  0xdf   : > { %v859_v44 = vshll.u32 %v2057_v11, %v2370_v22  ;;  %vm822_vm10 = vcmp.eq.s32.totalorder %v2397_v1, 0  ;;  %v1013_v55 = vand.u32 2147483647, %v1012_v30  ;;  %v1015_v47 = vcvt.s32.f32 %v1008_v23 }
  0xe0   : > { %v849_v49 = vor.u32 %v848_v5, %v847_v31  ;;  %v852_v0 = vor.u32 %v851_v18, %v850_v32  ;;  %vm821_vm11 = vcmp.lt.s32.totalorder %v2397_v1, 2  ;;  %vm1235_vm12 = vcmp.lt.s32.totalorder %v2406_v6, 2 }
  0xe1   : > { %v687_v17 = vshll.u32 %v2445_v7, 30  ;;  %v855_v37 = vor.u32 %v854_v61, %v853_v43  ;;  %v861_v54 = vor.u32 %v860_v33, %v859_v44  ;;  %vm865_vm13 = vcmp.lt.s32.totalorder %v2392_v58, 4 }
  0xe2   : > { %vm819_vm14 = vweird.f32 %v2181_v28  ;;  %v1016_v4 = vmul.f32 %v1015_v47, %v1013_v55  ;;  %vm1236_vm15 = vcmp.eq.s32.totalorder %v2406_v6, 0  ;;  %vm1239_vm0 = vcmp.eq.s32.totalorder %v2406_v6, 2 }
  0xe3   : > { %v871_v11 = vsel %vm865_vm13, %v858_v41, 920167782  ;;  %v1020_v22 = vsel %vm935_vm7, %v1019_v12, %v2336_v34  ;;  %v2464_v36 = vsub.s32 %v684_v21, %v687_v17  ;;  %v838_v3 = vor.u32 8388608, %v2420_v56  ;;  %v2536_v17 = vld [vmem:[%s2521_s20] sm:$0xff] }
  0xe4   : > { %v846_v45 = vshrl.u32 %v2053_v59, %v2395_v51  ;;  %v1017_v48 = vxor.u32 2147483648, %v1016_v4  ;;  %vm862_vm1 = vcmp.lt.s32.totalorder %v2392_v58, 1  ;;  %vm863_vm2 = vcmp.lt.s32.totalorder %v2392_v58, 2 }
  0xe5   : > { %vm864_vm3 = vcmp.lt.s32.totalorder %v2392_v58, 3  ;;  %v690_v8 = vsub.s32 0, %v2464_v36  ;;  %v870_v34 = vsel %vm862_vm1, %v849_v49, %v852_v0  ;;  %v875_v59 = vsel %vm865_vm13, %v861_v54, 1326507024 }
  0xe6   : > { %v872_v42 = vsel %vm864_vm3, %v855_v37, %v871_v11  ;;  %v1018_v12 = vsel %vm935_vm7, %v1017_v48, %v1016_v4  ;;  %v867_v9 = vsel %vm865_vm13, %v855_v37, 2102212464  ;;  %v874_v38 = vsel %vm862_vm1, %v852_v0, %v855_v37  ;;  %v2539_v37 = vld [vmem:[%s2521_s20 + $0x8] sm:$0xff] }
  0xe7   : > { %v2009_v39 = vpop.eup %2008  ;;  %v1021_v16 = vsel %vm2434_vm8, %v2183_v29, %v1018_v12  ;;  %v1890_v60 = vmin.u32 %v690_v8, %v2464_v36  ;;  %v876_v21 = vsel %vm864_vm3, %v858_v41, %v875_v59  ;;  %v873_v23 = vsel %vm863_vm2, %v870_v34, %v872_v42 }
  0xe8   : > { %v2011_v51 = vpop.eup %2010  ;;  %v826_v46 = vxor.u32 2147483648, %v2009_v39  ;;  %2012 = vcosq.f32 %v1021_v16  ;;  %v877_v24 = vsel %vm863_vm2, %v874_v38, %v876_v21  ;;  %v878_v30 = vshll.u32 %v838_v3, 8 }
  0xe9   : > { %v823_v13 = vxor.u32 2147483648, %v2011_v51  ;;  %2014 = vsinq.f32 %v1021_v16  ;;  %v692_v53 = vclz %v1890_v60  ;;  %v2512_v32 = vsel %vm2434_vm8, 0, %v1020_v22 }
  0xea   : > { %v827_v56 = vsel %vm825_vm9, %v826_v46, %v2011_v51  ;;  %v1241_v5 = vsel %vm1239_vm0, %v826_v46, %v2011_v51  ;;  %v866_v6 = vsel %vm862_vm1, %v846_v45, %v849_v49  ;;  %v868_v25 = vsel %vm864_vm3, %v852_v0, %v867_v9 }
  0xeb   : > { %v824_v14 = vsel %vm822_vm10, %v2009_v39, %v823_v13  ;;  %v1238_v18 = vsel %vm1236_vm15, %v2009_v39, %v823_v13  ;;  %v1891_v1 = vadd.s32 4294967294, %v692_v53  ;;  %v1026_v55 = vand.u32 3, %v2512_v32 }
  0xec   : > { %v828_v61 = vsel %vm821_vm11, %v824_v14, %v827_v56  ;;  %v1242_v35 = vsel %vm1235_vm12, %v1238_v18, %v1241_v5  ;;  %v2527_v43 = vmul.u32.u64.low %v878_v30, %v877_v24  ;;  %v2528_v41 = vmul.u32.u64.high %v878_v30, %v877_v24, %v2527_v43 }
  0xed   : > { %v829_v31 = vsel %vm819_vm14, nan, %v828_v61  ;;  %v2516_v33 = vsel %vm819_vm14, nan, %v1242_v35  ;;  %vm1892_vm4 = vcmp.lt.s32.totalorder %v1891_v1, 0  ;;  %v869_v0 = vsel %vm863_vm2, %v866_v6, %v868_v25 }
  0xee   : > { %v2530_v28 = vmul.u32.u64.low %v878_v30, %v873_v23  ;;  %v2531_v44 = vmul.u32.u64.high %v878_v30, %v873_v23, %v2530_v28  ;;  %v695_v47 = vsel %vm1892_vm4, 0, %v1891_v1  ;;  %v680_v4 = vadd.s32 %v2388_v63, %v2382_v62 }
  0xef   : > { %v696_v54 = vsub.s32 32, %v695_v47  ;;  %v700_v49 = vsub.s32 4294967266, %v695_v47  ;;  %vm1031_vm6 = vcmp.eq.s32.totalorder %v1026_v55, 2  ;;  %v1453_v45 = vunpack.c.h.bf16 %v2536_v17 }
  0xf0   : > { %vm887_vm5 = vc.u32 %v2528_v41, %v2530_v28  ;;  %v888_v22 = vadd.s32 1, %v2531_v44  ;;  %v1455_v48 = vunpack.c.h.bf16 %v2539_v37  ;;  %v885_v39 = vmul.u32 %v878_v30, %v869_v0 }
  0xf1   : > { %v701_v11 = vadd.s32 127, %v700_v49  ;;  %v698_v34 = vshrl.u32 %v680_v4, %v696_v54  ;;  %v1605_v51 = vmul.f32 %v2207_v57, %v1589_v20  ;;  %v1659_v46 = vmul.f32 %v2207_v57, %v2147_v10 }
  0xf2   : > { %v2548_v3 = vpop.eup %2012  ;;  %v889_v59 = vsel %vm887_vm5, %v888_v22, %v2531_v44  ;;  %vm1027_vm7 = vcmp.lt.s32.totalorder %v1026_v55, 2  ;;  %vm1028_vm8 = vcmp.eq.s32.totalorder %v1026_v55, 0  ;;  %v697_v9 = vshll.u32 %v2464_v36, %v695_v47 }
  0xf3   : > { %v2552_v8 = vpop.eup %2014  ;;  %v1032_v58 = vxor.u32 2147483648, %v2548_v3  ;;  %v702_v42 = vshll.u32 %v701_v11, 23  ;;  %v890_v63 = vadd.s32 %v889_v59, %v885_v39  ;;  %v1609_v60 = vrot.slane %v1605_v51, %v2156_v15 }
  0xf4   : > { %v1029_v62 = vxor.u32 2147483648, %v2552_v8  ;;  %vm1025_vm9 = vweird.f32 %v2183_v29  ;;  %v1461_v21 = vmul.f32 %v1453_v45, %v829_v31  ;;  %v1663_v56 = vrot.slane %v1659_v46, %v2156_v15 }
  0xf5   : > { %v1033_v12 = vsel %vm1031_vm6, %v1032_v58, %v2552_v8  ;;  %v703_v13 = vor.u32 4788187, %v702_v42  ;;  %v891_v16 = vadd.s32 536870912, %v890_v63  ;;  %v699_v23 = vor.u32 %v698_v34, %v697_v9  ;;  %1611 = vrot.lane.b32.xlu1 %v1609_v60, %s2052_s21 }
  0xf6   : > { %v1030_v38 = vsel %vm1028_vm8, %v2548_v3, %v1029_v62  ;;  %1665 = vrot.lane.b32.xlu0 %v1663_v56, %s2052_s21  ;;  %vm626_vm10 = vcmp.lt.s32.totalorder %v2179_v27, 0  ;;  %vm2581_vm12 = vcmp.le.f32.partialorder %v624_v52, 0.7853982  ;;  %v886_v54 = vadd.s32 %v2530_v28, %v2528_v41 }
  0xf7   : > { %v1034_v20 = vsel %vm1027_vm7, %v1030_v38, %v1033_v12  ;;  %v892_v14 = vshrl.u32 %v891_v16, 30  ;;  %v704_v18 = vand.u32 2147483647, %v703_v13  ;;  %v706_v35 = vcvt.s32.f32 %v699_v23  ;;  %v2595_v12 = vpop.permute.xlu0 %1487 }
  0xf8   : > { %v1035_v5 = vsel %vm1025_vm9, nan, %v1034_v20  ;;  %v710_v52 = vsub.s32 4, %v2445_v7  ;;  %v1441_v51 = vadd.s32 3, %v2512_v32  ;;  %vm832_vm13 = vcmp.lt.s32.totalorder %v2193_v40, 0 }
  0xf9   : > { %v1463_v36 = vmul.f32 %v1455_v48, %v1035_v5  ;;  %v893_v53 = vshll.u32 %v892_v14, 30  ;;  %v707_v30 = vmul.f32 %v706_v35, %v704_v18  ;;  %vm831_vm14 = vcmp.le.f32.partialorder %v830_v50, 0.7853982  ;;  %v470_v18 = vld [vmem:[%s2521_s20 + $0x10] sm:$0xff] }
  0xfa   : > { %v711_v41 = vsel %vm626_vm10, %v710_v52, %v2445_v7  ;;  %v1442_v60 = vand.u32 3, %v1441_v51  ;;  %vm716_vm3 = vweird.f32 %v2179_v27  ;;  %vm922_vm6 = vweird.f32 %v2193_v40 }
  0xfb   : > { %v1469_v61 = vpack.c.bf16 %v1463_v36, %v1461_v21  ;;  %v894_v24 = vsub.s32 %v890_v63, %v893_v53  ;;  %v708_v6 = vxor.u32 2147483648, %v707_v30  ;;  %v916_v63 = vsub.s32 4, %v892_v14 }
  0xfc   : > { %v713_v9 = vsel %vm2581_vm12, 0, %v711_v41  ;;  %vm1444_vm15 = vcmp.eq.s32.totalorder %v1442_v60, 0  ;;  %vm1447_vm0 = vcmp.eq.s32.totalorder %v1442_v60, 2  ;;  %vm1443_vm4 = vcmp.lt.s32.totalorder %v1442_v60, 2 }
  0xfd   : > { %1517 = vmatprep.subr.bf16.mxu0 %v1469_v61  ;;  %v896_v31 = vsub.s32 0, %v894_v24  ;;  %v709_v44 = vsel %vm626_vm10, %v708_v6, %v707_v30  ;;  %v917_v16 = vsel %vm832_vm13, %v916_v63, %v892_v14  ;;  %v717_v32 = vand.u32 3, %v713_v9 }
  0xfe   : > { %v712_v4 = vsel %vm2581_vm12, %v2179_v27, %v709_v44  ;;  %v919_v21 = vsel %vm831_vm14, 0, %v917_v16  ;;  %v1129_v56 = vadd.s32 3, %v713_v9  ;;  %v1446_v14 = vsel %vm1444_vm15, %v2548_v3, %v1029_v62  ;;  %v2005_v27 = vld [vmem:[%s2683_s5 + $0x8] sm:$0xff]  }
  0xff   : > { %v1898_v1 = vmin.u32 %v896_v31, %v894_v24  ;;  %2016 = vcosq.f32 %v712_v4  ;;  %vm719_vm1 = vcmp.eq.s32.totalorder %v717_v32, 0  ;;  %vm722_vm2 = vcmp.eq.s32.totalorder %v717_v32, 2 }
 0x100   : > { %2018 = vsinq.f32 %v712_v4  ;;  %v1337_v50 = vadd.s32 3, %v919_v21  ;;  %v1449_v61 = vsel %vm1447_vm0, %v1032_v58, %v2552_v8  ;;  %v1130_v35 = vand.u32 3, %v1129_v56 }
 0x101   : > { %v898_v25 = vclz %v1898_v1  ;;  %v1457_v1 = vunpack.c.h.bf16 %v470_v18  ;;  %vm718_vm5 = vcmp.lt.s32.totalorder %v717_v32, 2  ;;  %v923_v6 = vand.u32 3, %v919_v21 }
 0x102   : > { %v1450_v62 = vsel %vm1443_vm4, %v1446_v14, %v1449_v61  ;;  %v1452_v3 = vunpack.c.l.bf16 %v2536_v17  ;;  %v1454_v8 = vunpack.c.l.bf16 %v2539_v37  ;;  %vm1132_vm7 = vcmp.eq.s32.totalorder %v1130_v35, 0 }
 0x103   : > { %v1899_v43 = vadd.s32 4294967294, %v898_v25  ;;  %v1338_v25 = vand.u32 3, %v1337_v50  ;;  %vm1135_vm8 = vcmp.eq.s32.totalorder %v1130_v35, 2  ;;  %vm1131_vm10 = vcmp.lt.s32.totalorder %v1130_v35, 2 }
 0x104   : > { %vm928_vm12 = vcmp.eq.s32.totalorder %v923_v6, 2  ;;  %vm924_vm15 = vcmp.lt.s32.totalorder %v923_v6, 2 }
 0x105   : > { %vm1900_vm11 = vcmp.lt.s32.totalorder %v1899_v43, 0  ;;  %vm1339_vm0 = vcmp.lt.s32.totalorder %v1338_v25, 2 }
 0x106   : > { %v901_v55 = vsel %vm1900_vm11, 0, %v1899_v43  ;;  %vm925_vm11 = vcmp.eq.s32.totalorder %v923_v6, 0 }
 0x107   : > { %v902_v49 = vsub.s32 32, %v901_v55  ;;  %v906_v0 = vsub.s32 4294967266, %v901_v55  ;;  %v903_v11 = vshll.u32 %v894_v24, %v901_v55 }
 0x109   : > { %v904_v22 = vshrl.u32 %v886_v54, %v902_v49  ;;  %v907_v45 = vadd.s32 127, %v906_v0  ;;  %v2017_v38 = vpop.eup %2016  ;;  %v1465_v54 = vmul.f32 %v1457_v1, %v2516_v33  ;;  %v1451_v0 = vsel %vm1025_vm9, nan, %v1450_v62 }
 0x10a   : > { %v2019_v7 = vpop.eup %2018  ;;  %v723_v23 = vxor.u32 2147483648, %v2017_v38  ;;  %vm1510_vm9 = vcmask 261120  }
 0x10b   : > { %v905_v48 = vor.u32 %v904_v22, %v903_v11  ;;  %v908_v39 = vshll.u32 %v907_v45, 23  ;;  %v720_v5 = vxor.u32 2147483648, %v2019_v7  ;;  %v1456_v11 = vunpack.c.l.bf16 %v470_v18 }
 0x10c   : > { %v724_v31 = vsel %vm722_vm2, %v723_v23, %v2019_v7  ;;  %v1137_v47 = vsel %vm1135_vm8, %v723_v23, %v2019_v7  ;;  %v2004_v7 = vld [vmem:[%s2683_s5] sm:$0xff]   ;;  %vm1746_vm2 = vcmask 518144  }
 0x10d   : > { %v909_v34 = vor.u32 4788187, %v908_v39  ;;  %v912_v59 = vcvt.s32.f32 %v905_v48  ;;  %v721_v30 = vsel %vm719_vm1, %v2017_v38, %v720_v5  ;;  %v1134_v55 = vsel %vm1132_vm7, %v2017_v38, %v720_v5 }
 0x10e   : > { %v725_v58 = vsel %vm718_vm5, %v721_v30, %v724_v31  ;;  %v1138_v45 = vsel %vm1131_vm10, %v1134_v55, %v1137_v47  ;;  %vm2060_vm1 = vmmov 0  }
 0x10f   : > { %v910_v42 = vand.u32 2147483647, %v909_v34  ;;  %v726_v17 = vsel %vm716_vm3, nan, %v725_v58  ;;  %v1139_v41 = vsel %vm716_vm3, nan, %v1138_v45  ;;  %v1695_v45 = vld [vmem:[%s2686_s8] sm:$0x7] }
 0x110   : > { %v1460_v34 = vmul.f32 %v1452_v3, %v726_v17  ;;  %v1464_v9 = vmul.f32 %v1456_v11, %v1139_v41 }
 0x111   : > { %v913_v28 = vmul.f32 %v912_v59, %v910_v42 }
 0x113   : > { %v914_v46 = vxor.u32 2147483648, %v913_v28 }
 0x115   : > { %v915_v13 = vsel %vm832_vm13, %v914_v46, %v913_v28  ;;  %vm1343_vm13 = vcmp.eq.s32.totalorder %v1338_v25, 2 }
 0x116   : > { %v918_v20 = vsel %vm831_vm14, %v2193_v40, %v915_v13  ;;  %vm1340_vm14 = vcmp.eq.s32.totalorder %v1338_v25, 0 }
 0x117   : > { %2020 = vcosq.f32 %v918_v20 }
 0x118   : > { %2022 = vsinq.f32 %v918_v20  ;;  %v1596_v20 = vmul.f32 %v2207_v57, %v1592_v26  ;;  %v2059_v57 = vmov 0.0  }
 0x119   : > { %1935 = vmatprep.subr.bf16.mxu1 %v2059_v57  ;;  %1939 = vmatprep.mubr.msk.bf16.mxu1 %vm2060_vm1, %v2059_v57 }
 0x11e   : > { %v1640_v36 = vpop.permute.xlu0 %1639 }
 0x11f   : > { %v1642_v53 = vmul.f32 %v1640_v36, %v2147_v10  ;;  %v471_v10 = vld [vmem:[%s2521_s20 + $0x18] sm:$0xff] }
 0x120   : > { %v1459_v43 = vunpack.c.h.bf16 %v471_v10  ;;  %v1458_v42 = vunpack.c.l.bf16 %v471_v10 }
 0x121   : > { %v1646_v24 = vrot.slane %v1642_v53, %v2156_v15  ;;  %v2021_v44 = vpop.eup %2020 }
 0x122   : > { %v2023_v49 = vpop.eup %2022  ;;  %v929_v4 = vxor.u32 2147483648, %v2021_v44  ;;  %v1467_v63 = vmul.f32 %v1459_v43, %v1451_v0 }
 0x123   : > { %1648 = vrot.lane.b32.xlu1 %v1646_v24, %s2052_s21  ;;  %v926_v37 = vxor.u32 2147483648, %v2023_v49 }
 0x124   : > { %v930_v22 = vsel %vm928_vm12, %v929_v4, %v2023_v49  ;;  %v1345_v48 = vsel %vm1343_vm13, %v929_v4, %v2023_v49  ;;  %v1471_v13 = vpack.c.bf16 %v1467_v63, %v1465_v54 }
 0x125   : > { %v927_v39 = vsel %vm925_vm11, %v2021_v44, %v926_v37  ;;  %v1342_v33 = vsel %vm1340_vm14, %v2021_v44, %v926_v37 }
 0x126   : > { %v931_v52 = vsel %vm924_vm15, %v927_v39, %v930_v22  ;;  %v1346_v29 = vsel %vm1339_vm0, %v1342_v33, %v1345_v48 }
 0x127   : > { %v932_v59 = vsel %vm922_vm6, nan, %v931_v52  ;;  %v1347_v28 = vsel %vm922_vm6, nan, %v1346_v29 }
 0x128   : > { %v1462_v51 = vmul.f32 %v1454_v8, %v932_v59  ;;  %v1466_v38 = vmul.f32 %v1458_v42, %v1347_v28 }
 0x12a   : > { %v1468_v46 = vpack.c.bf16 %v1462_v51, %v1460_v34  ;;  %v1470_v16 = vpack.c.bf16 %v1466_v38, %v1464_v9 }
 0x12c   : > { %1518 = vmatpush1.bf16.msra.mxu0 %v1468_v46 }
 0x12d   : > { %1519 = vmatprep.subr.bf16.mxu0 %v1471_v13 }
 0x130   : > { %1520 = vmatpush1.bf16.msra.mxu0 %v1470_v16 }
 0x133   : > { %1923 = vmatmul.mubr.msk.bf16.vlgmr.msra.gmra.mrb[0].mxu0 %vm1510_vm9, %v2004_v7 }
 0x134   : > { %1559 = vmatprep.mubr.bf16.mxu0 %v2049_v2  ;;  %v1600_v2 = vrot.slane %v1596_v20, %v2156_v15 }
 0x13b   : > { %1924 = vmatmul.mubr.msk.bf16.gmra.mrb[4].mxu0 %vm1510_vm9, %v2005_v27 }
 0x13c   : > { %v1483_v40 = vpop.permute.xlu1 %1482 }
 0x140   : > { %v1493_v60 = vpop.permute.xlu1 %1492 }
 0x144   : > { %v1498_v32 = vpop.permute.xlu1 %1497 }
 0x167   : > { %v1612_v14 = vpop.permute.xlu1 %1611 }
 0x168   : > { %v1666_v24 = vpop.permute.xlu0 %1665 }
 0x195   : > { %v1649_v48 = vpop.permute.xlu1 %1648 }
 0x206   : > { %v1551_v21 = vpop.f32.mrb[0].mxu0 }
 0x207   : > { %v1552_v56 = vadd.f32 %v1551_v21, %v1483_v40  ;;  %v1553_v5 = vpop.f32.mrb[1].mxu0 }
 0x208   : > { %v1554_v23 = vadd.f32 %v1553_v5, %v1483_v40  ;;  %v1555_v36 = vpop.f32.mrb[2].mxu0 }
 0x209   : > { %v1570_v18 = vmax.f32 %v1552_v56, 0.0  ;;  %v1556_v53 = vadd.f32 %v1555_v36, %v2595_v12  ;;  %v1557_v50 = vpop.f32.mrb[3].mxu0  ;;  %v1694_v36 = vld [vmem:[%s2685_s7] sm:$0x3] }
 0x20a   : > { %v1571_v61 = vmax.f32 %v1554_v23, 0.0  ;;  %v1558_v35 = vadd.f32 %v1557_v50, %v2595_v12 }
 0x20b   : > { %v1572_v19 = vmax.f32 %v1556_v53, 0.0  ;;  %v1614_v30 = vmul.f32 %v1612_v14, %v1570_v18  ;;  %v1601_v26 = vmul.f32 %v1600_v2, %v1570_v18  ;;  %v1744_v53 = vld [vmem:[%s459_s15] sm:$0x7] }
 0x20c   : > { %v1573_v31 = vmax.f32 %v1558_v35, 0.0  ;;  %v1668_v10 = vmul.f32 %v1666_v24, %v1571_v61  ;;  %v1651_v29 = vmul.f32 %v1649_v48, %v1571_v61 }
 0x20d   : > { %1622 = vrot.lane.b32.xlu1 %v1614_v30, %s2052_s21  ;;  %v1602_v15 = vmul.f32 %v1600_v2, %v1572_v19  ;;  %v1615_v3 = vmul.f32 %v1612_v14, %v1572_v19 }
 0x20e   : > { %v1669_v1 = vmul.f32 %v1666_v24, %v1573_v31  ;;  %v1561_v6 = vpop.f32.mrb[4].mxu0  ;;  %1676 = vrot.lane.b32.xlu0 %v1668_v10, %s2052_s21  ;;  %v1652_v41 = vmul.f32 %v1649_v48, %v1573_v31 }
 0x20f   : > { %v1562_v62 = vadd.f32 %v1561_v6, %v1493_v60  ;;  %v1563_v25 = vpop.f32.mrb[5].mxu0 }
 0x210   : > { %v1564_v12 = vadd.f32 %v1563_v25, %v1493_v60  ;;  %v1565_v8 = vpop.f32.mrb[6].mxu0 }
 0x211   : > { %v1574_v58 = vmax.f32 %v1562_v62, 0.0  ;;  %v1566_v43 = vadd.f32 %v1565_v8, %v1498_v32  ;;  %v1567_v44 = vpop.f32.mrb[7].mxu0  ;;  %1678 = vrot.lane.b32.xlu1 %v1669_v1, %s2052_s21 }
 0x212   : > { %v1568_v55 = vadd.f32 %v1567_v44, %v1498_v32  ;;  %1624 = vrot.lane.b32.xlu0 %v1615_v3, %s2052_s21  ;;  %v1575_v0 = vmax.f32 %v1564_v12, 0.0 }
 0x213   : > { %v1616_v47 = vmul.f32 %v1612_v14, %v1574_v58  ;;  %v1576_v54 = vmax.f32 %v1566_v43, 0.0  ;;  %v1603_v49 = vmul.f32 %v1600_v2, %v1574_v58 }
 0x214   : > { %v1577_v11 = vmax.f32 %v1568_v55, 0.0  ;;  %v1670_v37 = vmul.f32 %v1666_v24, %v1575_v0  ;;  %v1653_v46 = vmul.f32 %v1649_v48, %v1575_v0 }
 0x215   : > { %v1617_v4 = vmul.f32 %v1612_v14, %v1576_v54  ;;  %v1604_v17 = vmul.f32 %v1600_v2, %v1576_v54 }
 0x216   : > { %1626 = vrot.lane.b32.xlu0 %v1616_v47, %s2052_s21  ;;  %v1671_v22 = vmul.f32 %v1666_v24, %v1577_v11  ;;  %v1654_v7 = vmul.f32 %v1649_v48, %v1577_v11 }
 0x217   : > { %1628 = vrot.lane.b32.xlu1 %v1617_v4, %s2052_s21 }
 0x21a   : > { %1680 = vrot.lane.b32.xlu0 %v1670_v37, %s2052_s21 }
 0x21b   : > { %1682 = vrot.lane.b32.xlu1 %v1671_v22, %s2052_s21 }
 0x21e   : > { %1698 = vperm.xlu0 %2003, %v1695_v45  }
 0x27f   : > { %v1623_v39 = vpop.permute.xlu1 %1622 }
 0x280   : > { %v1634_v33 = vadd.f32 %v1623_v39, %v1601_v26  ;;  %v1677_v52 = vpop.permute.xlu0 %1676 }
 0x282   : > { %v1655_v34 = vadd.f32 %v1651_v29, %v1634_v33 }
 0x283   : > { %v1679_v59 = vpop.permute.xlu1 %1678 }
 0x284   : > { %v1625_v42 = vpop.permute.xlu0 %1624  ;;  %v1688_v9 = vadd.f32 %v1677_v52, %v1655_v34 }
 0x285   : > { %v1635_v28 = vadd.f32 %v1625_v42, %v1602_v15 }
 0x287   : > { %v1656_v63 = vadd.f32 %v1652_v41, %v1635_v28 }
 0x288   : > { %v1627_v51 = vpop.permute.xlu0 %1626 }
 0x289   : > { %v1636_v38 = vadd.f32 %v1627_v51, %v1603_v49  ;;  %v1629_v13 = vpop.permute.xlu1 %1628  ;;  %v1689_v16 = vadd.f32 %v1679_v59, %v1656_v63 }
 0x28a   : > { %v1637_v27 = vadd.f32 %v1629_v13, %v1604_v17 }
 0x28b   : > { %v1657_v40 = vadd.f32 %v1653_v46, %v1636_v38  ;;  %v1692_v60 = vpack.c.bf16 %v1689_v16, %v1688_v9 }
 0x28c   : > { %v1681_v20 = vpop.permute.xlu0 %1680  ;;  %v1658_v32 = vadd.f32 %v1654_v7, %v1637_v27 }
 0x28d   : > { %v1690_v21 = vadd.f32 %v1681_v20, %v1657_v40  ;;  %v1683_v56 = vpop.permute.xlu1 %1682  ;;  %1936 = vmatpush3.bf16.msra.mxu1 %v1692_v60 }
 0x28e   : > { %v1691_v5 = vadd.f32 %v1683_v56, %v1658_v32  ;;  %1937 = vmatprep.subr.bf16.mxu1 %v2059_v57 }
 0x290   : > { %v1693_v23 = vpack.c.bf16 %v1691_v5, %v1690_v21 }
 0x292   : > { %1938 = vmatpush3.bf16.msra.mxu1 %v1693_v23 }
 0x295   : > { %1940 = vmatmul.mubr.msk.bf16.vlgmr.msra.gmra.mrb[0].mxu1 %vm1510_vm9, %v1694_v36 }
 0x29d   : > { %v1699_v2 = vpop.permute.xlu0 %1698 }
 0x368   : > { %v1738_v18 = vpop.f32.mrb[0].mxu1 }
 0x369   : > { %v1739_v50 = vadd.f32 %v1738_v18, %v1699_v2  ;;  %v1941_v14 = vpop.f32.mrb[1].mxu1 }
 0x36a   : > { %v1741_v61 = vpop.f32.mrb[2].mxu1 }
 0x36b   : > { %v1745_v35 = vadd.f32 %v1744_v53, %v1739_v50  ;;  %v1942_v24 = vpop.f32.mrb[3].mxu1 }
 0x36d   : > { %1747 = vst.msk [vmem:[%s466_s18] sm:$0x7] %vm1746_vm2, %v1745_v35 }
 0x36e PF: > { %s19_s11 = sadd.s32 1, %s2046_s11   ;;  %s2694_s30 = smov %s2042_s10 }
 0x36f   : > { %p16_p5 = scmp.ge.s32.totalorder %s19_s11, 4   ;;  %s2695_s10 = smov %s2697_s12 }
 0x371   :  { %18 = sbr.rel (!%p16_p5) target bundleno = 2 (0x2), region = 95 }

</bundles_post_ra>
